<compile_context>
chip_gen: v7x
topology: tpu7x:2x2x1
jax: 0.10.0
libtpu: 0.0.40
codegen_flags: <defaults>
</compile_context>

<pallas_src>
import jax
import jax.numpy as jnp
from jax.experimental import pallas as pl
from jax.experimental.pallas import tpu as pltpu


# ----------------------------- in-kernel helpers ---------------------------- #

def _conv3x3_relu(x, w_ref, b_ref):
    """x: (H, W, Cin) f32 value. w_ref: (9*Cin, Cout) flat HWIO. b_ref: (1, Cout).

    Returns relu(conv3x3(x, pad=1) + b) as a (H, W, Cout) value, using a single
    im2col MXU matmul with K = 9*Cin."""
    H, W, Cin = x.shape
    Cout = w_ref.shape[1]

    # In-kernel zero padding (pad=1 on H and W).
    zc = jnp.zeros((H, 1, Cin), x.dtype)
    xp = jnp.concatenate([zc, x, zc], axis=1)               # (H, W+2, Cin)
    zr = jnp.zeros((1, W + 2, Cin), x.dtype)
    xp = jnp.concatenate([zr, xp, zr], axis=0)              # (H+2, W+2, Cin)

    # im2col: stack the 9 taps on the contraction (lane) axis, dy-major then dx,
    # matching w_hwio.reshape(9*Cin, Cout).
    taps = [xp[dy:dy + H, dx:dx + W, :] for dy in range(3) for dx in range(3)]
    patch = jnp.concatenate(taps, axis=-1)                  # (H, W, 9*Cin)

    acc = jnp.dot(patch.reshape(H * W, 9 * Cin), w_ref[...],
                  preferred_element_type=jnp.float32)       # one MXU matmul
    acc = jnp.maximum(acc + b_ref[...], 0.0)                # bias + ReLU (f32)
    return acc.reshape(H, W, Cout)


def _maxpool2x2(y):
    """2x2 / stride-2 max pool of a (H, W, C) value -> (H//2, W//2, C)."""
    H, W, C = y.shape
    Ho, Wo = H // 2, W // 2
    # H pairs: split the (untiled) leading axis only — cheap.
    t = y.reshape(Ho, 2, W, C)
    a = jnp.maximum(t[:, 0], t[:, 1])                       # (Ho, W, C)
    # W pairs: static width-1 sublane slices + one sublane concatenate.
    cols = [jnp.maximum(a[:, 2 * k:2 * k + 1, :], a[:, 2 * k + 1:2 * k + 2, :])
            for k in range(Wo)]
    return jnp.concatenate(cols, axis=1)                    # (Ho, Wo, C)


def _make_encoder_kernel(num_blocks):
    def kernel(x_ref, *refs):
        # refs = (w1_0, b1_0, w2_0, b2_0, ..., w2_{n-1}, b2_{n-1}, out_0..out_{n-1})
        param_refs = refs[:4 * num_blocks]
        out_refs = refs[4 * num_blocks:]
        x = x_ref[0]                                        # (H, W, C0)
        for i in range(num_blocks):
            w1, b1, w2, b2 = param_refs[4 * i:4 * i + 4]
            y = _conv3x3_relu(x, w1, b1)
            y = _conv3x3_relu(y, w2, b2)
            out_refs[i][0] = y.astype(out_refs[i].dtype)    # pre-pool block output
            if i < num_blocks - 1:
                # Pool after the final block is computed-but-unused in the
                # PyTorch forward (return values are identical), so it is skipped.
                x = _maxpool2x2(y)
    return kernel


# ------------------------------ fused pallas_call --------------------------- #

def encoder_forward(x_nchw, params):
    """Encoder.forward: NCHW input -> list of per-block (pre-pool) NCHW outputs."""
    x = jnp.transpose(x_nchw, (0, 2, 3, 1))                 # NCHW -> NHWC (once)
    B, H, W, C0 = x.shape
    n = len(params)
    channels = (C0,) + tuple(p["w1"].shape[-1] for p in params)

    flat_args = [x]
    in_specs = [pl.BlockSpec((1, H, W, C0), lambda b: (b, 0, 0, 0))]
    for i, p in enumerate(params):
        cin, cout = channels[i], channels[i + 1]
        w1 = p["w1"].reshape(9 * cin, cout)                 # flat HWIO for im2col
        w2 = p["w2"].reshape(9 * cout, cout)
        flat_args += [w1, p["b1"], w2, p["b2"]]
        in_specs += [
            pl.BlockSpec((9 * cin, cout), lambda b: (0, 0)),
            pl.BlockSpec((1, cout), lambda b: (0, 0)),
            pl.BlockSpec((9 * cout, cout), lambda b: (0, 0)),
            pl.BlockSpec((1, cout), lambda b: (0, 0)),
        ]

    out_shapes, out_specs = [], []
    h, w = H, W
    for i in range(n):
        cout = channels[i + 1]
        out_shapes.append(jax.ShapeDtypeStruct((B, h, w, cout), x.dtype))
        out_specs.append(pl.BlockSpec((1, h, w, cout), lambda b: (b, 0, 0, 0)))
        if i < n - 1:
            assert h % 2 == 0 and w % 2 == 0, "maxpool2x2 needs even H and W"
            h //= 2
            w //= 2

    outs = pl.pallas_call(
        _make_encoder_kernel(n),
        out_shape=tuple(out_shapes),
        grid=(B,),
        in_specs=in_specs,
        out_specs=tuple(out_specs),
        compiler_params=pltpu.CompilerParams(
            dimension_semantics=("parallel",)),             # v7x: one image per TC
    )(*flat_args)

    return [jnp.transpose(o, (0, 3, 1, 2)) for o in outs]   # NHWC -> NCHW


# ------------------------------ parameters ---------------------------------- #

def init_encoder_params(key, channels=(4, 16, 32, 64)):
    """Deterministic synthetic parameters matching nn.Conv2d shapes (stored HWIO)."""
    params = []
    for i in range(len(channels) - 1):
        cin, cout = channels[i], channels[i + 1]
        key, k1, k2, k3, k4 = jax.random.split(key, 5)
        params.append(dict(
            w1=jax.random.normal(k1, (3, 3, cin, cout), jnp.float32) * 0.1,
            b1=jax.random.normal(k2, (1, cout), jnp.float32) * 0.05,
            w2=jax.random.normal(k3, (3, 3, cout, cout), jnp.float32) * 0.1,
            b2=jax.random.normal(k4, (1, cout), jnp.float32) * 0.05,
        ))
    return params


# ------------------------------ pure-JAX reference --------------------------- #

def _ref_block(x, p):
    for w, b in ((p["w1"], p["b1"]), (p["w2"], p["b2"])):
        y = jax.lax.conv_general_dilated(
            x, w, window_strides=(1, 1), padding="SAME",
            dimension_numbers=("NHWC", "HWIO", "NHWC"))
        x = jnp.maximum(y + b.reshape(1, 1, 1, -1), 0.0)
    return x


def _ref_encoder(x_nchw, params):
    x = jnp.transpose(x_nchw, (0, 2, 3, 1))
    outs = []
    for i, p in enumerate(params):
        x = _ref_block(x, p)
        outs.append(jnp.transpose(x, (0, 3, 1, 2)))
        if i < len(params) - 1:
            x = jax.lax.reduce_window(x, -jnp.inf, jax.lax.max,
                                      (1, 2, 2, 1), (1, 2, 2, 1), "VALID")
    return outs


# ----------------------------------- main ------------------------------------ #

if __name__ == "__main__":
    key = jax.random.PRNGKey(0)
    kx, kp = jax.random.split(key)

    # Same interface as the PyTorch module: NCHW input, channels[0] = 4.
    x = jax.random.normal(kx, (2, 4, 16, 16), jnp.float32)
    params = init_encoder_params(kp, channels=(4, 16, 32, 64))

    outs = encoder_forward(x, params)
    outs = [jax.block_until_ready(o) for o in outs]

    # Expected NCHW shapes: [(2,16,16,16), (2,32,8,8), (2,64,4,4)]
    refs = _ref_encoder(x, params)
    for o, r in zip(outs, refs):
        assert o.shape == r.shape, (o.shape, r.shape)
        assert jnp.allclose(o, r, atol=1e-3, rtol=1e-3), \
            float(jnp.max(jnp.abs(o - r)))

    print("KERNEL_OK")
</pallas_src>

<mosaic_0001>
module attributes {stable_mosaic.version = 11 : i64} {
  func.func @kernel(%arg0: i32, %arg1: memref<1x16x16x4xf32, #tpu.memory_space<vmem>>, %arg2: memref<36x16xf32, #tpu.memory_space<vmem>>, %arg3: memref<1x16xf32, #tpu.memory_space<vmem>>, %arg4: memref<144x16xf32, #tpu.memory_space<vmem>>, %arg5: memref<1x16xf32, #tpu.memory_space<vmem>>, %arg6: memref<144x32xf32, #tpu.memory_space<vmem>>, %arg7: memref<1x32xf32, #tpu.memory_space<vmem>>, %arg8: memref<288x32xf32, #tpu.memory_space<vmem>>, %arg9: memref<1x32xf32, #tpu.memory_space<vmem>>, %arg10: memref<288x64xf32, #tpu.memory_space<vmem>>, %arg11: memref<1x64xf32, #tpu.memory_space<vmem>>, %arg12: memref<576x64xf32, #tpu.memory_space<vmem>>, %arg13: memref<1x64xf32, #tpu.memory_space<vmem>>, %arg14: memref<1x16x16x16xf32, #tpu.memory_space<vmem>>, %arg15: memref<1x8x8x32xf32, #tpu.memory_space<vmem>>, %arg16: memref<1x4x4x64xf32, #tpu.memory_space<vmem>>) attributes {dimension_semantics = [#tpu.dimension_semantics<parallel>], iteration_bounds = array<i64: 2>, scalar_prefetch = 0 : i64, scratch_operands = 0 : i64, tpu.core_type = #tpu.core_type<tc>, window_params = [{transform_indices = @transform_0, window_bounds = array<i64: 1, 16, 16, 4>}, {pipeline_mode = #tpu.pipeline_mode<synchronous>, transform_indices = @transform_1, window_bounds = array<i64: 36, 16>}, {pipeline_mode = #tpu.pipeline_mode<synchronous>, transform_indices = @transform_2, window_bounds = array<i64: 1, 16>}, {pipeline_mode = #tpu.pipeline_mode<synchronous>, transform_indices = @transform_3, window_bounds = array<i64: 144, 16>}, {pipeline_mode = #tpu.pipeline_mode<synchronous>, transform_indices = @transform_4, window_bounds = array<i64: 1, 16>}, {pipeline_mode = #tpu.pipeline_mode<synchronous>, transform_indices = @transform_5, window_bounds = array<i64: 144, 32>}, {pipeline_mode = #tpu.pipeline_mode<synchronous>, transform_indices = @transform_6, window_bounds = array<i64: 1, 32>}, {pipeline_mode = #tpu.pipeline_mode<synchronous>, transform_indices = @transform_7, window_bounds = array<i64: 288, 32>}, {pipeline_mode = #tpu.pipeline_mode<synchronous>, transform_indices = @transform_8, window_bounds = array<i64: 1, 32>}, {pipeline_mode = #tpu.pipeline_mode<synchronous>, transform_indices = @transform_9, window_bounds = array<i64: 288, 64>}, {pipeline_mode = #tpu.pipeline_mode<synchronous>, transform_indices = @transform_10, window_bounds = array<i64: 1, 64>}, {pipeline_mode = #tpu.pipeline_mode<synchronous>, transform_indices = @transform_11, window_bounds = array<i64: 576, 64>}, {pipeline_mode = #tpu.pipeline_mode<synchronous>, transform_indices = @transform_12, window_bounds = array<i64: 1, 64>}, {transform_indices = @transform_13, window_bounds = array<i64: 1, 16, 16, 16>}, {transform_indices = @transform_14, window_bounds = array<i64: 1, 8, 8, 32>}, {transform_indices = @transform_15, window_bounds = array<i64: 1, 4, 4, 64>}]} {
    %c0 = arith.constant 0 : index
    %c0_0 = arith.constant 0 : index
    %c0_1 = arith.constant 0 : index
    %c0_2 = arith.constant 0 : index
    %0 = vector.load %arg1[%c0, %c0_0, %c0_1, %c0_2] : memref<1x16x16x4xf32, #tpu.memory_space<vmem>>, vector<1x16x16x4xf32>
    %1 = vector.shape_cast %0 : vector<1x16x16x4xf32> to vector<16x16x4xf32>
    %cst = arith.constant 0.000000e+00 : f32
    %2 = vector.broadcast %cst : f32 to vector<16x1x4xf32>
    %3 = tpu.concatenate %2, %1, %2 in 1 : vector<16x1x4xf32>, vector<16x16x4xf32>, vector<16x1x4xf32> -> vector<16x18x4xf32>
    %cst_3 = arith.constant 0.000000e+00 : f32
    %4 = vector.broadcast %cst_3 : f32 to vector<1x18x4xf32>
    %5 = tpu.concatenate %4, %3, %4 in 0 : vector<1x18x4xf32>, vector<16x18x4xf32>, vector<1x18x4xf32> -> vector<18x18x4xf32>
    %6 = vector.extract_strided_slice %5 {offsets = [0, 0, 0], sizes = [16, 16, 4], strides = [1, 1, 1]} : vector<18x18x4xf32> to vector<16x16x4xf32>
    %7 = vector.extract_strided_slice %5 {offsets = [0, 1, 0], sizes = [16, 16, 4], strides = [1, 1, 1]} : vector<18x18x4xf32> to vector<16x16x4xf32>
    %8 = vector.extract_strided_slice %5 {offsets = [0, 2, 0], sizes = [16, 16, 4], strides = [1, 1, 1]} : vector<18x18x4xf32> to vector<16x16x4xf32>
    %9 = vector.extract_strided_slice %5 {offsets = [1, 0, 0], sizes = [16, 16, 4], strides = [1, 1, 1]} : vector<18x18x4xf32> to vector<16x16x4xf32>
    %10 = vector.extract_strided_slice %5 {offsets = [1, 1, 0], sizes = [16, 16, 4], strides = [1, 1, 1]} : vector<18x18x4xf32> to vector<16x16x4xf32>
    %11 = vector.extract_strided_slice %5 {offsets = [1, 2, 0], sizes = [16, 16, 4], strides = [1, 1, 1]} : vector<18x18x4xf32> to vector<16x16x4xf32>
    %12 = vector.extract_strided_slice %5 {offsets = [2, 0, 0], sizes = [16, 16, 4], strides = [1, 1, 1]} : vector<18x18x4xf32> to vector<16x16x4xf32>
    %13 = vector.extract_strided_slice %5 {offsets = [2, 1, 0], sizes = [16, 16, 4], strides = [1, 1, 1]} : vector<18x18x4xf32> to vector<16x16x4xf32>
    %14 = vector.extract_strided_slice %5 {offsets = [2, 2, 0], sizes = [16, 16, 4], strides = [1, 1, 1]} : vector<18x18x4xf32> to vector<16x16x4xf32>
    %15 = tpu.concatenate %6, %7, %8, %9, %10, %11, %12, %13, %14 in 2 : vector<16x16x4xf32>, vector<16x16x4xf32>, vector<16x16x4xf32>, vector<16x16x4xf32>, vector<16x16x4xf32>, vector<16x16x4xf32>, vector<16x16x4xf32>, vector<16x16x4xf32>, vector<16x16x4xf32> -> vector<16x16x36xf32>
    %16 = vector.shape_cast %15 : vector<16x16x36xf32> to vector<256x36xf32>
    %c0_4 = arith.constant 0 : index
    %c0_5 = arith.constant 0 : index
    %17 = vector.load %arg2[%c0_4, %c0_5] : memref<36x16xf32, #tpu.memory_space<vmem>>, vector<36x16xf32>
    %cst_6 = arith.constant dense<0.000000e+00> : vector<256x16xf32>
    %18 = tpu.matmul %16, %17, %cst_6 {dimension_numbers = #tpu.dot_dimension_numbers<[1], [0], [0], [1], [0, 0, 1, 1], [], []>} : vector<256x36xf32>, vector<36x16xf32>, vector<256x16xf32> -> vector<256x16xf32>
    %c0_7 = arith.constant 0 : index
    %c0_8 = arith.constant 0 : index
    %19 = vector.load %arg3[%c0_7, %c0_8] : memref<1x16xf32, #tpu.memory_space<vmem>>, vector<1x16xf32>
    %20 = vector.broadcast %19 : vector<1x16xf32> to vector<256x16xf32>
    %21 = arith.addf %18, %20 : vector<256x16xf32>
    %cst_9 = arith.constant 0.000000e+00 : f32
    %22 = vector.broadcast %cst_9 : f32 to vector<256x16xf32>
    %23 = arith.maximumf %21, %22 : vector<256x16xf32>
    %24 = vector.shape_cast %23 : vector<256x16xf32> to vector<16x16x16xf32>
    %cst_10 = arith.constant 0.000000e+00 : f32
    %25 = vector.broadcast %cst_10 : f32 to vector<16x1x16xf32>
    %26 = tpu.concatenate %25, %24, %25 in 1 : vector<16x1x16xf32>, vector<16x16x16xf32>, vector<16x1x16xf32> -> vector<16x18x16xf32>
    %cst_11 = arith.constant 0.000000e+00 : f32
    %27 = vector.broadcast %cst_11 : f32 to vector<1x18x16xf32>
    %28 = tpu.concatenate %27, %26, %27 in 0 : vector<1x18x16xf32>, vector<16x18x16xf32>, vector<1x18x16xf32> -> vector<18x18x16xf32>
    %29 = vector.extract_strided_slice %28 {offsets = [0, 0, 0], sizes = [16, 16, 16], strides = [1, 1, 1]} : vector<18x18x16xf32> to vector<16x16x16xf32>
    %30 = vector.extract_strided_slice %28 {offsets = [0, 1, 0], sizes = [16, 16, 16], strides = [1, 1, 1]} : vector<18x18x16xf32> to vector<16x16x16xf32>
    %31 = vector.extract_strided_slice %28 {offsets = [0, 2, 0], sizes = [16, 16, 16], strides = [1, 1, 1]} : vector<18x18x16xf32> to vector<16x16x16xf32>
    %32 = vector.extract_strided_slice %28 {offsets = [1, 0, 0], sizes = [16, 16, 16], strides = [1, 1, 1]} : vector<18x18x16xf32> to vector<16x16x16xf32>
    %33 = vector.extract_strided_slice %28 {offsets = [1, 1, 0], sizes = [16, 16, 16], strides = [1, 1, 1]} : vector<18x18x16xf32> to vector<16x16x16xf32>
    %34 = vector.extract_strided_slice %28 {offsets = [1, 2, 0], sizes = [16, 16, 16], strides = [1, 1, 1]} : vector<18x18x16xf32> to vector<16x16x16xf32>
    %35 = vector.extract_strided_slice %28 {offsets = [2, 0, 0], sizes = [16, 16, 16], strides = [1, 1, 1]} : vector<18x18x16xf32> to vector<16x16x16xf32>
    %36 = vector.extract_strided_slice %28 {offsets = [2, 1, 0], sizes = [16, 16, 16], strides = [1, 1, 1]} : vector<18x18x16xf32> to vector<16x16x16xf32>
    %37 = vector.extract_strided_slice %28 {offsets = [2, 2, 0], sizes = [16, 16, 16], strides = [1, 1, 1]} : vector<18x18x16xf32> to vector<16x16x16xf32>
    %38 = tpu.concatenate %29, %30, %31, %32, %33, %34, %35, %36, %37 in 2 : vector<16x16x16xf32>, vector<16x16x16xf32>, vector<16x16x16xf32>, vector<16x16x16xf32>, vector<16x16x16xf32>, vector<16x16x16xf32>, vector<16x16x16xf32>, vector<16x16x16xf32>, vector<16x16x16xf32> -> vector<16x16x144xf32>
    %39 = vector.shape_cast %38 : vector<16x16x144xf32> to vector<256x144xf32>
    %c0_12 = arith.constant 0 : index
    %c0_13 = arith.constant 0 : index
    %40 = vector.load %arg4[%c0_12, %c0_13] : memref<144x16xf32, #tpu.memory_space<vmem>>, vector<144x16xf32>
    %cst_14 = arith.constant dense<0.000000e+00> : vector<256x16xf32>
    %41 = tpu.matmul %39, %40, %cst_14 {dimension_numbers = #tpu.dot_dimension_numbers<[1], [0], [0], [1], [0, 0, 1, 1], [], []>} : vector<256x144xf32>, vector<144x16xf32>, vector<256x16xf32> -> vector<256x16xf32>
    %c0_15 = arith.constant 0 : index
    %c0_16 = arith.constant 0 : index
    %42 = vector.load %arg5[%c0_15, %c0_16] : memref<1x16xf32, #tpu.memory_space<vmem>>, vector<1x16xf32>
    %43 = vector.broadcast %42 : vector<1x16xf32> to vector<256x16xf32>
    %44 = arith.addf %41, %43 : vector<256x16xf32>
    %cst_17 = arith.constant 0.000000e+00 : f32
    %45 = vector.broadcast %cst_17 : f32 to vector<256x16xf32>
    %46 = arith.maximumf %44, %45 : vector<256x16xf32>
    %47 = vector.shape_cast %46 : vector<256x16xf32> to vector<16x16x16xf32>
    %c0_18 = arith.constant 0 : index
    %c0_19 = arith.constant 0 : index
    %c0_20 = arith.constant 0 : index
    %c0_21 = arith.constant 0 : index
    %48 = vector.load %arg14[%c0_18, %c0_19, %c0_20, %c0_21] : memref<1x16x16x16xf32, #tpu.memory_space<vmem>>, vector<1x16x16x16xf32>
    %49 = vector.shape_cast %48 : vector<1x16x16x16xf32> to vector<16x16x16xf32>
    %50 = vector.shape_cast %47 : vector<16x16x16xf32> to vector<1x16x16x16xf32>
    tpu.vector_store %arg14[%c0_18, %c0_19, %c0_20, %c0_21], %50 {strides = array<i32>} : memref<1x16x16x16xf32, #tpu.memory_space<vmem>>, vector<1x16x16x16xf32>,
    %51 = vector.shape_cast %47 : vector<16x16x16xf32> to vector<8x2x16x16xf32>
    %52 = vector.extract_strided_slice %51 {offsets = [0, 0, 0, 0], sizes = [8, 1, 16, 16], strides = [1, 1, 1, 1]} : vector<8x2x16x16xf32> to vector<8x1x16x16xf32>
    %53 = vector.shape_cast %52 : vector<8x1x16x16xf32> to vector<8x16x16xf32>
    %54 = vector.extract_strided_slice %51 {offsets = [0, 1, 0, 0], sizes = [8, 1, 16, 16], strides = [1, 1, 1, 1]} : vector<8x2x16x16xf32> to vector<8x1x16x16xf32>
    %55 = vector.shape_cast %54 : vector<8x1x16x16xf32> to vector<8x16x16xf32>
    %56 = arith.maximumf %53, %55 : vector<8x16x16xf32>
    %57 = vector.extract_strided_slice %56 {offsets = [0, 0, 0], sizes = [8, 1, 16], strides = [1, 1, 1]} : vector<8x16x16xf32> to vector<8x1x16xf32>
    %58 = vector.extract_strided_slice %56 {offsets = [0, 1, 0], sizes = [8, 1, 16], strides = [1, 1, 1]} : vector<8x16x16xf32> to vector<8x1x16xf32>
    %59 = arith.maximumf %57, %58 : vector<8x1x16xf32>
    %60 = vector.extract_strided_slice %56 {offsets = [0, 2, 0], sizes = [8, 1, 16], strides = [1, 1, 1]} : vector<8x16x16xf32> to vector<8x1x16xf32>
    %61 = vector.extract_strided_slice %56 {offsets = [0, 3, 0], sizes = [8, 1, 16], strides = [1, 1, 1]} : vector<8x16x16xf32> to vector<8x1x16xf32>
    %62 = arith.maximumf %60, %61 : vector<8x1x16xf32>
    %63 = vector.extract_strided_slice %56 {offsets = [0, 4, 0], sizes = [8, 1, 16], strides = [1, 1, 1]} : vector<8x16x16xf32> to vector<8x1x16xf32>
    %64 = vector.extract_strided_slice %56 {offsets = [0, 5, 0], sizes = [8, 1, 16], strides = [1, 1, 1]} : vector<8x16x16xf32> to vector<8x1x16xf32>
    %65 = arith.maximumf %63, %64 : vector<8x1x16xf32>
    %66 = vector.extract_strided_slice %56 {offsets = [0, 6, 0], sizes = [8, 1, 16], strides = [1, 1, 1]} : vector<8x16x16xf32> to vector<8x1x16xf32>
    %67 = vector.extract_strided_slice %56 {offsets = [0, 7, 0], sizes = [8, 1, 16], strides = [1, 1, 1]} : vector<8x16x16xf32> to vector<8x1x16xf32>
    %68 = arith.maximumf %66, %67 : vector<8x1x16xf32>
    %69 = vector.extract_strided_slice %56 {offsets = [0, 8, 0], sizes = [8, 1, 16], strides = [1, 1, 1]} : vector<8x16x16xf32> to vector<8x1x16xf32>
    %70 = vector.extract_strided_slice %56 {offsets = [0, 9, 0], sizes = [8, 1, 16], strides = [1, 1, 1]} : vector<8x16x16xf32> to vector<8x1x16xf32>
    %71 = arith.maximumf %69, %70 : vector<8x1x16xf32>
    %72 = vector.extract_strided_slice %56 {offsets = [0, 10, 0], sizes = [8, 1, 16], strides = [1, 1, 1]} : vector<8x16x16xf32> to vector<8x1x16xf32>
    %73 = vector.extract_strided_slice %56 {offsets = [0, 11, 0], sizes = [8, 1, 16], strides = [1, 1, 1]} : vector<8x16x16xf32> to vector<8x1x16xf32>
    %74 = arith.maximumf %72, %73 : vector<8x1x16xf32>
    %75 = vector.extract_strided_slice %56 {offsets = [0, 12, 0], sizes = [8, 1, 16], strides = [1, 1, 1]} : vector<8x16x16xf32> to vector<8x1x16xf32>
    %76 = vector.extract_strided_slice %56 {offsets = [0, 13, 0], sizes = [8, 1, 16], strides = [1, 1, 1]} : vector<8x16x16xf32> to vector<8x1x16xf32>
    %77 = arith.maximumf %75, %76 : vector<8x1x16xf32>
    %78 = vector.extract_strided_slice %56 {offsets = [0, 14, 0], sizes = [8, 1, 16], strides = [1, 1, 1]} : vector<8x16x16xf32> to vector<8x1x16xf32>
    %79 = vector.extract_strided_slice %56 {offsets = [0, 15, 0], sizes = [8, 1, 16], strides = [1, 1, 1]} : vector<8x16x16xf32> to vector<8x1x16xf32>
    %80 = arith.maximumf %78, %79 : vector<8x1x16xf32>
    %81 = tpu.concatenate %59, %62, %65, %68, %71, %74, %77, %80 in 1 : vector<8x1x16xf32>, vector<8x1x16xf32>, vector<8x1x16xf32>, vector<8x1x16xf32>, vector<8x1x16xf32>, vector<8x1x16xf32>, vector<8x1x16xf32>, vector<8x1x16xf32> -> vector<8x8x16xf32>
    %cst_22 = arith.constant 0.000000e+00 : f32
    %82 = vector.broadcast %cst_22 : f32 to vector<8x1x16xf32>
    %83 = tpu.concatenate %82, %81, %82 in 1 : vector<8x1x16xf32>, vector<8x8x16xf32>, vector<8x1x16xf32> -> vector<8x10x16xf32>
    %cst_23 = arith.constant 0.000000e+00 : f32
    %84 = vector.broadcast %cst_23 : f32 to vector<1x10x16xf32>
    %85 = tpu.concatenate %84, %83, %84 in 0 : vector<1x10x16xf32>, vector<8x10x16xf32>, vector<1x10x16xf32> -> vector<10x10x16xf32>
    %86 = vector.extract_strided_slice %85 {offsets = [0, 0, 0], sizes = [8, 8, 16], strides = [1, 1, 1]} : vector<10x10x16xf32> to vector<8x8x16xf32>
    %87 = vector.extract_strided_slice %85 {offsets = [0, 1, 0], sizes = [8, 8, 16], strides = [1, 1, 1]} : vector<10x10x16xf32> to vector<8x8x16xf32>
    %88 = vector.extract_strided_slice %85 {offsets = [0, 2, 0], sizes = [8, 8, 16], strides = [1, 1, 1]} : vector<10x10x16xf32> to vector<8x8x16xf32>
    %89 = vector.extract_strided_slice %85 {offsets = [1, 0, 0], sizes = [8, 8, 16], strides = [1, 1, 1]} : vector<10x10x16xf32> to vector<8x8x16xf32>
    %90 = vector.extract_strided_slice %85 {offsets = [1, 1, 0], sizes = [8, 8, 16], strides = [1, 1, 1]} : vector<10x10x16xf32> to vector<8x8x16xf32>
    %91 = vector.extract_strided_slice %85 {offsets = [1, 2, 0], sizes = [8, 8, 16], strides = [1, 1, 1]} : vector<10x10x16xf32> to vector<8x8x16xf32>
    %92 = vector.extract_strided_slice %85 {offsets = [2, 0, 0], sizes = [8, 8, 16], strides = [1, 1, 1]} : vector<10x10x16xf32> to vector<8x8x16xf32>
    %93 = vector.extract_strided_slice %85 {offsets = [2, 1, 0], sizes = [8, 8, 16], strides = [1, 1, 1]} : vector<10x10x16xf32> to vector<8x8x16xf32>
    %94 = vector.extract_strided_slice %85 {offsets = [2, 2, 0], sizes = [8, 8, 16], strides = [1, 1, 1]} : vector<10x10x16xf32> to vector<8x8x16xf32>
    %95 = tpu.concatenate %86, %87, %88, %89, %90, %91, %92, %93, %94 in 2 : vector<8x8x16xf32>, vector<8x8x16xf32>, vector<8x8x16xf32>, vector<8x8x16xf32>, vector<8x8x16xf32>, vector<8x8x16xf32>, vector<8x8x16xf32>, vector<8x8x16xf32>, vector<8x8x16xf32> -> vector<8x8x144xf32>
    %96 = vector.shape_cast %95 : vector<8x8x144xf32> to vector<64x144xf32>
    %c0_24 = arith.constant 0 : index
    %c0_25 = arith.constant 0 : index
    %97 = vector.load %arg6[%c0_24, %c0_25] : memref<144x32xf32, #tpu.memory_space<vmem>>, vector<144x32xf32>
    %cst_26 = arith.constant dense<0.000000e+00> : vector<64x32xf32>
    %98 = tpu.matmul %96, %97, %cst_26 {dimension_numbers = #tpu.dot_dimension_numbers<[1], [0], [0], [1], [0, 0, 1, 1], [], []>} : vector<64x144xf32>, vector<144x32xf32>, vector<64x32xf32> -> vector<64x32xf32>
    %c0_27 = arith.constant 0 : index
    %c0_28 = arith.constant 0 : index
    %99 = vector.load %arg7[%c0_27, %c0_28] : memref<1x32xf32, #tpu.memory_space<vmem>>, vector<1x32xf32>
    %100 = vector.broadcast %99 : vector<1x32xf32> to vector<64x32xf32>
    %101 = arith.addf %98, %100 : vector<64x32xf32>
    %cst_29 = arith.constant 0.000000e+00 : f32
    %102 = vector.broadcast %cst_29 : f32 to vector<64x32xf32>
    %103 = arith.maximumf %101, %102 : vector<64x32xf32>
    %104 = vector.shape_cast %103 : vector<64x32xf32> to vector<8x8x32xf32>
    %cst_30 = arith.constant 0.000000e+00 : f32
    %105 = vector.broadcast %cst_30 : f32 to vector<8x1x32xf32>
    %106 = tpu.concatenate %105, %104, %105 in 1 : vector<8x1x32xf32>, vector<8x8x32xf32>, vector<8x1x32xf32> -> vector<8x10x32xf32>
    %cst_31 = arith.constant 0.000000e+00 : f32
    %107 = vector.broadcast %cst_31 : f32 to vector<1x10x32xf32>
    %108 = tpu.concatenate %107, %106, %107 in 0 : vector<1x10x32xf32>, vector<8x10x32xf32>, vector<1x10x32xf32> -> vector<10x10x32xf32>
    %109 = vector.extract_strided_slice %108 {offsets = [0, 0, 0], sizes = [8, 8, 32], strides = [1, 1, 1]} : vector<10x10x32xf32> to vector<8x8x32xf32>
    %110 = vector.extract_strided_slice %108 {offsets = [0, 1, 0], sizes = [8, 8, 32], strides = [1, 1, 1]} : vector<10x10x32xf32> to vector<8x8x32xf32>
    %111 = vector.extract_strided_slice %108 {offsets = [0, 2, 0], sizes = [8, 8, 32], strides = [1, 1, 1]} : vector<10x10x32xf32> to vector<8x8x32xf32>
    %112 = vector.extract_strided_slice %108 {offsets = [1, 0, 0], sizes = [8, 8, 32], strides = [1, 1, 1]} : vector<10x10x32xf32> to vector<8x8x32xf32>
    %113 = vector.extract_strided_slice %108 {offsets = [1, 1, 0], sizes = [8, 8, 32], strides = [1, 1, 1]} : vector<10x10x32xf32> to vector<8x8x32xf32>
    %114 = vector.extract_strided_slice %108 {offsets = [1, 2, 0], sizes = [8, 8, 32], strides = [1, 1, 1]} : vector<10x10x32xf32> to vector<8x8x32xf32>
    %115 = vector.extract_strided_slice %108 {offsets = [2, 0, 0], sizes = [8, 8, 32], strides = [1, 1, 1]} : vector<10x10x32xf32> to vector<8x8x32xf32>
    %116 = vector.extract_strided_slice %108 {offsets = [2, 1, 0], sizes = [8, 8, 32], strides = [1, 1, 1]} : vector<10x10x32xf32> to vector<8x8x32xf32>
    %117 = vector.extract_strided_slice %108 {offsets = [2, 2, 0], sizes = [8, 8, 32], strides = [1, 1, 1]} : vector<10x10x32xf32> to vector<8x8x32xf32>
    %118 = tpu.concatenate %109, %110, %111, %112, %113, %114, %115, %116, %117 in 2 : vector<8x8x32xf32>, vector<8x8x32xf32>, vector<8x8x32xf32>, vector<8x8x32xf32>, vector<8x8x32xf32>, vector<8x8x32xf32>, vector<8x8x32xf32>, vector<8x8x32xf32>, vector<8x8x32xf32> -> vector<8x8x288xf32>
    %119 = vector.shape_cast %118 : vector<8x8x288xf32> to vector<64x288xf32>
    %c0_32 = arith.constant 0 : index
    %c0_33 = arith.constant 0 : index
    %120 = vector.load %arg8[%c0_32, %c0_33] : memref<288x32xf32, #tpu.memory_space<vmem>>, vector<288x32xf32>
    %cst_34 = arith.constant dense<0.000000e+00> : vector<64x32xf32>
    %121 = tpu.matmul %119, %120, %cst_34 {dimension_numbers = #tpu.dot_dimension_numbers<[1], [0], [0], [1], [0, 0, 1, 1], [], []>} : vector<64x288xf32>, vector<288x32xf32>, vector<64x32xf32> -> vector<64x32xf32>
    %c0_35 = arith.constant 0 : index
    %c0_36 = arith.constant 0 : index
    %122 = vector.load %arg9[%c0_35, %c0_36] : memref<1x32xf32, #tpu.memory_space<vmem>>, vector<1x32xf32>
    %123 = vector.broadcast %122 : vector<1x32xf32> to vector<64x32xf32>
    %124 = arith.addf %121, %123 : vector<64x32xf32>
    %cst_37 = arith.constant 0.000000e+00 : f32
    %125 = vector.broadcast %cst_37 : f32 to vector<64x32xf32>
    %126 = arith.maximumf %124, %125 : vector<64x32xf32>
    %127 = vector.shape_cast %126 : vector<64x32xf32> to vector<8x8x32xf32>
    %c0_38 = arith.constant 0 : index
    %c0_39 = arith.constant 0 : index
    %c0_40 = arith.constant 0 : index
    %c0_41 = arith.constant 0 : index
    %128 = vector.load %arg15[%c0_38, %c0_39, %c0_40, %c0_41] : memref<1x8x8x32xf32, #tpu.memory_space<vmem>>, vector<1x8x8x32xf32>
    %129 = vector.shape_cast %128 : vector<1x8x8x32xf32> to vector<8x8x32xf32>
    %130 = vector.shape_cast %127 : vector<8x8x32xf32> to vector<1x8x8x32xf32>
    tpu.vector_store %arg15[%c0_38, %c0_39, %c0_40, %c0_41], %130 {strides = array<i32>} : memref<1x8x8x32xf32, #tpu.memory_space<vmem>>, vector<1x8x8x32xf32>,
    %131 = vector.shape_cast %127 : vector<8x8x32xf32> to vector<4x2x8x32xf32>
    %132 = vector.extract_strided_slice %131 {offsets = [0, 0, 0, 0], sizes = [4, 1, 8, 32], strides = [1, 1, 1, 1]} : vector<4x2x8x32xf32> to vector<4x1x8x32xf32>
    %133 = vector.shape_cast %132 : vector<4x1x8x32xf32> to vector<4x8x32xf32>
    %134 = vector.extract_strided_slice %131 {offsets = [0, 1, 0, 0], sizes = [4, 1, 8, 32], strides = [1, 1, 1, 1]} : vector<4x2x8x32xf32> to vector<4x1x8x32xf32>
    %135 = vector.shape_cast %134 : vector<4x1x8x32xf32> to vector<4x8x32xf32>
    %136 = arith.maximumf %133, %135 : vector<4x8x32xf32>
    %137 = vector.extract_strided_slice %136 {offsets = [0, 0, 0], sizes = [4, 1, 32], strides = [1, 1, 1]} : vector<4x8x32xf32> to vector<4x1x32xf32>
    %138 = vector.extract_strided_slice %136 {offsets = [0, 1, 0], sizes = [4, 1, 32], strides = [1, 1, 1]} : vector<4x8x32xf32> to vector<4x1x32xf32>
    %139 = arith.maximumf %137, %138 : vector<4x1x32xf32>
    %140 = vector.extract_strided_slice %136 {offsets = [0, 2, 0], sizes = [4, 1, 32], strides = [1, 1, 1]} : vector<4x8x32xf32> to vector<4x1x32xf32>
    %141 = vector.extract_strided_slice %136 {offsets = [0, 3, 0], sizes = [4, 1, 32], strides = [1, 1, 1]} : vector<4x8x32xf32> to vector<4x1x32xf32>
    %142 = arith.maximumf %140, %141 : vector<4x1x32xf32>
    %143 = vector.extract_strided_slice %136 {offsets = [0, 4, 0], sizes = [4, 1, 32], strides = [1, 1, 1]} : vector<4x8x32xf32> to vector<4x1x32xf32>
    %144 = vector.extract_strided_slice %136 {offsets = [0, 5, 0], sizes = [4, 1, 32], strides = [1, 1, 1]} : vector<4x8x32xf32> to vector<4x1x32xf32>
    %145 = arith.maximumf %143, %144 : vector<4x1x32xf32>
    %146 = vector.extract_strided_slice %136 {offsets = [0, 6, 0], sizes = [4, 1, 32], strides = [1, 1, 1]} : vector<4x8x32xf32> to vector<4x1x32xf32>
    %147 = vector.extract_strided_slice %136 {offsets = [0, 7, 0], sizes = [4, 1, 32], strides = [1, 1, 1]} : vector<4x8x32xf32> to vector<4x1x32xf32>
    %148 = arith.maximumf %146, %147 : vector<4x1x32xf32>
    %149 = tpu.concatenate %139, %142, %145, %148 in 1 : vector<4x1x32xf32>, vector<4x1x32xf32>, vector<4x1x32xf32>, vector<4x1x32xf32> -> vector<4x4x32xf32>
    %cst_42 = arith.constant 0.000000e+00 : f32
    %150 = vector.broadcast %cst_42 : f32 to vector<4x1x32xf32>
    %151 = tpu.concatenate %150, %149, %150 in 1 : vector<4x1x32xf32>, vector<4x4x32xf32>, vector<4x1x32xf32> -> vector<4x6x32xf32>
    %cst_43 = arith.constant 0.000000e+00 : f32
    %152 = vector.broadcast %cst_43 : f32 to vector<1x6x32xf32>
    %153 = tpu.concatenate %152, %151, %152 in 0 : vector<1x6x32xf32>, vector<4x6x32xf32>, vector<1x6x32xf32> -> vector<6x6x32xf32>
    %154 = vector.extract_strided_slice %153 {offsets = [0, 0, 0], sizes = [4, 4, 32], strides = [1, 1, 1]} : vector<6x6x32xf32> to vector<4x4x32xf32>
    %155 = vector.extract_strided_slice %153 {offsets = [0, 1, 0], sizes = [4, 4, 32], strides = [1, 1, 1]} : vector<6x6x32xf32> to vector<4x4x32xf32>
    %156 = vector.extract_strided_slice %153 {offsets = [0, 2, 0], sizes = [4, 4, 32], strides = [1, 1, 1]} : vector<6x6x32xf32> to vector<4x4x32xf32>
    %157 = vector.extract_strided_slice %153 {offsets = [1, 0, 0], sizes = [4, 4, 32], strides = [1, 1, 1]} : vector<6x6x32xf32> to vector<4x4x32xf32>
    %158 = vector.extract_strided_slice %153 {offsets = [1, 1, 0], sizes = [4, 4, 32], strides = [1, 1, 1]} : vector<6x6x32xf32> to vector<4x4x32xf32>
    %159 = vector.extract_strided_slice %153 {offsets = [1, 2, 0], sizes = [4, 4, 32], strides = [1, 1, 1]} : vector<6x6x32xf32> to vector<4x4x32xf32>
    %160 = vector.extract_strided_slice %153 {offsets = [2, 0, 0], sizes = [4, 4, 32], strides = [1, 1, 1]} : vector<6x6x32xf32> to vector<4x4x32xf32>
    %161 = vector.extract_strided_slice %153 {offsets = [2, 1, 0], sizes = [4, 4, 32], strides = [1, 1, 1]} : vector<6x6x32xf32> to vector<4x4x32xf32>
    %162 = vector.extract_strided_slice %153 {offsets = [2, 2, 0], sizes = [4, 4, 32], strides = [1, 1, 1]} : vector<6x6x32xf32> to vector<4x4x32xf32>
    %163 = tpu.concatenate %154, %155, %156, %157, %158, %159, %160, %161, %162 in 2 : vector<4x4x32xf32>, vector<4x4x32xf32>, vector<4x4x32xf32>, vector<4x4x32xf32>, vector<4x4x32xf32>, vector<4x4x32xf32>, vector<4x4x32xf32>, vector<4x4x32xf32>, vector<4x4x32xf32> -> vector<4x4x288xf32>
    %164 = vector.shape_cast %163 : vector<4x4x288xf32> to vector<16x288xf32>
    %c0_44 = arith.constant 0 : index
    %c0_45 = arith.constant 0 : index
    %165 = vector.load %arg10[%c0_44, %c0_45] : memref<288x64xf32, #tpu.memory_space<vmem>>, vector<288x64xf32>
    %cst_46 = arith.constant dense<0.000000e+00> : vector<16x64xf32>
    %166 = tpu.matmul %164, %165, %cst_46 {dimension_numbers = #tpu.dot_dimension_numbers<[1], [0], [0], [1], [0, 0, 1, 1], [], []>} : vector<16x288xf32>, vector<288x64xf32>, vector<16x64xf32> -> vector<16x64xf32>
    %c0_47 = arith.constant 0 : index
    %c0_48 = arith.constant 0 : index
    %167 = vector.load %arg11[%c0_47, %c0_48] : memref<1x64xf32, #tpu.memory_space<vmem>>, vector<1x64xf32>
    %168 = vector.broadcast %167 : vector<1x64xf32> to vector<16x64xf32>
    %169 = arith.addf %166, %168 : vector<16x64xf32>
    %cst_49 = arith.constant 0.000000e+00 : f32
    %170 = vector.broadcast %cst_49 : f32 to vector<16x64xf32>
    %171 = arith.maximumf %169, %170 : vector<16x64xf32>
    %172 = vector.shape_cast %171 : vector<16x64xf32> to vector<4x4x64xf32>
    %cst_50 = arith.constant 0.000000e+00 : f32
    %173 = vector.broadcast %cst_50 : f32 to vector<4x1x64xf32>
    %174 = tpu.concatenate %173, %172, %173 in 1 : vector<4x1x64xf32>, vector<4x4x64xf32>, vector<4x1x64xf32> -> vector<4x6x64xf32>
    %cst_51 = arith.constant 0.000000e+00 : f32
    %175 = vector.broadcast %cst_51 : f32 to vector<1x6x64xf32>
    %176 = tpu.concatenate %175, %174, %175 in 0 : vector<1x6x64xf32>, vector<4x6x64xf32>, vector<1x6x64xf32> -> vector<6x6x64xf32>
    %177 = vector.extract_strided_slice %176 {offsets = [0, 0, 0], sizes = [4, 4, 64], strides = [1, 1, 1]} : vector<6x6x64xf32> to vector<4x4x64xf32>
    %178 = vector.extract_strided_slice %176 {offsets = [0, 1, 0], sizes = [4, 4, 64], strides = [1, 1, 1]} : vector<6x6x64xf32> to vector<4x4x64xf32>
    %179 = vector.extract_strided_slice %176 {offsets = [0, 2, 0], sizes = [4, 4, 64], strides = [1, 1, 1]} : vector<6x6x64xf32> to vector<4x4x64xf32>
    %180 = vector.extract_strided_slice %176 {offsets = [1, 0, 0], sizes = [4, 4, 64], strides = [1, 1, 1]} : vector<6x6x64xf32> to vector<4x4x64xf32>
    %181 = vector.extract_strided_slice %176 {offsets = [1, 1, 0], sizes = [4, 4, 64], strides = [1, 1, 1]} : vector<6x6x64xf32> to vector<4x4x64xf32>
    %182 = vector.extract_strided_slice %176 {offsets = [1, 2, 0], sizes = [4, 4, 64], strides = [1, 1, 1]} : vector<6x6x64xf32> to vector<4x4x64xf32>
    %183 = vector.extract_strided_slice %176 {offsets = [2, 0, 0], sizes = [4, 4, 64], strides = [1, 1, 1]} : vector<6x6x64xf32> to vector<4x4x64xf32>
    %184 = vector.extract_strided_slice %176 {offsets = [2, 1, 0], sizes = [4, 4, 64], strides = [1, 1, 1]} : vector<6x6x64xf32> to vector<4x4x64xf32>
    %185 = vector.extract_strided_slice %176 {offsets = [2, 2, 0], sizes = [4, 4, 64], strides = [1, 1, 1]} : vector<6x6x64xf32> to vector<4x4x64xf32>
    %186 = tpu.concatenate %177, %178, %179, %180, %181, %182, %183, %184, %185 in 2 : vector<4x4x64xf32>, vector<4x4x64xf32>, vector<4x4x64xf32>, vector<4x4x64xf32>, vector<4x4x64xf32>, vector<4x4x64xf32>, vector<4x4x64xf32>, vector<4x4x64xf32>, vector<4x4x64xf32> -> vector<4x4x576xf32>
    %187 = vector.shape_cast %186 : vector<4x4x576xf32> to vector<16x576xf32>
    %c0_52 = arith.constant 0 : index
    %c0_53 = arith.constant 0 : index
    %188 = vector.load %arg12[%c0_52, %c0_53] : memref<576x64xf32, #tpu.memory_space<vmem>>, vector<576x64xf32>
    %cst_54 = arith.constant dense<0.000000e+00> : vector<16x64xf32>
    %189 = tpu.matmul %187, %188, %cst_54 {dimension_numbers = #tpu.dot_dimension_numbers<[1], [0], [0], [1], [0, 0, 1, 1], [], []>} : vector<16x576xf32>, vector<576x64xf32>, vector<16x64xf32> -> vector<16x64xf32>
    %c0_55 = arith.constant 0 : index
    %c0_56 = arith.constant 0 : index
    %190 = vector.load %arg13[%c0_55, %c0_56] : memref<1x64xf32, #tpu.memory_space<vmem>>, vector<1x64xf32>
    %191 = vector.broadcast %190 : vector<1x64xf32> to vector<16x64xf32>
    %192 = arith.addf %189, %191 : vector<16x64xf32>
    %cst_57 = arith.constant 0.000000e+00 : f32
    %193 = vector.broadcast %cst_57 : f32 to vector<16x64xf32>
    %194 = arith.maximumf %192, %193 : vector<16x64xf32>
    %195 = vector.shape_cast %194 : vector<16x64xf32> to vector<4x4x64xf32>
    %c0_58 = arith.constant 0 : index
    %c0_59 = arith.constant 0 : index
    %c0_60 = arith.constant 0 : index
    %c0_61 = arith.constant 0 : index
    %196 = vector.load %arg16[%c0_58, %c0_59, %c0_60, %c0_61] : memref<1x4x4x64xf32, #tpu.memory_space<vmem>>, vector<1x4x4x64xf32>
    %197 = vector.shape_cast %196 : vector<1x4x4x64xf32> to vector<4x4x64xf32>
    %198 = vector.shape_cast %195 : vector<4x4x64xf32> to vector<1x4x4x64xf32>
    tpu.vector_store %arg16[%c0_58, %c0_59, %c0_60, %c0_61], %198 {strides = array<i32>} : memref<1x4x4x64xf32, #tpu.memory_space<vmem>>, vector<1x4x4x64xf32>,
    return
  }
  func.func @transform_0(%arg0: i32) -> (i32, i32, i32, i32) {
    %c0_i32 = arith.constant 0 : i32
    %c0_i32_0 = arith.constant 0 : i32
    %c0_i32_1 = arith.constant 0 : i32
    %c0_i32_2 = arith.constant 0 : i32
    return %arg0, %c0_i32, %c0_i32_0, %c0_i32_1 : i32, i32, i32, i32
  }
  func.func @transform_1(%arg0: i32) -> (i32, i32) {
    %c0_i32 = arith.constant 0 : i32
    %c0_i32_0 = arith.constant 0 : i32
    %c0_i32_1 = arith.constant 0 : i32
    return %c0_i32, %c0_i32_0 : i32, i32
  }
  func.func @transform_2(%arg0: i32) -> (i32, i32) {
    %c0_i32 = arith.constant 0 : i32
    %c0_i32_0 = arith.constant 0 : i32
    %c0_i32_1 = arith.constant 0 : i32
    return %c0_i32, %c0_i32_0 : i32, i32
  }
  func.func @transform_3(%arg0: i32) -> (i32, i32) {
    %c0_i32 = arith.constant 0 : i32
    %c0_i32_0 = arith.constant 0 : i32
    %c0_i32_1 = arith.constant 0 : i32
    return %c0_i32, %c0_i32_0 : i32, i32
  }
  func.func @transform_4(%arg0: i32) -> (i32, i32) {
    %c0_i32 = arith.constant 0 : i32
    %c0_i32_0 = arith.constant 0 : i32
    %c0_i32_1 = arith.constant 0 : i32
    return %c0_i32, %c0_i32_0 : i32, i32
  }
  func.func @transform_5(%arg0: i32) -> (i32, i32) {
    %c0_i32 = arith.constant 0 : i32
    %c0_i32_0 = arith.constant 0 : i32
    %c0_i32_1 = arith.constant 0 : i32
    return %c0_i32, %c0_i32_0 : i32, i32
  }
  func.func @transform_6(%arg0: i32) -> (i32, i32) {
    %c0_i32 = arith.constant 0 : i32
    %c0_i32_0 = arith.constant 0 : i32
    %c0_i32_1 = arith.constant 0 : i32
    return %c0_i32, %c0_i32_0 : i32, i32
  }
  func.func @transform_7(%arg0: i32) -> (i32, i32) {
    %c0_i32 = arith.constant 0 : i32
    %c0_i32_0 = arith.constant 0 : i32
    %c0_i32_1 = arith.constant 0 : i32
    return %c0_i32, %c0_i32_0 : i32, i32
  }
  func.func @transform_8(%arg0: i32) -> (i32, i32) {
    %c0_i32 = arith.constant 0 : i32
    %c0_i32_0 = arith.constant 0 : i32
    %c0_i32_1 = arith.constant 0 : i32
    return %c0_i32, %c0_i32_0 : i32, i32
  }
  func.func @transform_9(%arg0: i32) -> (i32, i32) {
    %c0_i32 = arith.constant 0 : i32
    %c0_i32_0 = arith.constant 0 : i32
    %c0_i32_1 = arith.constant 0 : i32
    return %c0_i32, %c0_i32_0 : i32, i32
  }
  func.func @transform_10(%arg0: i32) -> (i32, i32) {
    %c0_i32 = arith.constant 0 : i32
    %c0_i32_0 = arith.constant 0 : i32
    %c0_i32_1 = arith.constant 0 : i32
    return %c0_i32, %c0_i32_0 : i32, i32
  }
  func.func @transform_11(%arg0: i32) -> (i32, i32) {
    %c0_i32 = arith.constant 0 : i32
    %c0_i32_0 = arith.constant 0 : i32
    %c0_i32_1 = arith.constant 0 : i32
    return %c0_i32, %c0_i32_0 : i32, i32
  }
  func.func @transform_12(%arg0: i32) -> (i32, i32) {
    %c0_i32 = arith.constant 0 : i32
    %c0_i32_0 = arith.constant 0 : i32
    %c0_i32_1 = arith.constant 0 : i32
    return %c0_i32, %c0_i32_0 : i32, i32
  }
  func.func @transform_13(%arg0: i32) -> (i32, i32, i32, i32) {
    %c0_i32 = arith.constant 0 : i32
    %c0_i32_0 = arith.constant 0 : i32
    %c0_i32_1 = arith.constant 0 : i32
    %c0_i32_2 = arith.constant 0 : i32
    return %arg0, %c0_i32, %c0_i32_0, %c0_i32_1 : i32, i32, i32, i32
  }
  func.func @transform_14(%arg0: i32) -> (i32, i32, i32, i32) {
    %c0_i32 = arith.constant 0 : i32
    %c0_i32_0 = arith.constant 0 : i32
    %c0_i32_1 = arith.constant 0 : i32
    %c0_i32_2 = arith.constant 0 : i32
    return %arg0, %c0_i32, %c0_i32_0, %c0_i32_1 : i32, i32, i32, i32
  }
  func.func @transform_15(%arg0: i32) -> (i32, i32, i32, i32) {
    %c0_i32 = arith.constant 0 : i32
    %c0_i32_0 = arith.constant 0 : i32
    %c0_i32_1 = arith.constant 0 : i32
    %c0_i32_2 = arith.constant 0 : i32
    return %arg0, %c0_i32, %c0_i32_0, %c0_i32_1 : i32, i32, i32, i32
  }
}

</mosaic_0001>

<bundles_post_ra>
// kernel: tpu_custom_call.1
= control target key start
LH: loop header
LB: loop body
LE: loop exit
PB: predicated region body
PF: predicated region fallthrough
CT: control target
= control target key end

     0   :  { %s11968_s0 = inlined_call_operand.vmem [shape: f32[2,16,16,4], index: 0, kind: input, shape index: {}]   ;;  %s11969_s1 = inlined_call_operand.vmem [shape: f32[36,16], index: 1, kind: input, shape index: {}]   ;;  %s11970_s2 = inlined_call_operand.vmem [shape: f32[1,16], index: 2, kind: input, shape index: {}]   ;;  %s11971_s3 = inlined_call_operand.vmem [shape: f32[144,16], index: 3, kind: input, shape index: {}]   ;;  %s11972_s4 = inlined_call_operand.vmem [shape: f32[1,16], index: 4, kind: input, shape index: {}]   ;;  %s11973_s5 = inlined_call_operand.vmem [shape: f32[144,32], index: 5, kind: input, shape index: {}]   ;;  %s11974_s6 = inlined_call_operand.vmem [shape: f32[1,32], index: 6, kind: input, shape index: {}]   ;;  %s11975_s7 = inlined_call_operand.vmem [shape: f32[288,32], index: 7, kind: input, shape index: {}]   ;;  %s11976_s8 = inlined_call_operand.vmem [shape: f32[1,32], index: 8, kind: input, shape index: {}]   ;;  %s11977_s9 = inlined_call_operand.vmem [shape: f32[288,64], index: 9, kind: input, shape index: {}]   ;;  %s11978_s10 = inlined_call_operand.vmem [shape: f32[1,64], index: 10, kind: input, shape index: {}]   ;;  %s11979_s11 = inlined_call_operand.vmem [shape: f32[576,64], index: 11, kind: input, shape index: {}]   ;;  %s11980_s12 = inlined_call_operand.vmem [shape: f32[1,64], index: 12, kind: input, shape index: {}]   ;;  %s11981_s13 = inlined_call_operand.hbm [shape: f32[2,16,16,16], index: 13, kind: output, shape index: {0}]   ;;  %s11982_s14 = inlined_call_operand.hbm [shape: f32[2,8,8,32], index: 14, kind: output, shape index: {1}]   ;;  %s11983_s15 = inlined_call_operand.hbm [shape: f32[2,4,4,64], index: 15, kind: output, shape index: {2}]  }
   0x1   :  { %12018 = sst [smem:[#allocation15_spill]] %s11968_s0 }
   0x2   :  { %12019 = sst [smem:[#allocation16_spill]] %s11969_s1 }
   0x3   :  { %12020 = sst [smem:[#allocation17_spill]] %s11970_s2 }
   0x4   :  { %12021 = sst [smem:[#allocation18_spill]] %s11971_s3 }
   0x5   :  { %12022 = sst [smem:[#allocation19_spill]] %s11972_s4 }
   0x6   :  { %12023 = sst [smem:[#allocation20_spill]] %s11973_s5 }
   0x7   :  { %21 = vsyncpa [#allocation3], 0 }
   0x8   :  { %23 = vsyncpa [#allocation3 + $0x1], 0 }
   0x9   :  { %24 = vsyncpa [#allocation5], 0 }
   0xa   :  { %26 = vsyncpa [#allocation5 + $0x1], 0  ;;  %s8004_s18 = smov 0   ;;  %s8006_s19 = smov 0  }
   0xb   :  { %s8008_s20 = smov 0   ;;  %s8010_s21 = smov 0  }
   0xc LB: > { %12024 = sst [smem:[#allocation9_spill]] %s7891_s18  ;;  %s8025_s22 = sadd.s32 4294967295, %s7903_s21   ;;  %s7903_s21 = sphi %s8010_s21, %s12055_s21   ;;  %s7899_s20 = sphi %s8008_s20, %s12058_s20   ;;  %s7895_s19 = sphi %s8006_s19, %s12057_s19   ;;  %s7891_s18 = sphi %s8004_s18, %s12056_s18  }
   0xd   : > { %12025 = sst [smem:[#allocation10_spill]] %s7895_s19  ;;  %s11984_s23 = sadd.s32 4294967294, %s7903_s21  }
   0xe   : > { %12026 = sst [smem:[#allocation11_spill]] %s7899_s20  ;;  %s8029_s24 = sadd.s32 1, %s7903_s21  }
   0xf   : > { %12027 = sst [smem:[#allocation12_spill]] %s8029_s24  ;;  %s317_s25 = sadd.s32 1, %s7899_s20 }
  0x10   : > { %s314_s26 = ssub.s32 %s7903_s21, %s8029_s24  ;;  %p327_p0 = scmp.ne.s32.totalorder %s7899_s20, %s7895_s19 }
  0x11   : > { %p315_p1 = scmp.eq.s32.totalorder %s314_s26, 0  ;;  %p328_p2 = scmp.eq.s32.totalorder %s8025_s22, 1 }
  0x12   : > { %p333_p3 = scmp.ne.s32.totalorder %s7895_s19, %s7891_s18  ;;  %p334_p4 = scmp.eq.s32.totalorder %s11984_s23, 1 }
  0x13   : > { %s8042_s27 = scalar_select %p315_p1, %s7899_s20, %s317_s25  }
  0x14   : > { %p8044_p5 = por %p328_p2, %p327_p0  ;;  %p8048_p6 = por %p334_p4, %p333_p3 }
  0x15   : > { %12028 = sst [smem:[#allocation13_spill]] %s8042_s27  ;;  %p6264_p7 = scmp.ge.s32.totalorder %s7903_s21, 1 }
  0x16   : > { %s12030_s29 = scalar_select %p8048_p6, 1, 0 }
  0x17   : > { %p448_p8 = scmp.lt.s32.totalorder %s7903_s21, 3 }
  0x18   : > { %12031 = sst [smem:[#allocation14_spill]] %s12030_s29 }
  0x19   : > { %p449_p9 = pnand %p6264_p7, %p448_p8 }
  0x1a   : > { %v7905_v0 = vmov (!%p449_p9), 0.0   ;;  %p506_p10 = scmp.lt.s32.totalorder (!%p449_p9), %s8025_s22, 1  ;;  %s11991_s30 = smov (!%p449_p9), 4   ;;  %vm575_vm0 = vcmask (!%p449_p9), 1040384   ;;  %vm734_vm1 = vcmask (!%p449_p9), 1046528   ;;  %vm905_vm2 = vcmask (!%p449_p9), 1045504  }
  0x1b   : > { %452 = sbr.rel (%p449_p9) target bundleno = 2714 (0xa9a), region = 72  ;;  %v8055_v1 = vrot.slane (!%p449_p9), %v7905_v0, 1  ;;  %v8059_v2 = vrot.slane (!%p449_p9), %v7905_v0, 2  ;;  %s12032_s0 = sld [smem:[#allocation15_spill]] (!%p449_p9)  ;;  %vm2026_vm3 = vcmask (!%p449_p9), 1043456   ;;  %vm1655_vm4 = vcmask (!%p449_p9), 31744  }
  0x1c   : > { %s11989_s27 = smov (!%p449_p9), 8   ;;  %s12000_s25 = smov (!%p449_p9), 20   ;;  %vm1687_vm5 = vcmask (!%p449_p9), 64512   ;;  %vm1719_vm6 = vcmask (!%p449_p9), 97280   ;;  %vm1752_vm7 = vcmask (!%p449_p9), 130048   ;;  %vm1785_vm8 = vcmask (!%p449_p9), 162816  }
  0x1d   : > { %812 = vrot.lane.b32.xlu0 (!%p449_p9), %v8055_v1, %s11991_s30  ;;  %s12033_s1 = sld [smem:[#allocation16_spill]] (!%p449_p9)  ;;  %s12035_s20 = smov (!%p449_p9), 12   ;;  %vm1818_vm9 = vcmask (!%p449_p9), 195584   ;;  %vm1851_vm10 = vcmask (!%p449_p9), 228352   ;;  %vm1884_vm11 = vcmask (!%p449_p9), 261120   ;;  %vm1929_vm12 = vcmask (!%p449_p9), 293888  }
  0x1e   : > { %s12036_s26 = smov (!%p449_p9), 16   ;;  %s12037_s24 = smov (!%p449_p9), 4   ;;  %vm3357_vm13 = vcmask (!%p449_p9), 392192   ;;  %vm3390_vm14 = vcmask (!%p449_p9), 523264   ;;  %vm3423_vm15 = vcmask (!%p449_p9), 654336  }
  0x1f   : > { %s12038_s2 = sld [smem:[#allocation17_spill]] (!%p449_p9)  ;;  %s12040_s3 = sld [smem:[#allocation18_spill]] (!%p449_p9) }
  0x20   : > { %s12043_s29 = smov (!%p449_p9), 28   ;;  %s12044_s4 = sld [smem:[#allocation19_spill]] (!%p449_p9) }
  0x21   : > { %983 = vrot.lane.b32.xlu0 (!%p449_p9), %v8059_v2, %s11989_s27  ;;  %s11998_s27 = smov (!%p449_p9), 24   ;;  %s12046_s5 = sld [smem:[#allocation20_spill]] (!%p449_p9) }
  0x22   : > { %s507_s16 = scalar_select %p506_p10, %s8025_s22, 1 }
  0x23   : > { %v1917_v23 = vld [vmem:[%s12033_s1] sm:$0xff]  ;;  %v1918_v24 = vld [vmem:[%s12033_s1 + $0x8] sm:$0xff]  ;;  %v1919_v28 = vld [vmem:[%s12033_s1 + $0x10] sm:$0xff]  ;;  %s6386_s18 = sshll.u32 %s8025_s22, 10 }
  0x24   : > { %s6384_s17 = sshll.u32 %s507_s16, 8  ;;  %s11985_s16 = smov 12   ;;  %v6731_v27 = vpack.c.bf16 %v1918_v24, %v1917_v23  ;;  %v1920_v29 = vld [vmem:[%s12033_s1 + $0x18] sm:$0xff]  ;;  %v1921_v36 = vld [vmem:[%s12033_s1 + $0x20] sm:$0xf] }
  0x25   : > { %s8067_s23 = scalar_lea.vmem %s12032_s0, %s6384_s17  ;;  %s11987_s17 = smov 16   ;;  %v6735_v30 = vpack.c.bf16 %v1920_v29, %v1919_v28 }
  0x26   : > { %v511_v3 = vld [vmem:[%s8067_s23] sm:$0xff]  ;;  %v512_v4 = vld [vmem:[%s8067_s23 + $0x8] sm:$0xff]  ;;  %v513_v19 = vld [vmem:[%s8067_s23 + $0x10] sm:$0xff]  ;;  %s12034_s0 = smov 8   ;;  %6732 = vmatprep.subr.bf16.mxu0 %v6731_v27  ;;  %s12010_s1 = smov 96  }
  0x27   : > { %v576_v5 = vrot.slane %v511_v3, 7  ;;  %v577_v6 = vrot.slane %v512_v4, 7  ;;  %v579_v21 = vrot.slane %v513_v19, 7  ;;  %v514_v22 = vld [vmem:[%s8067_s23 + $0x18] sm:$0xff]  ;;  %6734 = vmatpush3.bf16.msra.mxu0 %v6731_v27  ;;  %v515_v41 = vld [vmem:[%s8067_s23 + $0x20] sm:$0xff]  ;;  %v516_v42 = vld [vmem:[%s8067_s23 + $0x28] sm:$0xff] }
  0x28   : > { %v580_v25 = vrot.slane %v514_v22, 7  ;;  %6736 = vmatprep.subr.bf16.mxu0 %v6735_v30  ;;  %v582_v45 = vrot.slane %v515_v41, 7  ;;  %v583_v46 = vrot.slane %v516_v42, 7  ;;  %v517_v61 = vld [vmem:[%s8067_s23 + $0x30] sm:$0xff]  ;;  %v518_v62 = vld [vmem:[%s8067_s23 + $0x38] sm:$0xff]  ;;  %v519_v19 = vld [vmem:[%s8067_s23 + $0x40] sm:$0xff] }
  0x29   : > { %v8074_v7 = vsel %vm575_vm0, 0.0, %v576_v5  ;;  %v8077_v8 = vsel %vm575_vm0, %v576_v5, %v577_v6  ;;  %v687_v9 = vsel %vm575_vm0, %v577_v6, 0.0  ;;  %v8108_v26 = vsel %vm575_vm0, 0.0, %v579_v21 }
  0x2a   : > { %1077 = vrot.lane.b32.xlu1 %v8074_v7, %s11985_s16  ;;  %v737_v10 = vrot.slane %v8074_v7, 1  ;;  %v738_v11 = vrot.slane %v8077_v8, 1  ;;  %v740_v12 = vrot.slane %v687_v9, 1  ;;  %v908_v15 = vrot.slane %v8074_v7, 2 }
  0x2b   : > { %v909_v16 = vrot.slane %v8077_v8, 2  ;;  %v911_v17 = vrot.slane %v687_v9, 2  ;;  %v8120_v31 = vsel %vm575_vm0, %v579_v21, %v580_v25  ;;  %v742_v32 = vrot.slane %v8108_v26, 1  ;;  %6738 = vmatpush3.bf16.msra.mxu0 %v6735_v30 }
  0x2c   : > { %v739_v13 = vsel %vm734_vm1, %v737_v10, %v738_v11  ;;  %v741_v14 = vsel %vm734_vm1, %v738_v11, %v740_v12  ;;  %v743_v33 = vrot.slane %v8120_v31, 1  ;;  %v688_v34 = vsel %vm575_vm0, %v580_v25, 0.0  ;;  %6631 = vmatprep.subr.msk.mxu0 %vm2026_vm3, %v1921_v36 }
  0x2d   : > { %1179 = vrot.lane.b32.xlu0 %v739_v13, %s11987_s17  ;;  %v910_v18 = vsel %vm905_vm2, %v908_v15, %v909_v16  ;;  %v912_v20 = vsel %vm905_vm2, %v909_v16, %v911_v17  ;;  %v745_v35 = vrot.slane %v688_v34, 1  ;;  %v913_v39 = vrot.slane %v8108_v26, 2 }
  0x2e   : > { %1079 = vrot.lane.b32.xlu1 %v8077_v8, %s11985_s16  ;;  %v744_v37 = vsel %vm734_vm1, %v742_v32, %v743_v33  ;;  %v914_v40 = vrot.slane %v8120_v31, 2  ;;  %v916_v43 = vrot.slane %v688_v34, 2  ;;  %s11996_s16 = smov 32   ;;  %v8150_v48 = vsel %vm575_vm0, %v582_v45, %v583_v46 }
  0x2f   : > { %v746_v38 = vsel %vm734_vm1, %v743_v33, %v745_v35  ;;  %6632 = vmatpush3.msk.msra.mxu0 %vm2026_vm3, %v1921_v36  ;;  %v8153_v49 = vsel %vm575_vm0, 0.0, %v582_v45  ;;  %v748_v51 = vrot.slane %v8150_v48, 1  ;;  %v689_v52 = vsel %vm575_vm0, %v583_v46, 0.0 }
  0x30   : > { %v915_v44 = vsel %vm905_vm2, %v913_v39, %v914_v40  ;;  %v917_v47 = vsel %vm905_vm2, %v914_v40, %v916_v43  ;;  %v747_v50 = vrot.slane %v8153_v49, 1  ;;  %v918_v54 = vrot.slane %v8153_v49, 2 }
  0x31   : > { %1181 = vrot.lane.b32.xlu0 %v741_v14, %s11987_s17  ;;  %s12002_s17 = smov 28   ;;  %v919_v55 = vrot.slane %v8150_v48, 2  ;;  %v750_v56 = vrot.slane %v689_v52, 1  ;;  %v921_v58 = vrot.slane %v689_v52, 2  ;;  %v585_v63 = vrot.slane %v517_v61, 7 }
  0x32   : > { %814 = vrot.lane.b32.xlu1 %v739_v13, %s11991_s30  ;;  %v749_v53 = vsel %vm734_vm1, %v747_v50, %v748_v51  ;;  %v586_v3 = vrot.slane %v518_v62, 7  ;;  %v588_v21 = vrot.slane %v519_v19, 7  ;;  %v522_v50 = vld [vmem:[%s8067_s23 + $0x58] sm:$0xff] }
  0x33   : > { %v920_v57 = vsel %vm905_vm2, %v918_v54, %v919_v55  ;;  %v751_v59 = vsel %vm734_vm1, %v748_v51, %v750_v56  ;;  %v922_v60 = vsel %vm905_vm2, %v919_v55, %v921_v58  ;;  %v8190_v5 = vsel %vm575_vm0, 0.0, %v585_v63 }
  0x34   : > { %v8187_v4 = vsel %vm575_vm0, %v585_v63, %v586_v3  ;;  %v752_v6 = vrot.slane %v8190_v5, 1  ;;  %v690_v10 = vsel %vm575_vm0, %v586_v3, 0.0  ;;  %v923_v12 = vrot.slane %v8190_v5, 2 }
  0x35   : > { %816 = vrot.lane.b32.xlu0 %v741_v14, %s11991_s30  ;;  %v753_v9 = vrot.slane %v8187_v4, 1  ;;  %v924_v13 = vrot.slane %v8187_v4, 2  ;;  %v755_v14 = vrot.slane %v690_v10, 1  ;;  %v926_v16 = vrot.slane %v690_v10, 2  ;;  %s12012_s30 = smov 64  }
  0x36   : > { %1280 = vrot.lane.b32.xlu1 %v910_v18, %s12000_s25  ;;  %v8227_v24 = vsel %vm575_vm0, 0.0, %v588_v21 }
  0x37   : > { %v754_v11 = vsel %vm734_vm1, %v752_v6, %v753_v9  ;;  %v925_v15 = vsel %vm905_vm2, %v923_v12, %v924_v13  ;;  %v756_v17 = vsel %vm734_vm1, %v753_v9, %v755_v14  ;;  %v757_v25 = vrot.slane %v8227_v24, 1 }
  0x38   : > { %v928_v32 = vrot.slane %v8227_v24, 2 }
  0x39   : > { %1282 = vrot.lane.b32.xlu0 %v912_v20, %s12000_s25 }
  0x3a   : > { %985 = vrot.lane.b32.xlu1 %v910_v18, %s12034_s0  ;;  %v927_v18 = vsel %vm905_vm2, %v924_v13, %v926_v16 }
  0x3d   : > { %987 = vrot.lane.b32.xlu0 %v912_v20, %s12034_s0  ;;  %v520_v20 = vld [vmem:[%s8067_s23 + $0x48] sm:$0xff] }
  0x3e   : > { %1376 = vrot.lane.b32.xlu1 %v8108_v26, %s11998_s27  ;;  %v589_v22 = vrot.slane %v520_v20, 7 }
  0x40   : > { %v8224_v23 = vsel %vm575_vm0, %v588_v21, %v589_v22  ;;  %v691_v28 = vsel %vm575_vm0, %v589_v22, 0.0 }
  0x41   : > { %1378 = vrot.lane.b32.xlu0 %v8120_v31, %s11998_s27  ;;  %v758_v27 = vrot.slane %v8224_v23, 1  ;;  %v929_v33 = vrot.slane %v8224_v23, 2  ;;  %v760_v34 = vrot.slane %v691_v28, 1  ;;  %v931_v36 = vrot.slane %v691_v28, 2 }
  0x42   : > { %1081 = vrot.lane.b32.xlu1 %v8108_v26, %s12035_s20 }
  0x43   : > { %v8238_v30 = vsel %vm734_vm1, %v757_v25, %v758_v27  ;;  %v8247_v35 = vsel %vm905_vm2, %v928_v32, %v929_v33  ;;  %v8257_v40 = vsel %vm905_vm2, %v929_v33, %v931_v36 }
  0x45   : > { %1083 = vrot.lane.b32.xlu0 %v8120_v31, %s12035_s20 }
  0x46   : > { %1469 = vrot.lane.b32.xlu1 %v744_v37, %s12002_s17 }
  0x49   : > { %1471 = vrot.lane.b32.xlu0 %v746_v38, %s12002_s17 }
  0x4a   : > { %1183 = vrot.lane.b32.xlu1 %v744_v37, %s12036_s26 }
  0x4d   : > { %1185 = vrot.lane.b32.xlu0 %v746_v38, %s12036_s26 }
  0x4e   : > { %1562 = vrot.lane.b32.xlu1 %v915_v44, %s11996_s16 }
  0x51   : > { %1564 = vrot.lane.b32.xlu0 %v917_v47, %s11996_s16 }
  0x52   : > { %1284 = vrot.lane.b32.xlu1 %v915_v44, %s12000_s25 }
  0x55   : > { %1380 = vrot.lane.b32.xlu0 %v8153_v49, %s11998_s27 }
  0x56   : > { %1286 = vrot.lane.b32.xlu1 %v917_v47, %s12000_s25 }
  0x59   : > { %1473 = vrot.lane.b32.xlu0 %v749_v53, %s12002_s17 }
  0x5a   : > { %1382 = vrot.lane.b32.xlu1 %v8150_v48, %s11998_s27 }
  0x5d   : > { %1566 = vrot.lane.b32.xlu0 %v920_v57, %s11996_s16 }
  0x5e   : > { %1475 = vrot.lane.b32.xlu1 %v751_v59, %s12002_s17 }
  0x61   : > { %1568 = vrot.lane.b32.xlu0 %v922_v60, %s11996_s16 }
  0x62   : > { %818 = vrot.lane.b32.xlu1 %v744_v37, %s12037_s24 }
  0x65   : > { %989 = vrot.lane.b32.xlu0 %v915_v44, %s12034_s0 }
  0x66   : > { %820 = vrot.lane.b32.xlu1 %v746_v38, %s12037_s24  ;;  %v8250_v38 = vsel %vm734_vm1, %v758_v27, %v760_v34 }
  0x69   : > { %1085 = vrot.lane.b32.xlu0 %v8153_v49, %s12035_s20 }
  0x6a   : > { %991 = vrot.lane.b32.xlu1 %v917_v47, %s12034_s0  ;;  %v521_v47 = vld [vmem:[%s8067_s23 + $0x50] sm:$0xff] }
  0x6b   : > { %v591_v52 = vrot.slane %v521_v47, 7 }
  0x6d   : > { %1187 = vrot.lane.b32.xlu0 %v749_v53, %s12036_s26 }
  0x6e   : > { %1087 = vrot.lane.b32.xlu1 %v8150_v48, %s12035_s20 }
  0x71   : > { %1288 = vrot.lane.b32.xlu0 %v920_v57, %s12000_s25 }
  0x72   : > { %1189 = vrot.lane.b32.xlu1 %v751_v59, %s12036_s26 }
  0x75   : > { %1384 = vrot.lane.b32.xlu0 %v8190_v5, %s11998_s27 }
  0x76   : > { %1290 = vrot.lane.b32.xlu1 %v922_v60, %s12000_s25 }
  0x79   : > { %1477 = vrot.lane.b32.xlu0 %v754_v11, %s12002_s17 }
  0x7a   : > { %1386 = vrot.lane.b32.xlu1 %v8187_v4, %s11998_s27 }
  0x7d   : > { %1570 = vrot.lane.b32.xlu0 %v925_v15, %s11996_s16 }
  0x7e   : > { %1479 = vrot.lane.b32.xlu1 %v756_v17, %s12002_s17 }
  0x81   : > { %1572 = vrot.lane.b32.xlu0 %v927_v18, %s11996_s16 }
  0x82   : > { %822 = vrot.lane.b32.xlu1 %v749_v53, %s12037_s24  ;;  %v592_v53 = vrot.slane %v522_v50, 7 }
  0x84   : > { %v8284_v56 = vsel %vm575_vm0, %v591_v52, %v592_v53  ;;  %v692_v63 = vsel %vm575_vm0, %v592_v53, 0.0 }
  0x85   : > { %993 = vrot.lane.b32.xlu0 %v920_v57, %s12034_s0  ;;  %v8287_v57 = vsel %vm575_vm0, 0.0, %v591_v52  ;;  %v934_v9 = vrot.slane %v8284_v56, 2 }
  0x86   : > { %824 = vrot.lane.b32.xlu1 %v751_v59, %s12037_s24  ;;  %v762_v59 = vrot.slane %v8287_v57, 1  ;;  %v933_v6 = vrot.slane %v8287_v57, 2 }
  0x88   : > { %v8313_v14 = vsel %vm905_vm2, %v933_v6, %v934_v9 }
  0x89   : > { %1089 = vrot.lane.b32.xlu0 %v8190_v5, %s12035_s20 }
  0x8a   : > { %995 = vrot.lane.b32.xlu1 %v922_v60, %s12034_s0  ;;  %v763_v60 = vrot.slane %v8284_v56, 1 }
  0x8c   : > { %v8301_v3 = vsel %vm734_vm1, %v762_v59, %v763_v60 }
  0x8d   : > { %1191 = vrot.lane.b32.xlu0 %v754_v11, %s12036_s26 }
  0x8e   : > { %1091 = vrot.lane.b32.xlu1 %v8187_v4, %s12035_s20 }
  0x8f   : > { %v813_v29 = vpop.permute.xlu0 %812 }
  0x90   : > { %v1656_v12 = vsel %vm1655_vm4, 0.0, %v813_v29 }
  0x91   : > { %1292 = vrot.lane.b32.xlu0 %v925_v15, %s12000_s25 }
  0x92   : > { %1193 = vrot.lane.b32.xlu1 %v756_v17, %s12036_s26 }
  0x93   : > { %v984_v37 = vpop.permute.xlu0 %983 }
  0x94   : > { %v1688_v16 = vsel %vm1687_vm5, %v1656_v12, %v984_v37 }
  0x95   : > { %1388 = vrot.lane.b32.xlu0 %v8227_v24, %s11998_s27 }
  0x96   : > { %1294 = vrot.lane.b32.xlu1 %v927_v18, %s12000_s25 }
  0x99   : > { %1481 = vrot.lane.b32.xlu0 %v8238_v30, %s12002_s17 }
  0x9a   : > { %1390 = vrot.lane.b32.xlu1 %v8224_v23, %s11998_s27 }
  0x9c   : > { %v1078_v39 = vpop.permute.xlu1 %1077 }
  0x9d   : > { %1574 = vrot.lane.b32.xlu0 %v8247_v35, %s11996_s16  ;;  %v1720_v19 = vsel %vm1719_vm6, %v1688_v16, %v1078_v39 }
  0x9e   : > { %1483 = vrot.lane.b32.xlu1 %v8250_v38, %s12002_s17 }
  0x9f   : > { %v1180_v41 = vpop.permute.xlu0 %1179 }
  0xa0   : > { %v1080_v42 = vpop.permute.xlu1 %1079  ;;  %v1753_v21 = vsel %vm1752_vm7, %v1720_v19, %v1180_v41 }
  0xa1   : > { %1576 = vrot.lane.b32.xlu0 %v8257_v40, %s11996_s16  ;;  %v1721_v27 = vsel %vm1719_vm6, %v1688_v16, %v1080_v42 }
  0xa2   : > { %826 = vrot.lane.b32.xlu1 %v754_v11, %s12037_s24  ;;  %v765_v11 = vrot.slane %v692_v63, 1 }
  0xa3   : > { %v8262_v43 = vpop.permute.xlu0 %1181 }
  0xa4   : > { %v8264_v44 = vpop.permute.xlu1 %814  ;;  %v1754_v32 = vsel %vm1752_vm7, %v1721_v27, %v8262_v43 }
  0xa5   : > { %997 = vrot.lane.b32.xlu0 %v925_v15, %s12034_s0  ;;  %v936_v15 = vrot.slane %v692_v63, 2  ;;  %v1657_v52 = vsel %vm1655_vm4, %v8074_v7, %v8264_v44 }
  0xa6   : > { %828 = vrot.lane.b32.xlu1 %v756_v17, %s12037_s24 }
  0xa7   : > { %v8268_v45 = vpop.permute.xlu0 %816  ;;  %v8327_v25 = vsel %vm905_vm2, %v934_v9, %v936_v15 }
  0xa8   : > { %v1281_v46 = vpop.permute.xlu1 %1280  ;;  %v1658_v7 = vsel %vm1655_vm4, %v8077_v8, %v8268_v45 }
  0xa9   : > { %1093 = vrot.lane.b32.xlu0 %v8227_v24, %s12035_s20  ;;  %v1786_v22 = vsel %vm1785_vm8, %v1753_v21, %v1281_v46 }
  0xaa   : > { %999 = vrot.lane.b32.xlu1 %v927_v18, %s12034_s0  ;;  %v8317_v18 = vsel %vm734_vm1, %v763_v60, %v765_v11 }
  0xab   : > { %v1283_v51 = vpop.permute.xlu0 %1282 }
  0xac   : > { %v8275_v54 = vpop.permute.xlu1 %985  ;;  %v1787_v36 = vsel %vm1785_vm8, %v1754_v32, %v1283_v51  ;;  %v523_v51 = vld [vmem:[%s8067_s23 + $0x60] sm:$0xff] }
  0xad   : > { %1195 = vrot.lane.b32.xlu0 %v8238_v30, %s12036_s26  ;;  %v1689_v53 = vsel %vm1687_vm5, %v1657_v52, %v8275_v54  ;;  %v525_v52 = vld [vmem:[%s8067_s23 + $0x70] sm:$0xff] }
  0xae   : > { %1095 = vrot.lane.b32.xlu1 %v8224_v23, %s12035_s20 }
  0xaf   : > { %v8281_v55 = vpop.permute.xlu0 %987 }
  0xb0   : > { %v1377_v58 = vpop.permute.xlu1 %1376 }
  0xb1   : > { %1296 = vrot.lane.b32.xlu0 %v8247_v35, %s12000_s25  ;;  %v1819_v28 = vsel %vm1818_vm9, %v1786_v22, %v1377_v58  ;;  %v594_v58 = vrot.slane %v523_v51, 7 }
  0xb2   : > { %1197 = vrot.lane.b32.xlu1 %v8250_v38, %s12036_s26 }
  0xb3   : > { %v1379_v61 = vpop.permute.xlu0 %1378  ;;  %v8380_v45 = vsel %vm575_vm0, 0.0, %v594_v58 }
  0xb4   : > { %v1082_v62 = vpop.permute.xlu1 %1081  ;;  %v1820_v39 = vsel %vm1818_vm9, %v1787_v36, %v1379_v61  ;;  %v938_v27 = vrot.slane %v8380_v45, 2 }
  0xb5   : > { %1392 = vrot.lane.b32.xlu0 %v8287_v57, %s11998_s27 }
  0xb6   : > { %1298 = vrot.lane.b32.xlu1 %v8257_v40, %s12000_s25 }
  0xb7   : > { %v8305_v10 = vpop.permute.xlu0 %1083 }
  0xb8   : > { %v1470_v13 = vpop.permute.xlu1 %1469 }
  0xb9   : > { %1485 = vrot.lane.b32.xlu0 %v8301_v3, %s12002_s17  ;;  %v1852_v33 = vsel %vm1851_vm10, %v1819_v28, %v1470_v13  ;;  %v767_v13 = vrot.slane %v8380_v45, 1 }
  0xba   : > { %1394 = vrot.lane.b32.xlu1 %v8284_v56, %s11998_s27 }
  0xbb   : > { %v1472_v17 = vpop.permute.xlu0 %1471 }
  0xbc   : > { %v1184_v20 = vpop.permute.xlu1 %1183  ;;  %v1853_v41 = vsel %vm1851_vm10, %v1820_v39, %v1472_v17 }
  0xbd   : > { %1578 = vrot.lane.b32.xlu0 %v8313_v14, %s11996_s16 }
  0xbe   : > { %1487 = vrot.lane.b32.xlu1 %v8317_v18, %s12002_s17 }
  0xbf   : > { %v1186_v29 = vpop.permute.xlu0 %1185 }
  0xc0   : > { %v1563_v34 = vpop.permute.xlu1 %1562 }
  0xc1   : > { %1580 = vrot.lane.b32.xlu0 %v8327_v25, %s11996_s16  ;;  %v1885_v37 = vsel %vm1884_vm11, %v1852_v33, %v1563_v34 }
  0xc2   : > { %830 = vrot.lane.b32.xlu1 %v8238_v30, %s12037_s24  ;;  %6633 = vmatprep.mubr.msk.f32.mxu0 %vm1929_vm12, %v1885_v37  ;;  %v524_v30 = vld [vmem:[%s8067_s23 + $0x68] sm:$0xff] }
  0xc3   : > { %v1565_v42 = vpop.permute.xlu0 %1564  ;;  %v595_v59 = vrot.slane %v524_v30, 7 }
  0xc4   : > { %v1886_v43 = vsel %vm1884_vm11, %v1853_v41, %v1565_v42  ;;  %v1285_v46 = vpop.permute.xlu1 %1284 }
  0xc5   : > { %1001 = vrot.lane.b32.xlu0 %v8247_v35, %s12034_s0  ;;  %6634 = vmatmul.mubr.msk.f32.vlgmr.msra.gmra.mrb[0].mxu0 %vm1929_vm12, %v1886_v43  ;;  %v1722_v35 = vsel %vm1719_vm6, %v1689_v53, %v1082_v62  ;;  %v8377_v8 = vsel %vm575_vm0, %v594_v58, %v595_v59  ;;  %v693_v21 = vsel %vm575_vm0, %v595_v59, 0.0  ;;  %v526_v53 = vld [vmem:[%s8067_s23 + $0x78] sm:$0xff]  ;;  %v597_v58 = vrot.slane %v525_v52, 7 }
  0xc6   : > { %832 = vrot.lane.b32.xlu1 %v8250_v38, %s12037_s24  ;;  %v1755_v60 = vsel %vm1752_vm7, %v1722_v35, %v1184_v20  ;;  %v768_v15 = vrot.slane %v8377_v8, 1  ;;  %v939_v28 = vrot.slane %v8377_v8, 2  ;;  %v770_v32 = vrot.slane %v693_v21, 1 }
  0xc7   : > { %v1381_v47 = vpop.permute.xlu0 %1380  ;;  %v1788_v44 = vsel %vm1785_vm8, %v1755_v60, %v1285_v46  ;;  %v941_v36 = vrot.slane %v693_v21, 2 }
  0xc8   : > { %v1287_v50 = vpop.permute.xlu1 %1286  ;;  %v1821_v54 = vsel %vm1818_vm9, %v1788_v44, %v1381_v47  ;;  %v8402_v22 = vsel %vm734_vm1, %v767_v13, %v768_v15  ;;  %v8411_v34 = vsel %vm905_vm2, %v938_v27, %v939_v28  ;;  %v8414_v39 = vsel %vm734_vm1, %v768_v15, %v770_v32 }
  0xc9   : > { %1097 = vrot.lane.b32.xlu0 %v8287_v57, %s12035_s20  ;;  %v8421_v42 = vsel %vm905_vm2, %v939_v28, %v941_v36 }
  0xca   : > { %1003 = vrot.lane.b32.xlu1 %v8257_v40, %s12034_s0  ;;  %v1690_v40 = vsel %vm1687_vm5, %v1658_v7, %v8281_v55 }
  0xcb   : > { %v1474_v38 = vpop.permute.xlu0 %1473  ;;  %v1723_v62 = vsel %vm1719_vm6, %v1690_v40, %v8305_v10 }
  0xcc   : > { %v1383_v61 = vpop.permute.xlu1 %1382  ;;  %v1854_v63 = vsel %vm1851_vm10, %v1821_v54, %v1474_v38  ;;  %v1756_v9 = vsel %vm1752_vm7, %v1723_v62, %v1186_v29 }
  0xcd   : > { %1199 = vrot.lane.b32.xlu0 %v8301_v3, %s12036_s26  ;;  %v1789_v12 = vsel %vm1785_vm8, %v1756_v9, %v1287_v50 }
  0xce   : > { %1099 = vrot.lane.b32.xlu1 %v8284_v56, %s12035_s20  ;;  %v1822_v10 = vsel %vm1818_vm9, %v1789_v12, %v1383_v61 }
  0xcf   : > { %v1567_v6 = vpop.permute.xlu0 %1566 }
  0xd0   : > { %v1887_v55 = vsel %vm1884_vm11, %v1854_v63, %v1567_v6  ;;  %v1476_v11 = vpop.permute.xlu1 %1475 }
  0xd1   : > { %1300 = vrot.lane.b32.xlu0 %v8313_v14, %s12000_s25  ;;  %6636 = vmatprep.mubr.msk.f32.mxu0 %vm1929_vm12, %v1887_v55  ;;  %v1855_v16 = vsel %vm1851_vm10, %v1822_v10, %v1476_v11 }
  0xd2   : > { %1201 = vrot.lane.b32.xlu1 %v8317_v18, %s12036_s26 }
  0xd3   : > { %v1569_v17 = vpop.permute.xlu0 %1568 }
  0xd4   : > { %v1888_v19 = vsel %vm1884_vm11, %v1855_v16, %v1569_v17  ;;  %v819_v20 = vpop.permute.xlu1 %818 }
  0xd5   : > { %1396 = vrot.lane.b32.xlu0 %v8380_v45, %s11998_s27  ;;  %6637 = vmatmul.mubr.msk.f32.gmra.mrb[2].mxu0 %vm1929_vm12, %v1888_v19  ;;  %v1659_v35 = vsel %vm1655_vm4, %v8108_v26, %v819_v20 }
  0xd6   : > { %1302 = vrot.lane.b32.xlu1 %v8327_v25, %s12000_s25 }
  0xd7   : > { %v990_v29 = vpop.permute.xlu0 %989 }
  0xd8   : > { %v821_v33 = vpop.permute.xlu1 %820 }
  0xd9   : > { %1489 = vrot.lane.b32.xlu0 %v8402_v22, %s12002_s17  ;;  %v1660_v61 = vsel %vm1655_vm4, %v8120_v31, %v821_v33  ;;  %v8457_v31 = vsel %vm575_vm0, 0.0, %v597_v58 }
  0xda   : > { %1398 = vrot.lane.b32.xlu1 %v8377_v8, %s11998_s27  ;;  %v772_v12 = vrot.slane %v8457_v31, 1  ;;  %v943_v21 = vrot.slane %v8457_v31, 2 }
  0xdb   : > { %v1086_v37 = vpop.permute.xlu0 %1085 }
  0xdc   : > { %v992_v41 = vpop.permute.xlu1 %991 }
  0xdd   : > { %1582 = vrot.lane.b32.xlu0 %v8411_v34, %s11996_s16  ;;  %v1692_v7 = vsel %vm1687_vm5, %v1660_v61, %v992_v41 }
  0xde   : > { %1491 = vrot.lane.b32.xlu1 %v8414_v39, %s12002_s17 }
  0xdf   : > { %v1188_v43 = vpop.permute.xlu0 %1187 }
  0xe0   : > { %v1088_v46 = vpop.permute.xlu1 %1087 }
  0xe1   : > { %1584 = vrot.lane.b32.xlu0 %v8421_v42, %s11996_s16  ;;  %v1725_v44 = vsel %vm1719_vm6, %v1692_v7, %v1088_v46 }
  0xe2   : > { %834 = vrot.lane.b32.xlu1 %v8301_v3, %s12037_s24  ;;  %v1691_v3 = vsel %vm1687_vm5, %v1659_v35, %v990_v29  ;;  %v527_v35 = vld [vmem:[%s8067_s23 + $0x80] sm:$0xff] }
  0xe3   : > { %v1289_v47 = vpop.permute.xlu0 %1288 }
  0xe4   : > { %v1190_v50 = vpop.permute.xlu1 %1189 }
  0xe5   : > { %1005 = vrot.lane.b32.xlu0 %v8313_v14, %s12034_s0  ;;  %v1724_v14 = vsel %vm1719_vm6, %v1691_v3, %v1086_v37  ;;  %v1758_v63 = vsel %vm1752_vm7, %v1725_v44, %v1190_v50  ;;  %v528_v3 = vld [vmem:[%s8067_s23 + $0x88] sm:$0xff] }
  0xe6   : > { %836 = vrot.lane.b32.xlu1 %v8317_v18, %s12037_s24  ;;  %v598_v18 = vrot.slane %v526_v53, 7  ;;  %v1757_v59 = vsel %vm1752_vm7, %v1724_v14, %v1188_v43 }
  0xe7   : > { %v1385_v51 = vpop.permute.xlu0 %1384  ;;  %v1790_v26 = vsel %vm1785_vm8, %v1757_v59, %v1289_v47 }
  0xe8   : > { %v1291_v30 = vpop.permute.xlu1 %1290  ;;  %v8454_v62 = vsel %vm575_vm0, %v597_v58, %v598_v18  ;;  %v694_v19 = vsel %vm575_vm0, %v598_v18, 0.0  ;;  %v600_v58 = vrot.slane %v527_v35, 7 }
  0xe9   : > { %1101 = vrot.lane.b32.xlu0 %v8380_v45, %s12035_s20  ;;  %v1791_v55 = vsel %vm1785_vm8, %v1758_v63, %v1291_v30  ;;  %v773_v10 = vrot.slane %v8454_v62, 1  ;;  %v944_v27 = vrot.slane %v8454_v62, 2  ;;  %v775_v29 = vrot.slane %v694_v19, 1 }
  0xea   : > { %1007 = vrot.lane.b32.xlu1 %v8327_v25, %s12034_s0  ;;  %v1823_v25 = vsel %vm1818_vm9, %v1790_v26, %v1385_v51  ;;  %v946_v36 = vrot.slane %v694_v19, 2 }
  0xeb   : > { %v1478_v38 = vpop.permute.xlu0 %1477  ;;  %v8479_v20 = vsel %vm734_vm1, %v772_v12, %v773_v10  ;;  %v8488_v33 = vsel %vm905_vm2, %v943_v21, %v944_v27  ;;  %v8491_v41 = vsel %vm734_vm1, %v773_v10, %v775_v29 }
  0xec   : > { %v1387_v60 = vpop.permute.xlu1 %1386  ;;  %v1856_v40 = vsel %vm1851_vm10, %v1823_v25, %v1478_v38  ;;  %v8498_v46 = vsel %vm905_vm2, %v944_v27, %v946_v36 }
  0xed   : > { %1203 = vrot.lane.b32.xlu0 %v8402_v22, %s12036_s26  ;;  %v1824_v11 = vsel %vm1818_vm9, %v1791_v55, %v1387_v60 }
  0xee   : > { %1103 = vrot.lane.b32.xlu1 %v8377_v8, %s12035_s20 }
  0xef   : > { %v1571_v54 = vpop.permute.xlu0 %1570 }
  0xf0   : > { %v1889_v6 = vsel %vm1884_vm11, %v1856_v40, %v1571_v54  ;;  %v1480_v9 = vpop.permute.xlu1 %1479 }
  0xf1   : > { %1304 = vrot.lane.b32.xlu0 %v8411_v34, %s12000_s25  ;;  %6639 = vmatprep.mubr.msk.f32.mxu0 %vm1929_vm12, %v1889_v6  ;;  %v1857_v13 = vsel %vm1851_vm10, %v1824_v11, %v1480_v9 }
  0xf2   : > { %1205 = vrot.lane.b32.xlu1 %v8414_v39, %s12036_s26 }
  0xf3   : > { %v1573_v15 = vpop.permute.xlu0 %1572 }
  0xf4   : > { %v1890_v16 = vsel %vm1884_vm11, %v1857_v13, %v1573_v15  ;;  %v823_v17 = vpop.permute.xlu1 %822 }
  0xf5   : > { %1400 = vrot.lane.b32.xlu0 %v8457_v31, %s11998_s27  ;;  %6640 = vmatmul.mubr.msk.f32.gmra.mrb[4].mxu0 %vm1929_vm12, %v1890_v16  ;;  %v1661_v14 = vsel %vm1655_vm4, %v8153_v49, %v823_v17 }
  0xf6   : > { %1306 = vrot.lane.b32.xlu1 %v8421_v42, %s12000_s25 }
  0xf7   : > { %v994_v28 = vpop.permute.xlu0 %993 }
  0xf8   : > { %v825_v32 = vpop.permute.xlu1 %824 }
  0xf9   : > { %1493 = vrot.lane.b32.xlu0 %v8479_v20, %s12002_s17  ;;  %v1662_v60 = vsel %vm1655_vm4, %v8150_v48, %v825_v32  ;;  %v8534_v48 = vsel %vm575_vm0, 0.0, %v600_v58 }
  0xfa   : > { %1402 = vrot.lane.b32.xlu1 %v8454_v62, %s11998_s27  ;;  %v777_v55 = vrot.slane %v8534_v48, 1  ;;  %v948_v19 = vrot.slane %v8534_v48, 2 }
  0xfb   : > { %v1090_v37 = vpop.permute.xlu0 %1089 }
  0xfc   : > { %v996_v43 = vpop.permute.xlu1 %995 }
  0xfd   : > { %1586 = vrot.lane.b32.xlu0 %v8488_v33, %s11996_s16  ;;  %v1694_v61 = vsel %vm1687_vm5, %v1662_v60, %v996_v43 }
  0xfe   : > { %1495 = vrot.lane.b32.xlu1 %v8491_v41, %s12002_s17 }
  0xff   : > { %v1192_v47 = vpop.permute.xlu0 %1191 }
 0x100   : > { %v1092_v50 = vpop.permute.xlu1 %1091 }
 0x101   : > { %1588 = vrot.lane.b32.xlu0 %v8498_v46, %s11996_s16  ;;  %v1727_v26 = vsel %vm1719_vm6, %v1694_v61, %v1092_v50 }
 0x102   : > { %838 = vrot.lane.b32.xlu1 %v8402_v22, %s12037_s24  ;;  %v1693_v22 = vsel %vm1687_vm5, %v1661_v14, %v994_v28  ;;  %v529_v14 = vld [vmem:[%s8067_s23 + $0x90] sm:$0xff] }
 0x103   : > { %v1293_v51 = vpop.permute.xlu0 %1292 }
 0x104   : > { %v1194_v30 = vpop.permute.xlu1 %1193 }
 0x105   : > { %1009 = vrot.lane.b32.xlu0 %v8411_v34, %s12034_s0  ;;  %v1726_v34 = vsel %vm1719_vm6, %v1693_v22, %v1090_v37  ;;  %v1760_v40 = vsel %vm1752_vm7, %v1727_v26, %v1194_v30  ;;  %v530_v22 = vld [vmem:[%s8067_s23 + $0x98] sm:$0xff] }
 0x106   : > { %840 = vrot.lane.b32.xlu1 %v8414_v39, %s12037_s24  ;;  %v601_v39 = vrot.slane %v528_v3, 7  ;;  %v1759_v18 = vsel %vm1752_vm7, %v1726_v34, %v1192_v47 }
 0x107   : > { %v1389_v52 = vpop.permute.xlu0 %1388  ;;  %v1792_v49 = vsel %vm1785_vm8, %v1759_v18, %v1293_v51 }
 0x108   : > { %v1295_v53 = vpop.permute.xlu1 %1294  ;;  %v8531_v44 = vsel %vm575_vm0, %v600_v58, %v601_v39  ;;  %v695_v16 = vsel %vm575_vm0, %v601_v39, 0.0  ;;  %v603_v58 = vrot.slane %v529_v14, 7 }
 0x109   : > { %1105 = vrot.lane.b32.xlu0 %v8457_v31, %s12035_s20  ;;  %v1793_v6 = vsel %vm1785_vm8, %v1760_v40, %v1295_v53  ;;  %v778_v11 = vrot.slane %v8531_v44, 1  ;;  %v949_v21 = vrot.slane %v8531_v44, 2  ;;  %v780_v28 = vrot.slane %v695_v16, 1 }
 0x10a   : > { %1011 = vrot.lane.b32.xlu1 %v8421_v42, %s12034_s0  ;;  %v1825_v42 = vsel %vm1818_vm9, %v1792_v49, %v1389_v52  ;;  %v951_v36 = vrot.slane %v695_v16, 2 }
 0x10b   : > { %v1482_v38 = vpop.permute.xlu0 %1481  ;;  %v8556_v17 = vsel %vm734_vm1, %v777_v55, %v778_v11  ;;  %v8565_v32 = vsel %vm905_vm2, %v948_v19, %v949_v21  ;;  %v8568_v43 = vsel %vm734_vm1, %v778_v11, %v780_v28 }
 0x10c   : > { %v1391_v59 = vpop.permute.xlu1 %1390  ;;  %v1858_v7 = vsel %vm1851_vm10, %v1825_v42, %v1482_v38  ;;  %v8575_v50 = vsel %vm905_vm2, %v949_v21, %v951_v36 }
 0x10d   : > { %1207 = vrot.lane.b32.xlu0 %v8479_v20, %s12036_s26  ;;  %v1826_v9 = vsel %vm1818_vm9, %v1793_v6, %v1391_v59 }
 0x10e   : > { %1107 = vrot.lane.b32.xlu1 %v8454_v62, %s12035_s20 }
 0x10f   : > { %v1575_v25 = vpop.permute.xlu0 %1574 }
 0x110   : > { %v1891_v54 = vsel %vm1884_vm11, %v1858_v7, %v1575_v25  ;;  %v1484_v63 = vpop.permute.xlu1 %1483 }
 0x111   : > { %1308 = vrot.lane.b32.xlu0 %v8488_v33, %s12000_s25  ;;  %6642 = vmatprep.mubr.msk.f32.mxu0 %vm1929_vm12, %v1891_v54  ;;  %v1859_v12 = vsel %vm1851_vm10, %v1826_v9, %v1484_v63 }
 0x112   : > { %1209 = vrot.lane.b32.xlu1 %v8491_v41, %s12036_s26 }
 0x113   : > { %v1577_v10 = vpop.permute.xlu0 %1576 }
 0x114   : > { %v1892_v13 = vsel %vm1884_vm11, %v1859_v12, %v1577_v10  ;;  %v827_v15 = vpop.permute.xlu1 %826 }
 0x115   : > { %1404 = vrot.lane.b32.xlu0 %v8534_v48, %s11998_s27  ;;  %6643 = vmatmul.mubr.msk.f32.gmra.mrb[6].mxu0 %vm1929_vm12, %v1892_v13  ;;  %v1663_v34 = vsel %vm1655_vm4, %v8190_v5, %v827_v15 }
 0x116   : > { %1310 = vrot.lane.b32.xlu1 %v8498_v46, %s12000_s25 }
 0x117   : > { %v998_v27 = vpop.permute.xlu0 %997 }
 0x118   : > { %v829_v29 = vpop.permute.xlu1 %828 }
 0x119   : > { %1497 = vrot.lane.b32.xlu0 %v8556_v17, %s12002_s17  ;;  %v1664_v59 = vsel %vm1655_vm4, %v8187_v4, %v829_v29  ;;  %v8611_v4 = vsel %vm575_vm0, 0.0, %v603_v58 }
 0x11a   : > { %1406 = vrot.lane.b32.xlu1 %v8531_v44, %s11998_s27  ;;  %v782_v6 = vrot.slane %v8611_v4, 1  ;;  %v953_v16 = vrot.slane %v8611_v4, 2 }
 0x11b   : > { %v1094_v37 = vpop.permute.xlu0 %1093 }
 0x11c   : > { %v1000_v47 = vpop.permute.xlu1 %999 }
 0x11d   : > { %1590 = vrot.lane.b32.xlu0 %v8565_v32, %s11996_s16  ;;  %v1696_v60 = vsel %vm1687_vm5, %v1664_v59, %v1000_v47 }
 0x11e   : > { %1499 = vrot.lane.b32.xlu1 %v8568_v43, %s12002_s17 }
 0x11f   : > { %v1196_v51 = vpop.permute.xlu0 %1195 }
 0x120   : > { %v1096_v30 = vpop.permute.xlu1 %1095 }
 0x121   : > { %1592 = vrot.lane.b32.xlu0 %v8575_v50, %s11996_s16  ;;  %v1729_v49 = vsel %vm1719_vm6, %v1696_v60, %v1096_v30 }
 0x122   : > { %842 = vrot.lane.b32.xlu1 %v8479_v20, %s12037_s24  ;;  %v1695_v20 = vsel %vm1687_vm5, %v1663_v34, %v998_v27  ;;  %v531_v34 = vld [vmem:[%s8067_s23 + $0xa0] sm:$0xff] }
 0x123   : > { %v1297_v52 = vpop.permute.xlu0 %1296 }
 0x124   : > { %v1198_v53 = vpop.permute.xlu1 %1197 }
 0x125   : > { %1013 = vrot.lane.b32.xlu0 %v8488_v33, %s12034_s0  ;;  %v1728_v33 = vsel %vm1719_vm6, %v1695_v20, %v1094_v37  ;;  %v1762_v7 = vsel %vm1752_vm7, %v1729_v49, %v1198_v53  ;;  %v532_v20 = vld [vmem:[%s8067_s23 + $0xa8] sm:$0xff] }
 0x126   : > { %844 = vrot.lane.b32.xlu1 %v8491_v41, %s12037_s24  ;;  %v604_v41 = vrot.slane %v530_v22, 7  ;;  %v1761_v39 = vsel %vm1752_vm7, %v1728_v33, %v1196_v51 }
 0x127   : > { %v1393_v35 = vpop.permute.xlu0 %1392  ;;  %v1794_v5 = vsel %vm1785_vm8, %v1761_v39, %v1297_v52 }
 0x128   : > { %v1299_v3 = vpop.permute.xlu1 %1298  ;;  %v8608_v26 = vsel %vm575_vm0, %v603_v58, %v604_v41  ;;  %v696_v13 = vsel %vm575_vm0, %v604_v41, 0.0  ;;  %v606_v58 = vrot.slane %v531_v34, 7 }
 0x129   : > { %1109 = vrot.lane.b32.xlu0 %v8534_v48, %s12035_s20  ;;  %v1795_v54 = vsel %vm1785_vm8, %v1762_v7, %v1299_v3  ;;  %v783_v9 = vrot.slane %v8608_v26, 1  ;;  %v954_v19 = vrot.slane %v8608_v26, 2  ;;  %v785_v27 = vrot.slane %v696_v13, 1 }
 0x12a   : > { %1015 = vrot.lane.b32.xlu1 %v8498_v46, %s12034_s0  ;;  %v1827_v46 = vsel %vm1818_vm9, %v1794_v5, %v1393_v35  ;;  %v956_v36 = vrot.slane %v696_v13, 2 }
 0x12b   : > { %v1486_v38 = vpop.permute.xlu0 %1485  ;;  %v8633_v15 = vsel %vm734_vm1, %v782_v6, %v783_v9  ;;  %v8642_v29 = vsel %vm905_vm2, %v953_v16, %v954_v19  ;;  %v8645_v47 = vsel %vm734_vm1, %v783_v9, %v785_v27 }
 0x12c   : > { %v1395_v18 = vpop.permute.xlu1 %1394  ;;  %v1860_v61 = vsel %vm1851_vm10, %v1827_v46, %v1486_v38  ;;  %v8652_v30 = vsel %vm905_vm2, %v954_v19, %v956_v36 }
 0x12d   : > { %1211 = vrot.lane.b32.xlu0 %v8556_v17, %s12036_s26  ;;  %v1828_v63 = vsel %vm1818_vm9, %v1795_v54, %v1395_v18 }
 0x12e   : > { %1111 = vrot.lane.b32.xlu1 %v8531_v44, %s12035_s20 }
 0x12f   : > { %v1579_v42 = vpop.permute.xlu0 %1578 }
 0x130   : > { %v1893_v25 = vsel %vm1884_vm11, %v1860_v61, %v1579_v42  ;;  %v1488_v40 = vpop.permute.xlu1 %1487 }
 0x131   : > { %1312 = vrot.lane.b32.xlu0 %v8565_v32, %s12000_s25  ;;  %6645 = vmatprep.mubr.msk.f32.mxu0 %vm1929_vm12, %v1893_v25  ;;  %v1861_v55 = vsel %vm1851_vm10, %v1828_v63, %v1488_v40 }
 0x132   : > { %1213 = vrot.lane.b32.xlu1 %v8568_v43, %s12036_s26 }
 0x133   : > { %v1581_v11 = vpop.permute.xlu0 %1580 }
 0x134   : > { %v1894_v12 = vsel %vm1884_vm11, %v1861_v55, %v1581_v11  ;;  %v831_v10 = vpop.permute.xlu1 %830 }
 0x135   : > { %1408 = vrot.lane.b32.xlu0 %v8611_v4, %s11998_s27  ;;  %6646 = vmatmul.mubr.msk.f32.gmra.mrb[8].mxu0 %vm1929_vm12, %v1894_v12  ;;  %v1665_v33 = vsel %vm1655_vm4, %v8227_v24, %v831_v10 }
 0x136   : > { %1314 = vrot.lane.b32.xlu1 %v8575_v50, %s12000_s25 }
 0x137   : > { %v1002_v21 = vpop.permute.xlu0 %1001 }
 0x138   : > { %v833_v28 = vpop.permute.xlu1 %832 }
 0x139   : > { %1501 = vrot.lane.b32.xlu0 %v8633_v15, %s12002_s17  ;;  %v1666_v18 = vsel %vm1655_vm4, %v8224_v23, %v833_v28  ;;  %v8688_v23 = vsel %vm575_vm0, 0.0, %v606_v58 }
 0x13a   : > { %1410 = vrot.lane.b32.xlu1 %v8608_v26, %s11998_s27  ;;  %v787_v54 = vrot.slane %v8688_v23, 1  ;;  %v958_v13 = vrot.slane %v8688_v23, 2 }
 0x13b   : > { %v1098_v37 = vpop.permute.xlu0 %1097 }
 0x13c   : > { %v1004_v51 = vpop.permute.xlu1 %1003 }
 0x13d   : > { %1594 = vrot.lane.b32.xlu0 %v8642_v29, %s11996_s16  ;;  %v1698_v59 = vsel %vm1687_vm5, %v1666_v18, %v1004_v51 }
 0x13e   : > { %1503 = vrot.lane.b32.xlu1 %v8645_v47, %s12002_s17 }
 0x13f   : > { %v1200_v52 = vpop.permute.xlu0 %1199 }
 0x140   : > { %v1100_v53 = vpop.permute.xlu1 %1099 }
 0x141   : > { %1596 = vrot.lane.b32.xlu0 %v8652_v30, %s11996_s16  ;;  %v1731_v5 = vsel %vm1719_vm6, %v1698_v59, %v1100_v53 }
 0x142   : > { %846 = vrot.lane.b32.xlu1 %v8556_v17, %s12037_s24  ;;  %v1697_v17 = vsel %vm1687_vm5, %v1665_v33, %v1002_v21  ;;  %v533_v33 = vld [vmem:[%s8067_s23 + $0xb0] sm:$0xff] }
 0x143   : > { %v1301_v35 = vpop.permute.xlu0 %1300 }
 0x144   : > { %v1202_v3 = vpop.permute.xlu1 %1201 }
 0x145   : > { %1017 = vrot.lane.b32.xlu0 %v8565_v32, %s12034_s0  ;;  %v1730_v32 = vsel %vm1719_vm6, %v1697_v17, %v1098_v37  ;;  %v1764_v61 = vsel %vm1752_vm7, %v1731_v5, %v1202_v3  ;;  %v534_v17 = vld [vmem:[%s8067_s23 + $0xb8] sm:$0xff] }
 0x146   : > { %848 = vrot.lane.b32.xlu1 %v8568_v43, %s12037_s24  ;;  %v607_v43 = vrot.slane %v532_v20, 7  ;;  %v1763_v41 = vsel %vm1752_vm7, %v1730_v32, %v1200_v52 }
 0x147   : > { %v1397_v14 = vpop.permute.xlu0 %1396  ;;  %v1796_v24 = vsel %vm1785_vm8, %v1763_v41, %v1301_v35 }
 0x148   : > { %v1303_v22 = vpop.permute.xlu1 %1302  ;;  %v8685_v49 = vsel %vm575_vm0, %v606_v58, %v607_v43  ;;  %v697_v12 = vsel %vm575_vm0, %v607_v43, 0.0  ;;  %v609_v58 = vrot.slane %v533_v33, 7 }
 0x149   : > { %1113 = vrot.lane.b32.xlu0 %v8611_v4, %s12035_s20  ;;  %v1797_v25 = vsel %vm1785_vm8, %v1764_v61, %v1303_v22  ;;  %v788_v63 = vrot.slane %v8685_v49, 1  ;;  %v959_v16 = vrot.slane %v8685_v49, 2  ;;  %v790_v21 = vrot.slane %v697_v12, 1 }
 0x14a   : > { %1019 = vrot.lane.b32.xlu1 %v8575_v50, %s12034_s0  ;;  %v1829_v50 = vsel %vm1818_vm9, %v1796_v24, %v1397_v14  ;;  %v961_v36 = vrot.slane %v697_v12, 2 }
 0x14b   : > { %v1490_v38 = vpop.permute.xlu0 %1489  ;;  %v8710_v10 = vsel %vm734_vm1, %v787_v54, %v788_v63  ;;  %v8719_v28 = vsel %vm905_vm2, %v958_v13, %v959_v16  ;;  %v8722_v51 = vsel %vm734_vm1, %v788_v63, %v790_v21 }
 0x14c   : > { %v1399_v39 = vpop.permute.xlu1 %1398  ;;  %v1862_v60 = vsel %vm1851_vm10, %v1829_v50, %v1490_v38  ;;  %v8729_v53 = vsel %vm905_vm2, %v959_v16, %v961_v36 }
 0x14d   : > { %1215 = vrot.lane.b32.xlu0 %v8633_v15, %s12036_s26  ;;  %v1830_v40 = vsel %vm1818_vm9, %v1797_v25, %v1399_v39 }
 0x14e   : > { %1115 = vrot.lane.b32.xlu1 %v8608_v26, %s12035_s20 }
 0x14f   : > { %v1583_v46 = vpop.permute.xlu0 %1582 }
 0x150   : > { %v1895_v42 = vsel %vm1884_vm11, %v1862_v60, %v1583_v46  ;;  %v1492_v7 = vpop.permute.xlu1 %1491 }
 0x151   : > { %1316 = vrot.lane.b32.xlu0 %v8642_v29, %s12000_s25  ;;  %6648 = vmatprep.mubr.msk.f32.mxu0 %vm1929_vm12, %v1895_v42  ;;  %v1863_v6 = vsel %vm1851_vm10, %v1830_v40, %v1492_v7 }
 0x152   : > { %1217 = vrot.lane.b32.xlu1 %v8645_v47, %s12036_s26 }
 0x153   : > { %v1585_v9 = vpop.permute.xlu0 %1584 }
 0x154   : > { %v1896_v55 = vsel %vm1884_vm11, %v1863_v6, %v1585_v9  ;;  %v835_v11 = vpop.permute.xlu1 %834 }
 0x155   : > { %1412 = vrot.lane.b32.xlu0 %v8688_v23, %s11998_s27  ;;  %6649 = vmatmul.mubr.msk.f32.gmra.mrb[10].mxu0 %vm1929_vm12, %v1896_v55  ;;  %v1667_v32 = vsel %vm1655_vm4, %v8287_v57, %v835_v11 }
 0x156   : > { %1318 = vrot.lane.b32.xlu1 %v8652_v30, %s12000_s25 }
 0x157   : > { %v1006_v19 = vpop.permute.xlu0 %1005 }
 0x158   : > { %v837_v27 = vpop.permute.xlu1 %836 }
 0x159   : > { %1505 = vrot.lane.b32.xlu0 %v8710_v10, %s12002_s17  ;;  %v1668_v39 = vsel %vm1655_vm4, %v8284_v56, %v837_v27  ;;  %v8765_v56 = vsel %vm575_vm0, 0.0, %v609_v58 }
 0x15a   : > { %1414 = vrot.lane.b32.xlu1 %v8685_v49, %s11998_s27  ;;  %v792_v25 = vrot.slane %v8765_v56, 1  ;;  %v963_v12 = vrot.slane %v8765_v56, 2 }
 0x15b   : > { %v1102_v37 = vpop.permute.xlu0 %1101 }
 0x15c   : > { %v1008_v52 = vpop.permute.xlu1 %1007 }
 0x15d   : > { %1598 = vrot.lane.b32.xlu0 %v8719_v28, %s11996_s16  ;;  %v1700_v18 = vsel %vm1687_vm5, %v1668_v39, %v1008_v52 }
 0x15e   : > { %1507 = vrot.lane.b32.xlu1 %v8722_v51, %s12002_s17 }
 0x15f   : > { %v1204_v35 = vpop.permute.xlu0 %1203 }
 0x160   : > { %v1104_v3 = vpop.permute.xlu1 %1103 }
 0x161   : > { %1600 = vrot.lane.b32.xlu0 %v8729_v53, %s11996_s16  ;;  %v1733_v24 = vsel %vm1719_vm6, %v1700_v18, %v1104_v3 }
 0x162   : > { %850 = vrot.lane.b32.xlu1 %v8633_v15, %s12037_s24  ;;  %v1699_v15 = vsel %vm1687_vm5, %v1667_v32, %v1006_v19  ;;  %v535_v32 = vld [vmem:[%s8067_s23 + $0xc0] sm:$0xff] }
 0x163   : > { %v1305_v14 = vpop.permute.xlu0 %1304 }
 0x164   : > { %v1206_v22 = vpop.permute.xlu1 %1205 }
 0x165   : > { %1021 = vrot.lane.b32.xlu0 %v8642_v29, %s12034_s0  ;;  %v1732_v29 = vsel %vm1719_vm6, %v1699_v15, %v1102_v37  ;;  %v1766_v60 = vsel %vm1752_vm7, %v1733_v24, %v1206_v22  ;;  %v536_v15 = vld [vmem:[%s8067_s23 + $0xc8] sm:$0xff] }
 0x166   : > { %852 = vrot.lane.b32.xlu1 %v8645_v47, %s12037_s24  ;;  %v610_v47 = vrot.slane %v534_v17, 7  ;;  %v1765_v43 = vsel %vm1752_vm7, %v1732_v29, %v1204_v35 }
 0x167   : > { %v1401_v34 = vpop.permute.xlu0 %1400  ;;  %v1798_v57 = vsel %vm1785_vm8, %v1765_v43, %v1305_v14 }
 0x168   : > { %v1307_v20 = vpop.permute.xlu1 %1306  ;;  %v8762_v5 = vsel %vm575_vm0, %v609_v58, %v610_v47  ;;  %v698_v55 = vsel %vm575_vm0, %v610_v47, 0.0  ;;  %v612_v58 = vrot.slane %v535_v32, 7 }
 0x169   : > { %1117 = vrot.lane.b32.xlu0 %v8688_v23, %s12035_s20  ;;  %v1799_v42 = vsel %vm1785_vm8, %v1766_v60, %v1307_v20  ;;  %v793_v40 = vrot.slane %v8762_v5, 1  ;;  %v964_v13 = vrot.slane %v8762_v5, 2  ;;  %v795_v19 = vrot.slane %v698_v55, 1 }
 0x16a   : > { %1023 = vrot.lane.b32.xlu1 %v8652_v30, %s12034_s0  ;;  %v1831_v30 = vsel %vm1818_vm9, %v1798_v57, %v1401_v34  ;;  %v966_v36 = vrot.slane %v698_v55, 2 }
 0x16b   : > { %v1494_v38 = vpop.permute.xlu0 %1493  ;;  %v8787_v11 = vsel %vm734_vm1, %v792_v25, %v793_v40  ;;  %v8796_v27 = vsel %vm905_vm2, %v963_v12, %v964_v13  ;;  %v8799_v52 = vsel %vm734_vm1, %v793_v40, %v795_v19 }
 0x16c   : > { %v1403_v41 = vpop.permute.xlu1 %1402  ;;  %v1864_v59 = vsel %vm1851_vm10, %v1831_v30, %v1494_v38  ;;  %v8806_v3 = vsel %vm905_vm2, %v964_v13, %v966_v36 }
 0x16d   : > { %1219 = vrot.lane.b32.xlu0 %v8710_v10, %s12036_s26  ;;  %v1832_v7 = vsel %vm1818_vm9, %v1799_v42, %v1403_v41 }
 0x16e   : > { %1119 = vrot.lane.b32.xlu1 %v8685_v49, %s12035_s20 }
 0x16f   : > { %v1587_v50 = vpop.permute.xlu0 %1586 }
 0x170   : > { %v1897_v46 = vsel %vm1884_vm11, %v1864_v59, %v1587_v50  ;;  %v1496_v61 = vpop.permute.xlu1 %1495 }
 0x171   : > { %1320 = vrot.lane.b32.xlu0 %v8719_v28, %s12000_s25  ;;  %6651 = vmatprep.mubr.msk.f32.mxu0 %vm1929_vm12, %v1897_v46  ;;  %v1865_v54 = vsel %vm1851_vm10, %v1832_v7, %v1496_v61 }
 0x172   : > { %1221 = vrot.lane.b32.xlu1 %v8722_v51, %s12036_s26 }
 0x173   : > { %v1589_v63 = vpop.permute.xlu0 %1588 }
 0x174   : > { %v1898_v6 = vsel %vm1884_vm11, %v1865_v54, %v1589_v63  ;;  %v839_v9 = vpop.permute.xlu1 %838 }
 0x175   : > { %1416 = vrot.lane.b32.xlu0 %v8765_v56, %s11998_s27  ;;  %6652 = vmatmul.mubr.msk.f32.gmra.mrb[12].mxu0 %vm1929_vm12, %v1898_v6  ;;  %v1669_v29 = vsel %vm1655_vm4, %v8380_v45, %v839_v9  ;;  %v8866_v9 = vld [vmem:[%s12038_s2] ss:$0 sm:$0xff] }
 0x176   : > { %1322 = vrot.lane.b32.xlu1 %v8729_v53, %s12000_s25 }
 0x177   : > { %v1010_v16 = vpop.permute.xlu0 %1009 }
 0x178   : > { %v841_v21 = vpop.permute.xlu1 %840 }
 0x179   : > { %1509 = vrot.lane.b32.xlu0 %v8787_v11, %s12002_s17  ;;  %v1670_v41 = vsel %vm1655_vm4, %v8377_v8, %v841_v21  ;;  %v8842_v8 = vsel %vm575_vm0, 0.0, %v612_v58 }
 0x17a   : > { %1418 = vrot.lane.b32.xlu1 %v8762_v5, %s11998_s27  ;;  %v797_v42 = vrot.slane %v8842_v8, 1  ;;  %v968_v12 = vrot.slane %v8842_v8, 2 }
 0x17b   : > { %v1106_v37 = vpop.permute.xlu0 %1105 }
 0x17c   : > { %v1012_v35 = vpop.permute.xlu1 %1011 }
 0x17d   : > { %1602 = vrot.lane.b32.xlu0 %v8796_v27, %s11996_s16  ;;  %v1702_v39 = vsel %vm1687_vm5, %v1670_v41, %v1012_v35  ;;  %v537_v41 = vld [vmem:[%s8067_s23 + $0xd0] sm:$0xff] }
 0x17e   : > { %1511 = vrot.lane.b32.xlu1 %v8799_v52, %s12002_s17 }
 0x17f   : > { %v1208_v14 = vpop.permute.xlu0 %1207 }
 0x180   : > { %v1108_v22 = vpop.permute.xlu1 %1107 }
 0x181   : > { %1604 = vrot.lane.b32.xlu0 %v8806_v3, %s11996_s16  ;;  %v1735_v57 = vsel %vm1719_vm6, %v1702_v39, %v1108_v22  ;;  %s12039_s16 = smov 32  }
 0x182   : > { %854 = vrot.lane.b32.xlu1 %v8710_v10, %s12037_s24  ;;  %v1701_v10 = vsel %vm1687_vm5, %v1669_v29, %v1010_v16 }
 0x183   : > { %v1309_v34 = vpop.permute.xlu0 %1308 }
 0x184   : > { %v1210_v20 = vpop.permute.xlu1 %1209 }
 0x185   : > { %1025 = vrot.lane.b32.xlu0 %v8719_v28, %s12034_s0  ;;  %v1734_v28 = vsel %vm1719_vm6, %v1701_v10, %v1106_v37  ;;  %v1768_v59 = vsel %vm1752_vm7, %v1735_v57, %v1210_v20 }
 0x186   : > { %856 = vrot.lane.b32.xlu1 %v8722_v51, %s12037_s24  ;;  %v613_v51 = vrot.slane %v536_v15, 7  ;;  %v1767_v47 = vsel %vm1752_vm7, %v1734_v28, %v1208_v14 }
 0x187   : > { %v1405_v33 = vpop.permute.xlu0 %1404  ;;  %v1800_v45 = vsel %vm1785_vm8, %v1767_v47, %v1309_v34 }
 0x188   : > { %v1311_v17 = vpop.permute.xlu1 %1310  ;;  %v8839_v24 = vsel %vm575_vm0, %v612_v58, %v613_v51  ;;  %v699_v6 = vsel %vm575_vm0, %v613_v51, 0.0 }
 0x189   : > { %1121 = vrot.lane.b32.xlu0 %v8765_v56, %s12035_s20  ;;  %v1801_v46 = vsel %vm1785_vm8, %v1768_v59, %v1311_v17  ;;  %v798_v7 = vrot.slane %v8839_v24, 1  ;;  %v969_v13 = vrot.slane %v8839_v24, 2  ;;  %v800_v19 = vrot.slane %v699_v6, 1 }
 0x18a   : > { %1027 = vrot.lane.b32.xlu1 %v8729_v53, %s12034_s0  ;;  %v1833_v53 = vsel %vm1818_vm9, %v1800_v45, %v1405_v33  ;;  %v971_v34 = vrot.slane %v699_v6, 2  ;;  %v538_v45 = vld [vmem:[%s8067_s23 + $0xd8] sm:$0xff] }
 0x18b   : > { %v1498_v38 = vpop.permute.xlu0 %1497  ;;  %v8869_v55 = vsel %vm734_vm1, %v797_v42, %v798_v7  ;;  %v8880_v22 = vsel %vm905_vm2, %v968_v12, %v969_v13  ;;  %v8883_v17 = vsel %vm734_vm1, %v798_v7, %v800_v19 }
 0x18c   : > { %v1407_v43 = vpop.permute.xlu1 %1406  ;;  %v1866_v18 = vsel %vm1851_vm10, %v1833_v53, %v1498_v38  ;;  %v8892_v28 = vsel %vm905_vm2, %v969_v13, %v971_v34 }
 0x18d   : > { %1223 = vrot.lane.b32.xlu0 %v8787_v11, %s12036_s26  ;;  %v1834_v61 = vsel %vm1818_vm9, %v1801_v46, %v1407_v43 }
 0x18e   : > { %1123 = vrot.lane.b32.xlu1 %v8762_v5, %s12035_s20 }
 0x18f   : > { %v1591_v30 = vpop.permute.xlu0 %1590 }
 0x190   : > { %v1899_v50 = vsel %vm1884_vm11, %v1866_v18, %v1591_v30  ;;  %v1500_v60 = vpop.permute.xlu1 %1499  ;;  %v615_v18 = vrot.slane %v537_v41, 7 }
 0x191   : > { %1324 = vrot.lane.b32.xlu0 %v8796_v27, %s12000_s25  ;;  %6654 = vmatprep.mubr.msk.f32.mxu0 %vm1929_vm12, %v1899_v50  ;;  %v1867_v25 = vsel %vm1851_vm10, %v1834_v61, %v1500_v60 }
 0x192   : > { %1225 = vrot.lane.b32.xlu1 %v8799_v52, %s12036_s26 }
 0x193   : > { %v1593_v40 = vpop.permute.xlu0 %1592 }
 0x194   : > { %v1900_v54 = vsel %vm1884_vm11, %v1867_v25, %v1593_v40  ;;  %v843_v63 = vpop.permute.xlu1 %842 }
 0x195   : > { %1420 = vrot.lane.b32.xlu0 %v8842_v8, %s11998_s27  ;;  %6655 = vmatmul.mubr.msk.f32.gmra.mrb[14].mxu0 %vm1929_vm12, %v1900_v54  ;;  %v1671_v50 = vsel %vm1655_vm4, %v8457_v31, %v843_v63  ;;  %v8924_v31 = vsel %vm575_vm0, 0.0, %v615_v18 }
 0x196   : > { %1326 = vrot.lane.b32.xlu1 %v8806_v3, %s12000_s25 }
 0x197   : > { %v1014_v16 = vpop.permute.xlu0 %1013 }
 0x198   : > { %v845_v21 = vpop.permute.xlu1 %844  ;;  %v6635_v36 = vpop.f32.mrb[0].mxu0 }
 0x199   : > { %v2102_v37 = vadd.f32 %v6635_v36, %v8866_v9  ;;  %v2096_v35 = vpop.f32.mrb[1].mxu0  ;;  %1513 = vrot.lane.b32.xlu0 %v8869_v55, %s12002_s17  ;;  %v1672_v42 = vsel %vm1655_vm4, %v8454_v62, %v845_v21 }
 0x19a   : > { %v2097_v14 = vadd.f32 %v8866_v9, %v2096_v35  ;;  %1422 = vrot.lane.b32.xlu1 %v8839_v24, %s11998_s27 }
 0x19b   : > { %v2256_v20 = vmax.f32 %v2102_v37, 0.0  ;;  %v1110_v33 = vpop.permute.xlu0 %1109 }
 0x19c   : > { %v2255_v32 = vmax.f32 %v2097_v14, 0.0  ;;  %v1016_v15 = vpop.permute.xlu1 %1015 }
 0x19d   : > { %v2320_v29 = vrot.slane %v2256_v20, 7  ;;  %1606 = vrot.lane.b32.xlu0 %v8880_v22, %s12039_s16  ;;  %v1704_v54 = vsel %vm1687_vm5, %v1672_v42, %v1016_v15 }
 0x19e   : > { %v8887_v10 = vrot.slane %v2255_v32, 7  ;;  %1515 = vrot.lane.b32.xlu1 %v8883_v17, %s12002_s17 }
 0x19f   : > { %v1212_v38 = vpop.permute.xlu0 %1211  ;;  %v8918_v60 = vsel %vm575_vm0, %v2320_v29, 0.0 }
 0x1a0   : > { %v8896_v58 = vsel %vm575_vm0, %v8887_v10, %v2320_v29  ;;  %v1112_v51 = vpop.permute.xlu1 %1111  ;;  %v2647_v62 = vrot.slane %v8918_v60, 2 }
 0x1a1   : > { %1608 = vrot.lane.b32.xlu0 %v8892_v28, %s12039_s16  ;;  %v1737_v12 = vsel %vm1719_vm6, %v1704_v54, %v1112_v51  ;;  %v2645_v35 = vrot.slane %v8896_v58, 2 }
 0x1a2   : > { %858 = vrot.lane.b32.xlu1 %v8787_v11, %s12037_s24  ;;  %v616_v11 = vrot.slane %v538_v45, 7 }
 0x1a3   : > { %v1313_v47 = vpop.permute.xlu0 %1312 }
 0x1a4   : > { %v1214_v43 = vpop.permute.xlu1 %1213  ;;  %v8931_v6 = vsel %vm575_vm0, %v615_v18, %v616_v11 }
 0x1a5   : > { %1029 = vrot.lane.b32.xlu0 %v8796_v27, %s12034_s0  ;;  %v1770_v19 = vsel %vm1752_vm7, %v1737_v12, %v1214_v43  ;;  %v803_v41 = vrot.slane %v8931_v6, 1 }
 0x1a6   : > { %860 = vrot.lane.b32.xlu1 %v8799_v52, %s12037_s24  ;;  %v1703_v52 = vsel %vm1687_vm5, %v1671_v50, %v1014_v16 }
 0x1a7   : > { %v1409_v39 = vpop.permute.xlu0 %1408  ;;  %v1736_v7 = vsel %vm1719_vm6, %v1703_v52, %v1110_v33  ;;  %v973_v52 = vrot.slane %v8924_v31, 2 }
 0x1a8   : > { %v1315_v53 = vpop.permute.xlu1 %1314  ;;  %v6638_v57 = vpop.f32.mrb[2].mxu0 }
 0x1a9   : > { %v2112_v30 = vadd.f32 %v6638_v57, %v8866_v9  ;;  %v2106_v59 = vpop.f32.mrb[3].mxu0  ;;  %1125 = vrot.lane.b32.xlu0 %v8842_v8, %s12035_s20  ;;  %v1803_v15 = vsel %vm1785_vm8, %v1770_v19, %v1315_v53  ;;  %v700_v53 = vsel %vm575_vm0, %v616_v11, 0.0 }
 0x1aa   : > { %v2107_v27 = vadd.f32 %v8866_v9, %v2106_v59  ;;  %1031 = vrot.lane.b32.xlu1 %v8806_v3, %s12034_s0  ;;  %v1769_v3 = vsel %vm1752_vm7, %v1736_v7, %v1212_v38  ;;  %v802_v38 = vrot.slane %v8924_v31, 1  ;;  %v805_v42 = vrot.slane %v700_v53, 1 }
 0x1ab   : > { %v2258_v46 = vmax.f32 %v2112_v30, 0.0  ;;  %v1502_v61 = vpop.permute.xlu0 %1501  ;;  %v1802_v13 = vsel %vm1785_vm8, %v1769_v3, %v1313_v47  ;;  %v8970_v30 = vsel %vm905_vm2, %v2645_v35, %v2647_v62 }
 0x1ac   : > { %v2257_v25 = vmax.f32 %v2107_v27, 0.0  ;;  %v1411_v40 = vpop.permute.xlu1 %1410  ;;  %v1835_v21 = vsel %vm1818_vm9, %v1802_v13, %v1409_v39  ;;  %v8988_v11 = vsel %vm734_vm1, %v802_v38, %v803_v41  ;;  %v9000_v3 = vsel %vm734_vm1, %v803_v41, %v805_v42 }
 0x1ad   : > { %v2323_v63 = vrot.slane %v2258_v46, 7  ;;  %1227 = vrot.lane.b32.xlu0 %v8869_v55, %s12036_s26  ;;  %v1868_v33 = vsel %vm1851_vm10, %v1835_v21, %v1502_v61  ;;  %v1836_v51 = vsel %vm1818_vm9, %v1803_v15, %v1411_v40  ;;  %v974_v46 = vrot.slane %v8931_v6, 2 }
 0x1ae   : > { %v2322_v16 = vrot.slane %v2257_v25, 7  ;;  %1127 = vrot.lane.b32.xlu1 %v8839_v24, %s12035_s20  ;;  %v976_v40 = vrot.slane %v700_v53, 2 }
 0x1af   : > { %v8941_v36 = vsel %vm575_vm0, %v2323_v63, 0.0  ;;  %v1595_v37 = vpop.permute.xlu0 %1594  ;;  %v8997_v25 = vsel %vm905_vm2, %v973_v52, %v974_v46 }
 0x1b0   : > { %v2652_v14 = vrot.slane %v8941_v36, 2  ;;  %v8946_v34 = vsel %vm575_vm0, %v2322_v16, %v2323_v63  ;;  %v8949_v20 = vsel %vm575_vm0, 0.0, %v2322_v16  ;;  %v1504_v32 = vpop.permute.xlu1 %1503  ;;  %v1901_v29 = vsel %vm1884_vm11, %v1868_v33, %v1595_v37  ;;  %v539_v33 = vld [vmem:[%s8067_s23 + $0xe0] sm:$0xff] }
 0x1b1   : > { %1328 = vrot.lane.b32.xlu0 %v8880_v22, %s12000_s25  ;;  %6657 = vmatprep.mubr.msk.f32.mxu0 %vm1929_vm12, %v1901_v29  ;;  %v2649_v47 = vrot.slane %v8949_v20, 2  ;;  %v2650_v43 = vrot.slane %v8946_v34, 2  ;;  %v1869_v45 = vsel %vm1851_vm10, %v1836_v51, %v1504_v32  ;;  %v9007_v62 = vsel %vm905_vm2, %v974_v46, %v976_v40  ;;  %v540_v32 = vld [vmem:[%s8067_s23 + $0xe8] sm:$0xff] }
 0x1b2   : > { %1229 = vrot.lane.b32.xlu1 %v8883_v17, %s12036_s26  ;;  %v618_v51 = vrot.slane %v539_v33, 7 }
 0x1b3   : > { %v1597_v39 = vpop.permute.xlu0 %1596  ;;  %v8973_v59 = vsel %vm905_vm2, %v2649_v47, %v2650_v43  ;;  %v8976_v50 = vsel %vm905_vm2, %v2650_v43, %v2652_v14  ;;  %v619_v47 = vrot.slane %v540_v32, 7 }
 0x1b4   : > { %v1902_v57 = vsel %vm1884_vm11, %v1869_v45, %v1597_v39  ;;  %v847_v18 = vpop.permute.xlu1 %846  ;;  %v7073_v27 = vpack.i.bf16 %v8973_v59, %v8970_v30  ;;  %6305 = vmatprep.mubr.msk.f32.mxu1 %vm1752_vm7, %v8973_v59  ;;  %v9047_v42 = vsel %vm575_vm0, 0.0, %v618_v51 }
 0x1b5   : > { %1424 = vrot.lane.b32.xlu0 %v8924_v31, %s11998_s27  ;;  %6658 = vmatmul.mubr.msk.f32.gmra.mrb[16].mxu0 %vm1929_vm12, %v1902_v57 }
 0x1b6   : > { %1330 = vrot.lane.b32.xlu1 %v8892_v28, %s12000_s25 }
 0x1b7   : > { %v1018_v61 = vpop.permute.xlu0 %1017 }
 0x1b8   : > { %v849_v7 = vpop.permute.xlu1 %848 }
 0x1b9   : > { %1517 = vrot.lane.b32.xlu0 %v8988_v11, %s12002_s17  ;;  %v1674_v39 = vsel %vm1655_vm4, %v8531_v44, %v849_v7 }
 0x1ba   : > { %1426 = vrot.lane.b32.xlu1 %v8931_v6, %s11998_s27 }
 0x1bb   : > { %v1114_v54 = vpop.permute.xlu0 %1113 }
 0x1bc   : > { %v1020_v63 = vpop.permute.xlu1 %1019 }
 0x1bd   : > { %1610 = vrot.lane.b32.xlu0 %v8997_v25, %s12039_s16 }
 0x1be   : > { %1519 = vrot.lane.b32.xlu1 %v9000_v3, %s12002_s17 }
 0x1bf   : > { %v1216_v12 = vpop.permute.xlu0 %1215 }
 0x1c0   : > { %v1116_v13 = vpop.permute.xlu1 %1115 }
 0x1c1   : > { %1612 = vrot.lane.b32.xlu0 %v9007_v62, %s12039_s16 }
 0x1c2   : > { %862 = vrot.lane.b32.xlu1 %v8869_v55, %s12037_s24 }
 0x1c3   : > { %v1317_v16 = vpop.permute.xlu0 %1316 }
 0x1c4   : > { %v1218_v19 = vpop.permute.xlu1 %1217 }
 0x1c5   : > { %1033 = vrot.lane.b32.xlu0 %v8880_v22, %s12034_s0  ;;  %v1673_v22 = vsel %vm1655_vm4, %v8534_v48, %v847_v18  ;;  %v1706_v48 = vsel %vm1687_vm5, %v1674_v39, %v1020_v63 }
 0x1c6   : > { %864 = vrot.lane.b32.xlu1 %v8883_v17, %s12037_s24  ;;  %v1705_v43 = vsel %vm1687_vm5, %v1673_v22, %v1018_v61  ;;  %v1739_v52 = vsel %vm1719_vm6, %v1706_v48, %v1116_v13  ;;  %v9044_v61 = vsel %vm575_vm0, %v618_v51, %v619_v47  ;;  %v978_v22 = vrot.slane %v9047_v42, 2 }
 0x1c7   : > { %v1413_v21 = vpop.permute.xlu0 %1412  ;;  %v1738_v53 = vsel %vm1719_vm6, %v1705_v43, %v1114_v54  ;;  %v1772_v7 = vsel %vm1752_vm7, %v1739_v52, %v1218_v19  ;;  %v807_v19 = vrot.slane %v9047_v42, 1 }
 0x1c8   : > { %v1319_v37 = vpop.permute.xlu1 %1318  ;;  %v6641_v14 = vpop.f32.mrb[4].mxu0 }
 0x1c9   : > { %v2122_v15 = vadd.f32 %v6641_v14, %v8866_v9  ;;  %v2116_v29 = vpop.f32.mrb[5].mxu0  ;;  %1129 = vrot.lane.b32.xlu0 %v8924_v31, %s12035_s20 }
 0x1ca   : > { %v2117_v55 = vadd.f32 %v8866_v9, %v2116_v29  ;;  %1035 = vrot.lane.b32.xlu1 %v8892_v28, %s12034_s0  ;;  %v1771_v28 = vsel %vm1752_vm7, %v1738_v53, %v1216_v12  ;;  %v1805_v12 = vsel %vm1785_vm8, %v1772_v7, %v1319_v37  ;;  %v701_v29 = vsel %vm575_vm0, %v619_v47, 0.0 }
 0x1cb   : > { %v2260_v17 = vmax.f32 %v2122_v15, 0.0  ;;  %v1506_v38 = vpop.permute.xlu0 %1505  ;;  %v1804_v44 = vsel %vm1785_vm8, %v1771_v28, %v1317_v16  ;;  %v810_v51 = vrot.slane %v701_v29, 1 }
 0x1cc   : > { %v2259_v41 = vmax.f32 %v2117_v55, 0.0  ;;  %v1415_v45 = vpop.permute.xlu1 %1414  ;;  %v1837_v40 = vsel %vm1818_vm9, %v1804_v44, %v1413_v21  ;;  %v808_v21 = vrot.slane %v9044_v61, 1 }
 0x1cd   : > { %v9031_v57 = vrot.slane %v2260_v17, 7  ;;  %1231 = vrot.lane.b32.xlu0 %v8988_v11, %s12036_s26  ;;  %v1870_v13 = vsel %vm1851_vm10, %v1837_v40, %v1506_v38  ;;  %v1838_v16 = vsel %vm1818_vm9, %v1805_v12, %v1415_v45  ;;  %v979_v17 = vrot.slane %v9044_v61, 2  ;;  %v541_v12 = vld [vmem:[%s8067_s23 + $0xf0] sm:$0xff] }
 0x1ce   : > { %v9037_v18 = vrot.slane %v2259_v41, 7  ;;  %1131 = vrot.lane.b32.xlu1 %v8931_v6, %s12035_s20  ;;  %v9076_v55 = vsel %vm734_vm1, %v807_v19, %v808_v21  ;;  %v981_v41 = vrot.slane %v701_v29, 2  ;;  %v9088_v39 = vsel %vm734_vm1, %v808_v21, %v810_v51 }
 0x1cf   : > { %v1599_v46 = vpop.permute.xlu0 %1598  ;;  %v9085_v47 = vsel %vm905_vm2, %v978_v22, %v979_v17  ;;  %v621_v21 = vrot.slane %v541_v12, 7 }
 0x1d0   : > { %v9054_v54 = vsel %vm575_vm0, %v9037_v18, %v9031_v57  ;;  %v1508_v63 = vpop.permute.xlu1 %1507  ;;  %v1903_v14 = vsel %vm1884_vm11, %v1870_v13, %v1599_v46  ;;  %v9095_v48 = vsel %vm905_vm2, %v979_v17, %v981_v41  ;;  %v542_v13 = vld [vmem:[%s8067_s23 + $0xf8] sm:$0xff]  ;;  %s12006_s23 = smov 80  }
 0x1d1   : > { %1332 = vrot.lane.b32.xlu0 %v8997_v25, %s12000_s25  ;;  %v1871_v33 = vsel %vm1851_vm10, %v1838_v16, %v1508_v63  ;;  %6660 = vmatprep.mubr.msk.f32.mxu0 %vm1929_vm12, %v1903_v14 }
 0x1d2   : > { %1233 = vrot.lane.b32.xlu1 %v9000_v3, %s12036_s26 }
 0x1d3   : > { %v1601_v37 = vpop.permute.xlu0 %1600 }
 0x1d4   : > { %v1904_v32 = vsel %vm1884_vm11, %v1871_v33, %v1601_v37  ;;  %v851_v15 = vpop.permute.xlu1 %850  ;;  %v622_v33 = vrot.slane %v542_v13, 7 }
 0x1d5   : > { %1428 = vrot.lane.b32.xlu0 %v9047_v42, %s11998_s27  ;;  %6661 = vmatmul.mubr.msk.f32.gmra.mrb[18].mxu0 %vm1929_vm12, %v1904_v32 }
 0x1d6   : > { %1334 = vrot.lane.b32.xlu1 %v9007_v62, %s12000_s25  ;;  %v9132_v41 = vsel %vm575_vm0, %v621_v21, %v622_v33 }
 0x1d7   : > { %v1022_v38 = vpop.permute.xlu0 %1021 }
 0x1d8   : > { %v853_v43 = vpop.permute.xlu1 %852 }
 0x1d9   : > { %1521 = vrot.lane.b32.xlu0 %v9076_v55, %s12002_s17  ;;  %v1676_v22 = vsel %vm1655_vm4, %v8608_v26, %v853_v43 }
 0x1da   : > { %1430 = vrot.lane.b32.xlu1 %v9044_v61, %s11998_s27 }
 0x1db   : > { %v1118_v45 = vpop.permute.xlu0 %1117 }
 0x1dc   : > { %v1024_v53 = vpop.permute.xlu1 %1023 }
 0x1dd   : > { %1614 = vrot.lane.b32.xlu0 %v9085_v47, %s12039_s16 }
 0x1de   : > { %1523 = vrot.lane.b32.xlu1 %v9088_v39, %s12002_s17 }
 0x1df   : > { %v1220_v28 = vpop.permute.xlu0 %1219 }
 0x1e0   : > { %v1120_v52 = vpop.permute.xlu1 %1119 }
 0x1e1   : > { %1616 = vrot.lane.b32.xlu0 %v9095_v48, %s12039_s16 }
 0x1e2   : > { %866 = vrot.lane.b32.xlu1 %v8988_v11, %s12037_s24 }
 0x1e3   : > { %v1321_v44 = vpop.permute.xlu0 %1320 }
 0x1e4   : > { %v1222_v46 = vpop.permute.xlu1 %1221 }
 0x1e5   : > { %1037 = vrot.lane.b32.xlu0 %v8997_v25, %s12034_s0  ;;  %v1675_v25 = vsel %vm1655_vm4, %v8611_v4, %v851_v15  ;;  %v1708_v4 = vsel %vm1687_vm5, %v1676_v22, %v1024_v53 }
 0x1e6   : > { %868 = vrot.lane.b32.xlu1 %v9000_v3, %s12037_s24  ;;  %v1707_v37 = vsel %vm1687_vm5, %v1675_v25, %v1022_v38  ;;  %v1741_v38 = vsel %vm1719_vm6, %v1708_v4, %v1120_v52 }
 0x1e7   : > { %v1417_v7 = vpop.permute.xlu0 %1416  ;;  %v1740_v17 = vsel %vm1719_vm6, %v1707_v37, %v1118_v45  ;;  %v9135_v45 = vsel %vm575_vm0, 0.0, %v621_v21  ;;  %v1774_v53 = vsel %vm1752_vm7, %v1741_v38, %v1222_v46  ;;  %v1276_v37 = vrot.slane %v9132_v41, 2 }
 0x1e8   : > { %v1323_v40 = vpop.permute.xlu1 %1322  ;;  %v6644_v63 = vpop.f32.mrb[6].mxu0  ;;  %v1174_v46 = vrot.slane %v9135_v45, 1  ;;  %v12004_v38 = vmov 0.0|0.0  }
 0x1e9   : > { %v2132_v16 = vadd.f32 %v6644_v63, %v8866_v9  ;;  %v2126_v14 = vpop.f32.mrb[7].mxu0  ;;  %1133 = vrot.lane.b32.xlu0 %v9047_v42, %s12035_s20  ;;  %v1807_v52 = vsel %vm1785_vm8, %v1774_v53, %v1323_v40  ;;  %6739 = vmatprep.subr.bf16.mxu1 %v12004_v38 }
 0x1ea   : > { %v2127_v11 = vadd.f32 %v8866_v9, %v2126_v14  ;;  %1039 = vrot.lane.b32.xlu1 %v9007_v62, %s12034_s0  ;;  %v1773_v62 = vsel %vm1752_vm7, %v1740_v17, %v1220_v28  ;;  %v3523_v17 = vld [vmem:[%s12040_s3 + $0x8] sm:$0xff]  ;;  %6766 = vmatprep.subr.bf16.mxu0 %v12004_v38 }
 0x1eb   : > { %v2262_v3 = vmax.f32 %v2132_v16, 0.0  ;;  %v1510_v19 = vpop.permute.xlu0 %1509  ;;  %v1806_v26 = vsel %vm1785_vm8, %v1773_v62, %v1321_v44 }
 0x1ec   : > { %v2261_v32 = vmax.f32 %v2127_v11, 0.0  ;;  %v1419_v29 = vpop.permute.xlu1 %1418  ;;  %v1839_v28 = vsel %vm1818_vm9, %v1806_v26, %v1417_v7  ;;  %v1175_v7 = vrot.slane %v9132_v41, 1 }
 0x1ed   : > { %v9119_v51 = vrot.slane %v2262_v3, 7  ;;  %1235 = vrot.lane.b32.xlu0 %v9076_v55, %s12036_s26  ;;  %v1872_v44 = vsel %vm1851_vm10, %v1839_v28, %v1510_v19  ;;  %v1840_v13 = vsel %vm1818_vm9, %v1807_v52, %v1419_v29  ;;  %v702_v3 = vsel %vm575_vm0, %v622_v33, 0.0  ;;  %v3522_v33 = vld [vmem:[%s12040_s3] sm:$0xff]  ;;  %v3525_v52 = vld [vmem:[%s12040_s3 + $0x18] sm:$0xff] }
 0x1ee   : > { %v9125_v15 = vrot.slane %v2261_v32, 7  ;;  %1135 = vrot.lane.b32.xlu1 %v9044_v61, %s12035_s20  ;;  %v1275_v19 = vrot.slane %v9135_v45, 2  ;;  %v9167_v21 = vsel %vm734_vm1, %v1174_v46, %v1175_v7  ;;  %v1177_v29 = vrot.slane %v702_v3, 1 }
 0x1ef   : > { %v1603_v43 = vpop.permute.xlu0 %1602  ;;  %v1278_v62 = vrot.slane %v702_v3, 2  ;;  %v6740_v26 = vpack.c.bf16 %v3523_v17, %v3522_v33 }
 0x1f0   : > { %v9142_v63 = vsel %vm575_vm0, %v9125_v15, %v9119_v51  ;;  %v1512_v12 = vpop.permute.xlu1 %1511  ;;  %v1905_v16 = vsel %vm1884_vm11, %v1872_v44, %v1603_v43  ;;  %v9181_v4 = vsel %vm905_vm2, %v1275_v19, %v1276_v37  ;;  %v9185_v53 = vsel %vm734_vm1, %v1175_v7, %v1177_v29  ;;  %v3526_v7 = vld [vmem:[%s12040_s3 + $0x20] sm:$0xff]  ;;  %v3528_v19 = vld [vmem:[%s12040_s3 + $0x30] sm:$0xff] }
 0x1f1   : > { %1336 = vrot.lane.b32.xlu0 %v9085_v47, %s12000_s25  ;;  %v1873_v14 = vsel %vm1851_vm10, %v1840_v13, %v1512_v12  ;;  %6663 = vmatprep.mubr.msk.f32.mxu0 %vm1929_vm12, %v1905_v16  ;;  %v3524_v12 = vld [vmem:[%s12040_s3 + $0x10] sm:$0xff]  ;;  %v9200_v44 = vsel %vm905_vm2, %v1276_v37, %v1278_v62  ;;  %v3529_v37 = vld [vmem:[%s12040_s3 + $0x38] sm:$0xff] }
 0x1f2   : > { %1237 = vrot.lane.b32.xlu1 %v9088_v39, %s12036_s26  ;;  %6741 = vmatpush1.bf16.msra.mxu1 %v6740_v26  ;;  %v6743_v13 = vpack.c.bf16 %v3525_v52, %v3524_v12  ;;  %v3530_v26 = vld [vmem:[%s12040_s3 + $0x40] sm:$0xff] }
 0x1f3   : > { %v1605_v40 = vpop.permute.xlu0 %1604  ;;  %6742 = vmatprep.subr.bf16.mxu1 %v12004_v38 }
 0x1f4   : > { %v1906_v11 = vsel %vm1884_vm11, %v1873_v14, %v1605_v40  ;;  %v9157_v25 = vpop.permute.xlu1 %854  ;;  %v3527_v14 = vld [vmem:[%s12040_s3 + $0x28] sm:$0xff] }
 0x1f5   : > { %1432 = vrot.lane.b32.xlu0 %v9135_v45, %s11998_s27  ;;  %6664 = vmatmul.mubr.msk.f32.gmra.mrb[20].mxu0 %vm1929_vm12, %v1906_v11  ;;  %v6746_v40 = vpack.c.bf16 %v3527_v14, %v3526_v7  ;;  %s10234_s27 = sand.u32 1, %s7895_s19  }
 0x1f6   : > { %1338 = vrot.lane.b32.xlu1 %v9095_v48, %s12000_s25  ;;  %s12041_s25 = smov 24   ;;  %6744 = vmatpush1.bf16.msra.mxu1 %v6743_v13 }
 0x1f7   : > { %v1026_v32 = vpop.permute.xlu0 %1025  ;;  %6745 = vmatprep.subr.bf16.mxu1 %v12004_v38 }
 0x1f8   : > { %v857_v22 = vpop.permute.xlu1 %856 }
 0x1f9   : > { %1525 = vrot.lane.b32.xlu0 %v9167_v21, %s12002_s17 }
 0x1fa   : > { %1434 = vrot.lane.b32.xlu1 %v9132_v41, %s12041_s25  ;;  %6747 = vmatpush1.bf16.msra.mxu1 %v6746_v40 }
 0x1fb   : > { %v1122_v43 = vpop.permute.xlu0 %1121  ;;  %6748 = vmatprep.subr.bf16.mxu1 %v12004_v38 }
 0x1fc   : > { %v1028_v28 = vpop.permute.xlu1 %1027 }
 0x1fd   : > { %1618 = vrot.lane.b32.xlu0 %v9181_v4, %s12039_s16 }
 0x1fe   : > { %1527 = vrot.lane.b32.xlu1 %v9185_v53, %s12002_s17  ;;  %s12014_s17 = smov 48  }
 0x1ff   : > { %v1224_v16 = vpop.permute.xlu0 %1223 }
 0x200   : > { %v1124_v46 = vpop.permute.xlu1 %1123 }
 0x201   : > { %1620 = vrot.lane.b32.xlu0 %v9200_v44, %s12039_s16 }
 0x202   : > { %870 = vrot.lane.b32.xlu1 %v9076_v55, %s12037_s24  ;;  %v6749_v55 = vpack.c.bf16 %v3529_v37, %v3528_v19  ;;  %v9243_v37 = vsel %vm575_vm0, 0.0, %v8887_v10  ;;  %v3533_v10 = vld [vmem:[%s12040_s3 + $0x58] sm:$0xff] }
 0x203   : > { %v1325_v11 = vpop.permute.xlu0 %1324 }
 0x204   : > { %v1226_v3 = vpop.permute.xlu1 %1225  ;;  %6750 = vmatpush1.bf16.msra.mxu1 %v6749_v55  ;;  %v1678_v55 = vsel %vm1655_vm4, %v8685_v49, %v857_v22 }
 0x205   : > { %1041 = vrot.lane.b32.xlu0 %v9085_v47, %s12034_s0  ;;  %6751 = vmatprep.subr.bf16.mxu1 %v12004_v38 }
 0x206   : > { %872 = vrot.lane.b32.xlu1 %v9088_v39, %s12037_s24  ;;  %v3531_v39 = vld [vmem:[%s12040_s3 + $0x48] sm:$0xff] }
 0x207   : > { %v1421_v29 = vpop.permute.xlu0 %1420  ;;  %v6752_v52 = vpack.c.bf16 %v3531_v39, %v3530_v26 }
 0x208   : > { %v1327_v33 = vpop.permute.xlu1 %1326  ;;  %v6647_v17 = vpop.f32.mrb[8].mxu0 }
 0x209   : > { %v2142_v47 = vadd.f32 %v6647_v17, %v8866_v9  ;;  %v2136_v62 = vpop.f32.mrb[9].mxu0  ;;  %1137 = vrot.lane.b32.xlu0 %v9135_v45, %s12035_s20  ;;  %v1677_v45 = vsel %vm1655_vm4, %v8688_v23, %v9157_v25  ;;  %6753 = vmatpush1.bf16.msra.mxu1 %v6752_v52  ;;  %v3532_v23 = vld [vmem:[%s12040_s3 + $0x50] sm:$0xff]  ;;  %v1710_v25 = vsel %vm1687_vm5, %v1678_v55, %v1028_v28  ;;  %v2476_v52 = vrot.slane %v9243_v37, 1 }
 0x20a   : > { %v2137_v12 = vadd.f32 %v8866_v9, %v2136_v62  ;;  %1043 = vrot.lane.b32.xlu1 %v9095_v48, %s12034_s0  ;;  %v1709_v14 = vsel %vm1687_vm5, %v1677_v45, %v1026_v32  ;;  %6754 = vmatprep.subr.bf16.mxu1 %v12004_v38  ;;  %v1743_v22 = vsel %vm1719_vm6, %v1710_v25, %v1124_v46  ;;  %v2644_v62 = vrot.slane %v9243_v37, 2 }
 0x20b   : > { %v2264_v13 = vmax.f32 %v2142_v47, 0.0  ;;  %v1514_v7 = vpop.permute.xlu0 %1513  ;;  %v1742_v48 = vsel %vm1719_vm6, %v1709_v14, %v1122_v43  ;;  %v1776_v26 = vsel %vm1752_vm7, %v1743_v22, %v1226_v3  ;;  %v2477_v45 = vrot.slane %v8896_v58, 1  ;;  %v3536_v14 = vld [vmem:[%s12040_s3 + $0x70] sm:$0xff] }
 0x20c   : > { %v2263_v40 = vmax.f32 %v2137_v12, 0.0  ;;  %v1423_v19 = vpop.permute.xlu1 %1422  ;;  %v1775_v49 = vsel %vm1752_vm7, %v1742_v48, %v1224_v16  ;;  %v2479_v25 = vrot.slane %v8918_v60, 1  ;;  %v7028_v22 = vpack.i.bf16 %v8896_v58, %v9243_v37 }
 0x20d   : > { %v9248_v17 = vrot.slane %v2264_v13, 7  ;;  %1239 = vrot.lane.b32.xlu0 %v9167_v21, %s12036_s26  ;;  %v6755_v21 = vpack.c.bf16 %v3533_v10, %v3532_v23  ;;  %v1808_v43 = vsel %vm1785_vm8, %v1775_v49, %v1325_v11  ;;  %v2478_v23 = vsel %vm734_vm1, %v2476_v52, %v2477_v45  ;;  %v3539_v49 = vld [vmem:[%s12040_s3 + $0x88] sm:$0xff] }
 0x20e   : > { %v9261_v32 = vrot.slane %v2263_v40, 7  ;;  %1139 = vrot.lane.b32.xlu1 %v9132_v41, %s12035_s20  ;;  %v1841_v39 = vsel %vm1818_vm9, %v1808_v43, %v1421_v29  ;;  %v1809_v41 = vsel %vm1785_vm8, %v1776_v26, %v1327_v33  ;;  %s12042_s20 = smov 20   ;;  %v3534_v33 = vld [vmem:[%s12040_s3 + $0x60] sm:$0xff]  ;;  %v3537_v40 = vld [vmem:[%s12040_s3 + $0x78] sm:$0xff]  ;;  %v7023_v60 = vpack.i.bf16 %v2478_v23, %v8055_v1 }
 0x20f   : > { %v1607_v47 = vpop.permute.xlu0 %1606  ;;  %6756 = vmatpush1.bf16.msra.mxu1 %v6755_v21  ;;  %v1874_v46 = vsel %vm1851_vm10, %v1841_v39, %v1514_v7  ;;  %v1842_v11 = vsel %vm1818_vm9, %v1809_v41, %v1423_v19  ;;  %v6761_v10 = vpack.c.bf16 %v3537_v40, %v3536_v14  ;;  %v2484_v43 = vrot.slane %v8941_v36, 1 }
 0x210   : > { %v9273_v28 = vsel %vm575_vm0, %v9261_v32, %v9248_v17  ;;  %v1516_v16 = vpop.permute.xlu1 %1515  ;;  %6757 = vmatprep.subr.bf16.mxu1 %v12004_v38  ;;  %v1907_v3 = vsel %vm1884_vm11, %v1874_v46, %v1607_v47  ;;  %v2481_v47 = vrot.slane %v8949_v20, 1  ;;  %v7043_v52 = vpack.i.bf16 %v8946_v34, %v8949_v20 }
 0x211   : > { %1340 = vrot.lane.b32.xlu0 %v9181_v4, %s12042_s20  ;;  %v1875_v29 = vsel %vm1851_vm10, %v1842_v11, %v1516_v16  ;;  %6666 = vmatprep.mubr.msk.f32.mxu0 %vm1929_vm12, %v1907_v3  ;;  %v3535_v4 = vld [vmem:[%s12040_s3 + $0x68] sm:$0xff]  ;;  %v2480_v16 = vsel %vm734_vm1, %v2477_v45, %v2479_v25  ;;  %v9352_v14 = vsel %vm575_vm0, %v9031_v57, 0.0  ;;  %v9356_v40 = vsel %vm575_vm0, 0.0, %v9037_v18 }
 0x212   : > { %1241 = vrot.lane.b32.xlu1 %v9185_v53, %s12036_s26  ;;  %v2646_v53 = vsel %vm905_vm2, %v2644_v62, %v2645_v35  ;;  %v6758_v35 = vpack.c.bf16 %v3535_v4, %v3534_v33  ;;  %v2482_v62 = vrot.slane %v8946_v34, 1  ;;  %v7033_v11 = vpack.i.bf16 %v2480_v16, %v2478_v23 }
 0x213   : > { %v1609_v12 = vpop.permute.xlu0 %1608  ;;  %v7018_v55 = vpack.i.bf16 %v2646_v53, %v8059_v2  ;;  %v7038_v41 = vpack.i.bf16 %v8970_v30, %v2646_v53  ;;  %v2433_v30 = vsel %vm575_vm0, %v9119_v51, 0.0  ;;  %v2492_v51 = vrot.slane %v9142_v63, 1 }
 0x214   : > { %v1908_v13 = vsel %vm1884_vm11, %v1875_v29, %v1609_v12  ;;  %v9298_v7 = vpop.permute.xlu1 %858  ;;  %6759 = vmatpush1.bf16.msra.mxu1 %v6758_v35  ;;  %v2483_v3 = vsel %vm734_vm1, %v2481_v47, %v2482_v62  ;;  %v9341_v29 = vsel %vm734_vm1, %v2482_v62, %v2484_v43  ;;  %v2487_v47 = vrot.slane %v9054_v54, 1 }
 0x215   : > { %1436 = vrot.lane.b32.xlu0 %v7905_v0, %s12041_s25  ;;  %6667 = vmatmul.mubr.msk.f32.gmra.mrb[22].mxu0 %vm1929_vm12, %v1908_v13  ;;  %v7048_v33 = vpack.i.bf16 %v9341_v29, %v2483_v3  ;;  %s12008_s25 = smov 112   ;;  %v1679_v57 = vsel %vm1655_vm4, %v8765_v56, %v9298_v7  ;;  %v7063_v18 = vpack.i.bf16 %v2483_v3, %v2480_v16 }
 0x216   : > { %1342 = vrot.lane.b32.xlu1 %v9200_v44, %s12042_s20  ;;  %6760 = vmatprep.subr.bf16.mxu1 %v12004_v38  ;;  %v3538_v44 = vld [vmem:[%s12040_s3 + $0x80] sm:$0xff]  ;;  %s12045_s20 = smov 80   ;;  %s11842_s3 = scalar_lea.hbm %s11982_s14, %s6386_s18 }
 0x217   : > { %v9311_v19 = vpop.permute.xlu0 %1029  ;;  %v6764_v39 = vpack.c.bf16 %v3539_v49, %v3538_v44  ;;  %v2489_v49 = vrot.slane %v9352_v14, 1 }
 0x218   : > { %v9314_v48 = vpop.permute.xlu1 %860  ;;  %6762 = vmatpush1.bf16.msra.mxu1 %v6761_v10  ;;  %v7068_v10 = vpack.i.bf16 %v8976_v50, %v8973_v59  ;;  %v9419_v59 = vsel %vm575_vm0, 0.0, %v9125_v15 }
 0x219   : > { %7019 = vrot.lane.b32.xlu0 %v7018_v55, %s12039_s16  ;;  %6763 = vmatprep.subr.bf16.mxu1 %v12004_v38  ;;  %v1680_v62 = vsel %vm1655_vm4, %v8762_v5, %v9314_v48  ;;  %v7078_v5 = vpack.i.bf16 %v9054_v54, %v9356_v40 }
 0x21a   : > { %1529 = vrot.lane.b32.xlu1 %v8055_v1, %s12043_s29 }
 0x21b   : > { %v1126_v21 = vpop.permute.xlu0 %1125 }
 0x21c   : > { %v1032_v26 = vpop.permute.xlu1 %1031  ;;  %6765 = vmatpush1.bf16.msra.mxu1 %v6764_v39 }
 0x21d   : > { %7029 = vrot.lane.b32.xlu0 %v7028_v22, %s12014_s17  ;;  %v2486_v22 = vrot.slane %v9356_v40, 1  ;;  %v1712_v39 = vsel %vm1687_vm5, %v1680_v62, %v1032_v26 }
 0x21e   : > { %7024 = vrot.lane.b32.xlu1 %v7023_v60, %s12036_s26  ;;  %v1711_v60 = vsel %vm1687_vm5, %v1679_v57, %v9311_v19 }
 0x21f   : > { %v1228_v46 = vpop.permute.xlu0 %1227  ;;  %v1744_v56 = vsel %vm1719_vm6, %v1711_v60, %v1126_v21 }
 0x220   : > { %v1128_v36 = vpop.permute.xlu1 %1127  ;;  %v1777_v16 = vsel %vm1752_vm7, %v1744_v56, %v1228_v46 }
 0x221   : > { %7039 = vrot.lane.b32.xlu0 %v7038_v41, %s12006_s23  ;;  %v1745_v19 = vsel %vm1719_vm6, %v1712_v39, %v1128_v36 }
 0x222   : > { %7034 = vrot.lane.b32.xlu1 %v7033_v11, %s12012_s30 }
 0x223   : > { %v1329_v12 = vpop.permute.xlu0 %1328 }
 0x224   : > { %v1230_v4 = vpop.permute.xlu1 %1229  ;;  %v1810_v11 = vsel %vm1785_vm8, %v1777_v16, %v1329_v12  ;;  %v2488_v12 = vsel %vm734_vm1, %v2486_v22, %v2487_v47  ;;  %v2662_v16 = vrot.slane %v2433_v30, 2 }
 0x225   : > { %7049 = vrot.lane.b32.xlu0 %v7048_v33, %s12008_s25  ;;  %v1778_v48 = vsel %vm1752_vm7, %v1745_v19, %v1230_v4  ;;  %v2659_v19 = vrot.slane %v9419_v59, 2 }
 0x226   : > { %7044 = vrot.lane.b32.xlu1 %v7043_v52, %s12010_s1 }
 0x227   : > { %v1425_v45 = vpop.permute.xlu0 %1424 }
 0x228   : > { %v1331_v53 = vpop.permute.xlu1 %1330  ;;  %v6650_v13 = vpop.f32.mrb[10].mxu0  ;;  %v1843_v21 = vsel %vm1818_vm9, %v1810_v11, %v1425_v45  ;;  %v2660_v11 = vrot.slane %v9142_v63, 2 }
 0x229   : > { %v2152_v35 = vadd.f32 %v6650_v13, %v8866_v9  ;;  %v2146_v55 = vpop.f32.mrb[11].mxu0  ;;  %7059 = vrot.lane.b32.xlu0 %v7048_v33, %s12012_s30  ;;  %v1811_v33 = vsel %vm1785_vm8, %v1778_v48, %v1331_v53  ;;  %v2654_v53 = vrot.slane %v9356_v40, 2  ;;  %v2655_v13 = vrot.slane %v9054_v54, 2 }
 0x22a   : > { %v2147_v23 = vadd.f32 %v8866_v9, %v2146_v55  ;;  %7054 = vrot.lane.b32.xlu1 %v7043_v52, %s12014_s17  ;;  %v9400_v52 = vsel %vm734_vm1, %v2487_v47, %v2489_v49  ;;  %v2491_v49 = vrot.slane %v9419_v59, 1 }
 0x22b   : > { %v2266_v25 = vmax.f32 %v2152_v35, 0.0  ;;  %v1518_v44 = vpop.permute.xlu0 %1517  ;;  %v7083_v57 = vpack.i.bf16 %v9400_v52, %v2488_v12 }
 0x22c   : > { %v2265_v9 = vmax.f32 %v2147_v23, 0.0  ;;  %v1427_v43 = vpop.permute.xlu1 %1426  ;;  %v1876_v36 = vsel %vm1851_vm10, %v1843_v21, %v1518_v44  ;;  %v7098_v44 = vpack.i.bf16 %v2488_v12, %v9341_v29  ;;  %v2493_v47 = vsel %vm734_vm1, %v2491_v49, %v2492_v51 }
 0x22d   : > { %v9376_v7 = vrot.slane %v2266_v25, 7  ;;  %7069 = vrot.lane.b32.xlu0 %v7068_v10, %s12006_s23  ;;  %v1844_v4 = vsel %vm1818_vm9, %v1811_v33, %v1427_v43  ;;  %v2657_v25 = vrot.slane %v9352_v14, 2  ;;  %v2494_v14 = vrot.slane %v2433_v30, 1 }
 0x22e   : > { %v9381_v41 = vrot.slane %v2265_v9, 7  ;;  %7064 = vrot.lane.b32.xlu1 %v7063_v18, %s12036_s26  ;;  %v9426_v18 = vsel %vm905_vm2, %v2654_v53, %v2655_v13  ;;  %v9456_v33 = vsel %vm905_vm2, %v2660_v11, %v2662_v16  ;;  %v9465_v12 = vsel %vm575_vm0, %v9248_v17, 0.0  ;;  %v9477_v17 = vld [vmem:[%s12038_s2] ss:$0 sm:$0xff] }
 0x22f   : > { %v1611_v3 = vpop.permute.xlu0 %1610  ;;  %v9432_v15 = vsel %vm905_vm2, %v2655_v13, %v2657_v25  ;;  %v7108_v29 = vpack.i.bf16 %v9426_v18, %v8976_v50  ;;  %v9441_v62 = vsel %vm734_vm1, %v2492_v51, %v2494_v14  ;;  %v2497_v13 = vrot.slane %v9273_v28, 1 }
 0x230   : > { %v9393_v26 = vsel %vm575_vm0, %v9381_v41, %v9376_v7  ;;  %v1520_v46 = vpop.permute.xlu1 %1519  ;;  %v1909_v45 = vsel %vm1884_vm11, %v1876_v36, %v1611_v3  ;;  %v7103_v43 = vpack.i.bf16 %v9432_v15, %v9426_v18  ;;  %v7118_v39 = vpack.i.bf16 %v9441_v62, %v2493_v47 }
 0x231   : > { %7079 = vrot.lane.b32.xlu0 %v7078_v5, %s12010_s1  ;;  %v1877_v35 = vsel %vm1851_vm10, %v1844_v4, %v1520_v46  ;;  %6669 = vmatprep.mubr.msk.f32.mxu0 %vm1929_vm12, %v1909_v45  ;;  %v9453_v46 = vsel %vm905_vm2, %v2659_v19, %v2660_v11  ;;  %v9460_v36 = vsel %vm575_vm0, 0.0, %v9261_v32  ;;  %v7133_v32 = vpack.i.bf16 %v2493_v47, %v9400_v52 }
 0x232   : > { %7074 = vrot.lane.b32.xlu1 %v7073_v27, %s12039_s16  ;;  %v7138_v45 = vpack.i.bf16 %v9456_v33, %v9453_v46  ;;  %v2496_v53 = vrot.slane %v9460_v36, 1  ;;  %v7148_v49 = vpack.i.bf16 %v9273_v28, %v9460_v36  ;;  %v7143_v51 = vpack.i.bf16 %v9453_v46, %v9432_v15 }
 0x233   : > { %v1613_v55 = vpop.permute.xlu0 %1612 }
 0x234   : > { %v1910_v23 = vsel %vm1884_vm11, %v1877_v35, %v1613_v55  ;;  %v863_v10 = vpop.permute.xlu1 %862  ;;  %v2498_v16 = vsel %vm734_vm1, %v2496_v53, %v2497_v13  ;;  %v2665_v53 = vrot.slane %v9273_v28, 2 }
 0x235   : > { %7089 = vrot.lane.b32.xlu0 %v7078_v5, %s12014_s17  ;;  %6670 = vmatmul.mubr.msk.f32.gmra.mrb[24].mxu0 %vm1929_vm12, %v1910_v23  ;;  %v7113_v5 = vpack.i.bf16 %v9142_v63, %v9419_v59  ;;  %v2499_v23 = vrot.slane %v9465_v12, 1 }
 0x236   : > { %7084 = vrot.lane.b32.xlu1 %v7083_v57, %s12008_s25 }
 0x237   : > { %v1034_v27 = vpop.permute.xlu0 %1033  ;;  %v9497_v11 = vsel %vm734_vm1, %v2497_v13, %v2499_v23  ;;  %v2435_v23 = vsel %vm575_vm0, %v9376_v7, 0.0 }
 0x238   : > { %v865_v22 = vpop.permute.xlu1 %864 }
 0x239   : > { %7099 = vrot.lane.b32.xlu0 %v7098_v44, %s12036_s26  ;;  %v1681_v44 = vsel %vm1655_vm4, %v8842_v8, %v863_v10  ;;  %v1682_v19 = vsel %vm1655_vm4, %v8839_v24, %v865_v22 }
 0x23a   : > { %7094 = vrot.lane.b32.xlu1 %v7083_v57, %s12012_s30 }
 0x23b   : > { %v1130_v60 = vpop.permute.xlu0 %1129 }
 0x23c   : > { %v1036_v9 = vpop.permute.xlu1 %1035 }
 0x23d   : > { %7109 = vrot.lane.b32.xlu0 %v7108_v29, %s12039_s16  ;;  %v2667_v29 = vrot.slane %v9465_v12, 2  ;;  %v1714_v12 = vsel %vm1687_vm5, %v1682_v19, %v1036_v9 }
 0x23e   : > { %7104 = vrot.lane.b32.xlu1 %v7103_v43, %s12006_s23  ;;  %v1713_v43 = vsel %vm1687_vm5, %v1681_v44, %v1034_v27 }
 0x23f   : > { %v1232_v56 = vpop.permute.xlu0 %1231  ;;  %v1746_v8 = vsel %vm1719_vm6, %v1713_v43, %v1130_v60 }
 0x240   : > { %v1132_v3 = vpop.permute.xlu1 %1131  ;;  %v1779_v27 = vsel %vm1752_vm7, %v1746_v8, %v1232_v56  ;;  %v7153_v56 = vpack.i.bf16 %v9497_v11, %v2498_v16 }
 0x241   : > { %7119 = vrot.lane.b32.xlu0 %v7118_v39, %s12008_s25  ;;  %v1747_v24 = vsel %vm1719_vm6, %v1714_v12, %v1132_v3 }
 0x242   : > { %7114 = vrot.lane.b32.xlu1 %v7113_v5, %s12010_s1 }
 0x243   : > { %v1333_v48 = vpop.permute.xlu0 %1332 }
 0x244   : > { %v1234_v21 = vpop.permute.xlu1 %1233  ;;  %v1812_v22 = vsel %vm1785_vm8, %v1779_v27, %v1333_v48  ;;  %v2670_v27 = vrot.slane %v9393_v26, 2 }
 0x245   : > { %7129 = vrot.lane.b32.xlu0 %v7118_v39, %s12012_s30 }
 0x246   : > { %7124 = vrot.lane.b32.xlu1 %v7113_v5, %s12014_s17  ;;  %v2664_v5 = vrot.slane %v9460_v36, 2 }
 0x247   : > { %v1429_v4 = vpop.permute.xlu0 %1428 }
 0x248   : > { %v1335_v35 = vpop.permute.xlu1 %1334  ;;  %v6653_v55 = vpop.f32.mrb[12].mxu0  ;;  %v1845_v13 = vsel %vm1818_vm9, %v1812_v22, %v1429_v4 }
 0x249   : > { %v2162_v57 = vadd.f32 %v9477_v17, %v6653_v55  ;;  %v2156_v25 = vpop.f32.mrb[13].mxu0  ;;  %7139 = vrot.lane.b32.xlu0 %v7138_v45, %s12006_s23  ;;  %v1780_v55 = vsel %vm1752_vm7, %v1747_v24, %v1234_v21 }
 0x24a   : > { %v2157_v30 = vadd.f32 %v9477_v17, %v2156_v25  ;;  %7134 = vrot.lane.b32.xlu1 %v7133_v32, %s12036_s26  ;;  %v1813_v3 = vsel %vm1785_vm8, %v1780_v55, %v1335_v35  ;;  %v2504_v35 = vrot.slane %v2435_v23, 1 }
 0x24b   : > { %v2268_v52 = vmax.f32 %v2162_v57, 0.0  ;;  %v1522_v14 = vpop.permute.xlu0 %1521  ;;  %v9516_v57 = vsel %vm575_vm0, 0.0, %v9381_v41  ;;  %v7168_v41 = vpack.i.bf16 %v2498_v16, %v9441_v62 }
 0x24c   : > { %v2267_v47 = vmax.f32 %v2157_v30, 0.0  ;;  %v1431_v39 = vpop.permute.xlu1 %1430  ;;  %v1878_v48 = vsel %vm1851_vm10, %v1845_v13, %v1522_v14  ;;  %v9528_v30 = vsel %vm905_vm2, %v2664_v5, %v2665_v53  ;;  %v2501_v44 = vrot.slane %v9516_v57, 1 }
 0x24d   : > { %v2338_v10 = vrot.slane %v2268_v52, 7  ;;  %7149 = vrot.lane.b32.xlu0 %v7148_v49, %s12010_s1  ;;  %v1846_v21 = vsel %vm1818_vm9, %v1813_v3, %v1431_v39  ;;  %v2502_v52 = vrot.slane %v9393_v26, 1  ;;  %v7178_v43 = vpack.i.bf16 %v9528_v30, %v9456_v33 }
 0x24e   : > { %v2337_v45 = vrot.slane %v2267_v47, 7  ;;  %7144 = vrot.lane.b32.xlu1 %v7143_v51, %s12039_s16  ;;  %v9536_v51 = vsel %vm905_vm2, %v2665_v53, %v2667_v29  ;;  %v2672_v5 = vrot.slane %v2435_v23, 2  ;;  %v2669_v12 = vrot.slane %v9516_v57, 2 }
 0x24f   : > { %v1615_v60 = vpop.permute.xlu0 %1614  ;;  %v7173_v39 = vpack.i.bf16 %v9536_v51, %v9528_v30  ;;  %v2503_v16 = vsel %vm734_vm1, %v2501_v44, %v2502_v52  ;;  %v9545_v19 = vsel %vm734_vm1, %v2502_v52, %v2504_v35  ;;  %v7183_v24 = vpack.i.bf16 %v9393_v26, %v9516_v57 }
 0x250   : > { %v9509_v32 = vsel %vm575_vm0, %v2337_v45, %v2338_v10  ;;  %v1524_v9 = vpop.permute.xlu1 %1523  ;;  %v1911_v4 = vsel %vm1884_vm11, %v1878_v48, %v1615_v60  ;;  %v7188_v8 = vpack.i.bf16 %v9545_v19, %v2503_v16  ;;  %v9557_v55 = vsel %vm905_vm2, %v2669_v12, %v2670_v27 }
 0x251   : > { %7159 = vrot.lane.b32.xlu0 %v7148_v49, %s12014_s17  ;;  %v1879_v25 = vsel %vm1851_vm10, %v1846_v21, %v1524_v9  ;;  %6672 = vmatprep.mubr.msk.f32.mxu0 %vm1929_vm12, %v1911_v4  ;;  %v9560_v13 = vsel %vm905_vm2, %v2670_v27, %v2672_v5  ;;  %v2436_v9 = vsel %vm575_vm0, %v2338_v10, 0.0  ;;  %v7203_v21 = vpack.i.bf16 %v2503_v16, %v9497_v11 }
 0x252   : > { %7154 = vrot.lane.b32.xlu1 %v7153_v56, %s12008_s25  ;;  %v7208_v3 = vpack.i.bf16 %v9560_v13, %v9557_v55  ;;  %v2509_v4 = vrot.slane %v2436_v9, 1  ;;  %v7213_v11 = vpack.i.bf16 %v9557_v55, %v9536_v51 }
 0x253   : > { %v1617_v7 = vpop.permute.xlu0 %1616 }
 0x254   : > { %v1912_v14 = vsel %vm1884_vm11, %v1879_v25, %v1617_v7  ;;  %v867_v49 = vpop.permute.xlu1 %866  ;;  %v2507_v7 = vrot.slane %v9509_v32, 1 }
 0x255   : > { %7169 = vrot.lane.b32.xlu0 %v7168_v41, %s12036_s26  ;;  %6673 = vmatmul.mubr.msk.f32.gmra.mrb[26].mxu0 %vm1929_vm12, %v1912_v14  ;;  %v2677_v14 = vrot.slane %v2436_v9, 2  ;;  %v1683_v12 = vsel %vm1655_vm4, %v8924_v31, %v867_v49 }
 0x256   : > { %7164 = vrot.lane.b32.xlu1 %v7153_v56, %s12012_s30  ;;  %v9565_v56 = vsel %vm575_vm0, 0.0, %v2337_v45  ;;  %v2675_v45 = vrot.slane %v9509_v32, 2 }
 0x257   : > { %v1038_v62 = vpop.permute.xlu0 %1037  ;;  %v2506_v25 = vrot.slane %v9565_v56, 1  ;;  %v2674_v10 = vrot.slane %v9565_v56, 2  ;;  %v7218_v35 = vpack.i.bf16 %v9509_v32, %v9565_v56 }
 0x258   : > { %v869_v47 = vpop.permute.xlu1 %868  ;;  %v9602_v31 = vsel %vm905_vm2, %v2675_v45, %v2677_v14 }
 0x259   : > { %7179 = vrot.lane.b32.xlu0 %v7178_v43, %s12039_s16  ;;  %v2508_v16 = vsel %vm734_vm1, %v2506_v25, %v2507_v7  ;;  %v9592_v9 = vsel %vm905_vm2, %v2674_v10, %v2675_v45 }
 0x25a   : > { %7174 = vrot.lane.b32.xlu1 %v7173_v39, %s12006_s23 }
 0x25b   : > { %v1134_v29 = vpop.permute.xlu0 %1133 }
 0x25c   : > { %v1040_v53 = vpop.permute.xlu1 %1039 }
 0x25d   : > { %7189 = vrot.lane.b32.xlu0 %v7188_v8, %s12008_s25 }
 0x25e   : > { %7184 = vrot.lane.b32.xlu1 %v7183_v24, %s12010_s1 }
 0x25f   : > { %v1236_v22 = vpop.permute.xlu0 %1235 }
 0x260   : > { %v1136_v60 = vpop.permute.xlu1 %1135 }
 0x261   : > { %7199 = vrot.lane.b32.xlu0 %v7188_v8, %s12012_s30  ;;  %v9585_v8 = vsel %vm734_vm1, %v2507_v7, %v2509_v4 }
 0x262   : > { %7194 = vrot.lane.b32.xlu1 %v7183_v24, %s12014_s17  ;;  %v7223_v7 = vpack.i.bf16 %v9585_v8, %v2508_v16 }
 0x263   : > { %v1337_v23 = vpop.permute.xlu0 %1336 }
 0x264   : > { %v1238_v48 = vpop.permute.xlu1 %1237 }
 0x265   : > { %7209 = vrot.lane.b32.xlu0 %v7208_v3, %s12006_s23  ;;  %v1715_v3 = vsel %vm1687_vm5, %v1683_v12, %v1038_v62 }
 0x266   : > { %7204 = vrot.lane.b32.xlu1 %v7203_v21, %s12036_s26  ;;  %v1684_v21 = vsel %vm1655_vm4, %v8931_v6, %v869_v47  ;;  %v7238_v6 = vpack.i.bf16 %v2508_v16, %v9545_v19 }
 0x267   : > { %v1433_v41 = vpop.permute.xlu0 %1432 }
 0x268   : > { %v1339_v44 = vpop.permute.xlu1 %1338  ;;  %v6656_v52 = vpop.f32.mrb[14].mxu0 }
 0x269   : > { %v2172_v43 = vadd.f32 %v9477_v17, %v6656_v52  ;;  %v2166_v39 = vpop.f32.mrb[15].mxu0  ;;  %7219 = vrot.lane.b32.xlu0 %v7218_v35, %s12010_s1  ;;  %v1748_v52 = vsel %vm1719_vm6, %v1715_v3, %v1134_v29 }
 0x26a   : > { %v2167_v5 = vadd.f32 %v9477_v17, %v2166_v39  ;;  %7214 = vrot.lane.b32.xlu1 %v7213_v11, %s12039_s16  ;;  %v1716_v11 = vsel %vm1687_vm5, %v1684_v21, %v1040_v53  ;;  %v1781_v49 = vsel %vm1752_vm7, %v1748_v52, %v1236_v22 }
 0x26b   : > { %v2270_v27 = vmax.f32 %v2172_v43, 0.0  ;;  %v1526_v24 = vpop.permute.xlu0 %1525  ;;  %v1749_v62 = vsel %vm1719_vm6, %v1716_v11, %v1136_v60  ;;  %v1814_v47 = vsel %vm1785_vm8, %v1781_v49, %v1337_v23 }
 0x26c   : > { %v2269_v25 = vmax.f32 %v2167_v5, 0.0  ;;  %v1435_v4 = vpop.permute.xlu1 %1434  ;;  %v1782_v29 = vsel %vm1752_vm7, %v1749_v62, %v1238_v48 }
 0x26d   : > { %v2341_v39 = vrot.slane %v2270_v27, 7  ;;  %7229 = vrot.lane.b32.xlu0 %v7218_v35, %s12014_s17  ;;  %v1847_v35 = vsel %vm1818_vm9, %v1814_v47, %v1433_v41  ;;  %v1815_v5 = vsel %vm1785_vm8, %v1782_v29, %v1339_v44  ;;  %v7248_v44 = vpack.i.bf16 %v9592_v9, %v9560_v13 }
 0x26e   : > { %v2340_v10 = vrot.slane %v2269_v25, 7  ;;  %7224 = vrot.lane.b32.xlu1 %v7223_v7, %s12008_s25  ;;  %v1880_v48 = vsel %vm1851_vm10, %v1847_v35, %v1526_v24  ;;  %v1848_v41 = vsel %vm1818_vm9, %v1815_v5, %v1435_v4  ;;  %v7243_v24 = vpack.i.bf16 %v9602_v31, %v9592_v9 }
 0x26f   : > { %v2437_v53 = vsel %vm575_vm0, %v2341_v39, 0.0  ;;  %v1619_v43 = vpop.permute.xlu0 %1618 }
 0x270   : > { %v2514_v45 = vrot.slane %v2437_v53, 1  ;;  %v9613_v14 = vsel %vm575_vm0, %v2340_v10, %v2341_v39  ;;  %v9616_v22 = vsel %vm575_vm0, 0.0, %v2340_v10  ;;  %v1528_v60 = vpop.permute.xlu1 %1527  ;;  %v1913_v16 = vsel %vm1884_vm11, %v1880_v48, %v1619_v43 }
 0x271   : > { %v2511_v19 = vrot.slane %v9616_v22, 1  ;;  %v2512_v23 = vrot.slane %v9613_v14, 1  ;;  %7239 = vrot.lane.b32.xlu0 %v7238_v6, %s12036_s26  ;;  %v1881_v12 = vsel %vm1851_vm10, %v1848_v41, %v1528_v60  ;;  %6675 = vmatprep.mubr.msk.f32.mxu0 %vm1929_vm12, %v1913_v16  ;;  %v2682_v11 = vrot.slane %v2437_v53, 2 }
 0x272   : > { %7234 = vrot.lane.b32.xlu1 %v7223_v7, %s12012_s30  ;;  %v2679_v39 = vrot.slane %v9616_v22, 2  ;;  %v2680_v49 = vrot.slane %v9613_v14, 2  ;;  %v7253_v10 = vpack.i.bf16 %v9613_v14, %v9616_v22 }
 0x273   : > { %v1621_v27 = vpop.permute.xlu0 %1620  ;;  %v2513_v25 = vsel %vm734_vm1, %v2511_v19, %v2512_v23  ;;  %v9635_v4 = vsel %vm734_vm1, %v2512_v23, %v2514_v45 }
 0x274   : > { %v1914_v3 = vsel %vm1884_vm11, %v1881_v12, %v1621_v27  ;;  %v871_v21 = vpop.permute.xlu1 %870  ;;  %v7258_v52 = vpack.i.bf16 %v9635_v4, %v2513_v25  ;;  %v9648_v29 = vsel %vm905_vm2, %v2679_v39, %v2680_v49  ;;  %v9651_v43 = vsel %vm905_vm2, %v2680_v49, %v2682_v11 }
 0x275   : > { %7249 = vrot.lane.b32.xlu0 %v7248_v44, %s12039_s16  ;;  %6676 = vmatmul.mubr.msk.f32.gmra.mrb[28].mxu0 %vm1929_vm12, %v1914_v3  ;;  %v7278_v35 = vpack.i.bf16 %v9651_v43, %v9648_v29  ;;  %v7273_v60 = vpack.i.bf16 %v2513_v25, %v9585_v8  ;;  %v7283_v23 = vpack.i.bf16 %v9648_v29, %v9602_v31 }
 0x276   : > { %7244 = vrot.lane.b32.xlu1 %v7243_v24, %s12006_s23  ;;  %v1685_v16 = vsel %vm1655_vm4, %v9047_v42, %v871_v21 }
 0x277   : > { %v1042_v7 = vpop.permute.xlu0 %1041 }
 0x278   : > { %v873_v62 = vpop.permute.xlu1 %872  ;;  %v1717_v27 = vsel %vm1687_vm5, %v1685_v16, %v1042_v7 }
 0x279   : > { %7259 = vrot.lane.b32.xlu0 %v7258_v52, %s12008_s25  ;;  %v1686_v48 = vsel %vm1655_vm4, %v9044_v61, %v873_v62  ;;  %vm3456_vm4 = vcmask 785408  }
 0x27a   : > { %7254 = vrot.lane.b32.xlu1 %v7253_v10, %s12010_s1 }
 0x27b   : > { %v1138_v6 = vpop.permute.xlu0 %1137 }
 0x27c   : > { %v1044_v47 = vpop.permute.xlu1 %1043  ;;  %v1750_v24 = vsel %vm1719_vm6, %v1717_v27, %v1138_v6 }
 0x27d   : > { %7269 = vrot.lane.b32.xlu0 %v7258_v52, %s12012_s30  ;;  %v1718_v41 = vsel %vm1687_vm5, %v1686_v48, %v1044_v47  ;;  %vm3489_vm5 = vcmask 916480  }
 0x27e   : > { %7264 = vrot.lane.b32.xlu1 %v7253_v10, %s12014_s17 }
 0x27f   : > { %v1240_v53 = vpop.permute.xlu0 %1239 }
 0x280   : > { %v1140_v45 = vpop.permute.xlu1 %1139  ;;  %v1783_v52 = vsel %vm1752_vm7, %v1750_v24, %v1240_v53 }
 0x281   : > { %7279 = vrot.lane.b32.xlu0 %v7278_v35, %s12006_s23  ;;  %v1751_v8 = vsel %vm1719_vm6, %v1718_v41, %v1140_v45  ;;  %vm4114_vm6 = vcmask 1041408  }
 0x282   : > { %7274 = vrot.lane.b32.xlu1 %v7273_v60, %s12036_s26 }
 0x283   : > { %v1341_v5 = vpop.permute.xlu0 %1340 }
 0x284   : > { %v1242_v19 = vpop.permute.xlu1 %1241  ;;  %v1816_v42 = vsel %vm1785_vm8, %v1783_v52, %v1341_v5 }
 0x285   : > { %v1784_v44 = vsel %vm1752_vm7, %v1751_v8, %v1242_v19 }
 0x286   : > { %7284 = vrot.lane.b32.xlu1 %v7283_v23, %s12039_s16 }
 0x287   : > { %v1437_v12 = vpop.permute.xlu0 %1436 }
 0x288   : > { %v1343_v3 = vpop.permute.xlu1 %1342  ;;  %v6659_v61 = vpop.f32.mrb[16].mxu0  ;;  %v1849_v7 = vsel %vm1818_vm9, %v1816_v42, %v1437_v12 }
 0x289   : > { %v1817_v25 = vsel %vm1785_vm8, %v1784_v44, %v1343_v3  ;;  %v2182_v11 = vadd.f32 %v9477_v17, %v6659_v61  ;;  %v2176_v39 = vpop.f32.mrb[17].mxu0  ;;  %vm4123_vm8 = vcmask 1042432  }
 0x28a   : > { %v2177_v21 = vadd.f32 %v9477_v17, %v2176_v39  ;;  %v1850_v62 = vsel %vm1818_vm9, %v1817_v25, %v1437_v12  ;;  %vm4140_vm9 = vcmask 1044480  }
 0x28b   : > { %v9677_v49 = vpop.permute.xlu0 %7019  ;;  %v2272_v10 = vmax.f32 %v2182_v11, 0.0 }
 0x28c   : > { %v7021_v6 = vunpack.i.l.bf16 %v9677_v49  ;;  %v1530_v47 = vpop.permute.xlu1 %1529  ;;  %v2271_v35 = vmax.f32 %v2177_v21, 0.0 }
 0x28d   : > { %v1882_v53 = vsel %vm1851_vm10, %v1849_v7, %v1530_v47  ;;  %v1883_v45 = vsel %vm1851_vm10, %v1850_v62, %v1530_v47  ;;  %v2344_v60 = vrot.slane %v2272_v10, 7 }
 0x28e   : > { %v1915_v5 = vsel %vm1884_vm11, %v1882_v53, %v7021_v6  ;;  %v1916_v19 = vsel %vm1884_vm11, %v1883_v45, %v7021_v6  ;;  %v2343_v23 = vrot.slane %v2271_v35, 7 }
 0x28f   : > { %v7030_v48 = vpop.permute.xlu0 %7029  ;;  %6678 = vmatprep.mubr.msk.f32.mxu0 %vm1929_vm12, %v1915_v5  ;;  %v2438_v41 = vsel %vm575_vm0, %v2344_v60, 0.0 }
 0x290   : > { %v7025_v16 = vpop.permute.xlu1 %7024  ;;  %6679 = vmatmul.mubr.msk.f32.gmra.mrb[30].mxu0 %vm1929_vm12, %v1916_v19  ;;  %v2519_v8 = vrot.slane %v2438_v41, 1  ;;  %v9690_v12 = vsel %vm575_vm0, %v2343_v23, %v2344_v60  ;;  %v9693_v27 = vsel %vm575_vm0, 0.0, %v2343_v23  ;;  %v7032_v52 = vunpack.i.h.bf16 %v7030_v48 }
 0x291   : > { %v2516_v44 = vrot.slane %v9693_v27, 1  ;;  %v2517_v3 = vrot.slane %v9690_v12, 1  ;;  %v7026_v24 = vunpack.i.l.bf16 %v7025_v16  ;;  %v7288_v25 = vpack.i.bf16 %v9690_v12, %v9693_v27 }
 0x292   : > { %v7031_v21 = vunpack.i.l.bf16 %v7030_v48  ;;  %v2687_v47 = vrot.slane %v2438_v41, 2  ;;  %v2684_v35 = vrot.slane %v9693_v27, 2  ;;  %v2685_v60 = vrot.slane %v9690_v12, 2 }
 0x293   : > { %v7040_v61 = vpop.permute.xlu0 %7039  ;;  %v2518_v39 = vsel %vm734_vm1, %v2516_v44, %v2517_v3  ;;  %v9701_v42 = vsel %vm734_vm1, %v2517_v3, %v2519_v8  ;;  %v3295_v7 = vsel %vm1752_vm7, 0.0, %v7026_v24  ;;  %7289 = vrot.lane.b32.xlu0 %v7288_v25, %s12010_s1 }
 0x294   : > { %v7035_v11 = vpop.permute.xlu1 %7034  ;;  %v9707_v53 = vsel %vm1884_vm11, %v3295_v7, %v7021_v6  ;;  %v7293_v45 = vpack.i.bf16 %v9701_v42, %v2518_v39  ;;  %v7041_v48 = vunpack.i.l.bf16 %v7040_v61  ;;  %v7027_v6 = vunpack.i.h.bf16 %v7025_v16 }
 0x295   : > { %v7037_v62 = vunpack.i.h.bf16 %v7035_v11  ;;  %v7036_v10 = vunpack.i.l.bf16 %v7035_v11  ;;  %v3358_v5 = vsel %vm3357_vm13, %v9707_v53, %v7031_v21  ;;  %v3359_v19 = vsel %vm3357_vm13, %v9707_v53, %v7032_v52 }
 0x296   : > { %7294 = vrot.lane.b32.xlu1 %v7293_v45, %s12008_s25  ;;  %v7042_v11 = vunpack.i.h.bf16 %v7040_v61  ;;  %v7308_v7 = vpack.i.bf16 %v2518_v39, %v9635_v4  ;;  %v9726_v16 = vsel %vm905_vm2, %v2685_v60, %v2687_v47  ;;  %v3296_v47 = vsel %vm1752_vm7, %v9243_v37, %v7027_v6 }
 0x297   : > { %v7050_v23 = vpop.permute.xlu0 %7049  ;;  %v3391_v8 = vsel %vm3390_vm14, %v3358_v5, %v7036_v10  ;;  %v3392_v44 = vsel %vm3390_vm14, %v3359_v19, %v7037_v62  ;;  %7299 = vrot.lane.b32.xlu0 %v7288_v25, %s12014_s17  ;;  %v9723_v5 = vsel %vm905_vm2, %v2684_v35, %v2685_v60 }
 0x298   : > { %v7045_v41 = vpop.permute.xlu1 %7044  ;;  %v7051_v21 = vunpack.i.l.bf16 %v7050_v23  ;;  %v3424_v52 = vsel %vm3423_vm15, %v3391_v8, %v7041_v48  ;;  %v3425_v61 = vsel %vm3423_vm15, %v3392_v44, %v7042_v11  ;;  %v7052_v39 = vunpack.i.h.bf16 %v7050_v23 }
 0x299   : > { %v7047_v3 = vunpack.i.h.bf16 %v7045_v41  ;;  %v7046_v24 = vunpack.i.l.bf16 %v7045_v41  ;;  %v7313_v35 = vpack.i.bf16 %v9726_v16, %v9723_v5  ;;  %v7318_v60 = vpack.i.bf16 %v9723_v5, %v9651_v43 }
 0x29a   : > { %7304 = vrot.lane.b32.xlu1 %v7293_v45, %s12012_s30  ;;  %v7022_v48 = vunpack.i.h.bf16 %v9677_v49 }
 0x29b   : > { %v7060_v38 = vpop.permute.xlu0 %7059  ;;  %v3457_v10 = vsel %vm3456_vm4, %v3424_v52, %v7046_v24  ;;  %7309 = vrot.lane.b32.xlu0 %v7308_v7, %s12036_s26  ;;  %v3458_v4 = vsel %vm3456_vm4, %v3425_v61, %v7047_v3 }
 0x29c   : > { %v7055_v25 = vpop.permute.xlu1 %7054  ;;  %v3490_v62 = vsel %vm3489_vm5, %v3457_v10, %v7051_v21  ;;  %v3491_v23 = vsel %vm3489_vm5, %v3458_v4, %v7052_v39  ;;  %v7061_v44 = vunpack.i.l.bf16 %v7060_v38  ;;  %v7062_v10 = vunpack.i.h.bf16 %v7060_v38 }
 0x29d   : > { %3674 = vmatmul.mubr.f32.vlgmr.msra.gmra.mrb[0].mxu1 %v3490_v62  ;;  %v7056_v45 = vunpack.i.l.bf16 %v7055_v25  ;;  %v7057_v11 = vunpack.i.h.bf16 %v7055_v25 }
 0x29e   : > { %6306 = vmatprep.mubr.msk.f32.mxu1 %vm1752_vm7, %v8976_v50  ;;  %7314 = vrot.lane.b32.xlu1 %v7313_v35, %s12006_s23  ;;  %v3327_v50 = vsel %vm1884_vm11, %v3296_v47, %v7022_v48 }
 0x29f   : > { %v7070_v19 = vpop.permute.xlu0 %7069  ;;  %7319 = vrot.lane.b32.xlu0 %v7318_v60, %s12039_s16  ;;  %v3360_v37 = vsel %vm3357_vm13, %v3327_v50, %v7056_v45 }
 0x2a0   : > { %v7065_v8 = vpop.permute.xlu1 %7064  ;;  %v7071_v49 = vunpack.i.l.bf16 %v7070_v19  ;;  %v3393_v7 = vsel %vm3390_vm14, %v3360_v37, %v7061_v44  ;;  %v7072_v4 = vunpack.i.h.bf16 %v7070_v19 }
 0x2a1   : > { %3679 = vmatmul.mubr.f32.gmra.mrb[2].mxu1 %v3491_v23  ;;  %v7066_v41 = vunpack.i.l.bf16 %v7065_v8  ;;  %v7067_v19 = vunpack.i.h.bf16 %v7065_v8 }
 0x2a2   : > { %6307 = vmatprep.mubr.msk.f32.mxu1 %vm1752_vm7, %v9426_v18  ;;  %v3426_v25 = vsel %vm3423_vm15, %v3393_v7, %v7071_v49 }
 0x2a3   : > { %v7080_v6 = vpop.permute.xlu0 %7079  ;;  %v3297_v21 = vsel %vm1752_vm7, %v8896_v58, %v7066_v41 }
 0x2a4   : > { %v7075_v3 = vpop.permute.xlu1 %7074  ;;  %v7081_v52 = vunpack.i.l.bf16 %v7080_v6  ;;  %v7082_v48 = vunpack.i.h.bf16 %v7080_v6 }
 0x2a5   : > { %v7076_v24 = vunpack.i.l.bf16 %v7075_v3 }
 0x2a6   : > { %v3459_v38 = vsel %vm3456_vm4, %v3426_v25, %v7081_v52 }
 0x2a7   : > { %v3328_v62 = vsel %vm1884_vm11, %v3297_v21, %v7076_v24  ;;  %v7090_v61 = vpop.permute.xlu0 %7089 }
 0x2a8   : > { %v3361_v18 = vsel %vm3357_vm13, %v3328_v62, %v7057_v11  ;;  %v7085_v39 = vpop.permute.xlu1 %7084  ;;  %v6662_v35 = vpop.f32.mrb[18].mxu0  ;;  %v7077_v11 = vunpack.i.h.bf16 %v7075_v3  ;;  %v7091_v6 = vunpack.i.l.bf16 %v7090_v61  ;;  %v7092_v25 = vunpack.i.h.bf16 %v7090_v61 }
 0x2a9   : > { %v7086_v47 = vunpack.i.l.bf16 %v7085_v39  ;;  %v2192_v45 = vadd.f32 %v9477_v17, %v6662_v35  ;;  %v2186_v60 = vpop.f32.mrb[19].mxu0  ;;  %v3394_v58 = vsel %vm3390_vm14, %v3361_v18, %v7062_v10  ;;  %v7087_v41 = vunpack.i.h.bf16 %v7085_v39 }
 0x2aa   : > { %v2187_v23 = vadd.f32 %v9477_v17, %v2186_v60  ;;  %v3427_v50 = vsel %vm3423_vm15, %v3394_v58, %v7072_v4  ;;  %v3298_v10 = vsel %vm1752_vm7, %v8949_v20, %v7067_v19 }
 0x2ab   : > { %v2274_v37 = vmax.f32 %v2192_v45, 0.0  ;;  %v9760_v44 = vpop.permute.xlu0 %7099  ;;  %v3492_v24 = vsel %vm3489_vm5, %v3459_v38, %v7086_v47  ;;  %v3460_v49 = vsel %vm3456_vm4, %v3427_v50, %v7082_v48  ;;  %v3329_v35 = vsel %vm1884_vm11, %v3298_v10, %v7077_v11 }
 0x2ac   : > { %v2273_v21 = vmax.f32 %v2187_v23, 0.0  ;;  %v7095_v62 = vpop.permute.xlu1 %7094  ;;  %3684 = vmatmul.mubr.f32.gmra.mrb[4].mxu1 %v3492_v24  ;;  %v7101_v8 = vunpack.i.l.bf16 %v9760_v44  ;;  %v3493_v39 = vsel %vm3489_vm5, %v3460_v49, %v7087_v41  ;;  %v3362_v20 = vsel %vm3357_vm13, %v3329_v35, %v7091_v6 }
 0x2ad   : > { %v2347_v7 = vrot.slane %v2274_v37, 7  ;;  %6308 = vmatprep.mubr.msk.f32.mxu1 %vm1752_vm7, %v9432_v15  ;;  %v7096_v18 = vunpack.i.l.bf16 %v7095_v62  ;;  %v7097_v38 = vunpack.i.h.bf16 %v7095_v62 }
 0x2ae   : > { %v2346_v52 = vrot.slane %v2273_v21, 7  ;;  %v3299_v23 = vsel %vm1752_vm7, %v8946_v34, %v7101_v8 }
 0x2af   : > { %v2439_v4 = vsel %vm575_vm0, %v2347_v7, 0.0  ;;  %v9770_v3 = vpop.permute.xlu0 %7109  ;;  %v3395_v41 = vsel %vm3390_vm14, %v3362_v20, %v7096_v18 }
 0x2b0   : > { %v2524_v47 = vrot.slane %v2439_v4, 1  ;;  %v9775_v45 = vsel %vm575_vm0, %v2346_v52, %v2347_v7  ;;  %v9778_v15 = vsel %vm575_vm0, 0.0, %v2346_v52  ;;  %v7105_v60 = vpop.permute.xlu1 %7104  ;;  %3689 = vmatmul.mubr.f32.gmra.mrb[6].mxu1 %v3493_v39  ;;  %v7111_v50 = vunpack.i.l.bf16 %v9770_v3 }
 0x2b1   : > { %v2521_v58 = vrot.slane %v9778_v15, 1  ;;  %v2522_v48 = vrot.slane %v9775_v45, 1  ;;  %6309 = vmatprep.mubr.msk.f32.mxu1 %vm1752_vm7, %v9453_v46  ;;  %v7106_v19 = vunpack.i.l.bf16 %v7105_v60  ;;  %v7323_v61 = vpack.i.bf16 %v9775_v45, %v9778_v15 }
 0x2b2   : > { %v2692_v21 = vrot.slane %v2439_v4, 2  ;;  %v2689_v46 = vrot.slane %v9778_v15, 2  ;;  %v3330_v34 = vsel %vm1884_vm11, %v3299_v23, %v7111_v50  ;;  %v7107_v62 = vunpack.i.h.bf16 %v7105_v60 }
 0x2b3   : > { %v7120_v37 = vpop.permute.xlu0 %7119  ;;  %v2523_v24 = vsel %vm734_vm1, %v2521_v58, %v2522_v48  ;;  %v9793_v11 = vsel %vm734_vm1, %v2522_v48, %v2524_v47  ;;  %v3363_v6 = vsel %vm3357_vm13, %v3330_v34, %v7092_v25  ;;  %7324 = vrot.lane.b32.xlu1 %v7323_v61, %s12010_s1  ;;  %v2690_v10 = vrot.slane %v9775_v45, 2 }
 0x2b4   : > { %v7115_v49 = vpop.permute.xlu1 %7114  ;;  %v7328_v8 = vpack.i.bf16 %v9793_v11, %v2523_v24  ;;  %v7121_v18 = vunpack.i.l.bf16 %v7120_v37  ;;  %v3428_v39 = vsel %vm3423_vm15, %v3395_v41, %v7106_v19  ;;  %v3396_v4 = vsel %vm3390_vm14, %v3363_v6, %v7097_v38 }
 0x2b5   : > { %v7117_v7 = vunpack.i.h.bf16 %v7115_v49  ;;  %v7116_v52 = vunpack.i.l.bf16 %v7115_v49  ;;  %v3429_v60 = vsel %vm3423_vm15, %v3396_v4, %v7107_v62  ;;  %v7102_v58 = vunpack.i.h.bf16 %v9760_v44 }
 0x2b6   : > { %7329 = vrot.lane.b32.xlu0 %v7328_v8, %s12008_s25  ;;  %v7112_v23 = vunpack.i.h.bf16 %v9770_v3  ;;  %v7122_v38 = vunpack.i.h.bf16 %v7120_v37  ;;  %v9814_v50 = vsel %vm905_vm2, %v2689_v46, %v2690_v10  ;;  %v9817_v19 = vsel %vm905_vm2, %v2690_v10, %v2692_v21 }
 0x2b7   : > { %v7130_v35 = vpop.permute.xlu0 %7129  ;;  %v3461_v47 = vsel %vm3456_vm4, %v3428_v39, %v7116_v52  ;;  %7334 = vrot.lane.b32.xlu1 %v7323_v61, %s12014_s17  ;;  %v3462_v48 = vsel %vm3456_vm4, %v3429_v60, %v7117_v7  ;;  %v7343_v44 = vpack.i.bf16 %v2523_v24, %v9701_v42  ;;  %v3300_v3 = vsel %vm1752_vm7, %v9356_v40, %v7102_v58 }
 0x2b8   : > { %v7125_v25 = vpop.permute.xlu1 %7124  ;;  %v3494_v20 = vsel %vm3489_vm5, %v3461_v47, %v7121_v18  ;;  %v3495_v62 = vsel %vm3489_vm5, %v3462_v48, %v7122_v38  ;;  %v3331_v37 = vsel %vm1884_vm11, %v3300_v3, %v7112_v23  ;;  %v7353_v24 = vpack.i.bf16 %v9814_v50, %v9726_v16 }
 0x2b9   : > { %3694 = vmatmul.mubr.f32.gmra.mrb[8].mxu1 %v3494_v20  ;;  %v7126_v41 = vunpack.i.l.bf16 %v7125_v25  ;;  %v7131_v46 = vunpack.i.l.bf16 %v7130_v35  ;;  %v7127_v52 = vunpack.i.h.bf16 %v7125_v25  ;;  %v7132_v18 = vunpack.i.h.bf16 %v7130_v35 }
 0x2ba   : > { %6310 = vmatprep.mubr.msk.f32.mxu1 %vm1752_vm7, %v9456_v33  ;;  %7339 = vrot.lane.b32.xlu0 %v7328_v8, %s12012_s30  ;;  %v7348_v33 = vpack.i.bf16 %v9817_v19, %v9814_v50 }
 0x2bb   : > { %v7140_v61 = vpop.permute.xlu0 %7139  ;;  %7344 = vrot.lane.b32.xlu1 %v7343_v44, %s12036_s26  ;;  %v3364_v42 = vsel %vm3357_vm13, %v3331_v37, %v7126_v41 }
 0x2bc   : > { %v7135_v34 = vpop.permute.xlu1 %7134  ;;  %v7141_v6 = vunpack.i.l.bf16 %v7140_v61  ;;  %v7142_v47 = vunpack.i.h.bf16 %v7140_v61 }
 0x2bd   : > { %3699 = vmatmul.mubr.f32.gmra.mrb[10].mxu1 %v3495_v62  ;;  %v7136_v21 = vunpack.i.l.bf16 %v7135_v34 }
 0x2be   : > { %6311 = vmatprep.mubr.msk.f32.mxu1 %vm1752_vm7, %v9528_v30  ;;  %7349 = vrot.lane.b32.xlu0 %v7348_v33, %s12006_s23  ;;  %v3397_v30 = vsel %vm3390_vm14, %v3364_v42, %v7131_v46  ;;  %v7137_v33 = vunpack.i.h.bf16 %v7135_v34 }
 0x2bf   : > { %v7150_v40 = vpop.permute.xlu0 %7149  ;;  %7354 = vrot.lane.b32.xlu1 %v7353_v24, %s12039_s16  ;;  %v3301_v8 = vsel %vm1752_vm7, %v9054_v54, %v7136_v21  ;;  %v3430_v48 = vsel %vm3423_vm15, %v3397_v30, %v7141_v6 }
 0x2c0   : > { %v7145_v49 = vpop.permute.xlu1 %7144  ;;  %v7151_v10 = vunpack.i.l.bf16 %v7150_v40  ;;  %v7152_v25 = vunpack.i.h.bf16 %v7150_v40  ;;  %v3302_v30 = vsel %vm1752_vm7, %v9419_v59, %v7137_v33 }
 0x2c1   : > { %v7146_v7 = vunpack.i.l.bf16 %v7145_v49  ;;  %v7147_v42 = vunpack.i.h.bf16 %v7145_v49 }
 0x2c2   : > { %v3463_v38 = vsel %vm3456_vm4, %v3430_v48, %v7151_v10 }
 0x2c3   : > { %v3332_v39 = vsel %vm1884_vm11, %v3301_v8, %v7146_v7  ;;  %v7160_v4 = vpop.permute.xlu0 %7159 }
 0x2c4   : > { %v3365_v60 = vsel %vm3357_vm13, %v3332_v39, %v7127_v52  ;;  %v7155_v20 = vpop.permute.xlu1 %7154  ;;  %v7161_v46 = vunpack.i.l.bf16 %v7160_v4 }
 0x2c5   : > { %v7156_v58 = vunpack.i.l.bf16 %v7155_v20  ;;  %v3398_v23 = vsel %vm3390_vm14, %v3365_v60, %v7132_v18  ;;  %v7157_v41 = vunpack.i.h.bf16 %v7155_v20  ;;  %v7162_v60 = vunpack.i.h.bf16 %v7160_v4 }
 0x2c6   : > { %v3431_v54 = vsel %vm3423_vm15, %v3398_v23, %v7142_v47 }
 0x2c7   : > { %v9844_v44 = vpop.permute.xlu0 %7169  ;;  %v3496_v35 = vsel %vm3489_vm5, %v3463_v38, %v7156_v58  ;;  %v3464_v3 = vsel %vm3456_vm4, %v3431_v54, %v7152_v25 }
 0x2c8   : > { %v7165_v62 = vpop.permute.xlu1 %7164  ;;  %v6665_v61 = vpop.f32.mrb[20].mxu0  ;;  %3704 = vmatmul.mubr.f32.gmra.mrb[12].mxu1 %v3496_v35  ;;  %v7171_v24 = vunpack.i.l.bf16 %v9844_v44  ;;  %v3497_v52 = vsel %vm3489_vm5, %v3464_v3, %v7157_v41  ;;  %v7172_v23 = vunpack.i.h.bf16 %v9844_v44 }
 0x2c9   : > { %v2202_v37 = vadd.f32 %v9477_v17, %v6665_v61  ;;  %v2196_v21 = vpop.f32.mrb[21].mxu0  ;;  %6312 = vmatprep.mubr.msk.f32.mxu1 %vm1752_vm7, %v9536_v51  ;;  %v7166_v51 = vunpack.i.l.bf16 %v7165_v62  ;;  %v7167_v54 = vunpack.i.h.bf16 %v7165_v62 }
 0x2ca   : > { %v2197_v40 = vadd.f32 %v9477_v17, %v2196_v21  ;;  %v3333_v17 = vsel %vm1884_vm11, %v3302_v30, %v7147_v42  ;;  %v3303_v18 = vsel %vm1752_vm7, %v9142_v63, %v7171_v24 }
 0x2cb   : > { %v2276_v6 = vmax.f32 %v2202_v37, 0.0  ;;  %v9853_v7 = vpop.permute.xlu0 %7179  ;;  %v3366_v20 = vsel %vm3357_vm13, %v3333_v17, %v7161_v46 }
 0x2cc   : > { %v2275_v8 = vmax.f32 %v2197_v40, 0.0  ;;  %v7181_v34 = vunpack.i.l.bf16 %v9853_v7  ;;  %v7175_v10 = vpop.permute.xlu1 %7174  ;;  %3709 = vmatmul.mubr.f32.gmra.mrb[14].mxu1 %v3497_v52  ;;  %v3399_v4 = vsel %vm3390_vm14, %v3366_v20, %v7166_v51  ;;  %v7182_v17 = vunpack.i.h.bf16 %v9853_v7 }
 0x2cd   : > { %v2350_v49 = vrot.slane %v2276_v6, 7  ;;  %6313 = vmatprep.mubr.msk.f32.mxu1 %vm1752_vm7, %v9557_v55  ;;  %v7176_v47 = vunpack.i.l.bf16 %v7175_v10  ;;  %v7177_v46 = vunpack.i.h.bf16 %v7175_v10 }
 0x2ce   : > { %v2349_v39 = vrot.slane %v2275_v8, 7  ;;  %v3334_v48 = vsel %vm1884_vm11, %v3303_v18, %v7181_v34 }
 0x2cf   : > { %v2440_v58 = vsel %vm575_vm0, %v2350_v49, 0.0  ;;  %v7190_v59 = vpop.permute.xlu0 %7189  ;;  %v3367_v61 = vsel %vm3357_vm13, %v3334_v48, %v7162_v60  ;;  %v3432_v44 = vsel %vm3423_vm15, %v3399_v4, %v7176_v47 }
 0x2d0   : > { %v2529_v25 = vrot.slane %v2440_v58, 1  ;;  %v9869_v55 = vsel %vm575_vm0, %v2349_v39, %v2350_v49  ;;  %v9872_v38 = vsel %vm575_vm0, 0.0, %v2349_v39  ;;  %v7185_v63 = vpop.permute.xlu1 %7184  ;;  %v7191_v3 = vunpack.i.l.bf16 %v7190_v59 }
 0x2d1   : > { %v2526_v41 = vrot.slane %v9872_v38, 1  ;;  %v2527_v35 = vrot.slane %v9869_v55, 1  ;;  %v7186_v33 = vunpack.i.l.bf16 %v7185_v63  ;;  %v7187_v37 = vunpack.i.h.bf16 %v7185_v63 }
 0x2d2   : > { %v7358_v21 = vpack.i.bf16 %v9869_v55, %v9872_v38  ;;  %v2697_v40 = vrot.slane %v2440_v58, 2  ;;  %v2694_v34 = vrot.slane %v9872_v38, 2  ;;  %v2695_v30 = vrot.slane %v9869_v55, 2 }
 0x2d3   : > { %v7200_v42 = vpop.permute.xlu0 %7199  ;;  %v2528_v24 = vsel %vm734_vm1, %v2526_v41, %v2527_v35  ;;  %v9883_v62 = vsel %vm734_vm1, %v2527_v35, %v2529_v25  ;;  %v3465_v52 = vsel %vm3456_vm4, %v3432_v44, %v7186_v33  ;;  %v3400_v49 = vsel %vm3390_vm14, %v3367_v61, %v7167_v54 }
 0x2d4   : > { %v7195_v6 = vpop.permute.xlu1 %7194  ;;  %v7363_v8 = vpack.i.bf16 %v9883_v62, %v2528_v24  ;;  %7359 = vrot.lane.b32.xlu0 %v7358_v21, %s12010_s1  ;;  %v3498_v51 = vsel %vm3489_vm5, %v3465_v52, %v7191_v3  ;;  %v3433_v10 = vsel %vm3423_vm15, %v3400_v49, %v7177_v46  ;;  %v7192_v18 = vunpack.i.h.bf16 %v7190_v59 }
 0x2d5   : > { %3714 = vmatmul.mubr.f32.gmra.mrb[16].mxu1 %v3498_v51  ;;  %v7196_v39 = vunpack.i.l.bf16 %v7195_v6  ;;  %v3466_v60 = vsel %vm3456_vm4, %v3433_v10, %v7187_v37  ;;  %v3304_v58 = vsel %vm1752_vm7, %v9460_v36, %v7172_v23  ;;  %v9905_v48 = vsel %vm905_vm2, %v2694_v34, %v2695_v30 }
 0x2d6   : > { %7364 = vrot.lane.b32.xlu1 %v7363_v8, %s12008_s25  ;;  %6314 = vmatprep.mubr.msk.f32.mxu1 %vm1752_vm7, %v9560_v13  ;;  %v3499_v7 = vsel %vm3489_vm5, %v3466_v60, %v7192_v18  ;;  %v9908_v59 = vsel %vm905_vm2, %v2695_v30, %v2697_v40  ;;  %v3335_v13 = vsel %vm1884_vm11, %v3304_v58, %v7182_v17  ;;  %v7201_v54 = vunpack.i.l.bf16 %v7200_v42 }
 0x2d7   : > { %v7210_v47 = vpop.permute.xlu0 %7209  ;;  %v3368_v63 = vsel %vm3357_vm13, %v3335_v13, %v7196_v39  ;;  %v7378_v36 = vpack.i.bf16 %v2528_v24, %v9793_v11  ;;  %v7383_v41 = vpack.i.bf16 %v9908_v59, %v9905_v48  ;;  %v7197_v3 = vunpack.i.h.bf16 %v7195_v6 }
 0x2d8   : > { %v9898_v20 = vpop.permute.xlu1 %7204  ;;  %7369 = vrot.lane.b32.xlu0 %v7358_v21, %s12014_s17  ;;  %v7211_v35 = vunpack.i.l.bf16 %v7210_v47  ;;  %v7202_v11 = vunpack.i.h.bf16 %v7200_v42  ;;  %v7388_v21 = vpack.i.bf16 %v9905_v48, %v9817_v19  ;;  %v7212_v40 = vunpack.i.h.bf16 %v7210_v47 }
 0x2d9   : > { %v7206_v25 = vunpack.i.l.bf16 %v9898_v20  ;;  %3719 = vmatmul.mubr.f32.gmra.mrb[18].mxu1 %v3499_v7  ;;  %v7207_v47 = vunpack.i.h.bf16 %v9898_v20 }
 0x2da   : > { %7374 = vrot.lane.b32.xlu1 %v7363_v8, %s12012_s30  ;;  %6315 = vmatprep.mubr.msk.f32.mxu1 %vm1752_vm7, %v9592_v9  ;;  %v3401_v9 = vsel %vm3390_vm14, %v3368_v63, %v7201_v54 }
 0x2db   : > { %v7220_v23 = vpop.permute.xlu0 %7219  ;;  %v3305_v33 = vsel %vm1752_vm7, %v9273_v28, %v7206_v25  ;;  %v3434_v28 = vsel %vm3423_vm15, %v3401_v9, %v7211_v35 }
 0x2dc   : > { %v7215_v4 = vpop.permute.xlu1 %7214  ;;  %7379 = vrot.lane.b32.xlu0 %v7378_v36, %s12036_s26  ;;  %v7221_v44 = vunpack.i.l.bf16 %v7220_v23  ;;  %v7222_v34 = vunpack.i.h.bf16 %v7220_v23 }
 0x2dd   : > { %v7216_v61 = vunpack.i.l.bf16 %v7215_v4  ;;  %v7217_v7 = vunpack.i.h.bf16 %v7215_v4 }
 0x2de   : > { %7384 = vrot.lane.b32.xlu1 %v7383_v41, %s12006_s23  ;;  %v3467_v42 = vsel %vm3456_vm4, %v3434_v28, %v7221_v44 }
 0x2df   : > { %v3336_v37 = vsel %vm1884_vm11, %v3305_v33, %v7216_v61  ;;  %v7230_v24 = vpop.permute.xlu0 %7229 }
 0x2e0   : > { %v3369_v46 = vsel %vm3357_vm13, %v3336_v37, %v7197_v3  ;;  %v7225_v52 = vpop.permute.xlu1 %7224  ;;  %7389 = vrot.lane.b32.xlu0 %v7388_v21, %s12039_s16  ;;  %v7232_v36 = vunpack.i.h.bf16 %v7230_v24  ;;  %v7231_v23 = vunpack.i.l.bf16 %v7230_v24  ;;  %v3306_v3 = vsel %vm1752_vm7, %v9516_v57, %v7207_v47 }
 0x2e1   : > { %v7226_v6 = vunpack.i.l.bf16 %v7225_v52  ;;  %v3402_v8 = vsel %vm3390_vm14, %v3369_v46, %v7202_v11  ;;  %v7227_v51 = vunpack.i.h.bf16 %v7225_v52  ;;  %v3337_v9 = vsel %vm1884_vm11, %v3306_v3, %v7217_v7 }
 0x2e2   : > { %v3435_v30 = vsel %vm3423_vm15, %v3402_v8, %v7212_v40  ;;  %v3370_v24 = vsel %vm3357_vm13, %v3337_v9, %v7231_v23 }
 0x2e3   : > { %v9933_v49 = vpop.permute.xlu0 %7239  ;;  %v3500_v17 = vsel %vm3489_vm5, %v3467_v42, %v7226_v6  ;;  %v3468_v18 = vsel %vm3456_vm4, %v3435_v30, %v7222_v34 }
 0x2e4   : > { %v7235_v10 = vpop.permute.xlu1 %7234  ;;  %3724 = vmatmul.mubr.f32.gmra.mrb[20].mxu1 %v3500_v17  ;;  %v7241_v39 = vunpack.i.l.bf16 %v9933_v49  ;;  %v3501_v58 = vsel %vm3489_vm5, %v3468_v18, %v7227_v51 }
 0x2e5   : > { %6316 = vmatprep.mubr.msk.f32.mxu1 %vm1752_vm7, %v9602_v31  ;;  %v9950_v31 = vld [vmem:[%s12038_s2] ss:$0 sm:$0xff]  ;;  %v7236_v4 = vunpack.i.l.bf16 %v7235_v10  ;;  %v7237_v11 = vunpack.i.h.bf16 %v7235_v10  ;;  %s6087_s2 = sand.u32 1, %s8025_s22  }
 0x2e6   : > { %v3307_v54 = vsel %vm1752_vm7, %v9393_v26, %v7241_v39 }
 0x2e7   : > { %v9941_v60 = vpop.permute.xlu0 %7249  ;;  %v3403_v46 = vsel %vm3390_vm14, %v3370_v24, %v7236_v4 }
 0x2e8   : > { %v7251_v13 = vunpack.i.l.bf16 %v9941_v60  ;;  %v7245_v25 = vpop.permute.xlu1 %7244  ;;  %v6668_v63 = vpop.f32.mrb[22].mxu0  ;;  %3729 = vmatmul.mubr.f32.gmra.mrb[22].mxu1 %v3501_v58 }
 0x2e9   : > { %v2212_v20 = vadd.f32 %v9950_v31, %v6668_v63  ;;  %v2206_v41 = vpop.f32.mrb[23].mxu0  ;;  %6317 = vmatprep.mubr.msk.f32.mxu1 %vm1752_vm7, %v9648_v29  ;;  %v7246_v33 = vunpack.i.l.bf16 %v7245_v25  ;;  %v7247_v57 = vunpack.i.h.bf16 %v7245_v25 }
 0x2ea   : > { %v3338_v35 = vsel %vm1884_vm11, %v3307_v54, %v7251_v13  ;;  %v2207_v61 = vadd.f32 %v9950_v31, %v2206_v41 }
 0x2eb   : > { %v3371_v26 = vsel %vm3357_vm13, %v3338_v35, %v7232_v36  ;;  %v2278_v44 = vmax.f32 %v2212_v20, 0.0  ;;  %v7260_v6 = vpop.permute.xlu0 %7259  ;;  %v3436_v42 = vsel %vm3423_vm15, %v3403_v46, %v7246_v33 }
 0x2ec   : > { %v2277_v37 = vmax.f32 %v2207_v61, 0.0  ;;  %v7255_v21 = vpop.permute.xlu1 %7254  ;;  %v3404_v28 = vsel %vm3390_vm14, %v3371_v26, %v7237_v11  ;;  %v7261_v47 = vunpack.i.l.bf16 %v7260_v6  ;;  %v7262_v54 = vunpack.i.h.bf16 %v7260_v6 }
 0x2ed   : > { %v2353_v29 = vrot.slane %v2278_v44, 7  ;;  %v7256_v40 = vunpack.i.l.bf16 %v7255_v21  ;;  %v7257_v34 = vunpack.i.h.bf16 %v7255_v21  ;;  %v3437_v58 = vsel %vm3423_vm15, %v3404_v28, %v7247_v57 }
 0x2ee   : > { %v2352_v52 = vrot.slane %v2277_v37, 7  ;;  %v7252_v21 = vunpack.i.h.bf16 %v9941_v60 }
 0x2ef   : > { %v2441_v8 = vsel %vm575_vm0, %v2353_v29, 0.0  ;;  %v3469_v10 = vsel %vm3456_vm4, %v3436_v42, %v7256_v40  ;;  %v3470_v36 = vsel %vm3456_vm4, %v3437_v58, %v7257_v34  ;;  %v7270_v44 = vpop.permute.xlu0 %7269 }
 0x2f0   : > { %v2534_v30 = vrot.slane %v2441_v8, 1  ;;  %v9967_v51 = vsel %vm575_vm0, %v2352_v52, %v2353_v29  ;;  %v9970_v17 = vsel %vm575_vm0, 0.0, %v2352_v52  ;;  %v7265_v7 = vpop.permute.xlu1 %7264  ;;  %v3502_v13 = vsel %vm3489_vm5, %v3469_v10, %v7261_v47 }
 0x2f1   : > { %v2531_v18 = vrot.slane %v9970_v17, 1  ;;  %v2532_v39 = vrot.slane %v9967_v51, 1  ;;  %v7393_v25 = vpack.i.bf16 %v9967_v51, %v9970_v17  ;;  %3734 = vmatmul.mubr.f32.gmra.mrb[24].mxu1 %v3502_v13  ;;  %v2702_v41 = vrot.slane %v2441_v8, 2 }
 0x2f2   : > { %6318 = vmatprep.mubr.msk.f32.mxu1 %vm1752_vm7, %v9651_v43  ;;  %v2699_v4 = vrot.slane %v9970_v17, 2  ;;  %v2700_v35 = vrot.slane %v9967_v51, 2  ;;  %v3503_v61 = vsel %vm3489_vm5, %v3470_v36, %v7262_v54  ;;  %v7266_v24 = vunpack.i.l.bf16 %v7265_v7 }
 0x2f3   : > { %v2533_v63 = vsel %vm734_vm1, %v2531_v18, %v2532_v39  ;;  %v9982_v23 = vsel %vm734_vm1, %v2532_v39, %v2534_v30  ;;  %7394 = vrot.lane.b32.xlu1 %v7393_v25, %s12010_s1  ;;  %v7271_v28 = vunpack.i.l.bf16 %v7270_v44  ;;  %v7267_v57 = vunpack.i.h.bf16 %v7265_v7 }
 0x2f4   : > { %v7398_v20 = vpack.i.bf16 %v9982_v23, %v2533_v63  ;;  %v9992_v3 = vpop.permute.xlu1 %7274  ;;  %v9998_v43 = vsel %vm905_vm2, %v2699_v4, %v2700_v35  ;;  %v10001_v26 = vsel %vm905_vm2, %v2700_v35, %v2702_v41  ;;  %v7413_v33 = vpack.i.bf16 %v2533_v63, %v9883_v62 }
 0x2f5   : > { %3739 = vmatmul.mubr.f32.gmra.mrb[26].mxu1 %v3503_v61  ;;  %v7418_v9 = vpack.i.bf16 %v10001_v26, %v9998_v43  ;;  %v7423_v37 = vpack.i.bf16 %v9998_v43, %v9908_v59  ;;  %v7276_v62 = vunpack.i.l.bf16 %v9992_v3  ;;  %v7272_v47 = vunpack.i.h.bf16 %v7270_v44 }
 0x2f6   : > { %7399 = vrot.lane.b32.xlu0 %v7398_v20, %s12008_s25  ;;  %6319 = vmatprep.mubr.msk.f32.mxu1 %vm1752_vm7, %v9723_v5  ;;  %v7242_v5 = vunpack.i.h.bf16 %v9933_v49  ;;  %v7280_v49 = vpop.permute.xlu0 %7279 }
 0x2f7   : > { %7404 = vrot.lane.b32.xlu1 %v7393_v25, %s12014_s17  ;;  %v3309_v6 = vsel %vm1752_vm7, %v9509_v32, %v7276_v62  ;;  %v7281_v8 = vunpack.i.l.bf16 %v7280_v49  ;;  %v7282_v41 = vunpack.i.h.bf16 %v7280_v49 }
 0x2f8   : > { %v10009_v11 = vpop.permute.xlu1 %7284  ;;  %v3308_v40 = vsel %vm1752_vm7, %v9565_v56, %v7242_v5 }
 0x2f9   : > { %v7286_v29 = vunpack.i.l.bf16 %v10009_v11  ;;  %v3339_v46 = vsel %vm1884_vm11, %v3308_v40, %v7252_v21 }
 0x2fa   : > { %7409 = vrot.lane.b32.xlu0 %v7398_v20, %s12012_s30  ;;  %v3372_v52 = vsel %vm3357_vm13, %v3339_v46, %v7266_v24 }
 0x2fb   : > { %7414 = vrot.lane.b32.xlu1 %v7413_v33, %s12036_s26  ;;  %v3340_v60 = vsel %vm1884_vm11, %v3309_v6, %v7286_v29  ;;  %v3405_v10 = vsel %vm3390_vm14, %v3372_v52, %v7271_v28 }
 0x2fc   : > { %v3373_v56 = vsel %vm3357_vm13, %v3340_v60, %v7267_v57  ;;  %v3438_v63 = vsel %vm3423_vm15, %v3405_v10, %v7281_v8 }
 0x2fd   : > { %v3406_v20 = vsel %vm3390_vm14, %v3373_v56, %v7272_v47  ;;  %v7277_v47 = vunpack.i.h.bf16 %v9992_v3 }
 0x2fe   : > { %7419 = vrot.lane.b32.xlu0 %v7418_v9, %s12006_s23  ;;  %v3439_v9 = vsel %vm3423_vm15, %v3406_v20, %v7282_v41 }
 0x2ff   : > { %7424 = vrot.lane.b32.xlu1 %v7423_v37, %s12039_s16 }
 0x305   : > { %v7290_v34 = vpop.permute.xlu0 %7289 }
 0x306   : > { %v7291_v42 = vunpack.i.l.bf16 %v7290_v34  ;;  %v7292_v7 = vunpack.i.h.bf16 %v7290_v34 }
 0x308   : > { %v6671_v30 = vpop.f32.mrb[24].mxu0  ;;  %v7295_v58 = vpop.permute.xlu1 %7294  ;;  %v3471_v54 = vsel %vm3456_vm4, %v3438_v63, %v7291_v42  ;;  %v3472_v24 = vsel %vm3456_vm4, %v3439_v9, %v7292_v7 }
 0x309   : > { %v2222_v18 = vadd.f32 %v9950_v31, %v6671_v30  ;;  %v2216_v39 = vpop.f32.mrb[25].mxu0  ;;  %v7296_v32 = vunpack.i.l.bf16 %v7295_v58  ;;  %v7297_v4 = vunpack.i.h.bf16 %v7295_v58  ;;  %v7300_v49 = vpop.permute.xlu0 %7299  ;;  %v7287_v58 = vunpack.i.h.bf16 %v10009_v11 }
 0x30a   : > { %v2217_v13 = vadd.f32 %v9950_v31, %v2216_v39 }
 0x30b   : > { %v2280_v25 = vmax.f32 %v2222_v18, 0.0  ;;  %v3504_v61 = vsel %vm3489_vm5, %v3471_v54, %v7296_v32  ;;  %v3505_v40 = vsel %vm3489_vm5, %v3472_v24, %v7297_v4  ;;  %v7301_v32 = vunpack.i.l.bf16 %v7300_v49 }
 0x30c   : > { %v2279_v36 = vmax.f32 %v2217_v13, 0.0  ;;  %3744 = vmatmul.mubr.f32.gmra.mrb[28].mxu1 %v3504_v61  ;;  %v7305_v30 = vpop.permute.xlu1 %7304  ;;  %v7302_v54 = vunpack.i.h.bf16 %v7300_v49 }
 0x30d   : > { %v2356_v35 = vrot.slane %v2280_v25, 7  ;;  %6320 = vmatprep.mubr.msk.f32.mxu1 %vm1752_vm7, %v9726_v16  ;;  %v10060_v8 = vpop.permute.xlu0 %7309  ;;  %v7306_v63 = vunpack.i.l.bf16 %v7305_v30 }
 0x30e   : > { %v2355_v33 = vrot.slane %v2279_v36, 7  ;;  %v3310_v36 = vsel %vm1752_vm7, %v9616_v22, %v7277_v47 }
 0x30f   : > { %v2442_v44 = vsel %vm575_vm0, %v2356_v35, 0.0  ;;  %v3341_v41 = vsel %vm1884_vm11, %v3310_v36, %v7287_v58 }
 0x310   : > { %v2539_v5 = vrot.slane %v2442_v44, 1  ;;  %v10038_v37 = vsel %vm575_vm0, %v2355_v33, %v2356_v35  ;;  %v10041_v21 = vsel %vm575_vm0, 0.0, %v2355_v33  ;;  %3749 = vmatmul.mubr.f32.gmra.mrb[30].mxu1 %v3505_v40  ;;  %v2707_v28 = vrot.slane %v2442_v44, 2  ;;  %v7315_v13 = vpop.permute.xlu1 %7314 }
 0x311   : > { %v2536_v62 = vrot.slane %v10041_v21, 1  ;;  %v2537_v29 = vrot.slane %v10038_v37, 1  ;;  %v7428_v16 = vpack.i.bf16 %v10038_v37, %v10041_v21  ;;  %6321 = vmatprep.mubr.msk.f32.mxu1 %vm1752_vm7, %v9814_v50  ;;  %v2704_v60 = vrot.slane %v10041_v21, 2  ;;  %v10074_v56 = vpop.permute.xlu0 %7319 }
 0x312   : > { %v2705_v57 = vrot.slane %v10038_v37, 2  ;;  %v7321_v39 = vunpack.i.l.bf16 %v10074_v56  ;;  %v7316_v20 = vunpack.i.l.bf16 %v7315_v13  ;;  %v3374_v3 = vsel %vm3357_vm13, %v3341_v41, %v7301_v32 }
 0x313   : > { %v2538_v46 = vsel %vm734_vm1, %v2536_v62, %v2537_v29  ;;  %v10053_v52 = vsel %vm734_vm1, %v2537_v29, %v2539_v5  ;;  %7429 = vrot.lane.b32.xlu0 %v7428_v16, %s12010_s1  ;;  %v7307_v33 = vunpack.i.h.bf16 %v7305_v30 }
 0x314   : > { %v7433_v6 = vpack.i.bf16 %v10053_v52, %v2538_v46  ;;  %v7448_v50 = vpack.i.bf16 %v2538_v46, %v9982_v23  ;;  %v10065_v34 = vsel %vm905_vm2, %v2704_v60, %v2705_v57  ;;  %v10068_v42 = vsel %vm905_vm2, %v2705_v57, %v2707_v28 }
 0x315   : > { %v7453_v10 = vpack.i.bf16 %v10068_v42, %v10065_v34  ;;  %v7458_v18 = vpack.i.bf16 %v10065_v34, %v10001_v26  ;;  %v7311_v23 = vunpack.i.l.bf16 %v10060_v8  ;;  %v7317_v46 = vunpack.i.h.bf16 %v7315_v13 }
 0x316   : > { %7434 = vrot.lane.b32.xlu1 %v7433_v6, %s12008_s25 }
 0x317   : > { %7439 = vrot.lane.b32.xlu0 %v7428_v16, %s12014_s17  ;;  %v3311_v25 = vsel %vm1752_vm7, %v9613_v14, %v7311_v23  ;;  %v3407_v14 = vsel %vm3390_vm14, %v3374_v3, %v7306_v63 }
 0x318   : > { %v3342_v7 = vsel %vm1884_vm11, %v3311_v25, %v7321_v39  ;;  %v3440_v62 = vsel %vm3423_vm15, %v3407_v14, %v7316_v20 }
 0x319   : > { %v3375_v11 = vsel %vm3357_vm13, %v3342_v7, %v7302_v54 }
 0x31a   : > { %7444 = vrot.lane.b32.xlu1 %v7433_v6, %s12012_s30  ;;  %v3408_v16 = vsel %vm3390_vm14, %v3375_v11, %v7307_v33 }
 0x31b   : > { %7449 = vrot.lane.b32.xlu0 %v7448_v50, %s12036_s26  ;;  %v3441_v30 = vsel %vm3423_vm15, %v3408_v16, %v7317_v46 }
 0x31e   : > { %7454 = vrot.lane.b32.xlu1 %v7453_v10, %s12006_s23 }
 0x31f   : > { %7459 = vrot.lane.b32.xlu0 %v7458_v18, %s12039_s16 }
 0x325   : > { %v7325_v4 = vpop.permute.xlu1 %7324 }
 0x326   : > { %v7326_v35 = vunpack.i.l.bf16 %v7325_v4  ;;  %v7327_v29 = vunpack.i.h.bf16 %v7325_v4 }
 0x328   : > { %v6674_v61 = vpop.f32.mrb[26].mxu0  ;;  %v7330_v9 = vpop.permute.xlu0 %7329  ;;  %v3473_v49 = vsel %vm3456_vm4, %v3440_v62, %v7326_v35  ;;  %v3474_v18 = vsel %vm3456_vm4, %v3441_v30, %v7327_v29 }
 0x329   : > { %v2232_v44 = vadd.f32 %v9950_v31, %v6674_v61  ;;  %v2226_v5 = vpop.f32.mrb[27].mxu0  ;;  %v7331_v24 = vunpack.i.l.bf16 %v7330_v9  ;;  %v7332_v6 = vunpack.i.h.bf16 %v7330_v9  ;;  %v7335_v13 = vpop.permute.xlu1 %7334 }
 0x32a   : > { %v2227_v22 = vadd.f32 %v9950_v31, %v2226_v5  ;;  %v7312_v5 = vunpack.i.h.bf16 %v10060_v8  ;;  %v7337_v16 = vunpack.i.h.bf16 %v7335_v13 }
 0x32b   : > { %v2282_v40 = vmax.f32 %v2232_v44, 0.0  ;;  %v3506_v60 = vsel %vm3489_vm5, %v3473_v49, %v7331_v24  ;;  %v3507_v58 = vsel %vm3489_vm5, %v3474_v18, %v7332_v6 }
 0x32c   : > { %v2281_v28 = vmax.f32 %v2227_v22, 0.0  ;;  %3754 = vmatmul.mubr.f32.gmra.mrb[32].mxu1 %v3506_v60  ;;  %v7340_v35 = vpop.permute.xlu0 %7339  ;;  %v7336_v22 = vunpack.i.l.bf16 %v7335_v13  ;;  %v3312_v49 = vsel %vm1752_vm7, %v9693_v27, %v7312_v5 }
 0x32d   : > { %v2359_v57 = vrot.slane %v2282_v40, 7  ;;  %6322 = vmatprep.mubr.msk.f32.mxu1 %vm1752_vm7, %v9817_v19  ;;  %v10125_v4 = vpop.permute.xlu1 %7344  ;;  %v7341_v29 = vunpack.i.l.bf16 %v7340_v35  ;;  %v7342_v60 = vunpack.i.h.bf16 %v7340_v35 }
 0x32e   : > { %v2358_v50 = vrot.slane %v2281_v28, 7  ;;  %v7346_v14 = vunpack.i.l.bf16 %v10125_v4 }
 0x32f   : > { %v2443_v10 = vsel %vm575_vm0, %v2359_v57, 0.0 }
 0x330   : > { %v2544_v23 = vrot.slane %v2443_v10, 1  ;;  %v10105_v39 = vsel %vm575_vm0, %v2358_v50, %v2359_v57  ;;  %v10108_v47 = vsel %vm575_vm0, 0.0, %v2358_v50  ;;  %3759 = vmatmul.mubr.f32.gmra.mrb[34].mxu1 %v3507_v58  ;;  %v2712_v54 = vrot.slane %v2443_v10, 2  ;;  %v7350_v24 = vpop.permute.xlu0 %7349 }
 0x331   : > { %v2541_v32 = vrot.slane %v10108_v47, 1  ;;  %v2542_v19 = vrot.slane %v10105_v39, 1  ;;  %6323 = vmatprep.mubr.msk.f32.mxu1 %vm1752_vm7, %v9905_v48  ;;  %v7463_v25 = vpack.i.bf16 %v10105_v39, %v10108_v47  ;;  %v2709_v20 = vrot.slane %v10108_v47, 2  ;;  %v10137_v61 = vpop.permute.xlu1 %7354 }
 0x332   : > { %v2710_v41 = vrot.slane %v10105_v39, 2  ;;  %v7356_v9 = vunpack.i.l.bf16 %v10137_v61  ;;  %v3313_v62 = vsel %vm1752_vm7, %v9690_v12, %v7346_v14  ;;  %v7351_v46 = vunpack.i.l.bf16 %v7350_v24 }
 0x333   : > { %v2543_v63 = vsel %vm734_vm1, %v2541_v32, %v2542_v19  ;;  %v10119_v7 = vsel %vm734_vm1, %v2542_v19, %v2544_v23  ;;  %7464 = vrot.lane.b32.xlu1 %v7463_v25, %s12010_s1 }
 0x334   : > { %v7468_v36 = vpack.i.bf16 %v10119_v7, %v2543_v63  ;;  %v10130_v48 = vsel %vm905_vm2, %v2709_v20, %v2710_v41  ;;  %v10133_v3 = vsel %vm905_vm2, %v2710_v41, %v2712_v54  ;;  %v7483_v11 = vpack.i.bf16 %v2543_v63, %v10053_v52 }
 0x335   : > { %v7488_v33 = vpack.i.bf16 %v10133_v3, %v10130_v48  ;;  %v7493_v44 = vpack.i.bf16 %v10130_v48, %v10068_v42  ;;  %v7322_v52 = vunpack.i.h.bf16 %v10074_v56  ;;  %v3344_v40 = vsel %vm1884_vm11, %v3313_v62, %v7356_v9 }
 0x336   : > { %7469 = vrot.lane.b32.xlu0 %v7468_v36, %s12008_s25  ;;  %v3377_v28 = vsel %vm3357_vm13, %v3344_v40, %v7337_v16 }
 0x337   : > { %7474 = vrot.lane.b32.xlu1 %v7463_v25, %s12014_s17  ;;  %v3343_v6 = vsel %vm1884_vm11, %v3312_v49, %v7322_v52  ;;  %v3410_v19 = vsel %vm3390_vm14, %v3377_v28, %v7342_v60  ;;  %v7352_v25 = vunpack.i.h.bf16 %v7350_v24 }
 0x338   : > { %v3376_v8 = vsel %vm3357_vm13, %v3343_v6, %v7336_v22 }
 0x339   : > { %v3409_v57 = vsel %vm3390_vm14, %v3376_v8, %v7341_v29 }
 0x33a   : > { %7479 = vrot.lane.b32.xlu0 %v7468_v36, %s12012_s30  ;;  %v3442_v27 = vsel %vm3423_vm15, %v3409_v57, %v7351_v46 }
 0x33b   : > { %7484 = vrot.lane.b32.xlu1 %v7483_v11, %s12036_s26  ;;  %v3443_v11 = vsel %vm3423_vm15, %v3410_v19, %v7352_v25 }
 0x33e   : > { %7489 = vrot.lane.b32.xlu0 %v7488_v33, %s12006_s23 }
 0x33f   : > { %7494 = vrot.lane.b32.xlu1 %v7493_v44, %s12039_s16 }
 0x346   : > { %v7360_v56 = vpop.permute.xlu0 %7359 }
 0x347   : > { %v7361_v50 = vunpack.i.l.bf16 %v7360_v56  ;;  %v7362_v58 = vunpack.i.h.bf16 %v7360_v56 }
 0x348   : > { %v7365_v12 = vpop.permute.xlu1 %7364  ;;  %v6677_v30 = vpop.f32.mrb[28].mxu0 }
 0x349   : > { %v7366_v10 = vunpack.i.l.bf16 %v7365_v12  ;;  %v2242_v18 = vadd.f32 %v9950_v31, %v6677_v30  ;;  %v2236_v23 = vpop.f32.mrb[29].mxu0  ;;  %v3475_v32 = vsel %vm3456_vm4, %v3442_v27, %v7361_v50  ;;  %v7367_v63 = vunpack.i.h.bf16 %v7365_v12 }
 0x34a   : > { %v2237_v13 = vadd.f32 %v9950_v31, %v2236_v23  ;;  %v3476_v33 = vsel %vm3456_vm4, %v3443_v11, %v7362_v58  ;;  %v7370_v22 = vpop.permute.xlu0 %7369 }
 0x34b   : > { %v2284_v36 = vmax.f32 %v2242_v18, 0.0  ;;  %v3508_v54 = vsel %vm3489_vm5, %v3475_v32, %v7366_v10  ;;  %v3509_v44 = vsel %vm3489_vm5, %v3476_v33, %v7367_v63  ;;  %v7357_v18 = vunpack.i.h.bf16 %v10137_v61 }
 0x34c   : > { %v2283_v20 = vmax.f32 %v2237_v13, 0.0  ;;  %3764 = vmatmul.mubr.f32.gmra.mrb[36].mxu1 %v3508_v54  ;;  %v7375_v60 = vpop.permute.xlu1 %7374  ;;  %v7371_v13 = vunpack.i.l.bf16 %v7370_v22  ;;  %v7372_v63 = vunpack.i.h.bf16 %v7370_v22 }
 0x34d   : > { %v2362_v41 = vrot.slane %v2284_v36, 7  ;;  %6324 = vmatprep.mubr.msk.f32.mxu1 %vm1752_vm7, %v9908_v59  ;;  %v7376_v36 = vunpack.i.l.bf16 %v7375_v60 }
 0x34e   : > { %v2361_v35 = vrot.slane %v2283_v20, 7  ;;  %v10191_v8 = vpop.permute.xlu0 %7379 }
 0x34f   : > { %v2444_v14 = vsel %vm575_vm0, %v2362_v41, 0.0  ;;  %v7381_v12 = vunpack.i.l.bf16 %v10191_v8 }
 0x350   : > { %v2549_v9 = vrot.slane %v2444_v14, 1  ;;  %v10172_v5 = vsel %vm575_vm0, %v2361_v35, %v2362_v41  ;;  %v10175_v52 = vsel %vm575_vm0, 0.0, %v2361_v35  ;;  %3769 = vmatmul.mubr.f32.gmra.mrb[38].mxu1 %v3509_v44  ;;  %v2717_v16 = vrot.slane %v2444_v14, 2  ;;  %v7385_v27 = vpop.permute.xlu1 %7384 }
 0x351   : > { %v2546_v24 = vrot.slane %v10175_v52, 1  ;;  %v2547_v59 = vrot.slane %v10172_v5, 1  ;;  %6325 = vmatprep.mubr.msk.f32.mxu1 %vm1752_vm7, %v9998_v43  ;;  %v7498_v62 = vpack.i.bf16 %v10172_v5, %v10175_v52  ;;  %v2714_v46 = vrot.slane %v10175_v52, 2 }
 0x352   : > { %v2715_v6 = vrot.slane %v10172_v5, 2  ;;  %v10203_v57 = vpop.permute.xlu0 %7389  ;;  %v3315_v23 = vsel %vm1752_vm7, %v9775_v45, %v7381_v12  ;;  %v7386_v20 = vunpack.i.l.bf16 %v7385_v27  ;;  %v7377_v14 = vunpack.i.h.bf16 %v7375_v60 }
 0x353   : > { %v2548_v29 = vsel %vm734_vm1, %v2546_v24, %v2547_v59  ;;  %v10185_v40 = vsel %vm734_vm1, %v2547_v59, %v2549_v9  ;;  %7499 = vrot.lane.b32.xlu0 %v7498_v62, %s12010_s1  ;;  %v7391_v10 = vunpack.i.l.bf16 %v10203_v57 }
 0x354   : > { %v7503_v49 = vpack.i.bf16 %v10185_v40, %v2548_v29  ;;  %v10196_v43 = vsel %vm905_vm2, %v2714_v46, %v2715_v6  ;;  %v10199_v28 = vsel %vm905_vm2, %v2715_v6, %v2717_v16  ;;  %v7518_v56 = vpack.i.bf16 %v2548_v29, %v10119_v7 }
 0x355   : > { %v7523_v50 = vpack.i.bf16 %v10199_v28, %v10196_v43  ;;  %v7528_v30 = vpack.i.bf16 %v10196_v43, %v10133_v3  ;;  %v7347_v7 = vunpack.i.h.bf16 %v10125_v4  ;;  %v3346_v32 = vsel %vm1884_vm11, %v3315_v23, %v7391_v10 }
 0x356   : > { %7504 = vrot.lane.b32.xlu1 %v7503_v49, %s12008_s25  ;;  %v3379_v45 = vsel %vm3357_vm13, %v3346_v32, %v7372_v63 }
 0x357   : > { %7509 = vrot.lane.b32.xlu0 %v7498_v62, %s12014_s17  ;;  %v3314_v4 = vsel %vm1752_vm7, %v9778_v15, %v7347_v7 }
 0x358   : > { %v3345_v41 = vsel %vm1884_vm11, %v3314_v4, %v7357_v18 }
 0x359   : > { %v3378_v33 = vsel %vm3357_vm13, %v3345_v41, %v7371_v13 }
 0x35a   : > { %7514 = vrot.lane.b32.xlu1 %v7503_v49, %s12012_s30  ;;  %v3411_v24 = vsel %vm3390_vm14, %v3378_v33, %v7376_v36  ;;  %v3412_v49 = vsel %vm3390_vm14, %v3379_v45, %v7377_v14 }
 0x35b   : > { %7519 = vrot.lane.b32.xlu0 %v7518_v56, %s12036_s26  ;;  %v3444_v29 = vsel %vm3423_vm15, %v3411_v24, %v7386_v20 }
 0x35e   : > { %7524 = vrot.lane.b32.xlu1 %v7523_v50, %s12006_s23  ;;  %s6265_s23 = sshll.u32 %s10234_s27, 8 }
 0x35f   : > { %7529 = vrot.lane.b32.xlu0 %v7528_v30, %s12039_s16  ;;  %s10262_s29 = scalar_lea.vmem [#allocation2], %s6265_s23  ;;  %s6266_s23 = sshll.u32 %s10234_s27, 6 }
 0x363   : > { %v6680_v58 = vpop.f32.mrb[30].mxu0 }
 0x364   : > { %v2252_v19 = vadd.f32 %v9950_v31, %v6680_v58  ;;  %v2246_v25 = vpop.f32.mrb[31].mxu0 }
 0x365   : > { %v2247_v54 = vadd.f32 %v9950_v31, %v2246_v25  ;;  %v7395_v35 = vpop.permute.xlu1 %7394  ;;  %v7387_v31 = vunpack.i.h.bf16 %v7385_v27  ;;  %v10240_v27 = vld [vmem:[%s12044_s4] ss:$0 sm:$0xff] }
 0x366   : > { %v2286_v61 = vmax.f32 %v2252_v19, 0.0  ;;  %v7396_v9 = vunpack.i.l.bf16 %v7395_v35  ;;  %v7397_v56 = vunpack.i.h.bf16 %v7395_v35 }
 0x367   : > { %v2285_v11 = vmax.f32 %v2247_v54, 0.0  ;;  %v3445_v13 = vsel %vm3423_vm15, %v3412_v49, %v7387_v31 }
 0x368   : > { %v2365_v44 = vrot.slane %v2286_v61, 7  ;;  %v7400_v22 = vpop.permute.xlu0 %7399  ;;  %v3477_v30 = vsel %vm3456_vm4, %v3444_v29, %v7396_v9  ;;  %v3478_v63 = vsel %vm3456_vm4, %v3445_v13, %v7397_v56 }
 0x369   : > { %v2364_v59 = vrot.slane %v2285_v11, 7  ;;  %v7401_v62 = vunpack.i.l.bf16 %v7400_v22  ;;  %v7402_v12 = vunpack.i.h.bf16 %v7400_v22  ;;  %v7405_v41 = vpop.permute.xlu1 %7404  ;;  %v7382_v22 = vunpack.i.h.bf16 %v10191_v8 }
 0x36a   : > { %v2445_v15 = vsel %vm575_vm0, %v2365_v44, 0.0 }
 0x36b   : > { %v2910_v16 = vrot.slane %v2445_v15, 1  ;;  %v2366_v46 = vsel %vm575_vm0, %v2364_v59, %v2365_v44  ;;  %v2429_v6 = vsel %vm575_vm0, 0.0, %v2364_v59  ;;  %v3011_v10 = vrot.slane %v2445_v15, 2 }
 0x36c   : > { %v2907_v60 = vrot.slane %v2429_v6, 1  ;;  %v2908_v50 = vrot.slane %v2366_v46, 1  ;;  %v3008_v7 = vrot.slane %v2429_v6, 2  ;;  %v3510_v18 = vsel %vm3489_vm5, %v3477_v30, %v7401_v62 }
 0x36d   : > { %v7533_v23 = vpack.i.bf16 %v2366_v46, %v2429_v6  ;;  %3774 = vmatmul.mubr.f32.gmra.mrb[40].mxu1 %v3510_v18  ;;  %v3009_v19 = vrot.slane %v2366_v46, 2  ;;  %v3511_v4 = vsel %vm3489_vm5, %v3478_v63, %v7402_v12  ;;  %v10270_v44 = vpop.permute.xlu1 %7414  ;;  %v7392_v62 = vunpack.i.h.bf16 %v10203_v57 }
 0x36e   : > { %v2909_v58 = vsel %vm734_vm1, %v2907_v60, %v2908_v50  ;;  %6326 = vmatprep.mubr.msk.f32.mxu1 %vm1752_vm7, %v10001_v26  ;;  %v2911_v32 = vsel %vm734_vm1, %v2908_v50, %v2910_v16  ;;  %v7416_v24 = vunpack.i.l.bf16 %v10270_v44  ;;  %v7406_v16 = vunpack.i.l.bf16 %v7405_v41 }
 0x36f   : > { %7534 = vrot.lane.b32.xlu1 %v7533_v23, %s12010_s1  ;;  %v7538_v36 = vpack.i.bf16 %v2911_v32, %v2909_v58  ;;  %v10253_v61 = vsel %vm905_vm2, %v3008_v7, %v3009_v19  ;;  %v10256_v26 = vsel %vm905_vm2, %v3009_v19, %v3011_v10  ;;  %v3316_v57 = vsel %vm1752_vm7, %v9872_v38, %v7382_v22 }
 0x370   : > { %v3675_v25 = vpop.f32.mrb[0].mxu1  ;;  %v3317_v6 = vsel %vm1752_vm7, %v9869_v55, %v7416_v24  ;;  %v3347_v30 = vsel %vm1884_vm11, %v3316_v57, %v7392_v62  ;;  %v7407_v10 = vunpack.i.h.bf16 %v7405_v41 }
 0x371   : > { %v3676_v54 = vadd.f32 %v10240_v27, %v3675_v25  ;;  %v3677_v20 = vpop.f32.mrb[1].mxu1  ;;  %3779 = vmatmul.mubr.f32.gmra.mrb[42].mxu1 %v3511_v4  ;;  %7539 = vrot.lane.b32.xlu0 %v7538_v36, %s12008_s25  ;;  %v10278_v9 = vpop.permute.xlu1 %7424  ;;  %v3380_v55 = vsel %vm3357_vm13, %v3347_v30, %v7406_v16 }
 0x372   : > { %6327 = vmatprep.mubr.msk.f32.mxu1 %vm1752_vm7, %v10065_v34  ;;  %v7410_v34 = vpop.permute.xlu0 %7409  ;;  %v7426_v15 = vunpack.i.l.bf16 %v10278_v9 }
 0x373   : > { %v3834_v45 = vmax.f32 %v3676_v54, 0.0  ;;  %7544 = vrot.lane.b32.xlu1 %v7533_v23, %s12014_s17  ;;  %v7411_v50 = vunpack.i.l.bf16 %v7410_v34  ;;  %v7412_v38 = vunpack.i.h.bf16 %v7410_v34 }
 0x374   : > { %v3680_v11 = vpop.f32.mrb[2].mxu1  ;;  %v3348_v12 = vsel %vm1884_vm11, %v3317_v6, %v7426_v15 }
 0x375   : > { %3866 = vst.msk [vmem:[%s10262_s29] sm:$0xff] %vm1752_vm7, %v3834_v45  ;;  %v3681_v35 = vadd.f32 %v10240_v27, %v3680_v11  ;;  %v3682_v33 = vpop.f32.mrb[3].mxu1  ;;  %2972 = vrot.lane.b32.xlu0 %v2909_v58, %s12012_s30  ;;  %v3381_v13 = vsel %vm3357_vm13, %v3348_v12, %v7407_v10  ;;  %v3413_v63 = vsel %vm3390_vm14, %v3380_v55, %v7411_v50 }
 0x376   : > { %v7420_v29 = vpop.permute.xlu0 %7419  ;;  %v3414_v33 = vsel %vm3390_vm14, %v3381_v13, %v7412_v38 }
 0x377   : > { %v3835_v14 = vmax.f32 %v3681_v35, 0.0  ;;  %2611 = vrot.lane.b32.xlu1 %v10185_v40, %s12036_s26  ;;  %v7421_v58 = vunpack.i.l.bf16 %v7420_v29  ;;  %v7422_v54 = vunpack.i.h.bf16 %v7420_v29 }
 0x379   : > { %3867 = vst.msk [vmem:[%s10262_s29 + $0x8] sm:$0xff] %vm1752_vm7, %v3835_v14  ;;  %3073 = vrot.lane.b32.xlu0 %v10253_v61, %s12045_s20  ;;  %v3446_v35 = vsel %vm3423_vm15, %v3413_v63, %v7421_v58 }
 0x37b   : > { %2777 = vrot.lane.b32.xlu1 %v10199_v28, %s12039_s16 }
 0x37d   : > { %3169 = vrot.lane.b32.xlu0 %v7905_v0, %s12010_s1  ;;  %s12051_s1 = smov 48  }
 0x37f   : > { %3262 = vrot.lane.b32.xlu1 %v8055_v1, %s12008_s25  ;;  %v3685_v40 = vpop.f32.mrb[4].mxu1  ;;  %s12048_s25 = smov 64  }
 0x380   : > { %v3686_v31 = vadd.f32 %v10240_v27, %v3685_v40  ;;  %v3687_v59 = vpop.f32.mrb[5].mxu1 }
 0x381   : > { %2974 = vrot.lane.b32.xlu0 %v2911_v32, %s12012_s30  ;;  %s12050_s30 = smov 112  }
 0x382   : > { %v3836_v49 = vmax.f32 %v3686_v31, 0.0 }
 0x383   : > { %3075 = vrot.lane.b32.xlu1 %v10256_v26, %s12045_s20  ;;  %v3690_v46 = vpop.f32.mrb[6].mxu1 }
 0x384   : > { %3868 = vst.msk [vmem:[%s10262_s29 + $0x10] sm:$0xff] %vm1752_vm7, %v3836_v49  ;;  %v3898_v8 = vmax.f32 %v3834_v45, %v3836_v49  ;;  %v3691_v56 = vadd.f32 %v10240_v27, %v3690_v46  ;;  %v3692_v60 = vpop.f32.mrb[7].mxu1 }
 0x385   : > { %v7430_v23 = vpop.permute.xlu0 %7429 }
 0x386   : > { %v3922_v7 = vrot.slane %v3898_v8, 1  ;;  %v3837_v18 = vmax.f32 %v3691_v56, 0.0  ;;  %v7431_v25 = vunpack.i.l.bf16 %v7430_v23  ;;  %v7432_v45 = vunpack.i.h.bf16 %v7430_v23 }
 0x388   : > { %v3938_v32 = vmax.f32 %v3898_v8, %v3922_v7  ;;  %3869 = vst.msk [vmem:[%s10262_s29 + $0x18] sm:$0xff] %vm1752_vm7, %v3837_v18  ;;  %v3899_v19 = vmax.f32 %v3835_v14, %v3837_v18  ;;  %v7435_v36 = vpop.permute.xlu1 %7434  ;;  %v3479_v31 = vsel %vm3456_vm4, %v3446_v35, %v7431_v25  ;;  %v3447_v8 = vsel %vm3423_vm15, %v3414_v33, %v7422_v54 }
 0x389   : > { %v7436_v11 = vunpack.i.l.bf16 %v7435_v36  ;;  %v7437_v22 = vunpack.i.h.bf16 %v7435_v36  ;;  %v3480_v57 = vsel %vm3456_vm4, %v3447_v8, %v7432_v45  ;;  %v7440_v30 = vpop.permute.xlu0 %7439  ;;  %v7427_v35 = vunpack.i.h.bf16 %v10278_v9 }
 0x38a   : > { %v3986_v4 = vrot.slane %v3938_v32, 1  ;;  %v4002_v20 = vrot.slane %v3938_v32, 2  ;;  %v3954_v41 = vrot.slane %v3899_v19, 1  ;;  %v4018_v40 = vrot.slane %v3938_v32, 3 }
 0x38b   : > { %v3512_v62 = vsel %vm3489_vm5, %v3479_v31, %v7436_v11  ;;  %v3513_v7 = vsel %vm3489_vm5, %v3480_v57, %v7437_v22  ;;  %v7441_v33 = vunpack.i.l.bf16 %v7440_v30  ;;  %v7442_v9 = vunpack.i.h.bf16 %v7440_v30 }
 0x38c   : > { %v4106_v14 = vsel %vm575_vm0, %v3938_v32, %v3986_v4  ;;  %v3970_v24 = vmax.f32 %v3899_v19, %v3954_v41  ;;  %v3695_v34 = vpop.f32.mrb[8].mxu1  ;;  %3784 = vmatmul.mubr.f32.gmra.mrb[44].mxu1 %v3512_v62  ;;  %v7445_v19 = vpop.permute.xlu1 %7444  ;;  %v7417_v4 = vunpack.i.h.bf16 %v10270_v44 }
 0x38d   : > { %v4115_v59 = vsel %vm4114_vm6, %v4106_v14, %v4002_v20  ;;  %v3696_v15 = vadd.f32 %v10240_v27, %v3695_v34  ;;  %v3697_v29 = vpop.f32.mrb[9].mxu1  ;;  %6328 = vmatprep.mubr.msk.f32.mxu1 %vm1752_vm7, %v10068_v42  ;;  %v10332_v13 = vpop.permute.xlu0 %7449  ;;  %v7446_v34 = vunpack.i.l.bf16 %v7445_v19 }
 0x38e   : > { %v4124_v49 = vsel %vm4123_vm8, %v4115_v59, %v4018_v40  ;;  %v4042_v16 = vrot.slane %v3970_v24, 4  ;;  %v4058_v46 = vrot.slane %v3970_v24, 5  ;;  %v4074_v50 = vrot.slane %v3970_v24, 6 }
 0x38f   : > { %v3838_v6 = vmax.f32 %v3696_v15, 0.0  ;;  %v4090_v42 = vrot.slane %v3970_v24, 7  ;;  %v7451_v54 = vunpack.i.l.bf16 %v10332_v13  ;;  %v3318_v44 = vsel %vm1752_vm7, %v9970_v17, %v7417_v4 }
 0x390   : > { %v4132_v56 = vsel %vm2026_vm3, %v4124_v49, %v4042_v16  ;;  %v3700_v60 = vpop.f32.mrb[10].mxu1  ;;  %3789 = vmatmul.mubr.f32.gmra.mrb[46].mxu1 %v3513_v7  ;;  %v7455_v40 = vpop.permute.xlu1 %7454  ;;  %v3349_v62 = vsel %vm1884_vm11, %v3318_v44, %v7427_v35 }
 0x391   : > { %v4141_v12 = vsel %vm4140_vm9, %v4132_v56, %v4058_v46  ;;  %3870 = vst.msk [vmem:[%s10262_s29 + $0x20] sm:$0xff] %vm1752_vm7, %v3838_v6  ;;  %v3701_v10 = vadd.f32 %v10240_v27, %v3700_v60  ;;  %v3702_v18 = vpop.f32.mrb[11].mxu1  ;;  %6329 = vmatprep.mubr.msk.f32.mxu1 %vm1752_vm7, %v10130_v48  ;;  %v10335_v63 = vpop.permute.xlu0 %7459  ;;  %v3319_v31 = vsel %vm1752_vm7, %v9967_v51, %v7451_v54  ;;  %v7456_v29 = vunpack.i.l.bf16 %v7455_v40 }
 0x392   : > { %v4149_v55 = vsel %vm905_vm2, %v4141_v12, %v4074_v50  ;;  %v7461_v20 = vunpack.i.l.bf16 %v10335_v63  ;;  %v3382_v49 = vsel %vm3357_vm13, %v3349_v62, %v7441_v33  ;;  %v7447_v12 = vunpack.i.h.bf16 %v7445_v19 }
 0x393   : > { %v3839_v23 = vmax.f32 %v3701_v10, 0.0  ;;  %v10328_v58 = vsel %vm734_vm1, %v4149_v55, %v4090_v42  ;;  %v3415_v51 = vsel %vm3390_vm14, %v3382_v49, %v7446_v34  ;;  %v7457_v10 = vunpack.i.h.bf16 %v7455_v40 }
 0x394   : > { %v3350_v59 = vsel %vm1884_vm11, %v3319_v31, %v7461_v20  ;;  %v3448_v42 = vsel %vm3423_vm15, %v3415_v51, %v7456_v29 }
 0x395   : > { %3871 = vst.msk [vmem:[%s10262_s29 + $0x28] sm:$0xff] %vm1752_vm7, %v3839_v23  ;;  %v3383_v8 = vsel %vm3357_vm13, %v3350_v59, %v7442_v9 }
 0x396   : > { %v3416_v19 = vsel %vm3390_vm14, %v3383_v8, %v7447_v12 }
 0x397   : > { %v3449_v9 = vsel %vm3423_vm15, %v3416_v19, %v7457_v10 }
 0x39b   : > { %v3705_v32 = vpop.f32.mrb[12].mxu1 }
 0x39c   : > { %v3706_v25 = vadd.f32 %v10240_v27, %v3705_v32  ;;  %v3707_v38 = vpop.f32.mrb[13].mxu1 }
 0x39d   : > { %v4173_v38 = vrot.slane %v10328_v58, 7  ;;  %v4480_v58 = vld [vmem:[%s12046_s5 + $0x8] sm:$0xff] }
 0x39e   : > { %v3840_v36 = vmax.f32 %v3706_v25, 0.0 }
 0x39f   : > { %v3710_v48 = vpop.f32.mrb[14].mxu1  ;;  %v10377_v44 = vsel %vm575_vm0, 0.0, %v4173_v38  ;;  %v4197_v59 = vsel %vm575_vm0, %v4173_v38, 0.0  ;;  %v4486_v38 = vld [vmem:[%s12046_s5 + $0x38] sm:$0xff] }
 0x3a0   : > { %3872 = vst.msk [vmem:[%s10262_s29 + $0x30] sm:$0xff] %vm1752_vm7, %v3840_v36  ;;  %v3900_v41 = vmax.f32 %v3838_v6, %v3840_v36  ;;  %v3711_v45 = vadd.f32 %v10240_v27, %v3710_v48  ;;  %v3712_v11 = vpop.f32.mrb[15].mxu1 }
 0x3a1   : > { %v4479_v11 = vld [vmem:[%s12046_s5] sm:$0xff] }
 0x3a2   : > { %v3923_v14 = vrot.slane %v3900_v41, 1  ;;  %v3841_v24 = vmax.f32 %v3711_v45, 0.0  ;;  %v6767_v49 = vpack.c.bf16 %v4480_v58, %v4479_v11 }
 0x3a4   : > { %v3939_v22 = vmax.f32 %v3900_v41, %v3923_v14  ;;  %3873 = vst.msk [vmem:[%s10262_s29 + $0x38] sm:$0xff] %vm1752_vm7, %v3841_v24  ;;  %v3901_v15 = vmax.f32 %v3839_v23, %v3841_v24  ;;  %6768 = vmatpush1.bf16.msra.mxu0 %v6767_v49 }
 0x3a5   : > { %v7465_v17 = vpop.permute.xlu1 %7464 }
 0x3a6   : > { %v3987_v16 = vrot.slane %v3939_v22, 1  ;;  %v4003_v46 = vrot.slane %v3939_v22, 2  ;;  %v3955_v6 = vrot.slane %v3901_v15, 1  ;;  %v4019_v56 = vrot.slane %v3939_v22, 3 }
 0x3a7   : > { %v7466_v50 = vunpack.i.l.bf16 %v7465_v17  ;;  %v7467_v36 = vunpack.i.h.bf16 %v7465_v17 }
 0x3a8   : > { %v4107_v60 = vsel %vm575_vm0, %v3939_v22, %v3987_v16  ;;  %v3971_v57 = vmax.f32 %v3901_v15, %v3955_v6  ;;  %v7470_v7 = vpop.permute.xlu0 %7469  ;;  %v3715_v18 = vpop.f32.mrb[16].mxu1  ;;  %v4481_v22 = vld [vmem:[%s12046_s5 + $0x10] sm:$0xff]  ;;  %v4482_v15 = vld [vmem:[%s12046_s5 + $0x18] sm:$0xff] }
 0x3a9   : > { %v4116_v30 = vsel %vm4114_vm6, %v4107_v60, %v4003_v46  ;;  %v3717_v25 = vpop.f32.mrb[17].mxu1  ;;  %v7471_v54 = vunpack.i.l.bf16 %v7470_v7  ;;  %v10361_v48 = vadd.f32 %v10240_v27, %v3715_v18  ;;  %v3481_v45 = vsel %vm3456_vm4, %v3448_v42, %v7466_v50  ;;  %v10398_v6 = vpop.permute.xlu1 %7474  ;;  %v4484_v50 = vld [vmem:[%s12046_s5 + $0x28] sm:$0xff] }
 0x3aa   : > { %v4125_v23 = vsel %vm4123_vm8, %v4116_v30, %v4019_v56  ;;  %v4043_v55 = vrot.slane %v3971_v57, 4  ;;  %v4059_v32 = vrot.slane %v3971_v57, 5  ;;  %v4075_v4 = vrot.slane %v3971_v57, 6 }
 0x3ab   : > { %v4091_v20 = vrot.slane %v3971_v57, 7  ;;  %v7472_v33 = vunpack.i.h.bf16 %v7470_v7  ;;  %v3842_v40 = vmax.f32 %v10361_v48, 0.0  ;;  %v3514_v24 = vsel %vm3489_vm5, %v3481_v45, %v7471_v54  ;;  %v4483_v57 = vld [vmem:[%s12046_s5 + $0x20] sm:$0xff]  ;;  %v4489_v48 = vld [vmem:[%s12046_s5 + $0x50] sm:$0xff] }
 0x3ac   : > { %v4133_v41 = vsel %vm2026_vm3, %v4125_v23, %v4043_v55  ;;  %v3720_v14 = vpop.f32.mrb[18].mxu1  ;;  %3794 = vmatmul.mubr.f32.gmra.mrb[48].mxu1 %v3514_v24  ;;  %v3482_v16 = vsel %vm3456_vm4, %v3449_v9, %v7467_v36  ;;  %v6770_v17 = vpack.c.bf16 %v4482_v15, %v4481_v22  ;;  %v4262_v56 = vrot.slane %v4197_v59, 2  ;;  %v4487_v24 = vld [vmem:[%s12046_s5 + $0x40] sm:$0xff]  ;;  %v10458_v9 = vpop.permute.xlu0 %7479 }
 0x3ad   : > { %v4142_v35 = vsel %vm4140_vm9, %v4133_v41, %v4059_v32  ;;  %v3722_v31 = vpop.f32.mrb[19].mxu1  ;;  %3874 = vst.msk [vmem:[%s10262_s29 + $0x40] sm:$0xff] %vm1752_vm7, %v3842_v40  ;;  %v10391_v62 = vadd.f32 %v10240_v27, %v3720_v14  ;;  %6330 = vmatprep.mubr.msk.f32.mxu1 %vm1752_vm7, %v10133_v3  ;;  %v3515_v8 = vsel %vm3489_vm5, %v3482_v16, %v7472_v33  ;;  %v4261_v3 = vrot.slane %v10377_v44, 2  ;;  %v10433_v36 = vpop.permute.xlu1 %7484 }
 0x3ae   : > { %v4150_v34 = vsel %vm905_vm2, %v4142_v35, %v4075_v4  ;;  %v12047_v60 = vmov 0.0|0.0   ;;  %v4219_v30 = vrot.slane %v10377_v44, 1  ;;  %v4220_v7 = vrot.slane %v4197_v59, 1 }
 0x3af   : > { %v4158_v29 = vsel %vm734_vm1, %v4150_v34, %v4091_v20  ;;  %v3843_v51 = vmax.f32 %v10391_v62, 0.0  ;;  %6769 = vmatprep.subr.bf16.mxu0 %v12047_v60  ;;  %v6773_v25 = vpack.c.bf16 %v4484_v50, %v4483_v57  ;;  %v4263_v54 = vsel %vm905_vm2, %v4261_v3, %v4262_v56  ;;  %v4488_v34 = vld [vmem:[%s12046_s5 + $0x48] sm:$0xff] }
 0x3b0   : > { %v4174_v46 = vrot.slane %v4158_v29, 7  ;;  %3799 = vmatmul.mubr.f32.gmra.mrb[50].mxu1 %v3515_v8  ;;  %6771 = vmatpush1.bf16.msra.mxu0 %v6770_v17  ;;  %v4221_v20 = vsel %vm734_vm1, %v4219_v30, %v4220_v7  ;;  %v6779_v49 = vpack.c.bf16 %v4488_v34, %v4487_v24  ;;  %v7452_v16 = vunpack.i.h.bf16 %v10332_v13 }
 0x3b1   : > { %3875 = vst.msk [vmem:[%s10262_s29 + $0x48] sm:$0xff] %vm1752_vm7, %v3843_v51  ;;  %6331 = vmatprep.mubr.msk.f32.mxu1 %vm1752_vm7, %v10196_v43  ;;  %6772 = vmatprep.subr.bf16.mxu0 %v12047_v60  ;;  %v4485_v43 = vld [vmem:[%s12046_s5 + $0x30] sm:$0xff]  ;;  %v10460_v29 = vpop.permute.xlu1 %7494  ;;  %v7462_v17 = vunpack.i.h.bf16 %v10335_v63  ;;  %v7486_v3 = vunpack.i.l.bf16 %v10433_v36 }
 0x3b2   : > { %v10417_v12 = vsel %vm575_vm0, 0.0, %v4174_v46  ;;  %v4198_v10 = vsel %vm575_vm0, %v4174_v46, 0.0  ;;  %v6776_v33 = vpack.c.bf16 %v4486_v38, %v4485_v43  ;;  %v7496_v13 = vunpack.i.l.bf16 %v10460_v29 }
 0x3b3   : > { %v7548_v18 = vpack.i.bf16 %v10417_v12, %v10377_v44  ;;  %v4223_v42 = vrot.slane %v4198_v10, 1  ;;  %v4264_v23 = vrot.slane %v10417_v12, 2  ;;  %v4265_v55 = vrot.slane %v4198_v10, 2 }
 0x3b4   : > { %v4222_v32 = vrot.slane %v10417_v12, 1  ;;  %6774 = vmatpush1.bf16.msra.mxu0 %v6773_v25  ;;  %v3320_v10 = vsel %vm1752_vm7, %v10041_v21, %v7452_v16  ;;  %v3321_v21 = vsel %vm1752_vm7, %v10038_v37, %v7486_v3  ;;  %v7477_v38 = vunpack.i.h.bf16 %v10398_v6 }
 0x3b5   : > { %7549 = vrot.lane.b32.xlu0 %v7548_v18, %s12014_s17  ;;  %v4266_v19 = vsel %vm905_vm2, %v4264_v23, %v4265_v55  ;;  %6775 = vmatprep.subr.bf16.mxu0 %v12047_v60  ;;  %v4491_v18 = vld [vmem:[%s12046_s5 + $0x60] sm:$0xff]  ;;  %v3351_v62 = vsel %vm1884_vm11, %v3320_v10, %v7462_v17  ;;  %v7490_v23 = vpop.permute.xlu0 %7489  ;;  %v3352_v55 = vsel %vm1884_vm11, %v3321_v21, %v7496_v13  ;;  %s12049_s17 = smov 96  }
 0x3b6   : > { %v10439_v41 = vsel %vm734_vm1, %v4222_v32, %v4223_v42  ;;  %v7568_v45 = vpack.i.bf16 %v4266_v19, %v4263_v54  ;;  %6338 = vmatprep.mubr.msk.f32.mxu0 %vm1752_vm7, %v4266_v19  ;;  %v4492_v42 = vld [vmem:[%s12046_s5 + $0x68] sm:$0xff]  ;;  %v7481_v54 = vunpack.i.l.bf16 %v10458_v9 }
 0x3b7   : > { %v3725_v4 = vpop.f32.mrb[20].mxu1  ;;  %v7553_v35 = vpack.i.bf16 %v10439_v41, %v4221_v20  ;;  %v7491_v20 = vunpack.i.l.bf16 %v7490_v23 }
 0x3b8   : > { %v3726_v11 = vadd.f32 %v10240_v27, %v3725_v4  ;;  %v3727_v58 = vpop.f32.mrb[21].mxu1  ;;  %6777 = vmatpush1.bf16.msra.mxu0 %v6776_v33  ;;  %v6785_v4 = vpack.c.bf16 %v4492_v42, %v4491_v18  ;;  %v7482_v33 = vunpack.i.h.bf16 %v10458_v9  ;;  %v7492_v18 = vunpack.i.h.bf16 %v7490_v23 }
 0x3b9   : > { %7554 = vrot.lane.b32.xlu1 %v7553_v35, %s12048_s25  ;;  %7559 = vrot.lane.b32.xlu0 %v7553_v35, %s12036_s26  ;;  %v4493_v58 = vld [vmem:[%s12046_s5 + $0x70] sm:$0xff] }
 0x3ba   : > { %v3844_v14 = vmax.f32 %v3726_v11, 0.0  ;;  %6778 = vmatprep.subr.bf16.mxu0 %v12047_v60 }
 0x3bb   : > { %v3730_v31 = vpop.f32.mrb[22].mxu1 }
 0x3bc   : > { %3876 = vst.msk [vmem:[%s10262_s29 + $0x50] sm:$0xff] %vm1752_vm7, %v3844_v14  ;;  %v3902_v59 = vmax.f32 %v3842_v40, %v3844_v14  ;;  %v3731_v22 = vadd.f32 %v10240_v27, %v3730_v31  ;;  %v3732_v15 = vpop.f32.mrb[23].mxu1  ;;  %v4490_v40 = vld [vmem:[%s12046_s5 + $0x58] sm:$0xff]  ;;  %6780 = vmatpush1.bf16.msra.mxu0 %v6779_v49  ;;  %v3385_v14 = vsel %vm3357_vm13, %v3352_v55, %v7477_v38 }
 0x3bd   : > { %7564 = vrot.lane.b32.xlu1 %v7568_v45, %s12045_s20  ;;  %7569 = vrot.lane.b32.xlu0 %v7568_v45, %s12039_s16  ;;  %v6782_v50 = vpack.c.bf16 %v4490_v40, %v4489_v48 }
 0x3be   : > { %v3924_v46 = vrot.slane %v3902_v59, 1  ;;  %v3845_v8 = vmax.f32 %v3731_v22, 0.0  ;;  %6781 = vmatprep.subr.bf16.mxu0 %v12047_v60 }
 0x3c0   : > { %v3940_v56 = vmax.f32 %v3902_v59, %v3924_v46  ;;  %3877 = vst.msk [vmem:[%s10262_s29 + $0x58] sm:$0xff] %vm1752_vm7, %v3845_v8  ;;  %v3903_v57 = vmax.f32 %v3843_v51, %v3845_v8  ;;  %v7476_v51 = vunpack.i.l.bf16 %v10398_v6  ;;  %6783 = vmatpush1.bf16.msra.mxu0 %v6782_v50  ;;  %v4494_v6 = vld [vmem:[%s12046_s5 + $0x78] sm:$0xff] }
 0x3c1   : > { %6784 = vmatprep.subr.bf16.mxu0 %v12047_v60  ;;  %v6788_v9 = vpack.c.bf16 %v4494_v6, %v4493_v58 }
 0x3c2   : > { %v3988_v30 = vrot.slane %v3940_v56, 1  ;;  %v4004_v7 = vrot.slane %v3940_v56, 2  ;;  %v3956_v63 = vrot.slane %v3903_v57, 1  ;;  %v4020_v32 = vrot.slane %v3940_v56, 3 }
 0x3c3   : > { %v3384_v35 = vsel %vm3357_vm13, %v3351_v62, %v7476_v51 }
 0x3c4   : > { %v4108_v25 = vsel %vm575_vm0, %v3940_v56, %v3988_v30  ;;  %v3972_v43 = vmax.f32 %v3903_v57, %v3956_v63  ;;  %v3735_v24 = vpop.f32.mrb[24].mxu1  ;;  %v3417_v16 = vsel %vm3390_vm14, %v3384_v35, %v7481_v54  ;;  %6786 = vmatpush1.bf16.msra.mxu0 %v6785_v4  ;;  %v4495_v56 = vld [vmem:[%s12046_s5 + $0x80] sm:$0xff]  ;;  %v4496_v57 = vld [vmem:[%s12046_s5 + $0x88] sm:$0xff]  ;;  %s6385_s5 = sshll.u32 %s8025_s22, 12 }
 0x3c5   : > { %v4117_v19 = vsel %vm4114_vm6, %v4108_v25, %v4004_v7  ;;  %v7500_v34 = vpop.permute.xlu0 %7499  ;;  %v10510_v22 = vadd.f32 %v10240_v27, %v3735_v24  ;;  %v3737_v49 = vpop.f32.mrb[25].mxu1  ;;  %v3450_v13 = vsel %vm3423_vm15, %v3417_v16, %v7491_v20  ;;  %6787 = vmatprep.subr.bf16.mxu0 %v12047_v60  ;;  %v3418_v7 = vsel %vm3390_vm14, %v3385_v14, %v7482_v33 }
 0x3c6   : > { %v4126_v45 = vsel %vm4123_vm8, %v4117_v19, %v4020_v32  ;;  %v4044_v11 = vrot.slane %v3972_v43, 4  ;;  %v4060_v37 = vrot.slane %v3972_v43, 5  ;;  %v4076_v31 = vrot.slane %v3972_v43, 6 }
 0x3c7   : > { %v7501_v15 = vunpack.i.l.bf16 %v7500_v34  ;;  %v4092_v46 = vrot.slane %v3972_v43, 7  ;;  %v3846_v17 = vmax.f32 %v10510_v22, 0.0  ;;  %v7502_v50 = vunpack.i.h.bf16 %v7500_v34 }
 0x3c8   : > { %v4134_v59 = vsel %vm2026_vm3, %v4126_v45, %v4044_v11  ;;  %v7505_v48 = vpop.permute.xlu1 %7504  ;;  %v3740_v10 = vpop.f32.mrb[26].mxu1  ;;  %6789 = vmatpush1.bf16.msra.mxu0 %v6788_v9  ;;  %v6791_v25 = vpack.c.bf16 %v4496_v57, %v4495_v56  ;;  %v3451_v23 = vsel %vm3423_vm15, %v3418_v7, %v7492_v18  ;;  %v7487_v14 = vunpack.i.h.bf16 %v10433_v36 }
 0x3c9   : > { %v4143_v8 = vsel %vm4140_vm9, %v4134_v59, %v4060_v37  ;;  %v7506_v3 = vunpack.i.l.bf16 %v7505_v48  ;;  %v3483_v30 = vsel %vm3456_vm4, %v3450_v13, %v7501_v15  ;;  %3878 = vst.msk [vmem:[%s10262_s29 + $0x60] sm:$0xff] %vm1752_vm7, %v3846_v17  ;;  %v7507_v42 = vunpack.i.h.bf16 %v7505_v48  ;;  %v7510_v51 = vpop.permute.xlu0 %7509  ;;  %v3742_v21 = vpop.f32.mrb[27].mxu1  ;;  %6790 = vmatprep.subr.bf16.mxu0 %v12047_v60 }
 0x3ca   : > { %v4151_v40 = vsel %vm905_vm2, %v4143_v8, %v4076_v31  ;;  %v10532_v62 = vadd.f32 %v10240_v27, %v3740_v10  ;;  %v3484_v38 = vsel %vm3456_vm4, %v3451_v23, %v7502_v50  ;;  %v7497_v34 = vunpack.i.h.bf16 %v10460_v29 }
 0x3cb   : > { %v4159_v63 = vsel %vm734_vm1, %v4151_v40, %v4092_v46  ;;  %v3516_v55 = vsel %vm3489_vm5, %v3483_v30, %v7506_v3  ;;  %v3517_v4 = vsel %vm3489_vm5, %v3484_v38, %v7507_v42  ;;  %v7511_v31 = vunpack.i.l.bf16 %v7510_v51 }
 0x3cc   : > { %3804 = vmatmul.mubr.f32.gmra.mrb[52].mxu1 %v3516_v55  ;;  %v4175_v32 = vrot.slane %v4159_v63, 7  ;;  %v3847_v43 = vmax.f32 %v10532_v62, 0.0  ;;  %6792 = vmatpush1.bf16.msra.mxu0 %v6791_v25  ;;  %v7515_v58 = vpop.permute.xlu1 %7514  ;;  %v7512_v15 = vunpack.i.h.bf16 %v7510_v51 }
 0x3cd   : > { %6332 = vmatprep.mubr.msk.f32.mxu1 %vm1752_vm7, %v10199_v28  ;;  %v7520_v45 = vpop.permute.xlu0 %7519  ;;  %v7516_v49 = vunpack.i.l.bf16 %v7515_v58  ;;  %v7517_v3 = vunpack.i.h.bf16 %v7515_v58 }
 0x3ce   : > { %v10542_v54 = vsel %vm575_vm0, 0.0, %v4175_v32  ;;  %v10545_v19 = vsel %vm575_vm0, %v4175_v32, 0.0  ;;  %3879 = vst.msk [vmem:[%s10262_s29 + $0x68] sm:$0xff] %vm1752_vm7, %v3847_v43  ;;  %v7521_v35 = vunpack.i.l.bf16 %v7520_v45 }
 0x3cf   : > { %v7573_v28 = vpack.i.bf16 %v10542_v54, %v10417_v12  ;;  %v4225_v60 = vrot.slane %v10542_v54, 1  ;;  %v4226_v20 = vrot.slane %v10545_v19, 1 }
 0x3d0   : > { %3809 = vmatmul.mubr.f32.gmra.mrb[54].mxu1 %v3517_v4  ;;  %v7525_v24 = vpop.permute.xlu1 %7524 }
 0x3d1   : > { %7574 = vrot.lane.b32.xlu1 %v7573_v28, %s12049_s17  ;;  %6333 = vmatprep.mubr.msk.f32.mxu1 %vm1752_vm7, %v10253_v61  ;;  %v10560_v11 = vsel %vm734_vm1, %v4225_v60, %v4226_v20  ;;  %v7530_v6 = vpop.permute.xlu0 %7529  ;;  %v3323_v61 = vsel %vm1752_vm7, %v10105_v39, %v7521_v35  ;;  %v7526_v16 = vunpack.i.l.bf16 %v7525_v24  ;;  %v7527_v32 = vunpack.i.h.bf16 %v7525_v24 }
 0x3d2   : > { %v7578_v37 = vpack.i.bf16 %v10560_v11, %v10439_v41  ;;  %v7531_v33 = vunpack.i.l.bf16 %v7530_v6  ;;  %v3322_v41 = vsel %vm1752_vm7, %v10108_v47, %v7487_v14  ;;  %v7522_v47 = vunpack.i.h.bf16 %v7520_v45 }
 0x3d3   : > { %v3353_v48 = vsel %vm1884_vm11, %v3322_v41, %v7497_v34  ;;  %v7532_v25 = vunpack.i.h.bf16 %v7530_v6 }
 0x3d4   : > { %7579 = vrot.lane.b32.xlu0 %v7578_v37, %s12050_s30  ;;  %v3354_v59 = vsel %vm1884_vm11, %v3323_v61, %v7531_v33  ;;  %v3386_v40 = vsel %vm3357_vm13, %v3353_v48, %v7511_v31 }
 0x3d5   : > { %v3387_v36 = vsel %vm3357_vm13, %v3354_v59, %v7512_v15  ;;  %v3419_v13 = vsel %vm3390_vm14, %v3386_v40, %v7516_v49 }
 0x3d6   : > { %v3452_v7 = vsel %vm3423_vm15, %v3419_v13, %v7526_v16  ;;  %v3420_v63 = vsel %vm3390_vm14, %v3387_v36, %v7517_v3 }
 0x3d7   : > { %v3453_v22 = vsel %vm3423_vm15, %v3420_v63, %v7527_v32 }
 0x3df   : > { %v3745_v46 = vpop.f32.mrb[28].mxu1 }
 0x3e0   : > { %v3746_v29 = vadd.f32 %v10240_v27, %v3745_v46  ;;  %v3747_v9 = vpop.f32.mrb[29].mxu1 }
 0x3e1   : > { %v7535_v8 = vpop.permute.xlu1 %7534 }
 0x3e2   : > { %v7536_v39 = vunpack.i.l.bf16 %v7535_v8  ;;  %v3848_v56 = vmax.f32 %v3746_v29, 0.0  ;;  %v7537_v42 = vunpack.i.h.bf16 %v7535_v8 }
 0x3e3   : > { %v7540_v57 = vpop.permute.xlu0 %7539  ;;  %v3750_v50 = vpop.f32.mrb[30].mxu1 }
 0x3e4   : > { %v7541_v10 = vunpack.i.l.bf16 %v7540_v57  ;;  %3880 = vst.msk [vmem:[%s10262_s29 + $0x70] sm:$0xff] %vm1752_vm7, %v3848_v56  ;;  %v3904_v18 = vmax.f32 %v3846_v17, %v3848_v56  ;;  %v3751_v51 = vadd.f32 %v10240_v27, %v3750_v50  ;;  %v3752_v21 = vpop.f32.mrb[31].mxu1  ;;  %v3485_v55 = vsel %vm3456_vm4, %v3452_v7, %v7536_v39 }
 0x3e5   : > { %v7545_v30 = vpop.permute.xlu1 %7544  ;;  %v7542_v23 = vunpack.i.h.bf16 %v7540_v57  ;;  %v3324_v17 = vsel %vm1752_vm7, %v10175_v52, %v7522_v47  ;;  %v3486_v6 = vsel %vm3456_vm4, %v3453_v22, %v7537_v42 }
 0x3e6   : > { %v3518_v38 = vsel %vm3489_vm5, %v3485_v55, %v7541_v10  ;;  %v3925_v4 = vrot.slane %v3904_v18, 1  ;;  %v3849_v28 = vmax.f32 %v3751_v51, 0.0  ;;  %v7546_v60 = vunpack.i.l.bf16 %v7545_v30 }
 0x3e7   : > { %v2973_v20 = vpop.permute.xlu0 %2972  ;;  %3814 = vmatmul.mubr.f32.gmra.mrb[56].mxu1 %v3518_v38  ;;  %v3355_v35 = vsel %vm1884_vm11, %v3324_v17, %v7532_v25  ;;  %v3519_v33 = vsel %vm3489_vm5, %v3486_v6, %v7542_v23  ;;  %v7547_v3 = vunpack.i.h.bf16 %v7545_v30 }
 0x3e8   : > { %6334 = vmatprep.mubr.msk.f32.mxu1 %vm1752_vm7, %v10256_v26  ;;  %v3941_v37 = vmax.f32 %v3904_v18, %v3925_v4  ;;  %3881 = vst.msk [vmem:[%s10262_s29 + $0x78] sm:$0xff] %vm1752_vm7, %v3849_v28  ;;  %v3905_v58 = vmax.f32 %v3847_v43, %v3849_v28  ;;  %v3388_v34 = vsel %vm3357_vm13, %v3355_v35, %v7546_v60  ;;  %v4267_v60 = vrot.slane %v10542_v54, 2 }
 0x3e9   : > { %v2612_v45 = vpop.permute.xlu1 %2611  ;;  %v3421_v15 = vsel %vm3390_vm14, %v3388_v34, %v2973_v20  ;;  %v4268_v20 = vrot.slane %v10545_v19, 2 }
 0x3ea   : > { %v3989_v14 = vrot.slane %v3941_v37, 1  ;;  %v4005_v24 = vrot.slane %v3941_v37, 2  ;;  %v3957_v26 = vrot.slane %v3905_v58, 1  ;;  %v4021_v31 = vrot.slane %v3941_v37, 3 }
 0x3eb   : > { %v3074_v61 = vpop.permute.xlu0 %3073  ;;  %3819 = vmatmul.mubr.f32.gmra.mrb[58].mxu1 %v3519_v33  ;;  %v3325_v49 = vsel %vm1752_vm7, %v10172_v5, %v2612_v45  ;;  %v10652_v17 = vsel %vm905_vm2, %v4267_v60, %v4268_v20 }
 0x3ec   : > { %6335 = vmatprep.mubr.msk.f32.mxu1 %vm1752_vm7, %v8059_v2  ;;  %v4109_v62 = vsel %vm575_vm0, %v3941_v37, %v3989_v14  ;;  %v3973_v43 = vmax.f32 %v3905_v58, %v3957_v26  ;;  %v3454_v8 = vsel %vm3423_vm15, %v3421_v15, %v3074_v61 }
 0x3ed   : > { %v2778_v52 = vpop.permute.xlu1 %2777  ;;  %v4118_v59 = vsel %vm4114_vm6, %v4109_v62, %v4005_v24 }
 0x3ee   : > { %v4127_v41 = vsel %vm4123_vm8, %v4118_v59, %v4021_v31  ;;  %v4045_v16 = vrot.slane %v3973_v43, 4  ;;  %v4061_v46 = vrot.slane %v3973_v43, 5  ;;  %v3356_v36 = vsel %vm1884_vm11, %v3325_v49, %v2778_v52 }
 0x3ef   : > { %v10608_v48 = vpop.permute.xlu0 %3169  ;;  %v4077_v39 = vrot.slane %v3973_v43, 6  ;;  %v4093_v13 = vrot.slane %v3973_v43, 7  ;;  %v3389_v47 = vsel %vm3357_vm13, %v3356_v36, %v7547_v3 }
 0x3f0   : > { %v3487_v29 = vsel %vm3456_vm4, %v3454_v8, %v10608_v48  ;;  %v4135_v40 = vsel %vm2026_vm3, %v4127_v41, %v4045_v16 }
 0x3f1   : > { %v10613_v9 = vpop.permute.xlu1 %3262  ;;  %v4144_v56 = vsel %vm4140_vm9, %v4135_v40, %v4061_v46 }
 0x3f2   : > { %v3520_v5 = vsel %vm3489_vm5, %v3487_v29, %v10613_v9  ;;  %v4152_v57 = vsel %vm905_vm2, %v4144_v56, %v4077_v39 }
 0x3f3   : > { %3824 = vmatmul.mubr.f32.gmra.mrb[60].mxu1 %v3520_v5  ;;  %v2975_v50 = vpop.permute.xlu0 %2974  ;;  %v4160_v30 = vsel %vm734_vm1, %v4152_v57, %v4093_v13 }
 0x3f4   : > { %6336 = vmatprep.mubr.msk.f32.mxu1 %vm1752_vm7, %v8059_v2  ;;  %v3422_v10 = vsel %vm3390_vm14, %v3389_v47, %v2975_v50  ;;  %v4176_v18 = vrot.slane %v4160_v30, 7 }
 0x3f5   : > { %v3076_v7 = vpop.permute.xlu1 %3075 }
 0x3f6   : > { %v3455_v63 = vsel %vm3423_vm15, %v3422_v10, %v3076_v7  ;;  %v10631_v21 = vsel %vm575_vm0, 0.0, %v4176_v18  ;;  %v4200_v55 = vsel %vm575_vm0, %v4176_v18, 0.0 }
 0x3f7   : > { %v3488_v42 = vsel %vm3456_vm4, %v3455_v63, %v10608_v48  ;;  %v7583_v32 = vpack.i.bf16 %v10631_v21, %v10542_v54  ;;  %v4228_v25 = vrot.slane %v10631_v21, 1  ;;  %v4229_v23 = vrot.slane %v4200_v55, 1 }
 0x3f8   : > { %v3521_v51 = vsel %vm3489_vm5, %v3488_v42, %v10613_v9  ;;  %v4270_v38 = vrot.slane %v10631_v21, 2  ;;  %v4271_v4 = vrot.slane %v4200_v55, 2 }
 0x3f9   : > { %3829 = vmatmul.mubr.f32.gmra.mrb[62].mxu1 %v3521_v51  ;;  %7584 = vrot.lane.b32.xlu1 %v7583_v32, %s12051_s1  ;;  %v10640_v28 = vsel %vm734_vm1, %v4228_v25, %v4229_v23 }
 0x3fa   : > { %v7588_v45 = vpack.i.bf16 %v10640_v28, %v10560_v11  ;;  %v10647_v22 = vsel %vm905_vm2, %v4270_v38, %v4271_v4 }
 0x3fb   : > { %v7598_v58 = vpack.i.bf16 %v10647_v22, %v10652_v17 }
 0x3fc   : > { %7589 = vrot.lane.b32.xlu0 %v7588_v45, %s12048_s25 }
 0x3fd   : > { %7594 = vrot.lane.b32.xlu1 %v7588_v45, %s12036_s26 }
 0x3ff   : > { %v3755_v37 = vpop.f32.mrb[32].mxu1 }
 0x400   : > { %v3756_v19 = vadd.f32 %v10240_v27, %v3755_v37  ;;  %v3757_v6 = vpop.f32.mrb[33].mxu1  ;;  %7599 = vrot.lane.b32.xlu0 %v7598_v58, %s12045_s20 }
 0x401   : > { %7604 = vrot.lane.b32.xlu1 %v7598_v58, %s12039_s16 }
 0x402   : > { %v3850_v11 = vmax.f32 %v3756_v19, 0.0 }
 0x403   : > { %v3760_v35 = vpop.f32.mrb[34].mxu1 }
 0x404   : > { %3882 = vst.msk [vmem:[%s10262_s29 + $0x80] sm:$0xff] %vm1752_vm7, %v3850_v11  ;;  %v3761_v33 = vadd.f32 %v10240_v27, %v3760_v35  ;;  %v3762_v14 = vpop.f32.mrb[35].mxu1  ;;  %v10702_v35 = vld [vmem:[%s12044_s4] ss:$0 sm:$0xff] }
 0x406   : > { %v3851_v24 = vmax.f32 %v3761_v33, 0.0 }
 0x408   : > { %3883 = vst.msk [vmem:[%s10262_s29 + $0x88] sm:$0xff] %vm1752_vm7, %v3851_v24 }
 0x41f   : > { %v3765_v26 = vpop.f32.mrb[36].mxu1 }
 0x420   : > { %v3766_v34 = vadd.f32 %v10240_v27, %v3765_v26  ;;  %v3767_v61 = vpop.f32.mrb[37].mxu1 }
 0x422   : > { %v3852_v52 = vmax.f32 %v3766_v34, 0.0 }
 0x423   : > { %v3770_v31 = vpop.f32.mrb[38].mxu1 }
 0x424   : > { %3884 = vst.msk [vmem:[%s10262_s29 + $0x90] sm:$0xff] %vm1752_vm7, %v3852_v52  ;;  %v3906_v62 = vmax.f32 %v3850_v11, %v3852_v52  ;;  %v3771_v43 = vadd.f32 %v10240_v27, %v3770_v31  ;;  %v3772_v59 = vpop.f32.mrb[39].mxu1 }
 0x426   : > { %v3926_v15 = vrot.slane %v3906_v62, 1  ;;  %v3853_v49 = vmax.f32 %v3771_v43, 0.0 }
 0x427   : > { %v7550_v46 = vpop.permute.xlu0 %7549 }
 0x428   : > { %v3942_v41 = vmax.f32 %v3906_v62, %v3926_v15  ;;  %3885 = vst.msk [vmem:[%s10262_s29 + $0x98] sm:$0xff] %vm1752_vm7, %v3853_v49  ;;  %v3907_v16 = vmax.f32 %v3851_v24, %v3853_v49  ;;  %v7551_v24 = vunpack.i.l.bf16 %v7550_v46  ;;  %v7552_v31 = vunpack.i.h.bf16 %v7550_v46 }
 0x42a   : > { %v3990_v8 = vrot.slane %v3942_v41, 1  ;;  %v4006_v36 = vrot.slane %v3942_v41, 2  ;;  %v3958_v29 = vrot.slane %v3907_v16, 1  ;;  %v4022_v39 = vrot.slane %v3942_v41, 3 }
 0x42b   : > { %v7560_v13 = vpop.permute.xlu0 %7559  ;;  %v7555_v45 = vpop.permute.xlu1 %7554 }
 0x42c   : > { %v4110_v40 = vsel %vm575_vm0, %v3942_v41, %v3990_v8  ;;  %v3974_v3 = vmax.f32 %v3907_v16, %v3958_v29  ;;  %v7562_v47 = vunpack.i.h.bf16 %v7560_v13  ;;  %v7561_v58 = vunpack.i.l.bf16 %v7560_v13 }
 0x42d   : > { %v4119_v5 = vsel %vm4114_vm6, %v4110_v40, %v4006_v36  ;;  %v4439_v41 = vsel %vm3357_vm13, %v9707_v53, %v7551_v24  ;;  %v7557_v16 = vunpack.i.h.bf16 %v7555_v45 }
 0x42e   : > { %v4128_v27 = vsel %vm4123_vm8, %v4119_v5, %v4022_v39  ;;  %v4046_v56 = vrot.slane %v3974_v3, 4  ;;  %v4062_v57 = vrot.slane %v3974_v3, 5  ;;  %v4078_v50 = vrot.slane %v3974_v3, 6 }
 0x42f   : > { %v4094_v7 = vrot.slane %v3974_v3, 7  ;;  %v7570_v63 = vpop.permute.xlu0 %7569  ;;  %v4426_v51 = vsel %vm1752_vm7, %v10417_v12, %v7562_v47  ;;  %v7565_v19 = vpop.permute.xlu1 %7564  ;;  %v4425_v26 = vsel %vm1752_vm7, %v10377_v44, %v7561_v58 }
 0x430   : > { %v4136_v10 = vsel %vm2026_vm3, %v4128_v27, %v4046_v56  ;;  %v7572_v42 = vunpack.i.h.bf16 %v7570_v63  ;;  %v7571_v6 = vunpack.i.l.bf16 %v7570_v63  ;;  %v7566_v62 = vunpack.i.l.bf16 %v7565_v19 }
 0x431   : > { %v4145_v30 = vsel %vm4140_vm9, %v4136_v10, %v4062_v57  ;;  %v7567_v13 = vunpack.i.h.bf16 %v7565_v19 }
 0x432   : > { %v4153_v18 = vsel %vm905_vm2, %v4145_v30, %v4078_v50  ;;  %v10680_v32 = vsel %vm1884_vm11, %v4426_v51, %v7572_v42  ;;  %v4432_v34 = vsel %vm1884_vm11, %v4425_v26, %v7571_v6 }
 0x433   : > { %v4161_v55 = vsel %vm734_vm1, %v4153_v18, %v4094_v7  ;;  %v4440_v44 = vsel %vm3357_vm13, %v4432_v34, %v7552_v31 }
 0x434   : > { %v4177_v25 = vrot.slane %v4161_v55, 7  ;;  %v4448_v5 = vsel %vm3390_vm14, %v4440_v44, %v7557_v16 }
 0x435   : > { %v4456_v56 = vsel %vm3423_vm15, %v4448_v5, %v7567_v13 }
 0x436   : > { %v10683_v23 = vsel %vm575_vm0, 0.0, %v4177_v25  ;;  %v10686_v38 = vsel %vm575_vm0, %v4177_v25, 0.0 }
 0x437   : > { %v7608_v4 = vpack.i.bf16 %v10683_v23, %v10631_v21  ;;  %v4231_v60 = vrot.slane %v10683_v23, 1  ;;  %v4232_v20 = vrot.slane %v10686_v38, 1 }
 0x439   : > { %7609 = vrot.lane.b32.xlu0 %v7608_v4, %s12049_s17  ;;  %v10694_v12 = vsel %vm734_vm1, %v4231_v60, %v4232_v20 }
 0x43a   : > { %v7613_v37 = vpack.i.bf16 %v10694_v12, %v10640_v28  ;;  %v7556_v28 = vunpack.i.l.bf16 %v7555_v45 }
 0x43c   : > { %7614 = vrot.lane.b32.xlu1 %v7613_v37, %s12050_s30  ;;  %v4447_v8 = vsel %vm3390_vm14, %v4439_v41, %v7556_v28  ;;  %v4273_v41 = vrot.slane %v10683_v23, 2 }
 0x43d   : > { %v4455_v46 = vsel %vm3423_vm15, %v4447_v8, %v7566_v62 }
 0x440   : > { %v3775_v11 = vpop.f32.mrb[40].mxu1 }
 0x441   : > { %v3776_v33 = vadd.f32 %v10702_v35, %v3775_v11  ;;  %v3777_v14 = vpop.f32.mrb[41].mxu1 }
 0x443   : > { %v3854_v61 = vmax.f32 %v3776_v33, 0.0  ;;  %v7575_v52 = vpop.permute.xlu1 %7574 }
 0x444   : > { %v3780_v43 = vpop.f32.mrb[42].mxu1  ;;  %v7576_v15 = vunpack.i.l.bf16 %v7575_v52  ;;  %v7577_v40 = vunpack.i.h.bf16 %v7575_v52 }
 0x445   : > { %3886 = vst.msk [vmem:[%s10262_s29 + $0xa0] sm:$0xff] %vm1752_vm7, %v3854_v61  ;;  %v3781_v59 = vadd.f32 %v10702_v35, %v3780_v43  ;;  %v3782_v49 = vpop.f32.mrb[43].mxu1 }
 0x446   : > { %v7580_v29 = vpop.permute.xlu0 %7579  ;;  %v4463_v3 = vsel %vm3456_vm4, %v4455_v46, %v7576_v15  ;;  %v4464_v57 = vsel %vm3456_vm4, %v4456_v56, %v7577_v40 }
 0x447   : > { %v3855_v36 = vmax.f32 %v3781_v59, 0.0  ;;  %v7581_v39 = vunpack.i.l.bf16 %v7580_v29  ;;  %v7582_v53 = vunpack.i.h.bf16 %v7580_v29 }
 0x449   : > { %3887 = vst.msk [vmem:[%s10262_s29 + $0xa8] sm:$0xff] %vm1752_vm7, %v3855_v36  ;;  %v4471_v27 = vsel %vm3489_vm5, %v4463_v3, %v7581_v39  ;;  %v4472_v47 = vsel %vm3489_vm5, %v4464_v57, %v7582_v53 }
 0x44a   : > { %4583 = vmatmul.mubr.f32.vlgmr.msra.gmra.mrb[32].mxu0 %v4471_v27 }
 0x44b   : > { %6339 = vmatprep.mubr.msk.f32.mxu0 %vm1752_vm7, %v10652_v17 }
 0x44e   : > { %4588 = vmatmul.mubr.f32.gmra.mrb[34].mxu0 %v4472_v47 }
 0x44f   : > { %6340 = vmatprep.mubr.msk.f32.mxu0 %vm1752_vm7, %v10647_v22 }
 0x45f   : > { %v3785_v50 = vpop.f32.mrb[44].mxu1 }
 0x460   : > { %v3786_v10 = vadd.f32 %v10702_v35, %v3785_v50  ;;  %v3787_v7 = vpop.f32.mrb[45].mxu1 }
 0x462   : > { %v3856_v30 = vmax.f32 %v3786_v10, 0.0 }
 0x463   : > { %v3790_v63 = vpop.f32.mrb[46].mxu1 }
 0x464   : > { %3888 = vst.msk [vmem:[%s10262_s29 + $0xb0] sm:$0xff] %vm1752_vm7, %v3856_v30  ;;  %v3908_v17 = vmax.f32 %v3854_v61, %v3856_v30  ;;  %v3791_v18 = vadd.f32 %v10702_v35, %v3790_v63  ;;  %v3792_v42 = vpop.f32.mrb[47].mxu1 }
 0x466   : > { %v3927_v51 = vrot.slane %v3908_v17, 1  ;;  %v3857_v55 = vmax.f32 %v3791_v18, 0.0 }
 0x468   : > { %v3943_v25 = vmax.f32 %v3908_v17, %v3927_v51  ;;  %3889 = vst.msk [vmem:[%s10262_s29 + $0xb8] sm:$0xff] %vm1752_vm7, %v3857_v55  ;;  %v3909_v4 = vmax.f32 %v3855_v36, %v3857_v55  ;;  %v4274_v36 = vrot.slane %v10686_v38, 2 }
 0x46a   : > { %v3991_v60 = vrot.slane %v3943_v25, 1  ;;  %v4007_v22 = vrot.slane %v3943_v25, 2  ;;  %v3959_v20 = vrot.slane %v3909_v4, 1  ;;  %v4023_v37 = vrot.slane %v3943_v25, 3 }
 0x46b   : > { %v10734_v45 = vpop.permute.xlu1 %7584  ;;  %v10765_v38 = vsel %vm905_vm2, %v4273_v41, %v4274_v36 }
 0x46c   : > { %v4111_v58 = vsel %vm575_vm0, %v3943_v25, %v3991_v60  ;;  %v3975_v19 = vmax.f32 %v3909_v4, %v3959_v20 }
 0x46d   : > { %v4120_v6 = vsel %vm4114_vm6, %v4111_v58, %v4007_v22 }
 0x46e   : > { %v4129_v11 = vsel %vm4123_vm8, %v4120_v6, %v4023_v37  ;;  %v4047_v33 = vrot.slane %v3975_v19, 4  ;;  %v4063_v14 = vrot.slane %v3975_v19, 5  ;;  %v4079_v26 = vrot.slane %v3975_v19, 6  ;;  %v7590_v63 = vpop.permute.xlu0 %7589 }
 0x46f   : > { %v7595_v24 = vpop.permute.xlu1 %7594  ;;  %v4095_v34 = vrot.slane %v3975_v19, 7  ;;  %v7592_v41 = vunpack.i.h.bf16 %v7590_v63 }
 0x470   : > { %v4137_v28 = vsel %vm2026_vm3, %v4129_v11, %v4047_v33  ;;  %v7597_v52 = vunpack.i.h.bf16 %v7595_v24  ;;  %v7596_v51 = vunpack.i.l.bf16 %v7595_v24  ;;  %v7586_v24 = vunpack.i.l.bf16 %v10734_v45 }
 0x471   : > { %v4146_v61 = vsel %vm4140_vm9, %v4137_v28, %v4063_v14  ;;  %v7587_v14 = vunpack.i.h.bf16 %v10734_v45 }
 0x472   : > { %v4154_v31 = vsel %vm905_vm2, %v4146_v61, %v4079_v26  ;;  %v4428_v49 = vsel %vm1752_vm7, %v10631_v21, %v7597_v52  ;;  %v7600_v20 = vpop.permute.xlu0 %7599  ;;  %v4427_v19 = vsel %vm1752_vm7, %v10542_v54, %v7596_v51  ;;  %v7591_v26 = vunpack.i.l.bf16 %v7590_v63 }
 0x473   : > { %v7605_v62 = vpop.permute.xlu1 %7604  ;;  %v4162_v43 = vsel %vm734_vm1, %v4154_v31, %v4095_v34  ;;  %v7601_v31 = vunpack.i.l.bf16 %v7600_v20 }
 0x474   : > { %v7607_v59 = vunpack.i.h.bf16 %v7605_v62  ;;  %v4178_v15 = vrot.slane %v4162_v43, 7  ;;  %v7606_v25 = vunpack.i.l.bf16 %v7605_v62 }
 0x476   : > { %v10747_v44 = vsel %vm1884_vm11, %v4428_v49, %v7607_v59  ;;  %v10750_v16 = vsel %vm575_vm0, 0.0, %v4178_v15  ;;  %v4202_v8 = vsel %vm575_vm0, %v4178_v15, 0.0  ;;  %v4434_v6 = vsel %vm1884_vm11, %v4427_v19, %v7606_v25 }
 0x477   : > { %v7618_v29 = vpack.i.bf16 %v10750_v16, %v10683_v23  ;;  %v4234_v46 = vrot.slane %v10750_v16, 1  ;;  %v4235_v39 = vrot.slane %v4202_v8, 1  ;;  %v4276_v21 = vrot.slane %v10750_v16, 2 }
 0x478   : > { %v4277_v40 = vrot.slane %v4202_v8, 2  ;;  %v4442_v62 = vsel %vm3357_vm13, %v4434_v6, %v7587_v14  ;;  %v4441_v49 = vsel %vm3357_vm13, %v10680_v32, %v7586_v24 }
 0x479   : > { %7619 = vrot.lane.b32.xlu0 %v7618_v29, %s12051_s1  ;;  %v10760_v3 = vsel %vm734_vm1, %v4234_v46, %v4235_v39  ;;  %v4449_v36 = vsel %vm3390_vm14, %v4441_v49, %v7591_v26 }
 0x47a   : > { %v7623_v5 = vpack.i.bf16 %v10760_v3, %v10694_v12  ;;  %v10768_v13 = vsel %vm905_vm2, %v4276_v21, %v4277_v40  ;;  %v7602_v21 = vunpack.i.h.bf16 %v7600_v20 }
 0x47b   : > { %v7633_v53 = vpack.i.bf16 %v10768_v13, %v10765_v38 }
 0x47c   : > { %7624 = vrot.lane.b32.xlu1 %v7623_v5, %s12048_s25 }
 0x47d   : > { %7629 = vrot.lane.b32.xlu0 %v7623_v5, %s12036_s26  ;;  %v4457_v5 = vsel %vm3423_vm15, %v4449_v36, %v7601_v31 }
 0x47f   : > { %v3795_v27 = vpop.f32.mrb[48].mxu1 }
 0x480   : > { %v3796_v56 = vadd.f32 %v10702_v35, %v3795_v27  ;;  %v3797_v57 = vpop.f32.mrb[49].mxu1  ;;  %7634 = vrot.lane.b32.xlu1 %v7633_v53, %s12045_s20 }
 0x481   : > { %7639 = vrot.lane.b32.xlu0 %v7633_v53, %s12039_s16  ;;  %v4450_v53 = vsel %vm3390_vm14, %v4442_v62, %v7592_v41 }
 0x482   : > { %v3858_v12 = vmax.f32 %v3796_v56, 0.0 }
 0x483   : > { %v3800_v47 = vpop.f32.mrb[50].mxu1 }
 0x484   : > { %3890 = vst.msk [vmem:[%s10262_s29 + $0xc0] sm:$0xff] %vm1752_vm7, %v3858_v12  ;;  %v3801_v50 = vadd.f32 %v10702_v35, %v3800_v47  ;;  %v3802_v10 = vpop.f32.mrb[51].mxu1 }
 0x486   : > { %v3859_v7 = vmax.f32 %v3801_v50, 0.0 }
 0x488   : > { %3891 = vst.msk [vmem:[%s10262_s29 + $0xc8] sm:$0xff] %vm1752_vm7, %v3859_v7 }
 0x49f   : > { %v3805_v30 = vpop.f32.mrb[52].mxu1 }
 0x4a0   : > { %v3806_v17 = vadd.f32 %v10702_v35, %v3805_v30  ;;  %v3807_v18 = vpop.f32.mrb[53].mxu1  ;;  %v4458_v30 = vsel %vm3423_vm15, %v4450_v53, %v7602_v21 }
 0x4a2   : > { %v3860_v42 = vmax.f32 %v3806_v17, 0.0 }
 0x4a3   : > { %v3810_v55 = vpop.f32.mrb[54].mxu1 }
 0x4a4   : > { %3892 = vst.msk [vmem:[%s10262_s29 + $0xd0] sm:$0xff] %vm1752_vm7, %v3860_v42  ;;  %v3910_v4 = vmax.f32 %v3858_v12, %v3860_v42  ;;  %v3811_v60 = vadd.f32 %v10702_v35, %v3810_v55  ;;  %v3812_v22 = vpop.f32.mrb[55].mxu1 }
 0x4a6   : > { %v3928_v37 = vrot.slane %v3910_v4, 1  ;;  %v3861_v58 = vmax.f32 %v3811_v60, 0.0 }
 0x4a8   : > { %v3944_v11 = vmax.f32 %v3910_v4, %v3928_v37  ;;  %3893 = vst.msk [vmem:[%s10262_s29 + $0xd8] sm:$0xff] %vm1752_vm7, %v3861_v58  ;;  %v3911_v33 = vmax.f32 %v3859_v7, %v3861_v58 }
 0x4aa   : > { %v3992_v28 = vrot.slane %v3944_v11, 1  ;;  %v4008_v34 = vrot.slane %v3944_v11, 2  ;;  %v3960_v61 = vrot.slane %v3911_v33, 1  ;;  %v4024_v43 = vrot.slane %v3944_v11, 3 }
 0x4ab   : > { %v7610_v52 = vpop.permute.xlu0 %7609 }
 0x4ac   : > { %v4112_v54 = vsel %vm575_vm0, %v3944_v11, %v3992_v28  ;;  %v3976_v59 = vmax.f32 %v3911_v33, %v3960_v61  ;;  %v7611_v15 = vunpack.i.l.bf16 %v7610_v52  ;;  %v7612_v32 = vunpack.i.h.bf16 %v7610_v52 }
 0x4ad   : > { %v4121_v8 = vsel %vm4114_vm6, %v4112_v54, %v4008_v34 }
 0x4ae   : > { %v7615_v45 = vpop.permute.xlu1 %7614  ;;  %v4130_v29 = vsel %vm4123_vm8, %v4121_v8, %v4024_v43  ;;  %v4048_v46 = vrot.slane %v3976_v59, 4  ;;  %v4064_v39 = vrot.slane %v3976_v59, 5  ;;  %v4080_v27 = vrot.slane %v3976_v59, 6 }
 0x4af   : > { %v7616_v40 = vunpack.i.l.bf16 %v7615_v45  ;;  %v4465_v57 = vsel %vm3456_vm4, %v4457_v5, %v7611_v15  ;;  %v4096_v12 = vrot.slane %v3976_v59, 7  ;;  %v7617_v50 = vunpack.i.h.bf16 %v7615_v45 }
 0x4b0   : > { %v4138_v56 = vsel %vm2026_vm3, %v4130_v29, %v4048_v46  ;;  %v4466_v17 = vsel %vm3456_vm4, %v4458_v30, %v7612_v32 }
 0x4b1   : > { %v4147_v47 = vsel %vm4140_vm9, %v4138_v56, %v4064_v39  ;;  %v4473_v10 = vsel %vm3489_vm5, %v4465_v57, %v7616_v40  ;;  %v4474_v42 = vsel %vm3489_vm5, %v4466_v17, %v7617_v50 }
 0x4b2   : > { %v4155_v7 = vsel %vm905_vm2, %v4147_v47, %v4080_v27  ;;  %4593 = vmatmul.mubr.f32.gmra.mrb[36].mxu0 %v4473_v10 }
 0x4b3   : > { %6341 = vmatprep.mubr.msk.f32.mxu0 %vm1752_vm7, %v10765_v38  ;;  %v4163_v63 = vsel %vm734_vm1, %v4155_v7, %v4096_v12 }
 0x4b4   : > { %v4179_v18 = vrot.slane %v4163_v63, 7 }
 0x4b6   : > { %4598 = vmatmul.mubr.f32.gmra.mrb[38].mxu0 %v4474_v42  ;;  %v10814_v51 = vsel %vm575_vm0, 0.0, %v4179_v18  ;;  %v4203_v55 = vsel %vm575_vm0, %v4179_v18, 0.0 }
 0x4b7   : > { %6342 = vmatprep.mubr.msk.f32.mxu0 %vm1752_vm7, %v10768_v13  ;;  %v7643_v38 = vpack.i.bf16 %v10814_v51, %v10750_v16  ;;  %v4237_v25 = vrot.slane %v10814_v51, 1  ;;  %v4238_v4 = vrot.slane %v4203_v55, 1  ;;  %v4279_v13 = vrot.slane %v10814_v51, 2 }
 0x4b8   : > { %v4280_v19 = vrot.slane %v4203_v55, 2  ;;  %v4951_v55 = vld [vmem:[%s11975_s7 + $0x80] sm:$0xff] }
 0x4b9   : > { %7644 = vrot.lane.b32.xlu1 %v7643_v38, %s12049_s17  ;;  %v4239_v60 = vsel %vm734_vm1, %v4237_v25, %v4238_v4  ;;  %v4952_v38 = vld [vmem:[%s11975_s7 + $0x88] sm:$0xff]  ;;  %v4935_v4 = vld [vmem:[%s11975_s7] sm:$0xff] }
 0x4ba   : > { %v3815_v22 = vpop.f32.mrb[56].mxu1  ;;  %v7648_v20 = vpack.i.bf16 %v4239_v60, %v10760_v3  ;;  %v10834_v3 = vsel %vm905_vm2, %v4279_v13, %v4280_v19  ;;  %v6793_v25 = vpack.c.bf16 %v4952_v38, %v4951_v55  ;;  %v4937_v13 = vld [vmem:[%s11975_s7 + $0x10] sm:$0xff]  ;;  %v4938_v19 = vld [vmem:[%s11975_s7 + $0x18] sm:$0xff] }
 0x4bb   : > { %v3816_v37 = vadd.f32 %v10702_v35, %v3815_v22  ;;  %v3817_v58 = vpop.f32.mrb[57].mxu1  ;;  %v4966_v55 = vld [vmem:[%s11975_s7 + $0xf8] sm:$0xff] }
 0x4bc   : > { %7649 = vrot.lane.b32.xlu0 %v7648_v20, %s12050_s30  ;;  %6794 = vmatprep.subr.bf16.mxu0 %v6793_v25  ;;  %v4953_v20 = vld [vmem:[%s11975_s7 + $0x90] sm:$0xff] }
 0x4bd   : > { %v3862_v6 = vmax.f32 %v3816_v37, 0.0  ;;  %4252 = vrot.lane.b32.xlu1 %v4239_v60, %s12036_s26  ;;  %v4954_v37 = vld [vmem:[%s11975_s7 + $0x98] sm:$0xff] }
 0x4be   : > { %v3820_v11 = vpop.f32.mrb[58].mxu1  ;;  %v6797_v58 = vpack.c.bf16 %v4954_v37, %v4953_v20  ;;  %v4949_v37 = vld [vmem:[%s11975_s7 + $0x70] sm:$0xff] }
 0x4bf   : > { %3894 = vst.msk [vmem:[%s10262_s29 + $0xe0] sm:$0xff] %vm1752_vm7, %v3862_v6  ;;  %v3821_v33 = vadd.f32 %v10702_v35, %v3820_v11  ;;  %v3822_v14 = vpop.f32.mrb[59].mxu1  ;;  %v4955_v11 = vld [vmem:[%s11975_s7 + $0xa0] sm:$0xff] }
 0x4c0   : > { %4344 = vrot.lane.b32.xlu0 %v4239_v60, %s12048_s25  ;;  %v4936_v60 = vld [vmem:[%s11975_s7 + $0x8] sm:$0xff] }
 0x4c1   : > { %v3863_v24 = vmax.f32 %v3821_v33, 0.0  ;;  %4294 = vrot.lane.b32.xlu1 %v10834_v3, %s12039_s16  ;;  %v6795_v22 = vpack.c.bf16 %v4936_v60, %v4935_v4  ;;  %v4956_v33 = vld [vmem:[%s11975_s7 + $0xa8] sm:$0xff] }
 0x4c2   : > { %v6801_v14 = vpack.c.bf16 %v4956_v33, %v4955_v11 }
 0x4c3   : > { %3895 = vst.msk [vmem:[%s10262_s29 + $0xe8] sm:$0xff] %vm1752_vm7, %v3863_v24  ;;  %6796 = vmatpush3.bf16.msra.mxu0 %v6795_v22 }
 0x4c4   : > { %4371 = vrot.lane.b32.xlu0 %v10834_v3, %s12045_s20  ;;  %6798 = vmatprep.subr.bf16.mxu0 %v6797_v58  ;;  %v4950_v58 = vld [vmem:[%s11975_s7 + $0x78] sm:$0xff] }
 0x4c5   : > { %v6823_v11 = vpack.c.bf16 %v4950_v58, %v4949_v37 }
 0x4c6   : > { %v3825_v26 = vpop.f32.mrb[60].mxu1 }
 0x4c7   : > { %v3826_v28 = vadd.f32 %v10702_v35, %v3825_v26  ;;  %v3827_v34 = vpop.f32.mrb[61].mxu1  ;;  %v4940_v26 = vld [vmem:[%s11975_s7 + $0x28] sm:$0xff] }
 0x4c8   : > { %v4957_v34 = vld [vmem:[%s11975_s7 + $0xb0] sm:$0xff] }
 0x4c9   : > { %v3864_v61 = vmax.f32 %v3826_v28, 0.0 }
 0x4cb   : > { %3896 = vst.msk [vmem:[%s10262_s29 + $0xf0] sm:$0xff] %vm1752_vm7, %v3864_v61  ;;  %v3912_v52 = vmax.f32 %v3862_v6, %v3864_v61  ;;  %v6799_v6 = vpack.c.bf16 %v4938_v19, %v4937_v13  ;;  %v4958_v61 = vld [vmem:[%s11975_s7 + $0xb8] sm:$0xff] }
 0x4cc   : > { %v3830_v31 = vpop.f32.mrb[62].mxu1 }
 0x4cd   : > { %v3929_v62 = vrot.slane %v3912_v52, 1  ;;  %v3831_v43 = vadd.f32 %v10702_v35, %v3830_v31  ;;  %v3832_v54 = vpop.f32.mrb[63].mxu1  ;;  %6800 = vmatpush3.bf16.msra.mxu0 %v6799_v6  ;;  %v6805_v31 = vpack.c.bf16 %v4958_v61, %v4957_v34 }
 0x4ce   : > { %6802 = vmatprep.subr.bf16.mxu0 %v6801_v14  ;;  %v4960_v54 = vld [vmem:[%s11975_s7 + $0xc8] sm:$0xff] }
 0x4cf   : > { %v3945_v59 = vmax.f32 %v3912_v52, %v3929_v62  ;;  %v3865_v15 = vmax.f32 %v3831_v43, 0.0  ;;  %v4941_v52 = vld [vmem:[%s11975_s7 + $0x30] sm:$0xff]  ;;  %v4942_v62 = vld [vmem:[%s11975_s7 + $0x38] sm:$0xff]  ;;  %v4959_v43 = vld [vmem:[%s11975_s7 + $0xc0] sm:$0xff] }
 0x4d1   : > { %v3993_v49 = vrot.slane %v3945_v59, 1  ;;  %v4009_v41 = vrot.slane %v3945_v59, 2  ;;  %3897 = vst.msk [vmem:[%s10262_s29 + $0xf8] sm:$0xff] %vm1752_vm7, %v3865_v15  ;;  %v3913_v8 = vmax.f32 %v3863_v24, %v3865_v15  ;;  %v4025_v39 = vrot.slane %v3945_v59, 3  ;;  %v4939_v24 = vld [vmem:[%s11975_s7 + $0x20] sm:$0xff] }
 0x4d2   : > { %v6803_v28 = vpack.c.bf16 %v4940_v26, %v4939_v24  ;;  %v6807_v15 = vpack.c.bf16 %v4942_v62, %v4941_v52 }
 0x4d3   : > { %v4113_v45 = vsel %vm575_vm0, %v3945_v59, %v3993_v49  ;;  %v3961_v36 = vrot.slane %v3913_v8, 1  ;;  %v6809_v49 = vpack.c.bf16 %v4960_v54, %v4959_v43 }
 0x4d4   : > { %v4122_v29 = vsel %vm4114_vm6, %v4113_v45, %v4009_v41  ;;  %6804 = vmatpush3.bf16.msra.mxu0 %v6803_v28  ;;  %v4943_v41 = vld [vmem:[%s11975_s7 + $0x40] sm:$0xff] }
 0x4d5   : > { %v3977_v46 = vmax.f32 %v3913_v8, %v3961_v36  ;;  %v4131_v5 = vsel %vm4123_vm8, %v4122_v29, %v4025_v39  ;;  %v4944_v8 = vld [vmem:[%s11975_s7 + $0x48] sm:$0xff]  ;;  %6806 = vmatprep.subr.bf16.mxu0 %v6805_v31  ;;  %v4961_v36 = vld [vmem:[%s11975_s7 + $0xd0] sm:$0xff]  ;;  %v4962_v29 = vld [vmem:[%s11975_s7 + $0xd8] sm:$0xff] }
 0x4d6   : > { %v6811_v45 = vpack.c.bf16 %v4944_v8, %v4943_v41  ;;  %v6813_v39 = vpack.c.bf16 %v4962_v29, %v4961_v36 }
 0x4d7   : > { %v4049_v21 = vrot.slane %v3977_v46, 4  ;;  %v4065_v40 = vrot.slane %v3977_v46, 5  ;;  %v4081_v35 = vrot.slane %v3977_v46, 6  ;;  %v4097_v27 = vrot.slane %v3977_v46, 7  ;;  %v4945_v46 = vld [vmem:[%s11975_s7 + $0x50] sm:$0xff] }
 0x4d8   : > { %6808 = vmatpush3.bf16.msra.mxu0 %v6807_v15 }
 0x4d9   : > { %v4139_v53 = vsel %vm2026_vm3, %v4131_v5, %v4049_v21  ;;  %6810 = vmatprep.subr.bf16.mxu0 %v6809_v49  ;;  %v4946_v21 = vld [vmem:[%s11975_s7 + $0x58] sm:$0xff] }
 0x4da   : > { %v4148_v56 = vsel %vm4140_vm9, %v4139_v53, %v4065_v40  ;;  %v6815_v5 = vpack.c.bf16 %v4946_v21, %v4945_v46 }
 0x4db   : > { %v4156_v32 = vsel %vm905_vm2, %v4148_v56, %v4081_v35  ;;  %v10947_v35 = vld [vmem:[%s11974_s6] ss:$0 sm:$0xff] }
 0x4dc   : > { %v4164_v57 = vsel %vm734_vm1, %v4156_v32, %v4097_v27  ;;  %6812 = vmatpush3.bf16.msra.mxu0 %v6811_v45  ;;  %v4963_v32 = vld [vmem:[%s11975_s7 + $0xe0] sm:$0xff] }
 0x4dd   : > { %v4180_v12 = vrot.slane %v4164_v57, 7  ;;  %6814 = vmatprep.subr.bf16.mxu0 %v6813_v39  ;;  %v4964_v57 = vld [vmem:[%s11975_s7 + $0xe8] sm:$0xff] }
 0x4df   : > { %v4196_v47 = vsel %vm575_vm0, 0.0, %v4180_v12  ;;  %v4204_v50 = vsel %vm575_vm0, %v4180_v12, 0.0  ;;  %v6817_v12 = vpack.c.bf16 %v4964_v57, %v4963_v32 }
 0x4e0   : > { %4395 = vrot.lane.b32.xlu0 %v4196_v47, %s12049_s17  ;;  %v4329_v10 = vrot.slane %v4196_v47, 1  ;;  %v7653_v7 = vpack.i.bf16 %v4196_v47, %v10814_v51  ;;  %v4330_v30 = vrot.slane %v4204_v50, 1  ;;  %v4356_v17 = vrot.slane %v4196_v47, 2  ;;  %6816 = vmatpush3.bf16.msra.mxu0 %v6815_v5  ;;  %v4947_v47 = vld [vmem:[%s11975_s7 + $0x60] sm:$0xff] }
 0x4e1   : > { %v4357_v18 = vrot.slane %v4204_v50, 2  ;;  %v4948_v50 = vld [vmem:[%s11975_s7 + $0x68] sm:$0xff]  ;;  %6818 = vmatprep.subr.bf16.mxu0 %v6817_v12 }
 0x4e2   : > { %7654 = vrot.lane.b32.xlu1 %v7653_v7, %s12051_s1  ;;  %v4331_v63 = vsel %vm734_vm1, %v4329_v10, %v4330_v30  ;;  %s11393_s1 = scalar_lea.vmem [#allocation4], %s6266_s23 }
 0x4e3   : > { %v10864_v42 = vsel %vm905_vm2, %v4356_v17, %v4357_v18  ;;  %v4965_v18 = vld [vmem:[%s11975_s7 + $0xf0] sm:$0xff]  ;;  %s6122_s4 = sshll.u32 %s11393_s1, 4  ;;  %s11845_s4 = int_to_ptr.vmem [resolvable:$true] %s6122_s4 }
 0x4e4   : > { %4346 = vrot.lane.b32.xlu0 %v4331_v63, %s12048_s25  ;;  %v6821_v60 = vpack.c.bf16 %v4966_v55, %v4965_v18  ;;  %s7781_s19 = scalar_lea.vmem %s11845_s4, 1024 }
 0x4e5   : > { %p7782_p11 = scmp.ne.s32.totalorder %s11845_s4, %s7781_s19 }
 0x4e6   : > { %4416 = vrot.lane.b32.xlu1 %v4331_v63, %s12050_s30  ;;  %v6819_v63 = vpack.c.bf16 %v4948_v50, %v4947_v47  ;;  %s11848_s30 = scalar_lea.sflag [#allocation5], %s6087_s2 }
 0x4e7   : > { %p7783_p12 = pnand %p7782_p11, %p8044_p5 }
 0x4e8   : > { %6820 = vmatpush3.bf16.msra.mxu0 %v6819_v63 }
 0x4e9   : > { %6822 = vmatprep.subr.bf16.mxu0 %v6821_v60  ;;  %p7784_p13 = pneg %p7783_p12 }
 0x4ea   : > { %4373 = vrot.lane.b32.xlu1 %v10864_v42, %s12045_s20  ;;  %s7920_s20 = smov [#allocation4]  }
 0x4eb   : > { %v10922_v59 = vpop.permute.xlu0 %7619 }
 0x4ec   : > { %v7621_v24 = vunpack.i.l.bf16 %v10922_v59  ;;  %6824 = vmatpush3.bf16.msra.mxu0 %v6823_v11  ;;  %v7622_v36 = vunpack.i.h.bf16 %v10922_v59 }
 0x4ee   : > { %v10962_v10 = vpop.permute.xlu1 %7624  ;;  %v4443_v59 = vsel %vm3357_vm13, %v10747_v44, %v7621_v24 }
 0x4ef   : > { %v10942_v40 = vpop.permute.xlu0 %7629  ;;  %v7626_v26 = vunpack.i.l.bf16 %v10962_v10  ;;  %v7627_v12 = vunpack.i.h.bf16 %v10962_v10 }
 0x4f0   : > { %v7631_v22 = vunpack.i.l.bf16 %v10942_v40 }
 0x4f1   : > { %v4451_v47 = vsel %vm3390_vm14, %v4443_v59, %v7626_v26 }
 0x4f2   : > { %v7635_v28 = vpop.permute.xlu1 %7634  ;;  %v4429_v61 = vsel %vm1752_vm7, %v10683_v23, %v7631_v22 }
 0x4f3   : > { %v10964_v7 = vpop.permute.xlu0 %7639  ;;  %v7636_v29 = vunpack.i.l.bf16 %v7635_v28  ;;  %v7637_v55 = vunpack.i.h.bf16 %v7635_v28 }
 0x4f4   : > { %v7641_v20 = vunpack.i.l.bf16 %v10964_v7 }
 0x4f5   : > { %v4459_v44 = vsel %vm3423_vm15, %v4451_v47, %v7636_v29 }
 0x4f6   : > { %v4436_v43 = vsel %vm1884_vm11, %v4429_v61, %v7641_v20 }
 0x51d   : > { %v4584_v53 = vpop.f32.mrb[32].mxu0 }
 0x51e   : > { %v4585_v27 = vadd.f32 %v10947_v35, %v4584_v53  ;;  %v4586_v56 = vpop.f32.mrb[33].mxu0 }
 0x51f   : > { %v4444_v56 = vsel %vm3357_vm13, %v4436_v43, %v7622_v36 }
 0x520   : > { %v4623_v30 = vmax.f32 %v4585_v27, 0.0  ;;  %v4452_v18 = vsel %vm3390_vm14, %v4444_v56, %v7627_v12 }
 0x521   : > { %v4589_v17 = vpop.f32.mrb[34].mxu0  ;;  %v4460_v10 = vsel %vm3423_vm15, %v4452_v18, %v7637_v55 }
 0x522   : > { %v4639_v38 = vrot.slane %v4623_v30, 7  ;;  %v4590_v25 = vadd.f32 %v10947_v35, %v4589_v17  ;;  %v4591_v4 = vpop.f32.mrb[35].mxu0 }
 0x524   : > { %v10982_v13 = vsel %vm575_vm0, 0.0, %v4639_v38  ;;  %v4663_v19 = vsel %vm575_vm0, %v4639_v38, 0.0  ;;  %v4624_v6 = vmax.f32 %v4590_v25, 0.0 }
 0x525   : > { %v4730_v33 = vrot.slane %v10982_v13, 2  ;;  %v4731_v14 = vrot.slane %v4663_v19, 2  ;;  %v4685_v52 = vrot.slane %v10982_v13, 1  ;;  %v4686_v31 = vrot.slane %v4663_v19, 1 }
 0x526   : > { %v4640_v34 = vrot.slane %v4624_v6, 7  ;;  %v7632_v19 = vunpack.i.h.bf16 %v10942_v40  ;;  %v7642_v6 = vunpack.i.h.bf16 %v10964_v7 }
 0x527   : > { %v10992_v62 = vsel %vm905_vm2, %v4730_v33, %v4731_v14  ;;  %v11014_v27 = vsel %vm734_vm1, %v4685_v52, %v4686_v31 }
 0x528   : > { %v10996_v54 = vsel %vm575_vm0, 0.0, %v4640_v34  ;;  %v4664_v15 = vsel %vm575_vm0, %v4640_v34, 0.0  ;;  %v7658_v49 = vpack.i.bf16 %v8055_v1, %v10992_v62  ;;  %v4430_v33 = vsel %vm1752_vm7, %v10750_v16, %v7632_v19 }
 0x529   : > { %v4688_v41 = vrot.slane %v10996_v54, 1  ;;  %v4689_v8 = vrot.slane %v4664_v15, 1  ;;  %v4733_v23 = vrot.slane %v10996_v54, 2  ;;  %v4734_v45 = vrot.slane %v4664_v15, 2 }
 0x52a   : > { %7659 = vrot.lane.b32.xlu0 %v7658_v49, %s12039_s16  ;;  %v7663_v39 = vpack.i.bf16 %v8059_v2, %v10996_v54  ;;  %v4437_v26 = vsel %vm1884_vm11, %v4430_v33, %v7642_v6 }
 0x52b   : > { %v7645_v46 = vpop.permute.xlu1 %7644  ;;  %v11008_v21 = vsel %vm734_vm1, %v4688_v41, %v4689_v8  ;;  %v11011_v5 = vsel %vm905_vm2, %v4733_v23, %v4734_v45 }
 0x52c   : > { %v7646_v53 = vunpack.i.l.bf16 %v7645_v46  ;;  %7664 = vrot.lane.b32.xlu1 %v7663_v39, %s12048_s25  ;;  %v7668_v32 = vpack.i.bf16 %v10982_v13, %v11008_v21  ;;  %v7673_v57 = vpack.i.bf16 %v11014_v27, %v11011_v5  ;;  %v7647_v63 = vunpack.i.h.bf16 %v7645_v46 }
 0x52e   : > { %v7650_v50 = vpop.permute.xlu0 %7649  ;;  %7669 = vrot.lane.b32.xlu0 %v7668_v32, %s12049_s17  ;;  %v4467_v17 = vsel %vm3456_vm4, %v4459_v44, %v7646_v53  ;;  %v4468_v4 = vsel %vm3456_vm4, %v4460_v10, %v7647_v63 }
 0x52f   : > { %v7651_v30 = vunpack.i.l.bf16 %v7650_v50  ;;  %v7652_v38 = vunpack.i.h.bf16 %v7650_v50  ;;  %v4253_v20 = vpop.permute.xlu1 %4252 }
 0x530   : > { %7674 = vrot.lane.b32.xlu1 %v7673_v57, %s12039_s16 }
 0x531   : > { %v4475_v25 = vsel %vm3489_vm5, %v4467_v17, %v7651_v30  ;;  %v4476_v60 = vsel %vm3489_vm5, %v4468_v4, %v7652_v38 }
 0x532   : > { %4603 = vmatmul.mubr.f32.gmra.mrb[40].mxu0 %v4475_v25  ;;  %v4345_v22 = vpop.permute.xlu0 %4344 }
 0x533   : > { %6343 = vmatprep.mubr.msk.f32.mxu0 %vm1752_vm7, %v10834_v3  ;;  %v4295_v58 = vpop.permute.xlu1 %4294 }
 0x536   : > { %4608 = vmatmul.mubr.f32.gmra.mrb[42].mxu0 %v4476_v60  ;;  %v4372_v37 = vpop.permute.xlu0 %4371 }
 0x537   : > { %6344 = vmatprep.mubr.msk.f32.mxu0 %vm1752_vm7, %v10864_v42  ;;  %v4431_v42 = vsel %vm1752_vm7, %v10814_v51, %v4253_v20 }
 0x538   : > { %v4438_v34 = vsel %vm1884_vm11, %v4431_v42, %v4295_v58 }
 0x552   : > { %v4396_v11 = vpop.permute.xlu0 %4395 }
 0x554   : > { %v7655_v3 = vpop.permute.xlu1 %7654 }
 0x555   : > { %v7657_v14 = vunpack.i.h.bf16 %v7655_v3  ;;  %v7656_v24 = vunpack.i.l.bf16 %v7655_v3 }
 0x556   : > { %v4347_v52 = vpop.permute.xlu0 %4346 }
 0x557   : > { %v4445_v28 = vsel %vm3357_vm13, %v4437_v26, %v7656_v24  ;;  %v4446_v7 = vsel %vm3357_vm13, %v4438_v34, %v7657_v14 }
 0x558   : > { %v4417_v61 = vpop.permute.xlu1 %4416  ;;  %v4453_v40 = vsel %vm3390_vm14, %v4445_v28, %v4345_v22  ;;  %v4454_v15 = vsel %vm3390_vm14, %v4446_v7, %v4347_v52 }
 0x559   : > { %v4461_v31 = vsel %vm3423_vm15, %v4453_v40, %v4372_v37 }
 0x55a   : > { %v4469_v16 = vsel %vm3456_vm4, %v4461_v31, %v4396_v11 }
 0x55b   : > { %v4477_v43 = vsel %vm3489_vm5, %v4469_v16, %v4417_v61 }
 0x55c   : > { %4613 = vmatmul.mubr.f32.gmra.mrb[44].mxu0 %v4477_v43  ;;  %v4374_v51 = vpop.permute.xlu1 %4373 }
 0x55d   : > { %v4462_v49 = vsel %vm3423_vm15, %v4454_v15, %v4374_v51  ;;  %6345 = vmatprep.mubr.msk.f32.mxu0 %vm1752_vm7, %v8059_v2 }
 0x55e   : > { %v4470_v41 = vsel %vm3456_vm4, %v4462_v49, %v10608_v48 }
 0x55f   : > { %v4478_v8 = vsel %vm3489_vm5, %v4470_v41, %v10613_v9 }
 0x560   : > { %4618 = vmatmul.mubr.f32.gmra.mrb[46].mxu0 %v4478_v8 }
 0x585   : > { %v4594_v23 = vpop.f32.mrb[36].mxu0 }
 0x586   : > { %v4595_v45 = vadd.f32 %v10947_v35, %v4594_v23  ;;  %v4596_v36 = vpop.f32.mrb[37].mxu0 }
 0x588   : > { %v4625_v29 = vmax.f32 %v4595_v45, 0.0 }
 0x589   : > { %v4599_v46 = vpop.f32.mrb[38].mxu0 }
 0x58a   : > { %v4641_v39 = vrot.slane %v4625_v29, 7  ;;  %v4600_v53 = vadd.f32 %v10947_v35, %v4599_v46  ;;  %v4601_v59 = vpop.f32.mrb[39].mxu0 }
 0x58c   : > { %v11064_v56 = vsel %vm575_vm0, 0.0, %v4641_v39  ;;  %v4665_v32 = vsel %vm575_vm0, %v4641_v39, 0.0  ;;  %v4626_v48 = vmax.f32 %v4600_v53, 0.0 }
 0x58d   : > { %v4691_v57 = vrot.slane %v11064_v56, 1  ;;  %v4692_v9 = vrot.slane %v4665_v32, 1  ;;  %v4736_v12 = vrot.slane %v11064_v56, 2  ;;  %v4737_v47 = vrot.slane %v4665_v32, 2 }
 0x58e   : > { %v4642_v50 = vrot.slane %v4626_v48, 7  ;;  %v7678_v30 = vpack.i.bf16 %v10992_v62, %v11064_v56 }
 0x58f   : > { %v11072_v44 = vsel %vm734_vm1, %v4691_v57, %v4692_v9  ;;  %v11075_v63 = vsel %vm905_vm2, %v4736_v12, %v4737_v47 }
 0x590   : > { %v11078_v17 = vsel %vm575_vm0, 0.0, %v4642_v50  ;;  %v4666_v18 = vsel %vm575_vm0, %v4642_v50, 0.0  ;;  %7679 = vrot.lane.b32.xlu0 %v7678_v30, %s12048_s25  ;;  %v7683_v55 = vpack.i.bf16 %v10996_v54, %v11072_v44  ;;  %v7688_v38 = vpack.i.bf16 %v11008_v21, %v11075_v63 }
 0x591   : > { %v4694_v62 = vrot.slane %v11078_v17, 1  ;;  %v4695_v25 = vrot.slane %v4666_v18, 1  ;;  %v4739_v10 = vrot.slane %v11078_v17, 2  ;;  %v4740_v4 = vrot.slane %v4666_v18, 2 }
 0x592   : > { %7684 = vrot.lane.b32.xlu1 %v7683_v55, %s12049_s17  ;;  %v7693_v22 = vpack.i.bf16 %v11011_v5, %v11078_v17 }
 0x593   : > { %v11090_v60 = vsel %vm734_vm1, %v4694_v62, %v4695_v25  ;;  %v11098_v37 = vsel %vm905_vm2, %v4739_v10, %v4740_v4 }
 0x594   : > { %7689 = vrot.lane.b32.xlu0 %v7688_v38, %s12039_s16  ;;  %v7698_v20 = vpack.i.bf16 %v11064_v56, %v11090_v60  ;;  %v7703_v58 = vpack.i.bf16 %v11072_v44, %v11098_v37 }
 0x596   : > { %7694 = vrot.lane.b32.xlu1 %v7693_v22, %s12048_s25 }
 0x598   : > { %7699 = vrot.lane.b32.xlu0 %v7698_v20, %s12049_s17 }
 0x59a   : > { %7704 = vrot.lane.b32.xlu1 %v7703_v58, %s12039_s16 }
 0x59c   : > { %v7660_v19 = vpop.permute.xlu0 %7659 }
 0x59d   : > { %v7662_v6 = vunpack.i.h.bf16 %v7660_v19  ;;  %v7661_v11 = vunpack.i.l.bf16 %v7660_v19 }
 0x59e   : > { %v7665_v3 = vpop.permute.xlu1 %7664 }
 0x59f   : > { %v4887_v33 = vsel %vm1884_vm11, 0.0, %v7662_v6  ;;  %v7667_v14 = vunpack.i.h.bf16 %v7665_v3  ;;  %v7666_v24 = vunpack.i.l.bf16 %v7665_v3  ;;  %v4911_v26 = vsel %vm1884_vm11, %v11014_v27, %v7661_v11 }
 0x5a0   : > { %v7670_v42 = vpop.permute.xlu0 %7669 }
 0x5a1   : > { %v7672_v28 = vunpack.i.h.bf16 %v7670_v42  ;;  %v7671_v34 = vunpack.i.l.bf16 %v7670_v42  ;;  %v4895_v61 = vsel %vm3390_vm14, %v4887_v33, %v7667_v14  ;;  %v4919_v40 = vsel %vm3390_vm14, %v4911_v26, %v7666_v24 }
 0x5a2   : > { %v7675_v31 = vpop.permute.xlu1 %7674 }
 0x5a3   : > { %v4927_v7 = vsel %vm3456_vm4, %v4919_v40, %v7671_v34  ;;  %v4903_v52 = vsel %vm3456_vm4, %v4895_v61, %v7672_v28  ;;  %v7677_v16 = vunpack.i.h.bf16 %v7675_v31  ;;  %v7676_v43 = vunpack.i.l.bf16 %v7675_v31  ;;  %v4968_v31 = vld [vmem:[%s11975_s7 + $0x108] sm:$0xff] }
 0x5a4   : > { %5058 = vmatprep.mubr.f32.mxu0 %v4927_v7 }
 0x5a5   : > { %5059 = vmatmul.mubr.f32.vlgmr.msra.gmra.mrb[48].mxu0 %v4903_v52  ;;  %v4912_v45 = vsel %vm1884_vm11, %v11008_v21, %v7676_v43  ;;  %v4888_v36 = vsel %vm1884_vm11, %v10982_v13, %v7677_v16  ;;  %v4967_v52 = vld [vmem:[%s11975_s7 + $0x100] sm:$0xff] }
 0x602   : > { %v7680_v15 = vpop.permute.xlu0 %7679 }
 0x603   : > { %v7682_v51 = vunpack.i.h.bf16 %v7680_v15  ;;  %v7681_v49 = vunpack.i.l.bf16 %v7680_v15 }
 0x604   : > { %v7685_v27 = vpop.permute.xlu1 %7684 }
 0x605   : > { %v7687_v41 = vunpack.i.h.bf16 %v7685_v27  ;;  %v7686_v8 = vunpack.i.l.bf16 %v7685_v27  ;;  %v4604_v23 = vpop.f32.mrb[40].mxu0  ;;  %v4920_v53 = vsel %vm3390_vm14, %v4912_v45, %v7681_v49  ;;  %v4896_v59 = vsel %vm3390_vm14, %v4888_v36, %v7682_v51 }
 0x606   : > { %v4605_v29 = vadd.f32 %v10947_v35, %v4604_v23  ;;  %v7690_v46 = vpop.permute.xlu0 %7689  ;;  %v4606_v39 = vpop.f32.mrb[41].mxu0  ;;  %v6825_v49 = vpack.c.bf16 %v4968_v31, %v4967_v52 }
 0x607   : > { %v7692_v32 = vunpack.i.h.bf16 %v7690_v46  ;;  %v7691_v48 = vunpack.i.l.bf16 %v7690_v46  ;;  %v4928_v57 = vsel %vm3456_vm4, %v4920_v53, %v7686_v8  ;;  %v4904_v9 = vsel %vm3456_vm4, %v4896_v59, %v7687_v41  ;;  %v4969_v59 = vld [vmem:[%s11975_s7 + $0x110] sm:$0xff] }
 0x608   : > { %v4627_v12 = vmax.f32 %v4605_v29, 0.0  ;;  %v7695_v47 = vpop.permute.xlu1 %7694  ;;  %5063 = vmatprep.mubr.f32.mxu0 %v4928_v57  ;;  %6826 = vmatprep.subr.bf16.mxu0 %v6825_v49 }
 0x609   : > { %v7697_v21 = vunpack.i.h.bf16 %v7695_v47  ;;  %v7696_v50 = vunpack.i.l.bf16 %v7695_v47  ;;  %v4609_v13 = vpop.f32.mrb[42].mxu0  ;;  %5064 = vmatmul.mubr.f32.gmra.mrb[50].mxu0 %v4904_v9  ;;  %v4913_v62 = vsel %vm1884_vm11, %v11072_v44, %v7691_v48  ;;  %v4889_v22 = vsel %vm1884_vm11, %v10996_v54, %v7692_v32  ;;  %v4970_v32 = vld [vmem:[%s11975_s7 + $0x118] sm:$0xff] }
 0x60a   : > { %v4643_v30 = vrot.slane %v4627_v12, 7  ;;  %v4610_v18 = vadd.f32 %v10947_v35, %v4609_v13  ;;  %v7700_v55 = vpop.permute.xlu0 %7699  ;;  %v4611_v38 = vpop.f32.mrb[43].mxu0  ;;  %6828 = vmatpush3.bf16.msra.mxu0 %v6825_v49  ;;  %v6829_v12 = vpack.c.bf16 %v4970_v32, %v4969_v59 }
 0x60b   : > { %v7702_v25 = vunpack.i.h.bf16 %v7700_v55  ;;  %v7701_v10 = vunpack.i.l.bf16 %v7700_v55  ;;  %v4921_v4 = vsel %vm3390_vm14, %v4913_v62, %v7696_v50  ;;  %v4897_v6 = vsel %vm3390_vm14, %v4889_v22, %v7697_v21 }
 0x60c   : > { %v11128_v20 = vsel %vm575_vm0, 0.0, %v4643_v30  ;;  %v4667_v58 = vsel %vm575_vm0, %v4643_v30, 0.0  ;;  %v4628_v19 = vmax.f32 %v4610_v18, 0.0  ;;  %6830 = vmatprep.subr.bf16.mxu0 %v6829_v12 }
 0x60d   : > { %v4697_v11 = vrot.slane %v11128_v20, 1  ;;  %v4698_v3 = vrot.slane %v4667_v58, 1  ;;  %v4742_v44 = vrot.slane %v11128_v20, 2  ;;  %v4743_v33 = vrot.slane %v4667_v58, 2 }
 0x60e   : > { %v4644_v14 = vrot.slane %v4628_v19, 7  ;;  %v4929_v24 = vsel %vm3456_vm4, %v4921_v4, %v7701_v10  ;;  %v4905_v42 = vsel %vm3456_vm4, %v4897_v6, %v7702_v25  ;;  %v7708_v28 = vpack.i.bf16 %v11075_v63, %v11128_v20  ;;  %6832 = vmatpush3.bf16.msra.mxu0 %v6829_v12 }
 0x60f   : > { %v11136_v26 = vsel %vm734_vm1, %v4697_v11, %v4698_v3  ;;  %v11139_v54 = vsel %vm905_vm2, %v4742_v44, %v4743_v33  ;;  %5068 = vmatprep.mubr.f32.mxu0 %v4929_v24 }
 0x610   : > { %v11145_v34 = vsel %vm575_vm0, 0.0, %v4644_v14  ;;  %v4668_v61 = vsel %vm575_vm0, %v4644_v14, 0.0  ;;  %5069 = vmatmul.mubr.f32.gmra.mrb[52].mxu0 %v4905_v42  ;;  %v7713_v40 = vpack.i.bf16 %v11078_v17, %v11136_v26  ;;  %v7718_v7 = vpack.i.bf16 %v11090_v60, %v11139_v54  ;;  %7709 = vrot.lane.b32.xlu0 %v7708_v28, %s12048_s25 }
 0x611   : > { %v4700_v16 = vrot.slane %v11145_v34, 1  ;;  %v4701_v43 = vrot.slane %v4668_v61, 1  ;;  %v4745_v15 = vrot.slane %v11145_v34, 2  ;;  %v4746_v51 = vrot.slane %v4668_v61, 2 }
 0x612   : > { %7714 = vrot.lane.b32.xlu1 %v7713_v40, %s12049_s17  ;;  %v7723_v41 = vpack.i.bf16 %v11098_v37, %v11145_v34 }
 0x613   : > { %v11163_v27 = vsel %vm734_vm1, %v4700_v16, %v4701_v43  ;;  %v11168_v8 = vsel %vm905_vm2, %v4745_v15, %v4746_v51 }
 0x614   : > { %7719 = vrot.lane.b32.xlu0 %v7718_v7, %s12039_s16  ;;  %v7728_v23 = vpack.i.bf16 %v11128_v20, %v11163_v27  ;;  %v7733_v45 = vpack.i.bf16 %v11136_v26, %v11168_v8 }
 0x616   : > { %7724 = vrot.lane.b32.xlu1 %v7723_v41, %s12048_s25 }
 0x618   : > { %7729 = vrot.lane.b32.xlu0 %v7728_v23, %s12049_s17 }
 0x61a   : > { %7734 = vrot.lane.b32.xlu1 %v7733_v45, %s12039_s16 }
 0x62f   : > { %v4614_v36 = vpop.f32.mrb[44].mxu0 }
 0x630   : > { %v4615_v29 = vadd.f32 %v10947_v35, %v4614_v36  ;;  %v4616_v46 = vpop.f32.mrb[45].mxu0 }
 0x632   : > { %v4629_v39 = vmax.f32 %v4615_v29, 0.0 }
 0x633   : > { %v4619_v53 = vpop.f32.mrb[46].mxu0 }
 0x634   : > { %v4645_v48 = vrot.slane %v4629_v39, 7  ;;  %v4620_v57 = vadd.f32 %v10947_v35, %v4619_v53  ;;  %v4621_v9 = vpop.f32.mrb[47].mxu0 }
 0x636   : > { %v11187_v47 = vsel %vm575_vm0, 0.0, %v4645_v48  ;;  %v4669_v21 = vsel %vm575_vm0, %v4645_v48, 0.0  ;;  %v4630_v50 = vmax.f32 %v4620_v57, 0.0 }
 0x637   : > { %v4703_v13 = vrot.slane %v11187_v47, 1  ;;  %v4704_v30 = vrot.slane %v4669_v21, 1  ;;  %v4748_v18 = vrot.slane %v11187_v47, 2  ;;  %v4749_v55 = vrot.slane %v4669_v21, 2 }
 0x638   : > { %v4646_v38 = vrot.slane %v4630_v50, 7  ;;  %v7738_v35 = vpack.i.bf16 %v11139_v54, %v11187_v47 }
 0x639   : > { %v11195_v62 = vsel %vm734_vm1, %v4703_v13, %v4704_v30  ;;  %v11198_v25 = vsel %vm905_vm2, %v4748_v18, %v4749_v55 }
 0x63a   : > { %v4662_v10 = vsel %vm575_vm0, 0.0, %v4646_v38  ;;  %v4670_v4 = vsel %vm575_vm0, %v4646_v38, 0.0  ;;  %7739 = vrot.lane.b32.xlu0 %v7738_v35, %s12048_s25  ;;  %v7743_v22 = vpack.i.bf16 %v11145_v34, %v11195_v62  ;;  %v7748_v58 = vpack.i.bf16 %v11163_v27, %v11198_v25 }
 0x63b   : > { %v4801_v19 = vrot.slane %v4662_v10, 1  ;;  %v4802_v6 = vrot.slane %v4670_v4, 1  ;;  %v4812_v11 = vrot.slane %v4662_v10, 2  ;;  %v4813_v3 = vrot.slane %v4670_v4, 2 }
 0x63c   : > { %7744 = vrot.lane.b32.xlu1 %v7743_v22, %s12049_s17  ;;  %v7753_v33 = vpack.i.bf16 %v11168_v8, %v4662_v10  ;;  %v7763_v28 = vpack.i.bf16 %v11198_v25, %v7905_v0  ;;  %v7773_v61 = vpack.i.bf16 %v4662_v10, %v8055_v1  ;;  %v7705_v0 = vpop.permute.xlu1 %7704 }
 0x63d   : > { %v11209_v44 = vsel %vm734_vm1, %v4801_v19, %v4802_v6  ;;  %v11216_v24 = vsel %vm905_vm2, %v4812_v11, %v4813_v3  ;;  %v7707_v31 = vunpack.i.h.bf16 %v7705_v0  ;;  %v7706_v16 = vunpack.i.l.bf16 %v7705_v0 }
 0x63e   : > { %7749 = vrot.lane.b32.xlu0 %v7748_v58, %s12039_s16  ;;  %v7758_v14 = vpack.i.bf16 %v11187_v47, %v11209_v44  ;;  %v7768_v42 = vpack.i.bf16 %v11195_v62, %v11216_v24 }
 0x63f   : > { %v4914_v45 = vsel %vm1884_vm11, %v11090_v60, %v7706_v16  ;;  %v4890_v36 = vsel %vm1884_vm11, %v11064_v56, %v7707_v31 }
 0x640   : > { %7754 = vrot.lane.b32.xlu1 %v7753_v33, %s12048_s25 }
 0x642   : > { %7759 = vrot.lane.b32.xlu0 %v7758_v14, %s12049_s17 }
 0x644   : > { %7769 = vrot.lane.b32.xlu1 %v7768_v42, %s12039_s16 }
 0x646   : > { %7764 = vrot.lane.b32.xlu0 %v7763_v28, %s12048_s25 }
 0x648   : > { %7774 = vrot.lane.b32.xlu1 %v7773_v61, %s12049_s17 }
 0x64a   : > { %5306 = vrot.lane.b32.xlu0 %v8055_v1, %s12039_s16 }
 0x64e   : > { %5321 = vrot.lane.b32.xlu0 %v8059_v2, %s12048_s25 }
 0x652   : > { %5379 = vrot.lane.b32.xlu0 %v8055_v1, %s12049_s17 }
 0x678   : > { %v6457_v40 = vpop.f32.mrb[48].mxu0 }
 0x679   : > { %v6458_v7 = vpop.f32.mrb[49].mxu0 }
 0x67a   : > { %v11234_v52 = vadd.f32 %v6458_v7, %v6457_v40 }
 0x682   : > { %v7710_v43 = vpop.permute.xlu0 %7709 }
 0x683   : > { %v7712_v15 = vunpack.i.h.bf16 %v7710_v43  ;;  %v7711_v51 = vunpack.i.l.bf16 %v7710_v43 }
 0x684   : > { %v7715_v49 = vpop.permute.xlu1 %7714 }
 0x685   : > { %v7717_v41 = vunpack.i.h.bf16 %v7715_v49  ;;  %v7716_v23 = vunpack.i.l.bf16 %v7715_v49  ;;  %v4922_v29 = vsel %vm3390_vm14, %v4914_v45, %v7711_v51  ;;  %v4898_v46 = vsel %vm3390_vm14, %v4890_v36, %v7712_v15 }
 0x686   : > { %v7720_v39 = vpop.permute.xlu0 %7719 }
 0x687   : > { %v4930_v53 = vsel %vm3456_vm4, %v4922_v29, %v7716_v23  ;;  %v4906_v59 = vsel %vm3456_vm4, %v4898_v46, %v7717_v41  ;;  %v7722_v32 = vunpack.i.h.bf16 %v7720_v39  ;;  %v7721_v48 = vunpack.i.l.bf16 %v7720_v39 }
 0x688   : > { %v7725_v57 = vpop.permute.xlu1 %7724  ;;  %5073 = vmatprep.mubr.f32.mxu0 %v4930_v53 }
 0x689   : > { %v7727_v9 = vunpack.i.h.bf16 %v7725_v57  ;;  %v7726_v12 = vunpack.i.l.bf16 %v7725_v57  ;;  %5074 = vmatmul.mubr.f32.gmra.mrb[54].mxu0 %v4906_v59  ;;  %v4915_v60 = vsel %vm1884_vm11, %v11136_v26, %v7721_v48  ;;  %v4891_v56 = vsel %vm1884_vm11, %v11078_v17, %v7722_v32 }
 0x68a   : > { %v7730_v21 = vpop.permute.xlu0 %7729 }
 0x68b   : > { %v4923_v50 = vsel %vm3390_vm14, %v4915_v60, %v7726_v12  ;;  %v4899_v13 = vsel %vm3390_vm14, %v4891_v56, %v7727_v9  ;;  %v7732_v30 = vunpack.i.h.bf16 %v7730_v21  ;;  %v7731_v18 = vunpack.i.l.bf16 %v7730_v21 }
 0x68c   : > { %v7735_v35 = vpop.permute.xlu1 %7734 }
 0x68d   : > { %v4931_v55 = vsel %vm3456_vm4, %v4923_v50, %v7731_v18  ;;  %v4907_v38 = vsel %vm3456_vm4, %v4899_v13, %v7732_v30  ;;  %v7737_v10 = vunpack.i.h.bf16 %v7735_v35  ;;  %v7736_v4 = vunpack.i.l.bf16 %v7735_v35  ;;  %v5456_v50 = vld [vmem:[%s11977_s9 + $0x118] sm:$0xff]  ;;  %v5437_v30 = vld [vmem:[%s11977_s9 + $0x80] sm:$0xff]  ;;  %v5438_v18 = vld [vmem:[%s11977_s9 + $0x88] sm:$0xff] }
 0x68e   : > { %5078 = vmatprep.mubr.f32.mxu0 %v4931_v55  ;;  %v5421_v55 = vld [vmem:[%s11977_s9] sm:$0xff]  ;;  %v5422_v35 = vld [vmem:[%s11977_s9 + $0x8] sm:$0xff] }
 0x68f   : > { %5079 = vmatmul.mubr.f32.gmra.mrb[56].mxu0 %v4907_v38  ;;  %v4916_v11 = vsel %vm1884_vm11, %v11163_v27, %v7736_v4  ;;  %v4892_v3 = vsel %vm1884_vm11, %v11128_v20, %v7737_v10  ;;  %v6833_v38 = vpack.c.bf16 %v5438_v18, %v5437_v30  ;;  %v6835_v10 = vpack.c.bf16 %v5422_v35, %v5421_v55  ;;  %v5439_v4 = vld [vmem:[%s11977_s9 + $0x90] sm:$0xff] }
 0x691   : > { %6834 = vmatprep.subr.bf16.mxu1 %v6833_v38 }
 0x692   : > { %6836 = vmatpush3.bf16.msra.mxu1 %v6835_v10 }
 0x6ac   : > { %v7740_v26 = vpop.permute.xlu0 %7739 }
 0x6ad   : > { %v7742_v22 = vunpack.i.h.bf16 %v7740_v26  ;;  %v7741_v58 = vunpack.i.l.bf16 %v7740_v26  ;;  %v5440_v26 = vld [vmem:[%s11977_s9 + $0x98] sm:$0xff] }
 0x6ae   : > { %v7745_v17 = vpop.permute.xlu1 %7744 }
 0x6af   : > { %v7747_v19 = vunpack.i.h.bf16 %v7745_v17  ;;  %v7746_v6 = vunpack.i.l.bf16 %v7745_v17  ;;  %v4924_v14 = vsel %vm3390_vm14, %v4916_v11, %v7741_v58  ;;  %v4900_v42 = vsel %vm3390_vm14, %v4892_v3, %v7742_v22  ;;  %v5423_v22 = vld [vmem:[%s11977_s9 + $0x10] sm:$0xff]  ;;  %v5424_v17 = vld [vmem:[%s11977_s9 + $0x18] sm:$0xff]  ;;  %v5442_v11 = vld [vmem:[%s11977_s9 + $0xa8] sm:$0xff] }
 0x6b0   : > { %v7750_v33 = vpop.permute.xlu0 %7749  ;;  %v6837_v58 = vpack.c.bf16 %v5440_v26, %v5439_v4  ;;  %v5425_v3 = vld [vmem:[%s11977_s9 + $0x20] sm:$0xff] }
 0x6b1   : > { %v7752_v28 = vunpack.i.h.bf16 %v7750_v33  ;;  %v7751_v61 = vunpack.i.l.bf16 %v7750_v33  ;;  %v4932_v40 = vsel %vm3456_vm4, %v4924_v14, %v7746_v6  ;;  %v4908_v7 = vsel %vm3456_vm4, %v4900_v42, %v7747_v19  ;;  %v5441_v6 = vld [vmem:[%s11977_s9 + $0xa0] sm:$0xff]  ;;  %v5426_v14 = vld [vmem:[%s11977_s9 + $0x28] sm:$0xff]  ;;  %v5443_v42 = vld [vmem:[%s11977_s9 + $0xb0] sm:$0xff] }
 0x6b2   : > { %v7755_v0 = vpop.permute.xlu1 %7754  ;;  %5083 = vmatprep.mubr.f32.mxu0 %v4932_v40  ;;  %v6839_v19 = vpack.c.bf16 %v5424_v17, %v5423_v22  ;;  %6838 = vmatprep.subr.bf16.mxu1 %v6837_v58  ;;  %v6841_v33 = vpack.c.bf16 %v5442_v11, %v5441_v6 }
 0x6b3   : > { %v7757_v31 = vunpack.i.h.bf16 %v7755_v0  ;;  %v7756_v16 = vunpack.i.l.bf16 %v7755_v0  ;;  %5084 = vmatmul.mubr.f32.gmra.mrb[58].mxu0 %v4908_v7  ;;  %v4917_v20 = vsel %vm1884_vm11, %v11195_v62, %v7751_v61  ;;  %v4893_v43 = vsel %vm1884_vm11, %v11145_v34, %v7752_v28  ;;  %v5444_v28 = vld [vmem:[%s11977_s9 + $0xb8] sm:$0xff]  ;;  %v5427_v7 = vld [vmem:[%s11977_s9 + $0x30] sm:$0xff] }
 0x6b4   : > { %v7760_v27 = vpop.permute.xlu0 %7759  ;;  %6840 = vmatpush3.bf16.msra.mxu1 %v6839_v19  ;;  %v6843_v61 = vpack.c.bf16 %v5426_v14, %v5425_v3  ;;  %v6845_v40 = vpack.c.bf16 %v5444_v28, %v5443_v42  ;;  %v5428_v0 = vld [vmem:[%s11977_s9 + $0x38] sm:$0xff]  ;;  %v5450_v14 = vld [vmem:[%s11977_s9 + $0xe8] sm:$0xff]  ;;  %v5433_v42 = vld [vmem:[%s11977_s9 + $0x60] sm:$0xff] }
 0x6b5   : > { %v7762_v15 = vunpack.i.h.bf16 %v7760_v27  ;;  %v7761_v51 = vunpack.i.l.bf16 %v7760_v27  ;;  %v4925_v49 = vsel %vm3390_vm14, %v4917_v20, %v7756_v16  ;;  %v4901_v41 = vsel %vm3390_vm14, %v4893_v43, %v7757_v31  ;;  %v5445_v31 = vld [vmem:[%s11977_s9 + $0xc0] sm:$0xff]  ;;  %6842 = vmatprep.subr.bf16.mxu1 %v6841_v33  ;;  %v5446_v16 = vld [vmem:[%s11977_s9 + $0xc8] sm:$0xff] }
 0x6b6   : > { %v7770_v23 = vpop.permute.xlu1 %7769  ;;  %v6847_v27 = vpack.c.bf16 %v5428_v0, %v5427_v7  ;;  %v6849_v20 = vpack.c.bf16 %v5446_v16, %v5445_v31  ;;  %v5429_v43 = vld [vmem:[%s11977_s9 + $0x40] sm:$0xff]  ;;  %v5434_v0 = vld [vmem:[%s11977_s9 + $0x68] sm:$0xff] }
 0x6b7   : > { %v7772_v45 = vunpack.i.h.bf16 %v7770_v23  ;;  %v7771_v36 = vunpack.i.l.bf16 %v7770_v23  ;;  %v4933_v29 = vsel %vm3456_vm4, %v4925_v49, %v7761_v51  ;;  %v4909_v46 = vsel %vm3456_vm4, %v4901_v41, %v7762_v15  ;;  %v5430_v15 = vld [vmem:[%s11977_s9 + $0x48] sm:$0xff]  ;;  %v5447_v51 = vld [vmem:[%s11977_s9 + $0xd0] sm:$0xff]  ;;  %v5448_v49 = vld [vmem:[%s11977_s9 + $0xd8] sm:$0xff] }
 0x6b8   : > { %v11268_v39 = vpop.permute.xlu0 %7764  ;;  %5088 = vmatprep.mubr.f32.mxu0 %v4933_v29  ;;  %6844 = vmatpush3.bf16.msra.mxu1 %v6843_v61  ;;  %v6853_v29 = vpack.c.bf16 %v5448_v49, %v5447_v51  ;;  %v5449_v33 = vld [vmem:[%s11977_s9 + $0xe0] sm:$0xff] }
 0x6b9   : > { %v7767_v62 = vunpack.i.h.bf16 %v11268_v39  ;;  %v7766_v34 = vunpack.i.l.bf16 %v11268_v39  ;;  %5089 = vmatmul.mubr.f32.gmra.mrb[60].mxu0 %v4909_v46  ;;  %v4918_v53 = vsel %vm1884_vm11, %v11209_v44, %v7771_v36  ;;  %v4894_v59 = vsel %vm1884_vm11, %v11187_v47, %v7772_v45  ;;  %6846 = vmatprep.subr.bf16.mxu1 %v6845_v40  ;;  %v5431_v46 = vld [vmem:[%s11977_s9 + $0x50] sm:$0xff] }
 0x6ba   : > { %v7775_v32 = vpop.permute.xlu1 %7774  ;;  %v6851_v45 = vpack.c.bf16 %v5430_v15, %v5429_v43  ;;  %v6857_v7 = vpack.c.bf16 %v5450_v14, %v5449_v33  ;;  %v5436_v33 = vld [vmem:[%s11977_s9 + $0x78] sm:$0xff] }
 0x6bb   : > { %v7777_v48 = vunpack.i.h.bf16 %v7775_v32  ;;  %v7776_v57 = vunpack.i.l.bf16 %v7775_v32  ;;  %v4926_v9 = vsel %vm3390_vm14, %v4918_v53, %v7766_v34  ;;  %v4902_v12 = vsel %vm3390_vm14, %v4894_v59, %v7767_v62  ;;  %v5432_v62 = vld [vmem:[%s11977_s9 + $0x58] sm:$0xff] }
 0x6bc   : > { %6848 = vmatpush3.bf16.msra.mxu1 %v6847_v27  ;;  %v6855_v53 = vpack.c.bf16 %v5432_v62, %v5431_v46 }
 0x6bd   : > { %v4934_v60 = vsel %vm3456_vm4, %v4926_v9, %v7776_v57  ;;  %v4910_v56 = vsel %vm3456_vm4, %v4902_v12, %v7777_v48  ;;  %6850 = vmatprep.subr.bf16.mxu1 %v6849_v20  ;;  %v6859_v20 = vpack.c.bf16 %v5434_v0, %v5433_v42 }
 0x6be   : > { %5093 = vmatprep.mubr.f32.mxu0 %v4934_v60 }
 0x6bf   : > { %5094 = vmatmul.mubr.f32.gmra.mrb[62].mxu0 %v4910_v56 }
 0x6c0   : > { %6689 = vmatprep.mubr.msk.f32.mxu0 %vm1884_vm11, %v11011_v5  ;;  %6852 = vmatpush3.bf16.msra.mxu1 %v6851_v45 }
 0x6c1   : > { %6854 = vmatprep.subr.bf16.mxu1 %v6853_v29 }
 0x6c3   : > { %6690 = vmatmul.mubr.msk.f32.vlgmr.msra.gmra.mrb[64].mxu0 %vm1884_vm11, %v11075_v63 }
 0x6c4   : > { %6692 = vmatprep.mubr.msk.f32.mxu0 %vm1884_vm11, %v11098_v37  ;;  %6856 = vmatpush3.bf16.msra.mxu1 %v6855_v53 }
 0x6c5   : > { %6858 = vmatprep.subr.bf16.mxu1 %v6857_v7 }
 0x6c7   : > { %6693 = vmatmul.mubr.msk.f32.gmra.mrb[66].mxu0 %vm1884_vm11, %v11139_v54  ;;  %v5453_v54 = vld [vmem:[%s11977_s9 + $0x100] sm:$0xff] }
 0x6c8   : > { %6695 = vmatprep.mubr.msk.f32.mxu0 %vm1884_vm11, %v11168_v8  ;;  %v5454_v8 = vld [vmem:[%s11977_s9 + $0x108] sm:$0xff]  ;;  %6860 = vmatpush3.bf16.msra.mxu1 %v6859_v20 }
 0x6cb   : > { %6696 = vmatmul.mubr.msk.f32.gmra.mrb[68].mxu0 %vm1884_vm11, %v11198_v25  ;;  %v6865_v25 = vpack.c.bf16 %v5454_v8, %v5453_v54 }
 0x6cc   : > { %6698 = vmatprep.mubr.msk.f32.mxu0 %vm1884_vm11, %v11216_v24  ;;  %v5455_v24 = vld [vmem:[%s11977_s9 + $0x110] sm:$0xff] }
 0x6cd   : > { %6866 = vmatprep.subr.bf16.mxu0 %v6865_v25  ;;  %v6869_v13 = vpack.c.bf16 %v5456_v50, %v5455_v24 }
 0x6ce   : > { %6868 = vmatpush3.bf16.msra.mxu0 %v6865_v25 }
 0x6cf   : > { %6699 = vmatmul.mubr.msk.f32.gmra.mrb[70].mxu0 %vm1884_vm11, %v8059_v2  ;;  %6870 = vmatprep.subr.bf16.mxu0 %v6869_v13 }
 0x6d2   : > { %6872 = vmatpush3.bf16.msra.mxu0 %v6869_v13 }
 0x6dc   : > { %v6460_v5 = vpop.f32.mrb[50].mxu0 }
 0x6dd   : > { %v6461_v63 = vpop.f32.mrb[51].mxu0 }
 0x6de   : > { %v11298_v47 = vadd.f32 %v6461_v63, %v6460_v5 }
 0x6e3   : > { %v6463_v37 = vpop.f32.mrb[52].mxu0 }
 0x6e4   : > { %v6464_v44 = vpop.f32.mrb[53].mxu0 }
 0x6e5   : > { %v11300_v21 = vadd.f32 %v6464_v44, %v6463_v37  ;;  %v6346_v44 = vld [vmem:[%s11976_s8] ss:$0 sm:$0xff] }
 0x6e6   : > { %v5066_v8 = vadd.f32 %v11298_v47, %v6346_v44  ;;  %v5061_v24 = vadd.f32 %v11234_v52, %v6346_v44 }
 0x6e7   : > { %v5071_v10 = vadd.f32 %v11300_v21, %v6346_v44 }
 0x75c   : > { %v6466_v41 = vpop.f32.mrb[54].mxu0 }
 0x75d   : > { %v6467_v23 = vpop.f32.mrb[55].mxu0 }
 0x75e   : > { %v6468_v36 = vadd.f32 %v6467_v23, %v6466_v41 }
 0x760   : > { %v5076_v55 = vadd.f32 %v6468_v36, %v6346_v44 }
 0x762   : > { %v6469_v59 = vpop.f32.mrb[56].mxu0 }
 0x763   : > { %v6470_v32 = vpop.f32.mrb[57].mxu0 }
 0x764   : > { %v6471_v48 = vadd.f32 %v6470_v32, %v6469_v59 }
 0x766   : > { %v5081_v21 = vadd.f32 %v6471_v48, %v6346_v44 }
 0x786   : > { %v6472_v57 = vpop.f32.mrb[58].mxu0 }
 0x787   : > { %v6473_v9 = vpop.f32.mrb[59].mxu0 }
 0x788   : > { %v6474_v12 = vadd.f32 %v6473_v9, %v6472_v57 }
 0x78a   : > { %v5086_v58 = vadd.f32 %v6474_v12, %v6346_v44 }
 0x78c   : > { %v6475_v60 = vpop.f32.mrb[60].mxu0 }
 0x78d   : > { %v6476_v56 = vpop.f32.mrb[61].mxu0 }
 0x78e   : > { %v6477_v5 = vadd.f32 %v6476_v56, %v6475_v60 }
 0x790   : > { %v5091_v27 = vadd.f32 %v6477_v5, %v6346_v44 }
 0x792   : > { %v6478_v63 = vpop.f32.mrb[62].mxu0 }
 0x793   : > { %v6479_v37 = vpop.f32.mrb[63].mxu0 }
 0x794   : > { %v6480_v54 = vadd.f32 %v6479_v37, %v6478_v63 }
 0x796   : > { %v6691_v25 = vpop.f32.mrb[64].mxu0  ;;  %v5096_v16 = vadd.f32 %v6480_v54, %v6346_v44 }
 0x797   : > { %v5171_v50 = vadd.f32 %v6691_v25, %v5066_v8  ;;  %v5165_v13 = vpop.f32.mrb[65].mxu0 }
 0x798   : > { %v5166_v30 = vadd.f32 %v5165_v13, %v5061_v24 }
 0x799   : > { %v5205_v18 = vmax.f32 %v5171_v50, 0.0 }
 0x79a   : > { %v5204_v38 = vmax.f32 %v5166_v30, 0.0  ;;  %v6694_v35 = vpop.f32.mrb[66].mxu0 }
 0x79b   : > { %5213 = vst.msk [vmem:[%s11393_s1 + $0x8] sm:$0xff] %vm1884_vm11, %v5205_v18  ;;  %v5181_v47 = vadd.f32 %v6694_v35, %v5076_v55  ;;  %v5175_v4 = vpop.f32.mrb[67].mxu0 }
 0x79c   : > { %5212 = vst.msk [vmem:[%s11393_s1] sm:$0xff] %vm1884_vm11, %v5204_v38  ;;  %v5220_v52 = vmax.f32 %v5204_v38, %v5205_v18  ;;  %v5176_v26 = vadd.f32 %v5175_v4, %v5071_v10 }
 0x79d   : > { %v5207_v22 = vmax.f32 %v5181_v47, 0.0 }
 0x79e   : > { %v5228_v17 = vrot.slane %v5220_v52, 1  ;;  %v5206_v19 = vmax.f32 %v5176_v26, 0.0  ;;  %v6697_v6 = vpop.f32.mrb[68].mxu0 }
 0x79f   : > { %5215 = vst.msk [vmem:[%s11393_s1 + $0x18] sm:$0xff] %vm1884_vm11, %v5207_v22  ;;  %v5191_v11 = vadd.f32 %v6697_v6, %v5086_v58  ;;  %v5185_v3 = vpop.f32.mrb[69].mxu0  ;;  %v5452_v6 = vld [vmem:[%s11977_s9 + $0xf8] sm:$0xff] }
 0x7a0   : > { %v5236_v28 = vmax.f32 %v5220_v52, %v5228_v17  ;;  %5214 = vst.msk [vmem:[%s11393_s1 + $0x10] sm:$0xff] %vm1884_vm11, %v5206_v19  ;;  %v5221_v61 = vmax.f32 %v5206_v19, %v5207_v22  ;;  %v5186_v40 = vadd.f32 %v5185_v3, %v5081_v21  ;;  %v5451_v19 = vld [vmem:[%s11977_s9 + $0xf0] sm:$0xff] }
 0x7a1   : > { %v5209_v31 = vmax.f32 %v5191_v11, 0.0  ;;  %v6861_v11 = vpack.c.bf16 %v5452_v6, %v5451_v19  ;;  %v5435_v3 = vld [vmem:[%s11977_s9 + $0x70] sm:$0xff] }
 0x7a2   : > { %v5244_v43 = vrot.slane %v5236_v28, 1  ;;  %v5252_v15 = vrot.slane %v5236_v28, 2  ;;  %v5229_v51 = vrot.slane %v5221_v61, 1  ;;  %v5208_v49 = vmax.f32 %v5186_v40, 0.0  ;;  %v6700_v41 = vpop.f32.mrb[70].mxu0 }
 0x7a3   : > { %5217 = vst.msk [vmem:[%s11393_s1 + $0x28] sm:$0xff] %vm1884_vm11, %v5209_v31  ;;  %v5201_v23 = vadd.f32 %v6700_v41, %v5096_v16  ;;  %v5195_v45 = vpop.f32.mrb[71].mxu0  ;;  %v5260_v59 = vrot.slane %v5236_v28, 3  ;;  %6862 = vmatprep.subr.bf16.mxu1 %v6861_v11  ;;  %v6863_v7 = vpack.c.bf16 %v5436_v33, %v5435_v3 }
 0x7a4   : > { %v5237_v36 = vmax.f32 %v5221_v61, %v5229_v51  ;;  %5216 = vst.msk [vmem:[%s11393_s1 + $0x20] sm:$0xff] %vm1884_vm11, %v5208_v49  ;;  %v5222_v29 = vmax.f32 %v5208_v49, %v5209_v31  ;;  %v5196_v46 = vadd.f32 %v5195_v45, %v5091_v27  ;;  %v5268_v62 = vsel %vm575_vm0, %v5236_v28, %v5244_v43 }
 0x7a5   : > { %v5211_v53 = vmax.f32 %v5201_v23, 0.0  ;;  %v5272_v32 = vsel %vm4114_vm6, %v5268_v62, %v5252_v15  ;;  %6864 = vmatpush3.bf16.msra.mxu1 %v6863_v7 }
 0x7a6   : > { %v5245_v48 = vrot.slane %v5237_v36, 1  ;;  %v5253_v57 = vrot.slane %v5237_v36, 2  ;;  %v5230_v9 = vrot.slane %v5222_v29, 1  ;;  %v5210_v12 = vmax.f32 %v5196_v46, 0.0 }
 0x7a7   : > { %5219 = vst.msk [vmem:[%s11393_s1 + $0x38] sm:$0xff] %vm1884_vm11, %v5211_v53  ;;  %v5276_v60 = vsel %vm4123_vm8, %v5272_v32, %v5260_v59  ;;  %v5261_v37 = vrot.slane %v5237_v36, 3 }
 0x7a8   : > { %v5269_v56 = vsel %vm575_vm0, %v5237_v36, %v5245_v48  ;;  %v5238_v5 = vmax.f32 %v5222_v29, %v5230_v9  ;;  %v5284_v63 = vrot.slane %v5276_v60, 7  ;;  %5218 = vst.msk [vmem:[%s11393_s1 + $0x30] sm:$0xff] %vm1884_vm11, %v5210_v12  ;;  %v5223_v44 = vmax.f32 %v5210_v12, %v5211_v53  ;;  %v5307_v36 = vpop.permute.xlu0 %5306 }
 0x7a9   : > { %v5273_v54 = vsel %vm4114_vm6, %v5269_v56, %v5253_v57 }
 0x7aa   : > { %v5246_v8 = vrot.slane %v5238_v5, 1  ;;  %v5254_v25 = vrot.slane %v5238_v5, 2  ;;  %v5292_v24 = vsel %vm575_vm0, 0.0, %v5284_v63  ;;  %v5231_v50 = vrot.slane %v5223_v44, 1 }
 0x7ab   : > { %v11430_v13 = vsel %vm4140_vm9, %v5292_v24, 0.0  ;;  %v5277_v30 = vsel %vm4123_vm8, %v5273_v54, %v5261_v37  ;;  %v5262_v18 = vrot.slane %v5238_v5, 3 }
 0x7ac   : > { %v5270_v55 = vsel %vm575_vm0, %v5238_v5, %v5246_v8  ;;  %5334 = vrot.lane.b32.xlu0 %v11430_v13, %s12049_s17  ;;  %v5303_v38 = vrot.slane %v11430_v13, 1  ;;  %v5285_v35 = vrot.slane %v5277_v30, 7  ;;  %v5239_v47 = vmax.f32 %v5223_v44, %v5231_v50  ;;  %v5322_v29 = vpop.permute.xlu0 %5321 }
 0x7ad   : > { %v5274_v10 = vsel %vm4114_vm6, %v5270_v55, %v5254_v25  ;;  %v5318_v52 = vrot.slane %v11430_v13, 2  ;;  %v5385_v5 = vsel %vm1884_vm11, 0.0, %v5307_v36  ;;  %v5746_v36 = vld [vmem:[%s11979_s11 + $0x18] sm:$0xff] }
 0x7ae   : > { %v5278_v4 = vsel %vm4123_vm8, %v5274_v10, %v5262_v18  ;;  %5308 = vrot.lane.b32.xlu1 %v5303_v38, %s12039_s16  ;;  %v5293_v26 = vsel %vm575_vm0, 0.0, %v5285_v35  ;;  %v5247_v58 = vrot.slane %v5239_v47, 1  ;;  %v5255_v17 = vrot.slane %v5239_v47, 2 }
 0x7af   : > { %v5286_v22 = vrot.slane %v5278_v4, 7  ;;  %v11452_v21 = vsel %vm4140_vm9, %v5293_v26, 0.0  ;;  %v5263_v14 = vrot.slane %v5239_v47, 3  ;;  %v5389_v44 = vsel %vm3390_vm14, %v5385_v5, %v5322_v29  ;;  %v5763_v29 = vld [vmem:[%s11979_s11 + $0xa0] sm:$0xff]  ;;  %v5776_v5 = vld [vmem:[%s11979_s11 + $0x108] sm:$0xff] }
 0x7b0   : > { %5352 = vrot.lane.b32.xlu0 %v5318_v52, %s12039_s16  ;;  %v5271_v42 = vsel %vm575_vm0, %v5239_v47, %v5247_v58  ;;  %v5319_v31 = vrot.slane %v11452_v21, 2  ;;  %v5304_v15 = vrot.slane %v11452_v21, 1  ;;  %v5380_v46 = vpop.permute.xlu0 %5379 }
 0x7b1   : > { %v5294_v28 = vsel %vm575_vm0, 0.0, %v5286_v22  ;;  %v5275_v61 = vsel %vm4114_vm6, %v5271_v42, %v5255_v17 }
 0x7b2   : > { %5323 = vrot.lane.b32.xlu1 %v5318_v52, %s12048_s25  ;;  %v11465_v40 = vsel %vm4140_vm9, %v5294_v28, 0.0  ;;  %v5279_v0 = vsel %vm4123_vm8, %v5275_v61, %v5263_v14 }
 0x7b3   : > { %v5320_v16 = vrot.slane %v11465_v40, 2  ;;  %v5287_v27 = vrot.slane %v5279_v0, 7  ;;  %v5305_v23 = vrot.slane %v11465_v40, 1 }
 0x7b4   : > { %5364 = vrot.lane.b32.xlu0 %v11452_v21, %s12048_s25 }
 0x7b5   : > { %v5466_v20 = vcombine.low %v5319_v31, %v5320_v16  ;;  %v5295_v43 = vsel %vm575_vm0, 0.0, %v5287_v27  ;;  %v5760_v27 = vld [vmem:[%s11979_s11 + $0x88] sm:$0xff] }
 0x7b6   : > { %5336 = vrot.lane.b32.xlu1 %v11452_v21, %s12049_s17  ;;  %v5299_v51 = vsel %vm4140_vm9, %v5295_v43, 0.0 }
 0x7b7   : > { %6709 = vmatprep.mubr.msk.f32.mxu0 %vm1884_vm11, %v5466_v20  ;;  %v5351_v49 = vrot.slane %v5299_v51, 2  ;;  %v5346_v45 = vrot.slane %v5299_v51, 1  ;;  %v5743_v20 = vld [vmem:[%s11979_s11] sm:$0xff] }
 0x7b8   : > { %5373 = vrot.lane.b32.xlu0 %v5304_v15, %s12049_s17 }
 0x7b9   : > { %v5469_v41 = vcombine.low %v5351_v49, %v8059_v2 }
 0x7ba   : > { %5354 = vrot.lane.b32.xlu1 %v5319_v31, %s12039_s16 }
 0x7bb   : > { %6710 = vmatmul.mubr.msk.f32.vlgmr.msra.gmra.mrb[72].mxu0 %vm1884_vm11, %v5469_v41 }
 0x7bc   : > { %5310 = vrot.lane.b32.xlu0 %v5304_v15, %s12039_s16 }
 0x7be   : > { %5325 = vrot.lane.b32.xlu1 %v5319_v31, %s12048_s25 }
 0x7c0   : > { %5356 = vrot.lane.b32.xlu0 %v5320_v16, %s12039_s16 }
 0x7c2   : > { %5366 = vrot.lane.b32.xlu1 %v11465_v40, %s12048_s25 }
 0x7c4   : > { %5327 = vrot.lane.b32.xlu0 %v5320_v16, %s12048_s25  ;;  %v5759_v16 = vld [vmem:[%s11979_s11 + $0x80] sm:$0xff] }
 0x7c5   : > { %v6873_v43 = vpack.c.bf16 %v5760_v27, %v5759_v16  ;;  %v5798_v27 = vld [vmem:[%s11979_s11 + $0x1b8] sm:$0xff] }
 0x7c6   : > { %5375 = vrot.lane.b32.xlu1 %v5305_v23, %s12049_s17 }
 0x7c7   : > { %6874 = vmatprep.subr.bf16.mxu0 %v6873_v43 }
 0x7c8   : > { %5368 = vrot.lane.b32.xlu0 %v5299_v51, %s12048_s25 }
 0x7ca   : > { %5312 = vrot.lane.b32.xlu1 %v5305_v23, %s12039_s16 }
 0x7cc   : > { %5340 = vrot.lane.b32.xlu0 %v5299_v51, %s12049_s17  ;;  %v5761_v51 = vld [vmem:[%s11979_s11 + $0x90] sm:$0xff] }
 0x7ce   : > { %5358 = vrot.lane.b32.xlu1 %v5351_v49, %s12039_s16  ;;  %v5762_v49 = vld [vmem:[%s11979_s11 + $0x98] sm:$0xff]  ;;  %s7785_s16 = sshll.u32 %s7920_s20, 4  ;;  %s7786_s16 = int_to_ptr.vmem [resolvable:$false] %s7785_s16 }
 0x7cf   : > { %p7788_p0 = scmp.lt.s32.totalorder %s11845_s4, %s7786_s16 }
 0x7d2   : > { %5377 = vrot.lane.b32.xlu1 %v5346_v45, %s12049_s17 }
 0x7d6   : > { %5338 = vrot.lane.b32.xlu1 %v11465_v40, %s12049_s17  ;;  %s7787_s17 = scalar_lea.vmem %s7786_s16, 2048 }
 0x7d7   : > { %p7789_p1 = scmp.lt.s32.totalorder %s7787_s17, %s7781_s19 }
 0x7d9   : > { %p7790_p2 = por %p7789_p1, %p7788_p0 }
 0x7da   : > { %5656 = vrot.lane.b32.xlu1 %v8055_v1, %s12048_s25 }
 0x7db   : > { %p7791_p3 = pnand %p7790_p2, %p7784_p13 }
 0x81e   : > { %v5335_v62 = vpop.permute.xlu0 %5334 }
 0x81f   : > { %v5393_v10 = vsel %vm3456_vm4, %v5389_v44, %v5335_v62 }
 0x820   : > { %v5309_v53 = vpop.permute.xlu1 %5308 }
 0x821   : > { %v5386_v1 = vsel %vm1884_vm11, %v11430_v13, %v5309_v53  ;;  %v5747_v53 = vld [vmem:[%s11979_s11 + $0x20] sm:$0xff] }
 0x822   : > { %v5353_v59 = vpop.permute.xlu0 %5352 }
 0x823   : > { %v5397_v54 = vsel %vm1884_vm11, %v5303_v38, %v5353_v59  ;;  %v5791_v59 = vld [vmem:[%s11979_s11 + $0x180] sm:$0xff] }
 0x824   : > { %v5324_v32 = vpop.permute.xlu1 %5323 }
 0x825   : > { %v5390_v8 = vsel %vm3390_vm14, %v5386_v1, %v5324_v32  ;;  %v5794_v1 = vld [vmem:[%s11979_s11 + $0x198] sm:$0xff] }
 0x826   : > { %v5365_v48 = vpop.permute.xlu0 %5364 }
 0x827   : > { %v5401_v24 = vsel %vm3390_vm14, %v5397_v54, %v5365_v48  ;;  %v5748_v48 = vld [vmem:[%s11979_s11 + $0x28] sm:$0xff]  ;;  %v5749_v54 = vld [vmem:[%s11979_s11 + $0x30] sm:$0xff] }
 0x828   : > { %v5337_v57 = vpop.permute.xlu1 %5336  ;;  %v6883_v44 = vpack.c.bf16 %v5748_v48, %v5747_v53  ;;  %v5799_v53 = vld [vmem:[%s11979_s11 + $0x1c0] sm:$0xff] }
 0x829   : > { %v5394_v50 = vsel %vm3456_vm4, %v5390_v8, %v5337_v57  ;;  %v5765_v57 = vld [vmem:[%s11979_s11 + $0xb0] sm:$0xff] }
 0x82a   : > { %v5374_v9 = vpop.permute.xlu0 %5373  ;;  %v6356_v38 = vcombine.low %v5393_v10, %v5394_v50  ;;  %v5750_v50 = vld [vmem:[%s11979_s11 + $0x38] sm:$0xff]  ;;  %v5795_v10 = vld [vmem:[%s11979_s11 + $0x1a0] sm:$0xff] }
 0x82b   : > { %v5405_v55 = vsel %vm3456_vm4, %v5401_v24, %v5374_v9  ;;  %v5792_v9 = vld [vmem:[%s11979_s11 + $0x188] sm:$0xff] }
 0x82c   : > { %v5355_v12 = vpop.permute.xlu1 %5354 }
 0x82d   : > { %v5398_v25 = vsel %vm1884_vm11, %v5304_v15, %v5355_v12  ;;  %v5744_v15 = vld [vmem:[%s11979_s11 + $0x8] sm:$0xff]  ;;  %v5766_v12 = vld [vmem:[%s11979_s11 + $0xb8] sm:$0xff] }
 0x82e   : > { %v5311_v60 = vpop.permute.xlu0 %5310  ;;  %v6875_v41 = vpack.c.bf16 %v5744_v15, %v5743_v20  ;;  %v6885_v24 = vpack.c.bf16 %v5766_v12, %v5765_v57  ;;  %v5755_v15 = vld [vmem:[%s11979_s11 + $0x60] sm:$0xff]  ;;  %v5757_v57 = vld [vmem:[%s11979_s11 + $0x70] sm:$0xff] }
 0x82f   : > { %v5387_v3 = vsel %vm1884_vm11, %v11452_v21, %v5311_v60  ;;  %v6905_v60 = vpack.c.bf16 %v5792_v9, %v5791_v59  ;;  %v5800_v59 = vld [vmem:[%s11979_s11 + $0x1c8] sm:$0xff]  ;;  %v5783_v9 = vld [vmem:[%s11979_s11 + $0x140] sm:$0xff] }
 0x830   : > { %v5326_v56 = vpop.permute.xlu1 %5325  ;;  %6876 = vmatpush3.bf16.msra.mxu0 %v6875_v41 }
 0x831   : > { %6906 = vmatprep.subr.bf16.mxu1 %v6905_v60  ;;  %v5784_v60 = vld [vmem:[%s11979_s11 + $0x148] sm:$0xff] }
 0x832   : > { %v5357_v63 = vpop.permute.xlu0 %5356 }
 0x833   : > { %v5399_v17 = vsel %vm1884_vm11, %v5305_v23, %v5357_v63  ;;  %v6877_v23 = vpack.c.bf16 %v5762_v49, %v5761_v51  ;;  %v5756_v51 = vld [vmem:[%s11979_s11 + $0x68] sm:$0xff]  ;;  %v5781_v49 = vld [vmem:[%s11979_s11 + $0x130] sm:$0xff] }
 0x834   : > { %v5367_v37 = vpop.permute.xlu1 %5366  ;;  %v6899_v41 = vpack.c.bf16 %v5756_v51, %v5755_v15 }
 0x835   : > { %v5402_v30 = vsel %vm3390_vm14, %v5398_v25, %v5367_v37  ;;  %6878 = vmatprep.subr.bf16.mxu0 %v6877_v23  ;;  %v5793_v37 = vld [vmem:[%s11979_s11 + $0x190] sm:$0xff]  ;;  %v5782_v23 = vld [vmem:[%s11979_s11 + $0x138] sm:$0xff] }
 0x836   : > { %v5328_v13 = vpop.permute.xlu0 %5327  ;;  %v6909_v8 = vpack.c.bf16 %v5794_v1, %v5793_v37  ;;  %v5777_v25 = vld [vmem:[%s11979_s11 + $0x110] sm:$0xff]  ;;  %v5802_v1 = vld [vmem:[%s11979_s11 + $0x1d8] sm:$0xff] }
 0x837   : > { %v5801_v37 = vld [vmem:[%s11979_s11 + $0x1d0] sm:$0xff] }
 0x838   : > { %v5376_v18 = vpop.permute.xlu1 %5375 }
 0x839   : > { %v5406_v35 = vsel %vm3456_vm4, %v5402_v30, %v5376_v18  ;;  %v5767_v30 = vld [vmem:[%s11979_s11 + $0xc0] sm:$0xff]  ;;  %v5778_v18 = vld [vmem:[%s11979_s11 + $0x118] sm:$0xff] }
 0x83a   : > { %v6357_v47 = vcombine.low %v5405_v55, %v5406_v35  ;;  %v5369_v52 = vpop.permute.xlu0 %5368  ;;  %v5768_v55 = vld [vmem:[%s11979_s11 + $0xc8] sm:$0xff]  ;;  %v6911_v35 = vpack.c.bf16 %v5778_v18, %v5777_v25  ;;  %v5785_v25 = vld [vmem:[%s11979_s11 + $0x150] sm:$0xff] }
 0x83b   : > { %v5403_v6 = vsel %vm3390_vm14, %v5399_v17, %v5369_v52  ;;  %v6887_v52 = vpack.c.bf16 %v5750_v50, %v5749_v54  ;;  %v5803_v50 = vld [vmem:[%s11979_s11 + $0x1e0] sm:$0xff] }
 0x83c   : > { %v5313_v4 = vpop.permute.xlu1 %5312  ;;  %5542 = vmatprep.mubr.f32.mxu1 %v6357_v47 }
 0x83d   : > { %5543 = vmatmul.mubr.f32.vlgmr.msra.gmra.mrb[64].mxu1 %v6356_v38  ;;  %v5388_v19 = vsel %vm1884_vm11, %v11465_v40, %v5313_v4  ;;  %v5779_v38 = vld [vmem:[%s11979_s11 + $0x120] sm:$0xff]  ;;  %v5780_v4 = vld [vmem:[%s11979_s11 + $0x128] sm:$0xff] }
 0x83e   : > { %v5341_v42 = vpop.permute.xlu0 %5340  ;;  %v5392_v39 = vsel %vm3390_vm14, %v5388_v19, %v5328_v13  ;;  %v5796_v13 = vld [vmem:[%s11979_s11 + $0x1a8] sm:$0xff]  ;;  %v6915_v17 = vpack.c.bf16 %v5780_v4, %v5779_v38  ;;  %v5769_v19 = vld [vmem:[%s11979_s11 + $0xd0] sm:$0xff]  ;;  %v5787_v38 = vld [vmem:[%s11979_s11 + $0x160] sm:$0xff] }
 0x83f   : > { %v5396_v40 = vsel %vm3456_vm4, %v5392_v39, %v5341_v42  ;;  %v6913_v47 = vpack.c.bf16 %v5796_v13, %v5795_v10  ;;  %v5808_v10 = vld [vmem:[%s11979_s11 + $0x208] sm:$0xff] }
 0x840   : > { %v5359_v26 = vpop.permute.xlu1 %5358  ;;  %v5788_v4 = vld [vmem:[%s11979_s11 + $0x168] sm:$0xff] }
 0x841   : > { %v5400_v22 = vsel %vm1884_vm11, %v5346_v45, %v5359_v26  ;;  %v5745_v45 = vld [vmem:[%s11979_s11 + $0x10] sm:$0xff]  ;;  %v6889_v26 = vpack.c.bf16 %v5768_v55, %v5767_v30  ;;  %v5804_v55 = vld [vmem:[%s11979_s11 + $0x1e8] sm:$0xff] }
 0x842   : > { %v5404_v58 = vsel %vm3390_vm14, %v5400_v22, %v7766_v34  ;;  %v5391_v34 = vsel %vm3390_vm14, %v5387_v3, %v5326_v56  ;;  %v6879_v62 = vpack.c.bf16 %v5746_v36, %v5745_v45  ;;  %v5775_v56 = vld [vmem:[%s11979_s11 + $0x100] sm:$0xff]  ;;  %v5773_v45 = vld [vmem:[%s11979_s11 + $0xf0] sm:$0xff]  ;;  %v5774_v36 = vld [vmem:[%s11979_s11 + $0xf8] sm:$0xff] }
 0x843   : > { %v5408_v33 = vsel %vm3456_vm4, %v5404_v58, %v5380_v46  ;;  %v5764_v46 = vld [vmem:[%s11979_s11 + $0xa8] sm:$0xff]  ;;  %v6907_v63 = vpack.c.bf16 %v5776_v5, %v5775_v56  ;;  %v5751_v22 = vld [vmem:[%s11979_s11 + $0x40] sm:$0xff] }
 0x844   : > { %v5378_v11 = vpop.permute.xlu1 %5377  ;;  %v6881_v32 = vpack.c.bf16 %v5764_v46, %v5763_v29  ;;  %6880 = vmatpush3.bf16.msra.mxu0 %v6879_v62  ;;  %v5752_v58 = vld [vmem:[%s11979_s11 + $0x48] sm:$0xff]  ;;  %v6919_v46 = vpack.c.bf16 %v5782_v23, %v5781_v49  ;;  %v6901_v62 = vpack.c.bf16 %v5774_v36, %v5773_v45 }
 0x845   : > { %v5407_v14 = vsel %vm3456_vm4, %v5403_v6, %v5378_v11  ;;  %6908 = vmatpush3.bf16.msra.mxu1 %v6907_v63  ;;  %v5770_v6 = vld [vmem:[%s11979_s11 + $0xd8] sm:$0xff]  ;;  %v6891_v11 = vpack.c.bf16 %v5752_v58, %v5751_v22  ;;  %v6923_v63 = vpack.c.bf16 %v5784_v60, %v5783_v9 }
 0x846   : > { %v6359_v28 = vcombine.low %v5407_v14, %v5408_v33  ;;  %6882 = vmatprep.subr.bf16.mxu0 %v6881_v32  ;;  %6910 = vmatprep.subr.bf16.mxu1 %v6909_v8  ;;  %v6893_v3 = vpack.c.bf16 %v5770_v6, %v5769_v19  ;;  %v5753_v33 = vld [vmem:[%s11979_s11 + $0x50] sm:$0xff]  ;;  %v5754_v14 = vld [vmem:[%s11979_s11 + $0x58] sm:$0xff]  ;;  %v6921_v32 = vpack.c.bf16 %v5800_v59, %v5799_v53 }
 0x847   : > { %v6895_v42 = vpack.c.bf16 %v5754_v14, %v5753_v33  ;;  %v6931_v19 = vpack.c.bf16 %v5788_v4, %v5787_v38  ;;  %v5805_v33 = vld [vmem:[%s11979_s11 + $0x1f0] sm:$0xff]  ;;  %v5806_v14 = vld [vmem:[%s11979_s11 + $0x1f8] sm:$0xff] }
 0x848   : > { %v5339_v61 = vpop.permute.xlu1 %5338  ;;  %5547 = vmatprep.mubr.f32.mxu1 %v6359_v28  ;;  %6884 = vmatpush3.bf16.msra.mxu0 %v6883_v44  ;;  %v11645_v28 = vld [vmem:[%s11978_s10] ss:$0 sm:$0xff]  ;;  %v6925_v44 = vpack.c.bf16 %v5802_v1, %v5801_v37 }
 0x849   : > { %v5395_v7 = vsel %vm3456_vm4, %v5391_v34, %v5339_v61  ;;  %6886 = vmatprep.subr.bf16.mxu0 %v6885_v24  ;;  %6912 = vmatpush3.bf16.msra.mxu1 %v6911_v35  ;;  %v5771_v61 = vld [vmem:[%s11979_s11 + $0xe0] sm:$0xff]  ;;  %v5786_v24 = vld [vmem:[%s11979_s11 + $0x158] sm:$0xff] }
 0x84a   : > { %v6358_v0 = vcombine.low %v5395_v7, %v5396_v40  ;;  %6914 = vmatprep.subr.bf16.mxu1 %v6913_v47  ;;  %v5772_v40 = vld [vmem:[%s11979_s11 + $0xe8] sm:$0xff]  ;;  %v5797_v7 = vld [vmem:[%s11979_s11 + $0x1b0] sm:$0xff]  ;;  %v6927_v18 = vpack.c.bf16 %v5786_v24, %v5785_v25  ;;  %v5807_v35 = vld [vmem:[%s11979_s11 + $0x200] sm:$0xff]  ;;  %v6929_v47 = vpack.c.bf16 %v5804_v55, %v5803_v50 }
 0x84b   : > { %v6897_v16 = vpack.c.bf16 %v5772_v40, %v5771_v61  ;;  %v6917_v20 = vpack.c.bf16 %v5798_v27, %v5797_v7  ;;  %v11737_v22 = vpack.c.bf16 %v5808_v10, %v5807_v35 }
 0x84c   : > { %5548 = vmatmul.mubr.f32.gmra.mrb[66].mxu1 %v6358_v0  ;;  %6888 = vmatpush3.bf16.msra.mxu0 %v6887_v52  ;;  %v5657_v36 = vpop.permute.xlu1 %5656 }
 0x84d   : > { %6890 = vmatprep.subr.bf16.mxu0 %v6889_v26  ;;  %6916 = vmatpush3.bf16.msra.mxu1 %v6915_v17  ;;  %v5709_v9 = vsel %vm3390_vm14, 0.0, %v5657_v36 }
 0x84e   : > { %6918 = vmatprep.subr.bf16.mxu1 %v6917_v20 }
 0x850   : > { %6892 = vmatpush3.bf16.msra.mxu0 %v6891_v11 }
 0x851   : > { %6894 = vmatprep.subr.bf16.mxu0 %v6893_v3  ;;  %6920 = vmatpush3.bf16.msra.mxu1 %v6919_v46 }
 0x852   : > { %6922 = vmatprep.subr.bf16.mxu1 %v6921_v32 }
 0x854   : > { %6896 = vmatpush3.bf16.msra.mxu0 %v6895_v42 }
 0x855   : > { %6898 = vmatprep.subr.bf16.mxu0 %v6897_v16  ;;  %6924 = vmatpush3.bf16.msra.mxu1 %v6923_v63  ;;  %v5812_v63 = vld [vmem:[%s11979_s11 + $0x228] sm:$0xff] }
 0x856   : > { %6926 = vmatprep.subr.bf16.mxu1 %v6925_v44 }
 0x858   : > { %6900 = vmatpush3.bf16.msra.mxu0 %v6899_v41 }
 0x859   : > { %6902 = vmatprep.subr.bf16.mxu0 %v6901_v62  ;;  %6928 = vmatpush3.bf16.msra.mxu1 %v6927_v18 }
 0x85a   : > { %6930 = vmatprep.subr.bf16.mxu1 %v6929_v47 }
 0x85d   : > { %6932 = vmatpush3.bf16.msra.mxu1 %v6931_v19 }
 0x88e   : > { %v11530_v31 = vpop.f32.mrb[72].mxu0 }
 0x88f   : > { %v11532_v21 = vpop.f32.mrb[73].mxu0 }
 0x910   : > { %v6525_v39 = vpop.f32.mrb[64].mxu1 }
 0x911   : > { %v6526_v34 = vpop.f32.mrb[65].mxu1 }
 0x912   : > { %v6527_v0 = vadd.f32 %v6526_v34, %v6525_v39  ;;  %v6933_v39 = vpack.c.bf16 %v5806_v14, %v5805_v33  ;;  %v5790_v34 = vld [vmem:[%s11979_s11 + $0x178] sm:$0xff] }
 0x914   : > { %v5545_v43 = vadd.f32 %v6527_v0, %v11645_v28  ;;  %6934 = vmatprep.subr.bf16.mxu1 %v6933_v39 }
 0x916   : > { %v5620_v29 = vadd.f32 %v11532_v21, %v5545_v43  ;;  %v5758_v21 = vld [vmem:[%s11979_s11 + $0x78] sm:$0xff] }
 0x917   : > { %v6903_v12 = vpack.c.bf16 %v5758_v21, %v5757_v57  ;;  %v5810_v57 = vld [vmem:[%s11979_s11 + $0x218] sm:$0xff] }
 0x918   : > { %v5628_v48 = vmax.f32 %v5620_v29, 0.0 }
 0x919   : > { %6904 = vmatpush3.bf16.msra.mxu0 %v6903_v12 }
 0x91a   : > { %v5634_v56 = vrot.slane %v5628_v48, 7  ;;  %v5632_v5 = vcombine.high %v5628_v48, %v5628_v48  ;;  %6938 = vmatprep.subr.bf16.mxu0 %v11737_v22  ;;  %v5809_v48 = vld [vmem:[%s11979_s11 + $0x210] sm:$0xff] }
 0x91c   : > { %v5642_v54 = vsel %vm575_vm0, 0.0, %v5634_v56  ;;  %v5635_v8 = vrot.slane %v5632_v5, 7  ;;  %v6941_v56 = vpack.c.bf16 %v5810_v57, %v5809_v48  ;;  %v5811_v5 = vld [vmem:[%s11979_s11 + $0x220] sm:$0xff] }
 0x91d   : > { %v11714_v30 = vsel %vm4140_vm9, %v5642_v54, 0.0  ;;  %v6945_v1 = vpack.c.bf16 %v5812_v63, %v5811_v5  ;;  %v5813_v54 = vld [vmem:[%s11979_s11 + $0x230] sm:$0xff] }
 0x91e   : > { %5676 = vrot.lane.b32.xlu1 %v11714_v30, %s12048_s25  ;;  %v5643_v13 = vsel %vm575_vm0, 0.0, %v5635_v8  ;;  %v5668_v17 = vrot.slane %v11714_v30, 2  ;;  %v5653_v11 = vrot.slane %v11714_v30, 1  ;;  %v5814_v8 = vld [vmem:[%s11979_s11 + $0x238] sm:$0xff] }
 0x91f   : > { %v6528_v52 = vpop.f32.mrb[66].mxu1  ;;  %v11735_v26 = vsel %vm4140_vm9, %v5643_v13, 0.0  ;;  %v6949_v24 = vpack.c.bf16 %v5814_v8, %v5813_v54 }
 0x920   : > { %v6529_v58 = vpop.f32.mrb[67].mxu1  ;;  %5678 = vrot.lane.b32.xlu0 %v11735_v26, %s12048_s25  ;;  %v5654_v42 = vrot.slane %v11735_v26, 1  ;;  %v11765_v7 = vrot.slane %v11735_v26, 2 }
 0x921   : > { %v6530_v6 = vadd.f32 %v6529_v58, %v6528_v52 }
 0x922   : > { %5694 = vrot.lane.b32.xlu1 %v5668_v17, %s12048_s25 }
 0x923   : > { %v5550_v3 = vadd.f32 %v6530_v6, %v11645_v28  ;;  %v5789_v28 = vld [vmem:[%s11979_s11 + $0x170] sm:$0xff] }
 0x924   : > { %5658 = vrot.lane.b32.xlu0 %v5653_v11, %s12048_s25  ;;  %v6935_v40 = vpack.c.bf16 %v5790_v34, %v5789_v28 }
 0x925   : > { %v5625_v61 = vadd.f32 %v11530_v31, %v5550_v3 }
 0x926   : > { %5660 = vrot.lane.b32.xlu1 %v5654_v42, %s12048_s25  ;;  %6936 = vmatpush3.bf16.msra.mxu1 %v6935_v40 }
 0x927   : > { %v5629_v0 = vmax.f32 %v5625_v61, 0.0 }
 0x928   : > { %5696 = vrot.lane.b32.xlu0 %v11765_v7, %s12048_s25 }
 0x929   : > { %v5633_v16 = vcombine.high %v5629_v0, %v5629_v0  ;;  %v5636_v27 = vrot.slane %v5629_v0, 7 }
 0x92b   : > { %v5637_v20 = vrot.slane %v5633_v16, 7  ;;  %v5644_v43 = vsel %vm575_vm0, 0.0, %v5636_v27 }
 0x92c   : > { %v11771_v15 = vsel %vm4140_vm9, %v5644_v43, 0.0 }
 0x92d   : > { %v5645_v31 = vsel %vm575_vm0, 0.0, %v5637_v20  ;;  %5680 = vrot.lane.b32.xlu1 %v11771_v15, %s12048_s25  ;;  %v5655_v51 = vrot.slane %v11771_v15, 1  ;;  %v5670_v45 = vrot.slane %v11771_v15, 2 }
 0x92e   : > { %v11778_v49 = vsel %vm4140_vm9, %v5645_v31, 0.0 }
 0x92f   : > { %5662 = vrot.lane.b32.xlu0 %v5655_v51, %s12048_s25  ;;  %v5688_v41 = vrot.slane %v11778_v49, 1  ;;  %v5693_v23 = vrot.slane %v11778_v49, 2  ;;  %v5826_v6 = vcombine.low %v11765_v7, %v5670_v45 }
 0x931   : > { %5706 = vrot.lane.b32.xlu1 %v5688_v41, %s12048_s25  ;;  %v5831_v14 = vcombine.low %v5693_v23, %v8059_v2 }
 0x933   : > { %5682 = vrot.lane.b32.xlu0 %v11778_v49, %s12048_s25 }
 0x935   : > { %5700 = vrot.lane.b32.xlu1 %v5693_v23, %s12048_s25 }
 0x937   : > { %5698 = vrot.lane.b32.xlu0 %v5670_v45, %s12048_s25 }
 0x990   : > { %v5677_v29 = vpop.permute.xlu1 %5676 }
 0x991   : > { %v5713_v62 = vsel %vm3390_vm14, %v8059_v2, %v5677_v29 }
 0x992   : > { %v5679_v46 = vpop.permute.xlu0 %5678 }
 0x993   : > { %v5714_v53 = vsel %vm3390_vm14, %v5668_v17, %v5679_v46 }
 0x994   : > { %v6364_v59 = vcombine.low %v5713_v62, %v5714_v53  ;;  %v5695_v32 = vpop.permute.xlu1 %5694 }
 0x995   : > { %v5717_v10 = vsel %vm3390_vm14, %v5653_v11, %v5695_v32 }
 0x996   : > { %5908 = vmatprep.mubr.f32.mxu0 %v6364_v59  ;;  %v5659_v21 = vpop.permute.xlu0 %5658 }
 0x997   : > { %v5710_v12 = vsel %vm3390_vm14, %v11714_v30, %v5659_v21 }
 0x998   : > { %v6363_v60 = vcombine.low %v5709_v9, %v5710_v12  ;;  %v5661_v37 = vpop.permute.xlu1 %5660 }
 0x999   : > { %v5711_v55 = vsel %vm3390_vm14, %v11735_v26, %v5661_v37 }
 0x99a   : > { %5909 = vmatmul.mubr.f32.vlgmr.msra.gmra.mrb[74].mxu0 %v6363_v60  ;;  %v5697_v44 = vpop.permute.xlu0 %5696 }
 0x99b   : > { %6940 = vmatpush3.bf16.msra.mxu0 %v11737_v22  ;;  %v5718_v50 = vsel %vm3390_vm14, %v5654_v42, %v5697_v44 }
 0x99c   : > { %6942 = vmatprep.subr.bf16.mxu0 %v6941_v56  ;;  %v6365_v38 = vcombine.low %v5717_v10, %v5718_v50 }
 0x99f   : > { %v5681_v25 = vpop.permute.xlu1 %5680  ;;  %6944 = vmatpush3.bf16.msra.mxu0 %v6941_v56 }
 0x9a0   : > { %6946 = vmatprep.subr.bf16.mxu0 %v6945_v1  ;;  %v5715_v26 = vsel %vm3390_vm14, %v11765_v7, %v5681_v25 }
 0x9a1   : > { %v5663_v18 = vpop.permute.xlu0 %5662 }
 0x9a2   : > { %v5712_v35 = vsel %vm3390_vm14, %v11771_v15, %v5663_v18 }
 0x9a3   : > { %v6366_v13 = vcombine.low %v5711_v55, %v5712_v35  ;;  %v5707_v47 = vpop.permute.xlu1 %5706  ;;  %6948 = vmatpush3.bf16.msra.mxu0 %v6945_v1 }
 0x9a4   : > { %v5721_v4 = vsel %vm3390_vm14, %v11778_v49, %v5707_v47  ;;  %6950 = vmatprep.subr.bf16.mxu0 %v6949_v24 }
 0x9a5   : > { %v6370_v52 = vcombine.low %v5721_v4, %v5709_v9  ;;  %v5683_v22 = vpop.permute.xlu0 %5682  ;;  %5983 = vmatprep.mubr.f32.mxu1 %v6366_v13 }
 0x9a6   : > { %v5716_v58 = vsel %vm3390_vm14, %v5670_v45, %v5683_v22  ;;  %5984 = vmatmul.mubr.f32.vlgmr.msra.gmra.mrb[68].mxu1 %v6365_v38 }
 0x9a7   : > { %v6368_v30 = vcombine.low %v5715_v26, %v5716_v58  ;;  %v5701_v17 = vpop.permute.xlu1 %5700  ;;  %5988 = vmatprep.mubr.f32.mxu1 %v6370_v52  ;;  %6952 = vmatpush3.bf16.msra.mxu0 %v6949_v24 }
 0x9a8   : > { %v5720_v11 = vsel %vm3390_vm14, %v5688_v41, %v5701_v17 }
 0x9a9   : > { %v5699_v19 = vpop.permute.xlu0 %5698  ;;  %5913 = vmatprep.mubr.f32.mxu0 %v6368_v30 }
 0x9aa   : > { %v5719_v3 = vsel %vm3390_vm14, %v5655_v51, %v5699_v19  ;;  %5914 = vmatmul.mubr.f32.gmra.mrb[76].mxu0 %v6366_v13 }
 0x9ab   : > { %v6369_v33 = vcombine.low %v5719_v3, %v5720_v11  ;;  %6728 = vmatprep.mubr.msk.f32.mxu0 %vm3390_vm14, %v5826_v6 }
 0x9ad   : > { %5989 = vmatmul.mubr.f32.gmra.mrb[70].mxu1 %v6369_v33 }
 0x9ae   : > { %6729 = vmatmul.mubr.msk.f32.vlgmr.msra.gmra.mrb[78].mxu0 %vm3390_vm14, %v5831_v14 }
 0x9af   : > { %7794 = shalt.err (!%p7791_p3)
}
 0x9b0   : > { %s7795_s1 = scalar_lea.hbm %s11842_s3, 1024  ;;  %s7799_s26 = scalar_lea.hbm %s11982_s14, 2048 }
 0x9b1   : > { %p7796_p4 = scmp.ne.s32.totalorder %s11842_s3, %s7795_s1  ;;  %p7800_p9 = scmp.lt.u32.totalorder %s11842_s3, %s11982_s14 }
 0x9b2   : > { %p7801_p10 = scmp.lt.u32.totalorder %s7799_s26, %s7795_s1  ;;  %p7803_p12 = scmp.lt.u32.totalorder %s7795_s1, %s11842_s3 }
 0x9b3   : > { %p7797_p7 = pnand %p7796_p4, %p8044_p5 }
 0x9b4   : > { %p7802_p11 = por %p7801_p10, %p7800_p9 }
 0x9b5   : > { %p7798_p8 = pneg %p7797_p7 }
 0x9b6   : > { %p7804_p13 = por %p7803_p12, %p7802_p11 }
 0x9b8   : > { %p7805_p0 = pnand %p7804_p13, %p7798_p8 }
 0x9ba   : > { %7808 = shalt.err (!%p7805_p0)
}
 0x9bb   : > { %s7921_s19 = smov 128   ;;  %s11880_s1 = scalar_lea.hbm %s11981_s13, %s6385_s5 }
 0x9bc   : > { %6954 = dma.vmem_to_hbm [thread:$0]  (%p8044_p5), %s11845_s4, 1024, %s11842_s3, %s11848_s30, %s7921_s19, %s7921_s19, %s12034_s0  }
 0x9bd   : > { %s6106_s2 = sshll.u32 %s10262_s29, 4  ;;  %s6083_s18 = scalar_lea.sflag [#allocation3], %s10234_s27  ;;  %s11883_s2 = int_to_ptr.vmem [resolvable:$true] %s6106_s2 }
 0x9be   : > { %s7809_s26 = scalar_lea.vmem %s11883_s2, 4096  ;;  %s7922_s23 = smov [#allocation2]  }
 0x9bf   : > { %p7810_p1 = scmp.ne.s32.totalorder %s11883_s2, %s7809_s26  ;;  %s7813_s3 = sshll.u32 %s7922_s23, 4  ;;  %s7814_s3 = int_to_ptr.vmem [resolvable:$false] %s7813_s3 }
 0x9c0   : > { %s7815_s4 = scalar_lea.vmem %s7814_s3, 8192  ;;  %p7816_p4 = scmp.lt.s32.totalorder %s11883_s2, %s7814_s3 }
 0x9c1   : > { %p7811_p2 = pnand %p7810_p1, %p8044_p5  ;;  %p7817_p7 = scmp.lt.s32.totalorder %s7815_s4, %s7809_s26 }
 0x9c3   : > { %p7812_p3 = pneg %p7811_p2  ;;  %p7818_p8 = por %p7817_p7, %p7816_p4 }
 0x9c5   : > { %p7819_p9 = pnand %p7818_p8, %p7812_p3 }
 0x9c7   : > { %7822 = shalt.err (!%p7819_p9)
}
 0x9c8   : > { %s7823_s29 = scalar_lea.hbm %s11880_s1, 4096  ;;  %s7827_s16 = scalar_lea.hbm %s11981_s13, 8192 }
 0x9c9   : > { %p7824_p10 = scmp.ne.s32.totalorder %s11880_s1, %s7823_s29  ;;  %p7828_p13 = scmp.lt.u32.totalorder %s11880_s1, %s11981_s13 }
 0x9ca   : > { %p7829_p0 = scmp.lt.u32.totalorder %s7827_s16, %s7823_s29  ;;  %p7831_p2 = scmp.lt.u32.totalorder %s7823_s29, %s11880_s1 }
 0x9cb   : > { %p7825_p11 = pnand %p7824_p10, %p8044_p5 }
 0x9cc   : > { %p7830_p1 = por %p7829_p0, %p7828_p13 }
 0x9cd   : > { %p7826_p12 = pneg %p7825_p11 }
 0x9ce   : > { %p7832_p3 = por %p7831_p2, %p7830_p1 }
 0x9d0   : > { %p7833_p4 = pnand %p7832_p3, %p7826_p12 }
 0x9d2   : > { %7836 = shalt.err (!%p7833_p4)
}
 0x9d3   : > { %6953 = dma.vmem_to_hbm [thread:$0]  (%p8044_p5), %s11883_s2, 4096, %s11880_s1, %s6083_s18, %s7921_s19, %s7921_s19, %s12034_s0   ;;  %vm6077_vm0 = vcmask 519168  }
 0x9d4   : > { %v6362_v28 = vld [vmem:[%s11980_s12] ss:$0 sm:$0xff]  ;;  %s6267_s0 = sshll.u32 %s10234_s27, 4  ;;  %s6387_s2 = sshll.u32 %s8025_s22, 8 }
 0x9d5   : > { %s505_s19 = scalar_lea.vmem [#allocation6], %s6267_s0  ;;  %s11922_s4 = scalar_lea.hbm %s11983_s15, %s6387_s2 }
 0x9d6   : > { %s6138_s1 = sshll.u32 %s505_s19, 4  ;;  %s7923_s22 = smov [#allocation6]   ;;  %s11917_s1 = int_to_ptr.vmem [resolvable:$true] %s6138_s1 }
 0x9d7   : > { %s7837_s29 = scalar_lea.vmem %s11917_s1, 256  ;;  %s7841_s5 = sshll.u32 %s7923_s22, 4  ;;  %s7842_s5 = int_to_ptr.vmem [resolvable:$false] %s7841_s5 }
 0x9d8   : > { %p7838_p7 = scmp.ne.s32.totalorder %s11917_s1, %s7837_s29  ;;  %s7843_s20 = scalar_lea.vmem %s7842_s5, 512 }
 0x9d9   : > { %p7844_p10 = scmp.lt.s32.totalorder %s11917_s1, %s7842_s5  ;;  %p7845_p11 = scmp.lt.s32.totalorder %s7843_s20, %s7837_s29 }
 0x9da   : > { %p7839_p8 = pnand %p7838_p7, %p8044_p5 }
 0x9db   : > { %p7846_p12 = por %p7845_p11, %p7844_p10 }
 0x9dc   : > { %p7840_p9 = pneg %p7839_p8 }
 0x9de   : > { %p7847_p13 = pnand %p7846_p12, %p7840_p9 }
 0xa6d   : > { %v6569_v2 = vpop.f32.mrb[74].mxu0 }
 0xa6e   : > { %v6570_v42 = vpop.f32.mrb[75].mxu0 }
 0xa6f   : > { %v6571_v39 = vadd.f32 %v6570_v42, %v6569_v2 }
 0xa71   : > { %v5911_v40 = vadd.f32 %v6571_v39, %v6362_v28 }
 0xa79   : > { %v6607_v34 = vpop.f32.mrb[68].mxu1 }
 0xa7a   : > { %v6608_v61 = vpop.f32.mrb[69].mxu1 }
 0xa7b   : > { %v6609_v7 = vadd.f32 %v6608_v61, %v6607_v34 }
 0xa7d   : > { %v6572_v0 = vpop.f32.mrb[76].mxu0  ;;  %v5986_v16 = vadd.f32 %v6609_v7, %v5911_v40 }
 0xa7e   : > { %v6573_v27 = vpop.f32.mrb[77].mxu0 }
 0xa7f   : > { %v6574_v20 = vadd.f32 %v6573_v27, %v6572_v0 }
 0xa80   : > { %v6610_v43 = vpop.f32.mrb[70].mxu1 }
 0xa81   : > { %v5916_v15 = vadd.f32 %v6574_v20, %v6362_v28  ;;  %v6611_v31 = vpop.f32.mrb[71].mxu1  ;;  %v6730_v51 = vpop.f32.mrb[78].mxu0 }
 0xa82   : > { %v6612_v49 = vadd.f32 %v6611_v31, %v6610_v43  ;;  %v6060_v41 = vpop.f32.mrb[79].mxu0 }
 0xa83   : > { %v6061_v23 = vadd.f32 %v6060_v41, %v5986_v16 }
 0xa84   : > { %v5991_v45 = vadd.f32 %v6612_v49, %v5916_v15 }
 0xa85   : > { %v6069_v36 = vmax.f32 %v6061_v23, 0.0 }
 0xa86   : > { %v6066_v29 = vadd.f32 %v6730_v51, %v5991_v45 }
 0xa87   : > { %v6073_v46 = vcombine.high %v6069_v36, %v6069_v36  ;;  %6078 = vst.msk [vmem:[%s505_s19] sm:$0xf] %vm6077_vm0, %v6069_v36 }
 0xa88   : > { %v6070_v62 = vmax.f32 %v6066_v29, 0.0 }
 0xa89   : > { %6079 = vst.msk [vmem:[%s505_s19 + $0x4] sm:$0xf] %vm6077_vm0, %v6073_v46 }
 0xa8a   : > { %v6074_v53 = vcombine.high %v6070_v62, %v6070_v62  ;;  %6080 = vst.msk [vmem:[%s505_s19 + $0x8] sm:$0xf] %vm6077_vm0, %v6070_v62 }
 0xa8c   : > { %6081 = vst.msk [vmem:[%s505_s19 + $0xc] sm:$0xf] %vm6077_vm0, %v6074_v53 }
 0xa8d   : > { %7850 = shalt.err (!%p7847_p13)
}
 0xa8e   : > { %s7851_s16 = scalar_lea.hbm %s11922_s4, 256  ;;  %s7855_s26 = scalar_lea.hbm %s11983_s15, 512 }
 0xa8f   : > { %p7852_p0 = scmp.ne.s32.totalorder %s11922_s4, %s7851_s16  ;;  %p7856_p3 = scmp.lt.u32.totalorder %s11922_s4, %s11983_s15 }
 0xa90   : > { %p7857_p4 = scmp.lt.u32.totalorder %s7855_s26, %s7851_s16  ;;  %p7859_p8 = scmp.lt.u32.totalorder %s7851_s16, %s11922_s4 }
 0xa91   : > { %p7853_p1 = pnand %p7852_p0, %p8044_p5 }
 0xa92   : > { %p7858_p7 = por %p7857_p4, %p7856_p3 }
 0xa93   : > { %p7854_p2 = pneg %p7853_p1 }
 0xa94   : > { %p7860_p9 = por %p7859_p8, %p7858_p7 }
 0xa96   : > { %p7861_p10 = pnand %p7860_p9, %p7854_p2 }
 0xa98   : > { %7864 = shalt.err (!%p7861_p10)
}
 0xa99   : > { %6955 = dma.vmem_to_hbm [thread:$0]  (%p8044_p5), %s11917_s1, 256, %s11922_s4, %s11848_s30, %s12048_s25, %s12048_s25, %s12037_s24  }
 0xa9a PF: > { %s12052_s19 = sld [smem:[#allocation9_spill]]  ;;  %p6969_p11 = scmp.ge.s32.totalorder %s7903_s21, 2 }
 0xa9c   : > { %p6960_p12 = pnand %p6969_p11, %p8048_p6 }
 0xaa0   : > { %s6153_s27 = sand.u32 1, %s12052_s19  }
 0xaa1   : > { %s6154_s18 = scalar_lea.sflag [#allocation3], %s6153_s27 }
 0xaa2   : > { %7882 = dma.done.wait (!%p6960_p12), %s6154_s18, 4096  }
 0xaa3   : > { %7884 = vsyncadd (!%p6960_p12), %s6154_s18, 4294963200  ;;  %s12054_s28 = sadd.s32 4294967294, %s7903_s21  }
 0xaa4   : > { %s6162_s29 = sand.u32 1, %s12054_s28  }
 0xaa5   : > { %s6163_s22 = scalar_lea.sflag [#allocation5], %s6162_s29 }
 0xaa6   : > { %7886 = dma.done.wait (!%p6960_p12), %s6163_s22, 1280  }
 0xaa7   : > { %7888 = vsyncadd (!%p6960_p12), %s6163_s22, 4294966016  ;;  %s12055_s21 = sld [smem:[#allocation12_spill]]  ;;  %s12056_s18 = sld [smem:[#allocation10_spill]] }
 0xaa8   : > { %s12057_s19 = sld [smem:[#allocation11_spill]]  ;;  %s12058_s20 = sld [smem:[#allocation13_spill]] }
 0xaad   : > { %p29_p5 = scmp.ge.s32.totalorder %s12055_s21, 4  }
 0xaaf   :  { %31 = sbr.rel (!%p29_p5) target bundleno = 12 (0xc), region = 139 }
 0xab6   :  { %6177 = vsyncpa [#allocation3], 1 }
 0xab7   :  { %6179 = vsyncpa [#allocation3 + $0x1], 1 }
 0xab8   :  { %6180 = vsyncpa [#allocation5], 1 }
 0xab9   :  { %6182 = vsyncpa [#allocation5 + $0x1], 1 }

</bundles_post_ra>
